<compile_context>
chip_gen: v5e
topology: v5e:2x2
jax: 0.10.0
libtpu: 0.0.40
codegen_flags: <defaults>
</compile_context>

<pallas_src>
import functools

import jax
import jax.numpy as jnp
import numpy as np
from jax import lax
from jax.experimental import pallas as pl
from jax.experimental.pallas import tpu as pltpu


def _half_step(h_f32, x_bf, wx_ref, whzr_ref, whq_ref, b_ref, *, H, W, Ch, axis):
    """One GRU half-step. axis=1: conv along W (1,5); axis=0: conv along H (5,1).

    h_f32: (H*W, Ch) float32, x_bf: (H*W, Cx) bfloat16 (flattened row-major).
    """
    HW = H * W
    step = 1 if axis == 1 else W  # flat-index stride of a 1-pixel shift

    # Edge masks: only the horizontal pass needs them (a flat shift by d can
    # wrap a pixel into the neighbouring image row; those must read as the
    # conv's zero padding).  Vertical shifts are multiples of W, so the zero
    # rows added by `pad` land exactly on the out-of-range rows.
    if axis == 1:
        w_pos = lax.broadcasted_iota(jnp.int32, (HW, 1), 0) % W
        masks = {d: (w_pos + d >= 0) & (w_pos + d < W) for d in (-2, -1, 1, 2)}
    else:
        masks = None

    def pad(a):  # zero rows for the 2-pixel halo on each side
        z = jnp.zeros((2 * step, a.shape[-1]), a.dtype)
        return jnp.concatenate([z, a, z], axis=0)

    def tap(a_pad, k):  # shifted (H*W, C) slab for tap k (d = k - 2)
        sl = a_pad[k * step:k * step + HW, :]
        d = k - 2
        if masks is not None and d != 0:
            sl = jnp.where(masks[d], sl, jnp.zeros((), sl.dtype))
        return sl

    x_pad = pad(x_bf)
    h_pad = pad(h_f32.astype(jnp.bfloat16))

    # Fused x-contribution of z|r|q and h-contribution of z|r, f32 accumulation.
    acc_zrq = jnp.zeros((HW, 3 * Ch), jnp.float32)
    acc_zr = jnp.zeros((HW, 2 * Ch), jnp.float32)
    for k in range(5):  # static unrolled taps
        acc_zrq = acc_zrq + jnp.dot(tap(x_pad, k), wx_ref[k],
                                    preferred_element_type=jnp.float32)
        acc_zr = acc_zr + jnp.dot(tap(h_pad, k), whzr_ref[k],
                                  preferred_element_type=jnp.float32)
    acc_zrq = acc_zrq + b_ref[...]  # biases [bz | br | bq]

    zr = jax.nn.sigmoid(acc_zrq[:, :2 * Ch] + acc_zr)
    z = zr[:, :Ch]
    r = zr[:, Ch:]

    # q gate: x-part (+ bias) already in acc_zrq; only dot(r*h, Wq_h) remains.
    rh_pad = pad((r * h_f32).astype(jnp.bfloat16))
    acc_q = acc_zrq[:, 2 * Ch:]
    for k in range(5):
        acc_q = acc_q + jnp.dot(tap(rh_pad, k), whq_ref[k],
                                preferred_element_type=jnp.float32)
    q = jnp.tanh(acc_q)

    return (1.0 - z) * h_f32 + z * q


def _fused_gru_kernel(h_ref, x_ref,
                      wx1_ref, whzr1_ref, whq1_ref, b1_ref,
                      wx2_ref, whzr2_ref, whq2_ref, b2_ref,
                      out_ref, *, H, W, Ch):
    h = h_ref[0]  # (H*W, Ch) float32
    x = x_ref[0]  # (H*W, Cx) bfloat16

    # horizontal (1,5) pass, then vertical (5,1) pass — both on-chip.
    h = _half_step(h, x, wx1_ref, whzr1_ref, whq1_ref, b1_ref,
                   H=H, W=W, Ch=Ch, axis=1)
    h = _half_step(h, x, wx2_ref, whzr2_ref, whq2_ref, b2_ref,
                   H=H, W=W, Ch=Ch, axis=0)

    out_ref[0] = h


def sep_conv_gru_forward(h_nchw, x_nchw, params):
    """Pallas implementation of SepConvGRU.forward.  Inputs/outputs NCHW f32."""
    B, Ch, H, W = h_nchw.shape
    Cx = x_nchw.shape[1]
    HW = H * W

    # NCHW -> flattened NHWC glue (channels on lanes); x goes in as bf16 since
    # it is only ever a matmul operand.
    h = jnp.transpose(h_nchw, (0, 2, 3, 1)).reshape(B, HW, Ch).astype(jnp.float32)
    x = jnp.transpose(x_nchw, (0, 2, 3, 1)).reshape(B, HW, Cx).astype(jnp.bfloat16)

    def taps(name):
        """(Cout, Cin, kh, kw) PyTorch conv weight -> (5, Cin, Cout) tap-major."""
        w, _ = params[name]
        t = w[:, :, 0, :] if w.shape[2] == 1 else w[:, :, :, 0]   # (Cout, Cin, 5)
        return jnp.transpose(t, (2, 1, 0))                         # (5, Cin, Cout)

    def prep(zname, rname, qname):
        wz, wr, wq = taps(zname), taps(rname), taps(qname)
        bz, br, bq = params[zname][1], params[rname][1], params[qname][1]
        # hx concat order in the reference is [h, x] -> first Ch input channels
        # of each weight belong to h, the remaining Cx to x.
        wx = jnp.concatenate([wz[:, Ch:, :], wr[:, Ch:, :], wq[:, Ch:, :]],
                             axis=-1).astype(jnp.bfloat16)          # (5, Cx, 3Ch)
        wh_zr = jnp.concatenate([wz[:, :Ch, :], wr[:, :Ch, :]],
                                axis=-1).astype(jnp.bfloat16)       # (5, Ch, 2Ch)
        wh_q = wq[:, :Ch, :].astype(jnp.bfloat16)                   # (5, Ch, Ch)
        b = jnp.concatenate([bz, br, bq]).reshape(1, 3 * Ch).astype(jnp.float32)
        return wx, wh_zr, wh_q, b

    wx1, whzr1, whq1, b1 = prep("convz1", "convr1", "convq1")
    wx2, whzr2, whq2, b2 = prep("convz2", "convr2", "convq2")

    act_spec = lambda C: pl.BlockSpec((1, HW, C), lambda b: (b, 0, 0))

    def full_spec(arr):
        nd = arr.ndim
        return pl.BlockSpec(arr.shape, lambda b, _nd=nd: (0,) * _nd)

    out = pl.pallas_call(
        functools.partial(_fused_gru_kernel, H=H, W=W, Ch=Ch),
        out_shape=jax.ShapeDtypeStruct((B, HW, Ch), jnp.float32),
        grid_spec=pltpu.PrefetchScalarGridSpec(
            num_scalar_prefetch=0,
            grid=(B,),
            in_specs=[act_spec(Ch), act_spec(Cx),
                      full_spec(wx1), full_spec(whzr1), full_spec(whq1), full_spec(b1),
                      full_spec(wx2), full_spec(whzr2), full_spec(whq2), full_spec(b2)],
            out_specs=act_spec(Ch),
        ),
        compiler_params=pltpu.CompilerParams(
            dimension_semantics=("parallel",)),
    )(h, x, wx1, whzr1, whq1, b1, wx2, whzr2, whq2, b2)

    return jnp.transpose(out.reshape(B, H, W, Ch), (0, 3, 1, 2))  # back to NCHW


# ----------------------- pure-JAX reference (for checking) ------------------
def _conv_ref(x_nchw, w, b, padding):
    out = lax.conv_general_dilated(
        x_nchw, w, window_strides=(1, 1), padding=padding,
        dimension_numbers=("NCHW", "OIHW", "NCHW"))
    return out + b.reshape(1, -1, 1, 1)


def sep_conv_gru_reference(h, x, params):
    def conv(name, inp):
        w, b = params[name]
        pad = ((0, 0), (2, 2)) if w.shape[2] == 1 else ((2, 2), (0, 0))
        return _conv_ref(inp, w, b, pad)

    hx = jnp.concatenate([h, x], axis=1)
    z = jax.nn.sigmoid(conv("convz1", hx))
    r = jax.nn.sigmoid(conv("convr1", hx))
    q = jnp.tanh(conv("convq1", jnp.concatenate([r * h, x], axis=1)))
    h = (1 - z) * h + z * q
    hx = jnp.concatenate([h, x], axis=1)
    z = jax.nn.sigmoid(conv("convz2", hx))
    r = jax.nn.sigmoid(conv("convr2", hx))
    q = jnp.tanh(conv("convq2", jnp.concatenate([r * h, x], axis=1)))
    h = (1 - z) * h + z * q
    return h


# ------------------------------------ main -----------------------------------
if __name__ == "__main__":
    # small shapes consistent with SepConvGRU(hidden_dim, input_dim)
    B, HID, INP, H, W = 2, 32, 32, 8, 16
    CIN = HID + INP

    key = jax.random.PRNGKey(0)
    keys = jax.random.split(key, 16)

    def conv_params(kw_shape, kidx):
        w = jax.random.normal(keys[kidx], (HID, CIN) + kw_shape,
                              dtype=jnp.float32) * 0.05
        b = jax.random.normal(keys[kidx + 1], (HID,), dtype=jnp.float32) * 0.05
        return w, b

    params = {
        "convz1": conv_params((1, 5), 0),
        "convr1": conv_params((1, 5), 2),
        "convq1": conv_params((1, 5), 4),
        "convz2": conv_params((5, 1), 6),
        "convr2": conv_params((5, 1), 8),
        "convq2": conv_params((5, 1), 10),
    }

    h0 = jax.random.normal(keys[12], (B, HID, H, W), dtype=jnp.float32)
    x0 = jax.random.normal(keys[13], (B, INP, H, W), dtype=jnp.float32)

    out = jax.block_until_ready(sep_conv_gru_forward(h0, x0, params))
    ref = jax.block_until_ready(sep_conv_gru_reference(h0, x0, params))

    # bf16 matmul operands with f32 accumulation -> looser tolerance vs f32 ref.
    np.testing.assert_allclose(np.asarray(out), np.asarray(ref),
                               atol=5e-2, rtol=5e-2)
    print("KERNEL_OK")
</pallas_src>

<mosaic_0001>
module attributes {stable_mosaic.version = 11 : i64} {
  func.func @_fused_gru_kernel(%arg0: i32, %arg1: memref<1x128x32xf32, #tpu.memory_space<vmem>>, %arg2: memref<1x128x32xbf16, #tpu.memory_space<vmem>>, %arg3: memref<5x32x96xbf16, #tpu.memory_space<vmem>>, %arg4: memref<5x32x64xbf16, #tpu.memory_space<vmem>>, %arg5: memref<5x32x32xbf16, #tpu.memory_space<vmem>>, %arg6: memref<1x96xf32, #tpu.memory_space<vmem>>, %arg7: memref<5x32x96xbf16, #tpu.memory_space<vmem>>, %arg8: memref<5x32x64xbf16, #tpu.memory_space<vmem>>, %arg9: memref<5x32x32xbf16, #tpu.memory_space<vmem>>, %arg10: memref<1x96xf32, #tpu.memory_space<vmem>>, %arg11: memref<1x128x32xf32, #tpu.memory_space<vmem>>) attributes {dimension_semantics = [#tpu.dimension_semantics<parallel>], iteration_bounds = array<i64: 2>, scalar_prefetch = 0 : i64, scratch_operands = 0 : i64, tpu.core_type = #tpu.core_type<tc>, window_params = [{transform_indices = @transform_0, window_bounds = array<i64: 1, 128, 32>}, {transform_indices = @transform_1, window_bounds = array<i64: 1, 128, 32>}, {pipeline_mode = #tpu.pipeline_mode<synchronous>, transform_indices = @transform_2, window_bounds = array<i64: 5, 32, 96>}, {pipeline_mode = #tpu.pipeline_mode<synchronous>, transform_indices = @transform_3, window_bounds = array<i64: 5, 32, 64>}, {pipeline_mode = #tpu.pipeline_mode<synchronous>, transform_indices = @transform_4, window_bounds = array<i64: 5, 32, 32>}, {pipeline_mode = #tpu.pipeline_mode<synchronous>, transform_indices = @transform_5, window_bounds = array<i64: 1, 96>}, {pipeline_mode = #tpu.pipeline_mode<synchronous>, transform_indices = @transform_6, window_bounds = array<i64: 5, 32, 96>}, {pipeline_mode = #tpu.pipeline_mode<synchronous>, transform_indices = @transform_7, window_bounds = array<i64: 5, 32, 64>}, {pipeline_mode = #tpu.pipeline_mode<synchronous>, transform_indices = @transform_8, window_bounds = array<i64: 5, 32, 32>}, {pipeline_mode = #tpu.pipeline_mode<synchronous>, transform_indices = @transform_9, window_bounds = array<i64: 1, 96>}, {transform_indices = @transform_10, window_bounds = array<i64: 1, 128, 32>}]} {
    %c0 = arith.constant 0 : index
    %c0_0 = arith.constant 0 : index
    %c0_1 = arith.constant 0 : index
    %0 = vector.load %arg1[%c0, %c0_0, %c0_1] : memref<1x128x32xf32, #tpu.memory_space<vmem>>, vector<1x128x32xf32>
    %1 = vector.shape_cast %0 : vector<1x128x32xf32> to vector<128x32xf32>
    %c0_2 = arith.constant 0 : index
    %c0_3 = arith.constant 0 : index
    %c0_4 = arith.constant 0 : index
    %2 = vector.load %arg2[%c0_2, %c0_3, %c0_4] : memref<1x128x32xbf16, #tpu.memory_space<vmem>>, vector<1x128x32xbf16>
    %3 = vector.shape_cast %2 : vector<1x128x32xbf16> to vector<128x32xbf16>
    %4 = tpu.iota {dimensions = array<i32: 0>} : vector<128x1xi32>
    %c16_i32 = arith.constant 16 : i32
    %c0_i32 = arith.constant 0 : i32
    %5 = arith.cmpi eq, %c16_i32, %c0_i32 : i32
    %c1_i32 = arith.constant 1 : i32
    %6 = arith.select %5, %c1_i32, %c16_i32 : i32
    %7 = vector.broadcast %6 : i32 to vector<128x1xi32>
    %8 = arith.remsi %4, %7 : vector<128x1xi32>
    %c0_i32_5 = arith.constant 0 : i32
    %9 = vector.broadcast %c0_i32_5 : i32 to vector<128x1xi32>
    %10 = arith.cmpi ne, %8, %9 : vector<128x1xi32>
    %c0_i32_6 = arith.constant 0 : i32
    %11 = vector.broadcast %c0_i32_6 : i32 to vector<128x1xi32>
    %12 = arith.cmpi slt, %8, %11 : vector<128x1xi32>
    %c0_i32_7 = arith.constant 0 : i32
    %13 = arith.cmpi slt, %6, %c0_i32_7 : i32
    %14 = vector.broadcast %13 : i1 to vector<128x1xi1>
    %15 = vector.broadcast %14 : vector<128x1xi1> to vector<128x1xi1>
    %16 = arith.xori %12, %15 : vector<128x1xi1>
    %17 = arith.andi %16, %10 : vector<128x1xi1>
    %18 = vector.broadcast %6 : i32 to vector<128x1xi32>
    %19 = arith.addi %8, %18 : vector<128x1xi32>
    %20 = arith.select %17, %19, %8 : vector<128x1xi1>, vector<128x1xi32>
    %c-2_i32 = arith.constant -2 : i32
    %21 = vector.broadcast %c-2_i32 : i32 to vector<128x1xi32>
    %22 = arith.addi %20, %21 : vector<128x1xi32>
    %c0_i32_8 = arith.constant 0 : i32
    %23 = vector.broadcast %c0_i32_8 : i32 to vector<128x1xi32>
    %24 = arith.cmpi sge, %22, %23 : vector<128x1xi32>
    %c-2_i32_9 = arith.constant -2 : i32
    %25 = vector.broadcast %c-2_i32_9 : i32 to vector<128x1xi32>
    %26 = arith.addi %20, %25 : vector<128x1xi32>
    %c16_i32_10 = arith.constant 16 : i32
    %27 = vector.broadcast %c16_i32_10 : i32 to vector<128x1xi32>
    %28 = arith.cmpi slt, %26, %27 : vector<128x1xi32>
    %29 = arith.andi %24, %28 : vector<128x1xi1>
    %c-1_i32 = arith.constant -1 : i32
    %30 = vector.broadcast %c-1_i32 : i32 to vector<128x1xi32>
    %31 = arith.addi %20, %30 : vector<128x1xi32>
    %c0_i32_11 = arith.constant 0 : i32
    %32 = vector.broadcast %c0_i32_11 : i32 to vector<128x1xi32>
    %33 = arith.cmpi sge, %31, %32 : vector<128x1xi32>
    %c-1_i32_12 = arith.constant -1 : i32
    %34 = vector.broadcast %c-1_i32_12 : i32 to vector<128x1xi32>
    %35 = arith.addi %20, %34 : vector<128x1xi32>
    %c16_i32_13 = arith.constant 16 : i32
    %36 = vector.broadcast %c16_i32_13 : i32 to vector<128x1xi32>
    %37 = arith.cmpi slt, %35, %36 : vector<128x1xi32>
    %38 = arith.andi %33, %37 : vector<128x1xi1>
    %c1_i32_14 = arith.constant 1 : i32
    %39 = vector.broadcast %c1_i32_14 : i32 to vector<128x1xi32>
    %40 = arith.addi %20, %39 : vector<128x1xi32>
    %c0_i32_15 = arith.constant 0 : i32
    %41 = vector.broadcast %c0_i32_15 : i32 to vector<128x1xi32>
    %42 = arith.cmpi sge, %40, %41 : vector<128x1xi32>
    %c1_i32_16 = arith.constant 1 : i32
    %43 = vector.broadcast %c1_i32_16 : i32 to vector<128x1xi32>
    %44 = arith.addi %20, %43 : vector<128x1xi32>
    %c16_i32_17 = arith.constant 16 : i32
    %45 = vector.broadcast %c16_i32_17 : i32 to vector<128x1xi32>
    %46 = arith.cmpi slt, %44, %45 : vector<128x1xi32>
    %47 = arith.andi %42, %46 : vector<128x1xi1>
    %c2_i32 = arith.constant 2 : i32
    %48 = vector.broadcast %c2_i32 : i32 to vector<128x1xi32>
    %49 = arith.addi %20, %48 : vector<128x1xi32>
    %c0_i32_18 = arith.constant 0 : i32
    %50 = vector.broadcast %c0_i32_18 : i32 to vector<128x1xi32>
    %51 = arith.cmpi sge, %49, %50 : vector<128x1xi32>
    %c2_i32_19 = arith.constant 2 : i32
    %52 = vector.broadcast %c2_i32_19 : i32 to vector<128x1xi32>
    %53 = arith.addi %20, %52 : vector<128x1xi32>
    %c16_i32_20 = arith.constant 16 : i32
    %54 = vector.broadcast %c16_i32_20 : i32 to vector<128x1xi32>
    %55 = arith.cmpi slt, %53, %54 : vector<128x1xi32>
    %56 = arith.andi %51, %55 : vector<128x1xi1>
    %cst = arith.constant 0.000000e+00 : bf16
    %57 = vector.broadcast %cst : bf16 to vector<2x32xbf16>
    %58 = tpu.concatenate %57, %3, %57 in 0 : vector<2x32xbf16>, vector<128x32xbf16>, vector<2x32xbf16> -> vector<132x32xbf16>
    %59 = arith.truncf %1 : vector<128x32xf32> to vector<128x32xbf16>
    %cst_21 = arith.constant 0.000000e+00 : bf16
    %60 = vector.broadcast %cst_21 : bf16 to vector<2x32xbf16>
    %61 = tpu.concatenate %60, %59, %60 in 0 : vector<2x32xbf16>, vector<128x32xbf16>, vector<2x32xbf16> -> vector<132x32xbf16>
    %cst_22 = arith.constant 0.000000e+00 : f32
    %62 = vector.broadcast %cst_22 : f32 to vector<128x96xf32>
    %cst_23 = arith.constant 0.000000e+00 : f32
    %63 = vector.broadcast %cst_23 : f32 to vector<128x64xf32>
    %64 = vector.extract_strided_slice %58 {offsets = [0, 0], sizes = [128, 32], strides = [1, 1]} : vector<132x32xbf16> to vector<128x32xbf16>
    %cst_24 = arith.constant 0.000000e+00 : bf16
    %65 = vector.shape_cast %29 : vector<128x1xi1> to vector<128x1xi1>
    %66 = vector.broadcast %65 : vector<128x1xi1> to vector<128x32xi1>
    %67 = vector.broadcast %cst_24 : bf16 to vector<128x32xbf16>
    %68 = arith.select %66, %64, %67 : vector<128x32xi1>, vector<128x32xbf16>
    %c0_25 = arith.constant 0 : index
    %c0_26 = arith.constant 0 : index
    %c0_27 = arith.constant 0 : index
    %69 = vector.load %arg3[%c0_25, %c0_26, %c0_27] : memref<5x32x96xbf16, #tpu.memory_space<vmem>>, vector<1x32x96xbf16>
    %70 = vector.shape_cast %69 : vector<1x32x96xbf16> to vector<32x96xbf16>
    %cst_28 = arith.constant dense<0.000000e+00> : vector<128x96xf32>
    %71 = tpu.matmul %68, %70, %cst_28 {dimension_numbers = #tpu.dot_dimension_numbers<[1], [0], [0], [1], [0, 0, 1, 1], [], []>} : vector<128x32xbf16>, vector<32x96xbf16>, vector<128x96xf32> -> vector<128x96xf32>
    %72 = arith.addf %62, %71 : vector<128x96xf32>
    %73 = vector.extract_strided_slice %61 {offsets = [0, 0], sizes = [128, 32], strides = [1, 1]} : vector<132x32xbf16> to vector<128x32xbf16>
    %cst_29 = arith.constant 0.000000e+00 : bf16
    %74 = vector.shape_cast %29 : vector<128x1xi1> to vector<128x1xi1>
    %75 = vector.broadcast %74 : vector<128x1xi1> to vector<128x32xi1>
    %76 = vector.broadcast %cst_29 : bf16 to vector<128x32xbf16>
    %77 = arith.select %75, %73, %76 : vector<128x32xi1>, vector<128x32xbf16>
    %c0_30 = arith.constant 0 : index
    %c0_31 = arith.constant 0 : index
    %c0_32 = arith.constant 0 : index
    %78 = vector.load %arg4[%c0_30, %c0_31, %c0_32] : memref<5x32x64xbf16, #tpu.memory_space<vmem>>, vector<1x32x64xbf16>
    %79 = vector.shape_cast %78 : vector<1x32x64xbf16> to vector<32x64xbf16>
    %cst_33 = arith.constant dense<0.000000e+00> : vector<128x64xf32>
    %80 = tpu.matmul %77, %79, %cst_33 {dimension_numbers = #tpu.dot_dimension_numbers<[1], [0], [0], [1], [0, 0, 1, 1], [], []>} : vector<128x32xbf16>, vector<32x64xbf16>, vector<128x64xf32> -> vector<128x64xf32>
    %81 = arith.addf %63, %80 : vector<128x64xf32>
    %82 = vector.extract_strided_slice %58 {offsets = [1, 0], sizes = [128, 32], strides = [1, 1]} : vector<132x32xbf16> to vector<128x32xbf16>
    %cst_34 = arith.constant 0.000000e+00 : bf16
    %83 = vector.shape_cast %38 : vector<128x1xi1> to vector<128x1xi1>
    %84 = vector.broadcast %83 : vector<128x1xi1> to vector<128x32xi1>
    %85 = vector.broadcast %cst_34 : bf16 to vector<128x32xbf16>
    %86 = arith.select %84, %82, %85 : vector<128x32xi1>, vector<128x32xbf16>
    %c1 = arith.constant 1 : index
    %c0_35 = arith.constant 0 : index
    %c0_36 = arith.constant 0 : index
    %87 = vector.load %arg3[%c1, %c0_35, %c0_36] : memref<5x32x96xbf16, #tpu.memory_space<vmem>>, vector<1x32x96xbf16>
    %88 = vector.shape_cast %87 : vector<1x32x96xbf16> to vector<32x96xbf16>
    %cst_37 = arith.constant dense<0.000000e+00> : vector<128x96xf32>
    %89 = tpu.matmul %86, %88, %cst_37 {dimension_numbers = #tpu.dot_dimension_numbers<[1], [0], [0], [1], [0, 0, 1, 1], [], []>} : vector<128x32xbf16>, vector<32x96xbf16>, vector<128x96xf32> -> vector<128x96xf32>
    %90 = arith.addf %72, %89 : vector<128x96xf32>
    %91 = vector.extract_strided_slice %61 {offsets = [1, 0], sizes = [128, 32], strides = [1, 1]} : vector<132x32xbf16> to vector<128x32xbf16>
    %cst_38 = arith.constant 0.000000e+00 : bf16
    %92 = vector.shape_cast %38 : vector<128x1xi1> to vector<128x1xi1>
    %93 = vector.broadcast %92 : vector<128x1xi1> to vector<128x32xi1>
    %94 = vector.broadcast %cst_38 : bf16 to vector<128x32xbf16>
    %95 = arith.select %93, %91, %94 : vector<128x32xi1>, vector<128x32xbf16>
    %c1_39 = arith.constant 1 : index
    %c0_40 = arith.constant 0 : index
    %c0_41 = arith.constant 0 : index
    %96 = vector.load %arg4[%c1_39, %c0_40, %c0_41] : memref<5x32x64xbf16, #tpu.memory_space<vmem>>, vector<1x32x64xbf16>
    %97 = vector.shape_cast %96 : vector<1x32x64xbf16> to vector<32x64xbf16>
    %cst_42 = arith.constant dense<0.000000e+00> : vector<128x64xf32>
    %98 = tpu.matmul %95, %97, %cst_42 {dimension_numbers = #tpu.dot_dimension_numbers<[1], [0], [0], [1], [0, 0, 1, 1], [], []>} : vector<128x32xbf16>, vector<32x64xbf16>, vector<128x64xf32> -> vector<128x64xf32>
    %99 = arith.addf %81, %98 : vector<128x64xf32>
    %100 = vector.extract_strided_slice %58 {offsets = [2, 0], sizes = [128, 32], strides = [1, 1]} : vector<132x32xbf16> to vector<128x32xbf16>
    %c2 = arith.constant 2 : index
    %c0_43 = arith.constant 0 : index
    %c0_44 = arith.constant 0 : index
    %101 = vector.load %arg3[%c2, %c0_43, %c0_44] : memref<5x32x96xbf16, #tpu.memory_space<vmem>>, vector<1x32x96xbf16>
    %102 = vector.shape_cast %101 : vector<1x32x96xbf16> to vector<32x96xbf16>
    %cst_45 = arith.constant dense<0.000000e+00> : vector<128x96xf32>
    %103 = tpu.matmul %100, %102, %cst_45 {dimension_numbers = #tpu.dot_dimension_numbers<[1], [0], [0], [1], [0, 0, 1, 1], [], []>} : vector<128x32xbf16>, vector<32x96xbf16>, vector<128x96xf32> -> vector<128x96xf32>
    %104 = arith.addf %90, %103 : vector<128x96xf32>
    %105 = vector.extract_strided_slice %61 {offsets = [2, 0], sizes = [128, 32], strides = [1, 1]} : vector<132x32xbf16> to vector<128x32xbf16>
    %c2_46 = arith.constant 2 : index
    %c0_47 = arith.constant 0 : index
    %c0_48 = arith.constant 0 : index
    %106 = vector.load %arg4[%c2_46, %c0_47, %c0_48] : memref<5x32x64xbf16, #tpu.memory_space<vmem>>, vector<1x32x64xbf16>
    %107 = vector.shape_cast %106 : vector<1x32x64xbf16> to vector<32x64xbf16>
    %cst_49 = arith.constant dense<0.000000e+00> : vector<128x64xf32>
    %108 = tpu.matmul %105, %107, %cst_49 {dimension_numbers = #tpu.dot_dimension_numbers<[1], [0], [0], [1], [0, 0, 1, 1], [], []>} : vector<128x32xbf16>, vector<32x64xbf16>, vector<128x64xf32> -> vector<128x64xf32>
    %109 = arith.addf %99, %108 : vector<128x64xf32>
    %110 = vector.extract_strided_slice %58 {offsets = [3, 0], sizes = [128, 32], strides = [1, 1]} : vector<132x32xbf16> to vector<128x32xbf16>
    %cst_50 = arith.constant 0.000000e+00 : bf16
    %111 = vector.shape_cast %47 : vector<128x1xi1> to vector<128x1xi1>
    %112 = vector.broadcast %111 : vector<128x1xi1> to vector<128x32xi1>
    %113 = vector.broadcast %cst_50 : bf16 to vector<128x32xbf16>
    %114 = arith.select %112, %110, %113 : vector<128x32xi1>, vector<128x32xbf16>
    %c3 = arith.constant 3 : index
    %c0_51 = arith.constant 0 : index
    %c0_52 = arith.constant 0 : index
    %115 = vector.load %arg3[%c3, %c0_51, %c0_52] : memref<5x32x96xbf16, #tpu.memory_space<vmem>>, vector<1x32x96xbf16>
    %116 = vector.shape_cast %115 : vector<1x32x96xbf16> to vector<32x96xbf16>
    %cst_53 = arith.constant dense<0.000000e+00> : vector<128x96xf32>
    %117 = tpu.matmul %114, %116, %cst_53 {dimension_numbers = #tpu.dot_dimension_numbers<[1], [0], [0], [1], [0, 0, 1, 1], [], []>} : vector<128x32xbf16>, vector<32x96xbf16>, vector<128x96xf32> -> vector<128x96xf32>
    %118 = arith.addf %104, %117 : vector<128x96xf32>
    %119 = vector.extract_strided_slice %61 {offsets = [3, 0], sizes = [128, 32], strides = [1, 1]} : vector<132x32xbf16> to vector<128x32xbf16>
    %cst_54 = arith.constant 0.000000e+00 : bf16
    %120 = vector.shape_cast %47 : vector<128x1xi1> to vector<128x1xi1>
    %121 = vector.broadcast %120 : vector<128x1xi1> to vector<128x32xi1>
    %122 = vector.broadcast %cst_54 : bf16 to vector<128x32xbf16>
    %123 = arith.select %121, %119, %122 : vector<128x32xi1>, vector<128x32xbf16>
    %c3_55 = arith.constant 3 : index
    %c0_56 = arith.constant 0 : index
    %c0_57 = arith.constant 0 : index
    %124 = vector.load %arg4[%c3_55, %c0_56, %c0_57] : memref<5x32x64xbf16, #tpu.memory_space<vmem>>, vector<1x32x64xbf16>
    %125 = vector.shape_cast %124 : vector<1x32x64xbf16> to vector<32x64xbf16>
    %cst_58 = arith.constant dense<0.000000e+00> : vector<128x64xf32>
    %126 = tpu.matmul %123, %125, %cst_58 {dimension_numbers = #tpu.dot_dimension_numbers<[1], [0], [0], [1], [0, 0, 1, 1], [], []>} : vector<128x32xbf16>, vector<32x64xbf16>, vector<128x64xf32> -> vector<128x64xf32>
    %127 = arith.addf %109, %126 : vector<128x64xf32>
    %128 = vector.extract_strided_slice %58 {offsets = [4, 0], sizes = [128, 32], strides = [1, 1]} : vector<132x32xbf16> to vector<128x32xbf16>
    %cst_59 = arith.constant 0.000000e+00 : bf16
    %129 = vector.shape_cast %56 : vector<128x1xi1> to vector<128x1xi1>
    %130 = vector.broadcast %129 : vector<128x1xi1> to vector<128x32xi1>
    %131 = vector.broadcast %cst_59 : bf16 to vector<128x32xbf16>
    %132 = arith.select %130, %128, %131 : vector<128x32xi1>, vector<128x32xbf16>
    %c4 = arith.constant 4 : index
    %c0_60 = arith.constant 0 : index
    %c0_61 = arith.constant 0 : index
    %133 = vector.load %arg3[%c4, %c0_60, %c0_61] : memref<5x32x96xbf16, #tpu.memory_space<vmem>>, vector<1x32x96xbf16>
    %134 = vector.shape_cast %133 : vector<1x32x96xbf16> to vector<32x96xbf16>
    %cst_62 = arith.constant dense<0.000000e+00> : vector<128x96xf32>
    %135 = tpu.matmul %132, %134, %cst_62 {dimension_numbers = #tpu.dot_dimension_numbers<[1], [0], [0], [1], [0, 0, 1, 1], [], []>} : vector<128x32xbf16>, vector<32x96xbf16>, vector<128x96xf32> -> vector<128x96xf32>
    %136 = arith.addf %118, %135 : vector<128x96xf32>
    %137 = vector.extract_strided_slice %61 {offsets = [4, 0], sizes = [128, 32], strides = [1, 1]} : vector<132x32xbf16> to vector<128x32xbf16>
    %cst_63 = arith.constant 0.000000e+00 : bf16
    %138 = vector.shape_cast %56 : vector<128x1xi1> to vector<128x1xi1>
    %139 = vector.broadcast %138 : vector<128x1xi1> to vector<128x32xi1>
    %140 = vector.broadcast %cst_63 : bf16 to vector<128x32xbf16>
    %141 = arith.select %139, %137, %140 : vector<128x32xi1>, vector<128x32xbf16>
    %c4_64 = arith.constant 4 : index
    %c0_65 = arith.constant 0 : index
    %c0_66 = arith.constant 0 : index
    %142 = vector.load %arg4[%c4_64, %c0_65, %c0_66] : memref<5x32x64xbf16, #tpu.memory_space<vmem>>, vector<1x32x64xbf16>
    %143 = vector.shape_cast %142 : vector<1x32x64xbf16> to vector<32x64xbf16>
    %cst_67 = arith.constant dense<0.000000e+00> : vector<128x64xf32>
    %144 = tpu.matmul %141, %143, %cst_67 {dimension_numbers = #tpu.dot_dimension_numbers<[1], [0], [0], [1], [0, 0, 1, 1], [], []>} : vector<128x32xbf16>, vector<32x64xbf16>, vector<128x64xf32> -> vector<128x64xf32>
    %145 = arith.addf %127, %144 : vector<128x64xf32>
    %c0_68 = arith.constant 0 : index
    %c0_69 = arith.constant 0 : index
    %146 = vector.load %arg6[%c0_68, %c0_69] : memref<1x96xf32, #tpu.memory_space<vmem>>, vector<1x96xf32>
    %147 = vector.broadcast %146 : vector<1x96xf32> to vector<128x96xf32>
    %148 = arith.addf %136, %147 : vector<128x96xf32>
    %149 = vector.extract_strided_slice %148 {offsets = [0, 0], sizes = [128, 64], strides = [1, 1]} : vector<128x96xf32> to vector<128x64xf32>
    %150 = arith.addf %149, %145 : vector<128x64xf32>
    %151 = arith.negf %150 : vector<128x64xf32>
    %152 = math.exp %151 : vector<128x64xf32>
    %cst_70 = arith.constant 1.000000e+00 : f32
    %153 = vector.broadcast %cst_70 : f32 to vector<128x64xf32>
    %154 = arith.addf %153, %152 : vector<128x64xf32>
    %155 = arith.divf %153, %154 : vector<128x64xf32>
    %156 = vector.extract_strided_slice %155 {offsets = [0, 0], sizes = [128, 32], strides = [1, 1]} : vector<128x64xf32> to vector<128x32xf32>
    %157 = vector.extract_strided_slice %155 {offsets = [0, 32], sizes = [128, 32], strides = [1, 1]} : vector<128x64xf32> to vector<128x32xf32>
    %158 = arith.mulf %157, %1 : vector<128x32xf32>
    %159 = arith.truncf %158 : vector<128x32xf32> to vector<128x32xbf16>
    %cst_71 = arith.constant 0.000000e+00 : bf16
    %160 = vector.broadcast %cst_71 : bf16 to vector<2x32xbf16>
    %161 = tpu.concatenate %160, %159, %160 in 0 : vector<2x32xbf16>, vector<128x32xbf16>, vector<2x32xbf16> -> vector<132x32xbf16>
    %162 = vector.extract_strided_slice %148 {offsets = [0, 64], sizes = [128, 32], strides = [1, 1]} : vector<128x96xf32> to vector<128x32xf32>
    %163 = vector.extract_strided_slice %161 {offsets = [0, 0], sizes = [128, 32], strides = [1, 1]} : vector<132x32xbf16> to vector<128x32xbf16>
    %cst_72 = arith.constant 0.000000e+00 : bf16
    %164 = vector.shape_cast %29 : vector<128x1xi1> to vector<128x1xi1>
    %165 = vector.broadcast %164 : vector<128x1xi1> to vector<128x32xi1>
    %166 = vector.broadcast %cst_72 : bf16 to vector<128x32xbf16>
    %167 = arith.select %165, %163, %166 : vector<128x32xi1>, vector<128x32xbf16>
    %c0_73 = arith.constant 0 : index
    %c0_74 = arith.constant 0 : index
    %c0_75 = arith.constant 0 : index
    %168 = vector.load %arg5[%c0_73, %c0_74, %c0_75] : memref<5x32x32xbf16, #tpu.memory_space<vmem>>, vector<1x32x32xbf16>
    %169 = vector.shape_cast %168 : vector<1x32x32xbf16> to vector<32x32xbf16>
    %cst_76 = arith.constant dense<0.000000e+00> : vector<128x32xf32>
    %170 = tpu.matmul %167, %169, %cst_76 {dimension_numbers = #tpu.dot_dimension_numbers<[1], [0], [0], [1], [0, 0, 1, 1], [], []>} : vector<128x32xbf16>, vector<32x32xbf16>, vector<128x32xf32> -> vector<128x32xf32>
    %171 = arith.addf %162, %170 : vector<128x32xf32>
    %172 = vector.extract_strided_slice %161 {offsets = [1, 0], sizes = [128, 32], strides = [1, 1]} : vector<132x32xbf16> to vector<128x32xbf16>
    %cst_77 = arith.constant 0.000000e+00 : bf16
    %173 = vector.shape_cast %38 : vector<128x1xi1> to vector<128x1xi1>
    %174 = vector.broadcast %173 : vector<128x1xi1> to vector<128x32xi1>
    %175 = vector.broadcast %cst_77 : bf16 to vector<128x32xbf16>
    %176 = arith.select %174, %172, %175 : vector<128x32xi1>, vector<128x32xbf16>
    %c1_78 = arith.constant 1 : index
    %c0_79 = arith.constant 0 : index
    %c0_80 = arith.constant 0 : index
    %177 = vector.load %arg5[%c1_78, %c0_79, %c0_80] : memref<5x32x32xbf16, #tpu.memory_space<vmem>>, vector<1x32x32xbf16>
    %178 = vector.shape_cast %177 : vector<1x32x32xbf16> to vector<32x32xbf16>
    %cst_81 = arith.constant dense<0.000000e+00> : vector<128x32xf32>
    %179 = tpu.matmul %176, %178, %cst_81 {dimension_numbers = #tpu.dot_dimension_numbers<[1], [0], [0], [1], [0, 0, 1, 1], [], []>} : vector<128x32xbf16>, vector<32x32xbf16>, vector<128x32xf32> -> vector<128x32xf32>
    %180 = arith.addf %171, %179 : vector<128x32xf32>
    %181 = vector.extract_strided_slice %161 {offsets = [2, 0], sizes = [128, 32], strides = [1, 1]} : vector<132x32xbf16> to vector<128x32xbf16>
    %c2_82 = arith.constant 2 : index
    %c0_83 = arith.constant 0 : index
    %c0_84 = arith.constant 0 : index
    %182 = vector.load %arg5[%c2_82, %c0_83, %c0_84] : memref<5x32x32xbf16, #tpu.memory_space<vmem>>, vector<1x32x32xbf16>
    %183 = vector.shape_cast %182 : vector<1x32x32xbf16> to vector<32x32xbf16>
    %cst_85 = arith.constant dense<0.000000e+00> : vector<128x32xf32>
    %184 = tpu.matmul %181, %183, %cst_85 {dimension_numbers = #tpu.dot_dimension_numbers<[1], [0], [0], [1], [0, 0, 1, 1], [], []>} : vector<128x32xbf16>, vector<32x32xbf16>, vector<128x32xf32> -> vector<128x32xf32>
    %185 = arith.addf %180, %184 : vector<128x32xf32>
    %186 = vector.extract_strided_slice %161 {offsets = [3, 0], sizes = [128, 32], strides = [1, 1]} : vector<132x32xbf16> to vector<128x32xbf16>
    %cst_86 = arith.constant 0.000000e+00 : bf16
    %187 = vector.shape_cast %47 : vector<128x1xi1> to vector<128x1xi1>
    %188 = vector.broadcast %187 : vector<128x1xi1> to vector<128x32xi1>
    %189 = vector.broadcast %cst_86 : bf16 to vector<128x32xbf16>
    %190 = arith.select %188, %186, %189 : vector<128x32xi1>, vector<128x32xbf16>
    %c3_87 = arith.constant 3 : index
    %c0_88 = arith.constant 0 : index
    %c0_89 = arith.constant 0 : index
    %191 = vector.load %arg5[%c3_87, %c0_88, %c0_89] : memref<5x32x32xbf16, #tpu.memory_space<vmem>>, vector<1x32x32xbf16>
    %192 = vector.shape_cast %191 : vector<1x32x32xbf16> to vector<32x32xbf16>
    %cst_90 = arith.constant dense<0.000000e+00> : vector<128x32xf32>
    %193 = tpu.matmul %190, %192, %cst_90 {dimension_numbers = #tpu.dot_dimension_numbers<[1], [0], [0], [1], [0, 0, 1, 1], [], []>} : vector<128x32xbf16>, vector<32x32xbf16>, vector<128x32xf32> -> vector<128x32xf32>
    %194 = arith.addf %185, %193 : vector<128x32xf32>
    %195 = vector.extract_strided_slice %161 {offsets = [4, 0], sizes = [128, 32], strides = [1, 1]} : vector<132x32xbf16> to vector<128x32xbf16>
    %cst_91 = arith.constant 0.000000e+00 : bf16
    %196 = vector.shape_cast %56 : vector<128x1xi1> to vector<128x1xi1>
    %197 = vector.broadcast %196 : vector<128x1xi1> to vector<128x32xi1>
    %198 = vector.broadcast %cst_91 : bf16 to vector<128x32xbf16>
    %199 = arith.select %197, %195, %198 : vector<128x32xi1>, vector<128x32xbf16>
    %c4_92 = arith.constant 4 : index
    %c0_93 = arith.constant 0 : index
    %c0_94 = arith.constant 0 : index
    %200 = vector.load %arg5[%c4_92, %c0_93, %c0_94] : memref<5x32x32xbf16, #tpu.memory_space<vmem>>, vector<1x32x32xbf16>
    %201 = vector.shape_cast %200 : vector<1x32x32xbf16> to vector<32x32xbf16>
    %cst_95 = arith.constant dense<0.000000e+00> : vector<128x32xf32>
    %202 = tpu.matmul %199, %201, %cst_95 {dimension_numbers = #tpu.dot_dimension_numbers<[1], [0], [0], [1], [0, 0, 1, 1], [], []>} : vector<128x32xbf16>, vector<32x32xbf16>, vector<128x32xf32> -> vector<128x32xf32>
    %203 = arith.addf %194, %202 : vector<128x32xf32>
    %204 = math.tanh %203 : vector<128x32xf32>
    %cst_96 = arith.constant 1.000000e+00 : f32
    %205 = vector.broadcast %cst_96 : f32 to vector<128x32xf32>
    %206 = arith.subf %205, %156 : vector<128x32xf32>
    %207 = arith.mulf %206, %1 : vector<128x32xf32>
    %208 = arith.mulf %156, %204 : vector<128x32xf32>
    %209 = arith.addf %207, %208 : vector<128x32xf32>
    %cst_97 = arith.constant 0.000000e+00 : bf16
    %210 = vector.broadcast %cst_97 : bf16 to vector<32x32xbf16>
    %211 = tpu.concatenate %210, %3, %210 in 0 : vector<32x32xbf16>, vector<128x32xbf16>, vector<32x32xbf16> -> vector<192x32xbf16>
    %212 = arith.truncf %209 : vector<128x32xf32> to vector<128x32xbf16>
    %cst_98 = arith.constant 0.000000e+00 : bf16
    %213 = vector.broadcast %cst_98 : bf16 to vector<32x32xbf16>
    %214 = tpu.concatenate %213, %212, %213 in 0 : vector<32x32xbf16>, vector<128x32xbf16>, vector<32x32xbf16> -> vector<192x32xbf16>
    %cst_99 = arith.constant 0.000000e+00 : f32
    %215 = vector.broadcast %cst_99 : f32 to vector<128x96xf32>
    %cst_100 = arith.constant 0.000000e+00 : f32
    %216 = vector.broadcast %cst_100 : f32 to vector<128x64xf32>
    %217 = vector.extract_strided_slice %211 {offsets = [0, 0], sizes = [128, 32], strides = [1, 1]} : vector<192x32xbf16> to vector<128x32xbf16>
    %c0_101 = arith.constant 0 : index
    %c0_102 = arith.constant 0 : index
    %c0_103 = arith.constant 0 : index
    %218 = vector.load %arg7[%c0_101, %c0_102, %c0_103] : memref<5x32x96xbf16, #tpu.memory_space<vmem>>, vector<1x32x96xbf16>
    %219 = vector.shape_cast %218 : vector<1x32x96xbf16> to vector<32x96xbf16>
    %cst_104 = arith.constant dense<0.000000e+00> : vector<128x96xf32>
    %220 = tpu.matmul %217, %219, %cst_104 {dimension_numbers = #tpu.dot_dimension_numbers<[1], [0], [0], [1], [0, 0, 1, 1], [], []>} : vector<128x32xbf16>, vector<32x96xbf16>, vector<128x96xf32> -> vector<128x96xf32>
    %221 = arith.addf %215, %220 : vector<128x96xf32>
    %222 = vector.extract_strided_slice %214 {offsets = [0, 0], sizes = [128, 32], strides = [1, 1]} : vector<192x32xbf16> to vector<128x32xbf16>
    %c0_105 = arith.constant 0 : index
    %c0_106 = arith.constant 0 : index
    %c0_107 = arith.constant 0 : index
    %223 = vector.load %arg8[%c0_105, %c0_106, %c0_107] : memref<5x32x64xbf16, #tpu.memory_space<vmem>>, vector<1x32x64xbf16>
    %224 = vector.shape_cast %223 : vector<1x32x64xbf16> to vector<32x64xbf16>
    %cst_108 = arith.constant dense<0.000000e+00> : vector<128x64xf32>
    %225 = tpu.matmul %222, %224, %cst_108 {dimension_numbers = #tpu.dot_dimension_numbers<[1], [0], [0], [1], [0, 0, 1, 1], [], []>} : vector<128x32xbf16>, vector<32x64xbf16>, vector<128x64xf32> -> vector<128x64xf32>
    %226 = arith.addf %216, %225 : vector<128x64xf32>
    %227 = vector.extract_strided_slice %211 {offsets = [16, 0], sizes = [128, 32], strides = [1, 1]} : vector<192x32xbf16> to vector<128x32xbf16>
    %c1_109 = arith.constant 1 : index
    %c0_110 = arith.constant 0 : index
    %c0_111 = arith.constant 0 : index
    %228 = vector.load %arg7[%c1_109, %c0_110, %c0_111] : memref<5x32x96xbf16, #tpu.memory_space<vmem>>, vector<1x32x96xbf16>
    %229 = vector.shape_cast %228 : vector<1x32x96xbf16> to vector<32x96xbf16>
    %cst_112 = arith.constant dense<0.000000e+00> : vector<128x96xf32>
    %230 = tpu.matmul %227, %229, %cst_112 {dimension_numbers = #tpu.dot_dimension_numbers<[1], [0], [0], [1], [0, 0, 1, 1], [], []>} : vector<128x32xbf16>, vector<32x96xbf16>, vector<128x96xf32> -> vector<128x96xf32>
    %231 = arith.addf %221, %230 : vector<128x96xf32>
    %232 = vector.extract_strided_slice %214 {offsets = [16, 0], sizes = [128, 32], strides = [1, 1]} : vector<192x32xbf16> to vector<128x32xbf16>
    %c1_113 = arith.constant 1 : index
    %c0_114 = arith.constant 0 : index
    %c0_115 = arith.constant 0 : index
    %233 = vector.load %arg8[%c1_113, %c0_114, %c0_115] : memref<5x32x64xbf16, #tpu.memory_space<vmem>>, vector<1x32x64xbf16>
    %234 = vector.shape_cast %233 : vector<1x32x64xbf16> to vector<32x64xbf16>
    %cst_116 = arith.constant dense<0.000000e+00> : vector<128x64xf32>
    %235 = tpu.matmul %232, %234, %cst_116 {dimension_numbers = #tpu.dot_dimension_numbers<[1], [0], [0], [1], [0, 0, 1, 1], [], []>} : vector<128x32xbf16>, vector<32x64xbf16>, vector<128x64xf32> -> vector<128x64xf32>
    %236 = arith.addf %226, %235 : vector<128x64xf32>
    %237 = vector.extract_strided_slice %211 {offsets = [32, 0], sizes = [128, 32], strides = [1, 1]} : vector<192x32xbf16> to vector<128x32xbf16>
    %c2_117 = arith.constant 2 : index
    %c0_118 = arith.constant 0 : index
    %c0_119 = arith.constant 0 : index
    %238 = vector.load %arg7[%c2_117, %c0_118, %c0_119] : memref<5x32x96xbf16, #tpu.memory_space<vmem>>, vector<1x32x96xbf16>
    %239 = vector.shape_cast %238 : vector<1x32x96xbf16> to vector<32x96xbf16>
    %cst_120 = arith.constant dense<0.000000e+00> : vector<128x96xf32>
    %240 = tpu.matmul %237, %239, %cst_120 {dimension_numbers = #tpu.dot_dimension_numbers<[1], [0], [0], [1], [0, 0, 1, 1], [], []>} : vector<128x32xbf16>, vector<32x96xbf16>, vector<128x96xf32> -> vector<128x96xf32>
    %241 = arith.addf %231, %240 : vector<128x96xf32>
    %242 = vector.extract_strided_slice %214 {offsets = [32, 0], sizes = [128, 32], strides = [1, 1]} : vector<192x32xbf16> to vector<128x32xbf16>
    %c2_121 = arith.constant 2 : index
    %c0_122 = arith.constant 0 : index
    %c0_123 = arith.constant 0 : index
    %243 = vector.load %arg8[%c2_121, %c0_122, %c0_123] : memref<5x32x64xbf16, #tpu.memory_space<vmem>>, vector<1x32x64xbf16>
    %244 = vector.shape_cast %243 : vector<1x32x64xbf16> to vector<32x64xbf16>
    %cst_124 = arith.constant dense<0.000000e+00> : vector<128x64xf32>
    %245 = tpu.matmul %242, %244, %cst_124 {dimension_numbers = #tpu.dot_dimension_numbers<[1], [0], [0], [1], [0, 0, 1, 1], [], []>} : vector<128x32xbf16>, vector<32x64xbf16>, vector<128x64xf32> -> vector<128x64xf32>
    %246 = arith.addf %236, %245 : vector<128x64xf32>
    %247 = vector.extract_strided_slice %211 {offsets = [48, 0], sizes = [128, 32], strides = [1, 1]} : vector<192x32xbf16> to vector<128x32xbf16>
    %c3_125 = arith.constant 3 : index
    %c0_126 = arith.constant 0 : index
    %c0_127 = arith.constant 0 : index
    %248 = vector.load %arg7[%c3_125, %c0_126, %c0_127] : memref<5x32x96xbf16, #tpu.memory_space<vmem>>, vector<1x32x96xbf16>
    %249 = vector.shape_cast %248 : vector<1x32x96xbf16> to vector<32x96xbf16>
    %cst_128 = arith.constant dense<0.000000e+00> : vector<128x96xf32>
    %250 = tpu.matmul %247, %249, %cst_128 {dimension_numbers = #tpu.dot_dimension_numbers<[1], [0], [0], [1], [0, 0, 1, 1], [], []>} : vector<128x32xbf16>, vector<32x96xbf16>, vector<128x96xf32> -> vector<128x96xf32>
    %251 = arith.addf %241, %250 : vector<128x96xf32>
    %252 = vector.extract_strided_slice %214 {offsets = [48, 0], sizes = [128, 32], strides = [1, 1]} : vector<192x32xbf16> to vector<128x32xbf16>
    %c3_129 = arith.constant 3 : index
    %c0_130 = arith.constant 0 : index
    %c0_131 = arith.constant 0 : index
    %253 = vector.load %arg8[%c3_129, %c0_130, %c0_131] : memref<5x32x64xbf16, #tpu.memory_space<vmem>>, vector<1x32x64xbf16>
    %254 = vector.shape_cast %253 : vector<1x32x64xbf16> to vector<32x64xbf16>
    %cst_132 = arith.constant dense<0.000000e+00> : vector<128x64xf32>
    %255 = tpu.matmul %252, %254, %cst_132 {dimension_numbers = #tpu.dot_dimension_numbers<[1], [0], [0], [1], [0, 0, 1, 1], [], []>} : vector<128x32xbf16>, vector<32x64xbf16>, vector<128x64xf32> -> vector<128x64xf32>
    %256 = arith.addf %246, %255 : vector<128x64xf32>
    %257 = vector.extract_strided_slice %211 {offsets = [64, 0], sizes = [128, 32], strides = [1, 1]} : vector<192x32xbf16> to vector<128x32xbf16>
    %c4_133 = arith.constant 4 : index
    %c0_134 = arith.constant 0 : index
    %c0_135 = arith.constant 0 : index
    %258 = vector.load %arg7[%c4_133, %c0_134, %c0_135] : memref<5x32x96xbf16, #tpu.memory_space<vmem>>, vector<1x32x96xbf16>
    %259 = vector.shape_cast %258 : vector<1x32x96xbf16> to vector<32x96xbf16>
    %cst_136 = arith.constant dense<0.000000e+00> : vector<128x96xf32>
    %260 = tpu.matmul %257, %259, %cst_136 {dimension_numbers = #tpu.dot_dimension_numbers<[1], [0], [0], [1], [0, 0, 1, 1], [], []>} : vector<128x32xbf16>, vector<32x96xbf16>, vector<128x96xf32> -> vector<128x96xf32>
    %261 = arith.addf %251, %260 : vector<128x96xf32>
    %262 = vector.extract_strided_slice %214 {offsets = [64, 0], sizes = [128, 32], strides = [1, 1]} : vector<192x32xbf16> to vector<128x32xbf16>
    %c4_137 = arith.constant 4 : index
    %c0_138 = arith.constant 0 : index
    %c0_139 = arith.constant 0 : index
    %263 = vector.load %arg8[%c4_137, %c0_138, %c0_139] : memref<5x32x64xbf16, #tpu.memory_space<vmem>>, vector<1x32x64xbf16>
    %264 = vector.shape_cast %263 : vector<1x32x64xbf16> to vector<32x64xbf16>
    %cst_140 = arith.constant dense<0.000000e+00> : vector<128x64xf32>
    %265 = tpu.matmul %262, %264, %cst_140 {dimension_numbers = #tpu.dot_dimension_numbers<[1], [0], [0], [1], [0, 0, 1, 1], [], []>} : vector<128x32xbf16>, vector<32x64xbf16>, vector<128x64xf32> -> vector<128x64xf32>
    %266 = arith.addf %256, %265 : vector<128x64xf32>
    %c0_141 = arith.constant 0 : index
    %c0_142 = arith.constant 0 : index
    %267 = vector.load %arg10[%c0_141, %c0_142] : memref<1x96xf32, #tpu.memory_space<vmem>>, vector<1x96xf32>
    %268 = vector.broadcast %267 : vector<1x96xf32> to vector<128x96xf32>
    %269 = arith.addf %261, %268 : vector<128x96xf32>
    %270 = vector.extract_strided_slice %269 {offsets = [0, 0], sizes = [128, 64], strides = [1, 1]} : vector<128x96xf32> to vector<128x64xf32>
    %271 = arith.addf %270, %266 : vector<128x64xf32>
    %272 = arith.negf %271 : vector<128x64xf32>
    %273 = math.exp %272 : vector<128x64xf32>
    %cst_143 = arith.constant 1.000000e+00 : f32
    %274 = vector.broadcast %cst_143 : f32 to vector<128x64xf32>
    %275 = arith.addf %274, %273 : vector<128x64xf32>
    %276 = arith.divf %274, %275 : vector<128x64xf32>
    %277 = vector.extract_strided_slice %276 {offsets = [0, 0], sizes = [128, 32], strides = [1, 1]} : vector<128x64xf32> to vector<128x32xf32>
    %278 = vector.extract_strided_slice %276 {offsets = [0, 32], sizes = [128, 32], strides = [1, 1]} : vector<128x64xf32> to vector<128x32xf32>
    %279 = arith.mulf %278, %209 : vector<128x32xf32>
    %280 = arith.truncf %279 : vector<128x32xf32> to vector<128x32xbf16>
    %cst_144 = arith.constant 0.000000e+00 : bf16
    %281 = vector.broadcast %cst_144 : bf16 to vector<32x32xbf16>
    %282 = tpu.concatenate %281, %280, %281 in 0 : vector<32x32xbf16>, vector<128x32xbf16>, vector<32x32xbf16> -> vector<192x32xbf16>
    %283 = vector.extract_strided_slice %269 {offsets = [0, 64], sizes = [128, 32], strides = [1, 1]} : vector<128x96xf32> to vector<128x32xf32>
    %284 = vector.extract_strided_slice %282 {offsets = [0, 0], sizes = [128, 32], strides = [1, 1]} : vector<192x32xbf16> to vector<128x32xbf16>
    %c0_145 = arith.constant 0 : index
    %c0_146 = arith.constant 0 : index
    %c0_147 = arith.constant 0 : index
    %285 = vector.load %arg9[%c0_145, %c0_146, %c0_147] : memref<5x32x32xbf16, #tpu.memory_space<vmem>>, vector<1x32x32xbf16>
    %286 = vector.shape_cast %285 : vector<1x32x32xbf16> to vector<32x32xbf16>
    %cst_148 = arith.constant dense<0.000000e+00> : vector<128x32xf32>
    %287 = tpu.matmul %284, %286, %cst_148 {dimension_numbers = #tpu.dot_dimension_numbers<[1], [0], [0], [1], [0, 0, 1, 1], [], []>} : vector<128x32xbf16>, vector<32x32xbf16>, vector<128x32xf32> -> vector<128x32xf32>
    %288 = arith.addf %283, %287 : vector<128x32xf32>
    %289 = vector.extract_strided_slice %282 {offsets = [16, 0], sizes = [128, 32], strides = [1, 1]} : vector<192x32xbf16> to vector<128x32xbf16>
    %c1_149 = arith.constant 1 : index
    %c0_150 = arith.constant 0 : index
    %c0_151 = arith.constant 0 : index
    %290 = vector.load %arg9[%c1_149, %c0_150, %c0_151] : memref<5x32x32xbf16, #tpu.memory_space<vmem>>, vector<1x32x32xbf16>
    %291 = vector.shape_cast %290 : vector<1x32x32xbf16> to vector<32x32xbf16>
    %cst_152 = arith.constant dense<0.000000e+00> : vector<128x32xf32>
    %292 = tpu.matmul %289, %291, %cst_152 {dimension_numbers = #tpu.dot_dimension_numbers<[1], [0], [0], [1], [0, 0, 1, 1], [], []>} : vector<128x32xbf16>, vector<32x32xbf16>, vector<128x32xf32> -> vector<128x32xf32>
    %293 = arith.addf %288, %292 : vector<128x32xf32>
    %294 = vector.extract_strided_slice %282 {offsets = [32, 0], sizes = [128, 32], strides = [1, 1]} : vector<192x32xbf16> to vector<128x32xbf16>
    %c2_153 = arith.constant 2 : index
    %c0_154 = arith.constant 0 : index
    %c0_155 = arith.constant 0 : index
    %295 = vector.load %arg9[%c2_153, %c0_154, %c0_155] : memref<5x32x32xbf16, #tpu.memory_space<vmem>>, vector<1x32x32xbf16>
    %296 = vector.shape_cast %295 : vector<1x32x32xbf16> to vector<32x32xbf16>
    %cst_156 = arith.constant dense<0.000000e+00> : vector<128x32xf32>
    %297 = tpu.matmul %294, %296, %cst_156 {dimension_numbers = #tpu.dot_dimension_numbers<[1], [0], [0], [1], [0, 0, 1, 1], [], []>} : vector<128x32xbf16>, vector<32x32xbf16>, vector<128x32xf32> -> vector<128x32xf32>
    %298 = arith.addf %293, %297 : vector<128x32xf32>
    %299 = vector.extract_strided_slice %282 {offsets = [48, 0], sizes = [128, 32], strides = [1, 1]} : vector<192x32xbf16> to vector<128x32xbf16>
    %c3_157 = arith.constant 3 : index
    %c0_158 = arith.constant 0 : index
    %c0_159 = arith.constant 0 : index
    %300 = vector.load %arg9[%c3_157, %c0_158, %c0_159] : memref<5x32x32xbf16, #tpu.memory_space<vmem>>, vector<1x32x32xbf16>
    %301 = vector.shape_cast %300 : vector<1x32x32xbf16> to vector<32x32xbf16>
    %cst_160 = arith.constant dense<0.000000e+00> : vector<128x32xf32>
    %302 = tpu.matmul %299, %301, %cst_160 {dimension_numbers = #tpu.dot_dimension_numbers<[1], [0], [0], [1], [0, 0, 1, 1], [], []>} : vector<128x32xbf16>, vector<32x32xbf16>, vector<128x32xf32> -> vector<128x32xf32>
    %303 = arith.addf %298, %302 : vector<128x32xf32>
    %304 = vector.extract_strided_slice %282 {offsets = [64, 0], sizes = [128, 32], strides = [1, 1]} : vector<192x32xbf16> to vector<128x32xbf16>
    %c4_161 = arith.constant 4 : index
    %c0_162 = arith.constant 0 : index
    %c0_163 = arith.constant 0 : index
    %305 = vector.load %arg9[%c4_161, %c0_162, %c0_163] : memref<5x32x32xbf16, #tpu.memory_space<vmem>>, vector<1x32x32xbf16>
    %306 = vector.shape_cast %305 : vector<1x32x32xbf16> to vector<32x32xbf16>
    %cst_164 = arith.constant dense<0.000000e+00> : vector<128x32xf32>
    %307 = tpu.matmul %304, %306, %cst_164 {dimension_numbers = #tpu.dot_dimension_numbers<[1], [0], [0], [1], [0, 0, 1, 1], [], []>} : vector<128x32xbf16>, vector<32x32xbf16>, vector<128x32xf32> -> vector<128x32xf32>
    %308 = arith.addf %303, %307 : vector<128x32xf32>
    %309 = math.tanh %308 : vector<128x32xf32>
    %cst_165 = arith.constant 1.000000e+00 : f32
    %310 = vector.broadcast %cst_165 : f32 to vector<128x32xf32>
    %311 = arith.subf %310, %277 : vector<128x32xf32>
    %312 = arith.mulf %311, %209 : vector<128x32xf32>
    %313 = arith.mulf %277, %309 : vector<128x32xf32>
    %314 = arith.addf %312, %313 : vector<128x32xf32>
    %c0_166 = arith.constant 0 : index
    %c0_167 = arith.constant 0 : index
    %c0_168 = arith.constant 0 : index
    %315 = vector.load %arg11[%c0_166, %c0_167, %c0_168] : memref<1x128x32xf32, #tpu.memory_space<vmem>>, vector<1x128x32xf32>
    %316 = vector.shape_cast %315 : vector<1x128x32xf32> to vector<128x32xf32>
    %317 = vector.shape_cast %314 : vector<128x32xf32> to vector<1x128x32xf32>
    tpu.vector_store %arg11[%c0_166, %c0_167, %c0_168], %317 {strides = array<i32>} : memref<1x128x32xf32, #tpu.memory_space<vmem>>, vector<1x128x32xf32>,
    return
  }
  func.func @transform_0(%arg0: i32) -> (i32, i32, i32) {
    %c0_i32 = arith.constant 0 : i32
    %c0_i32_0 = arith.constant 0 : i32
    %c0_i32_1 = arith.constant 0 : i32
    return %arg0, %c0_i32, %c0_i32_0 : i32, i32, i32
  }
  func.func @transform_1(%arg0: i32) -> (i32, i32, i32) {
    %c0_i32 = arith.constant 0 : i32
    %c0_i32_0 = arith.constant 0 : i32
    %c0_i32_1 = arith.constant 0 : i32
    return %arg0, %c0_i32, %c0_i32_0 : i32, i32, i32
  }
  func.func @transform_2(%arg0: i32) -> (i32, i32, i32) {
    %c0_i32 = arith.constant 0 : i32
    %c0_i32_0 = arith.constant 0 : i32
    %c0_i32_1 = arith.constant 0 : i32
    %c0_i32_2 = arith.constant 0 : i32
    return %c0_i32, %c0_i32_0, %c0_i32_1 : i32, i32, i32
  }
  func.func @transform_3(%arg0: i32) -> (i32, i32, i32) {
    %c0_i32 = arith.constant 0 : i32
    %c0_i32_0 = arith.constant 0 : i32
    %c0_i32_1 = arith.constant 0 : i32
    %c0_i32_2 = arith.constant 0 : i32
    return %c0_i32, %c0_i32_0, %c0_i32_1 : i32, i32, i32
  }
  func.func @transform_4(%arg0: i32) -> (i32, i32, i32) {
    %c0_i32 = arith.constant 0 : i32
    %c0_i32_0 = arith.constant 0 : i32
    %c0_i32_1 = arith.constant 0 : i32
    %c0_i32_2 = arith.constant 0 : i32
    return %c0_i32, %c0_i32_0, %c0_i32_1 : i32, i32, i32
  }
  func.func @transform_5(%arg0: i32) -> (i32, i32) {
    %c0_i32 = arith.constant 0 : i32
    %c0_i32_0 = arith.constant 0 : i32
    %c0_i32_1 = arith.constant 0 : i32
    return %c0_i32, %c0_i32_0 : i32, i32
  }
  func.func @transform_6(%arg0: i32) -> (i32, i32, i32) {
    %c0_i32 = arith.constant 0 : i32
    %c0_i32_0 = arith.constant 0 : i32
    %c0_i32_1 = arith.constant 0 : i32
    %c0_i32_2 = arith.constant 0 : i32
    return %c0_i32, %c0_i32_0, %c0_i32_1 : i32, i32, i32
  }
  func.func @transform_7(%arg0: i32) -> (i32, i32, i32) {
    %c0_i32 = arith.constant 0 : i32
    %c0_i32_0 = arith.constant 0 : i32
    %c0_i32_1 = arith.constant 0 : i32
    %c0_i32_2 = arith.constant 0 : i32
    return %c0_i32, %c0_i32_0, %c0_i32_1 : i32, i32, i32
  }
  func.func @transform_8(%arg0: i32) -> (i32, i32, i32) {
    %c0_i32 = arith.constant 0 : i32
    %c0_i32_0 = arith.constant 0 : i32
    %c0_i32_1 = arith.constant 0 : i32
    %c0_i32_2 = arith.constant 0 : i32
    return %c0_i32, %c0_i32_0, %c0_i32_1 : i32, i32, i32
  }
  func.func @transform_9(%arg0: i32) -> (i32, i32) {
    %c0_i32 = arith.constant 0 : i32
    %c0_i32_0 = arith.constant 0 : i32
    %c0_i32_1 = arith.constant 0 : i32
    return %c0_i32, %c0_i32_0 : i32, i32
  }
  func.func @transform_10(%arg0: i32) -> (i32, i32, i32) {
    %c0_i32 = arith.constant 0 : i32
    %c0_i32_0 = arith.constant 0 : i32
    %c0_i32_1 = arith.constant 0 : i32
    return %arg0, %c0_i32, %c0_i32_0 : i32, i32, i32
  }
}

</mosaic_0001>

<bundles_post_ra>
// kernel: tpu_custom_call.1
= control target key start
LH: loop header
LB: loop body
LE: loop exit
PB: predicated region body
PF: predicated region fallthrough
CT: control target
= control target key end

     0   :  { %15 = vsyncpa [#allocation3], 0  ;;  %s8409_s13 = smov 0   ;;  %s12120_s0 = inlined_call_operand.vmem [shape: f32[2,128,32], index: 0, kind: input, shape index: {}]   ;;  %s12121_s1 = inlined_call_operand.vmem [shape: bf16[2,128,32], index: 1, kind: input, shape index: {}]   ;;  %s12122_s2 = inlined_call_operand.vmem [shape: bf16[5,32,96], index: 2, kind: input, shape index: {}]   ;;  %s12123_s3 = inlined_call_operand.vmem [shape: bf16[5,32,64], index: 3, kind: input, shape index: {}]   ;;  %s12124_s4 = inlined_call_operand.vmem [shape: bf16[5,32,32], index: 4, kind: input, shape index: {}]   ;;  %s12125_s5 = inlined_call_operand.vmem [shape: f32[1,96], index: 5, kind: input, shape index: {}]   ;;  %s12126_s6 = inlined_call_operand.vmem [shape: bf16[5,32,96], index: 6, kind: input, shape index: {}]   ;;  %s12127_s7 = inlined_call_operand.vmem [shape: bf16[5,32,64], index: 7, kind: input, shape index: {}]   ;;  %s12128_s8 = inlined_call_operand.hbm [shape: bf16[5,32,32], index: 8, kind: input, shape index: {}]   ;;  %s12129_s9 = inlined_call_operand.vmem [shape: f32[1,96], index: 9, kind: input, shape index: {}]   ;;  %s12130_s10 = inlined_call_operand.vmem [shape: f32[2,128,32], index: 10, kind: output, shape index: {}]  }
   0x1 LB: > { %s301_s16 = sshll.u32 %s12128_s8, 4  ;;  %s7343_s17 = sadd.s32 4294967295, %s8344_s13   ;;  %s8344_s13 = sphi %s8409_s13, %s21_s13   ;;  %s302_s16 = int_to_ptr.hbm [resolvable:$true] %s301_s16 }
   0x2   : > { %p7345_p0 = scmp.ge.s32.totalorder %s8344_s13, 1  ;;  %p272_p1 = scmp.lt.s32.totalorder %s8344_s13, 3 }
   0x3   : > { %p8063_p2 = scmp.eq.s32.totalorder %s7343_s17, 0  ;;  %s8346_s18 = smov [#allocation2]  }
   0x4   : > { %p273_p3 = pnand %p7345_p0, %p272_p1  ;;  %s303_s19 = sshll.u32 %s8346_s18, 4  ;;  %s304_s19 = int_to_ptr.vmem [resolvable:$true] %s303_s19 }
   0x5   : > { %s8347_s20 = smov 64   ;;  %s8348_s21 = smov 4  }
   0x6   : > { %p8059_p4 = pneg %p273_p3  ;;  %338 = sbr.rel (%p273_p3) target bundleno = 2188 (0x88c), region = 60 }
   0x8   : > { %p8060_p5 = pnand %p8063_p2, %p8059_p4 }
   0xa   : > { %8062 = dma.hbm_to_vmem [thread:$0]  (!%p8060_p5), %s302_s16, 1280, %s304_s19, [#allocation3], %s8347_s20, %s8347_s20, %s8348_s21  }
   0xb   : > { %8339 = dma.done.wait (%p8063_p2), [#allocation3], 1280  }
   0xc   : > { %8341 = vsyncadd (%p8063_p2), [#allocation3], 4294966016  ;;  %p382_p6 = scmp.lt.s32.totalorder %s7343_s17, 1  ;;  %v432_v0 = vlaneseq  ;;  %vm8349_vm0 = vmmov 1   ;;  %v12149_v2 = vmov 0   ;;  %v7992_v13 = vld [vmem:[%s12122_s2 + $0x8] sm:$0xff] }
   0xd   : > { %vm1085_vm1 = vmpackc.low %vm8349_vm0, %vm8349_vm0  ;;  %vm12131_vm2 = vcmask 1040384   ;;  %v7996_v19 = vld [vmem:[%s12122_s2 + $0x18] sm:$0xff]  ;;  %8053 = vmatpush.bf16.msra.mxu3 %v7992_v13  ;;  %v7991_v21 = vld [vmem:[%s12122_s2] sm:$0xff]  ;;  %v8465_v23 = vunpack.c.h.b16 %v12149_v2  ;;  %1646 = vmatpush.bf16.msra.mxu1 %v7992_v13  ;;  %v8481_v36 = vunpack.c.l.b16 %v12149_v2  ;;  %vm12133_vm0 = vcmask 261120   ;;  %s8351_s20 = smov 32   ;;  %s8352_s30 = smov 96  }
   0xe   : > { %s13006_s17 = smov (!%p382_p6, %s7343_s17), 1  ;;  %v8422_v1 = vshrl.u32 %v432_v0, 7  ;;  %v1101_v3 = vsel %vm1085_vm1, 65537, %v12149_v2  ;;  %1561 = vmatpush.bf16.msra.mxu0 %v7996_v19  ;;  %8051 = vmatpush.bf16.msra.mxu2 %v7996_v19  ;;  %v7995_v25 = vld [vmem:[%s12122_s2 + $0x10] sm:$0xff]  ;;  %v7998_v42 = vld [vmem:[%s12123_s3 + $0x18] sm:$0xff]  ;;  %v7994_v43 = vld [vmem:[%s12123_s3 + $0x8] sm:$0xff] }
   0xf   : > { %s7981_s22 = sshll.u32 %s13006_s17, 6  ;;  %v8436_v7 = vunpack.c.l.b16 %v1101_v3  ;;  %v8000_v48 = vld [vmem:[%s12122_s2 + $0x28] sm:$0xff]  ;;  %v12303_v53 = vmov 0  ;;  %v12306_v56 = vmov 0  ;;  %s7980_s14 = sshll.u32 %s13006_s17, 7 }
  0x10   : > { %v441_v4 = vadd.s32 64, %v8422_v1  ;;  %v453_v5 = vand.u32 15, %v8422_v1  ;;  %v8429_v6 = vadd.s32 16, %v8422_v1  ;;  %s8434_s25 = scalar_lea.vmem %s12121_s1, %s7981_s22  ;;  %v8439_v8 = vadd.s32 48, %v8422_v1  ;;  %v8002_v49 = vld [vmem:[%s12123_s3 + $0x28] sm:$0xff]  ;;  %s8788_s18 = scalar_lea.vmem %s12120_s0, %s7980_s14 }
  0x11   : > { %v8442_v12 = vadd.s32 80, %v8422_v1  ;;  %v8448_v14 = vld [vmem:[%s8434_s25 + $0x18] sm:$0xff]  ;;  %v8452_v16 = vld [vmem:[%s8434_s25 + $0x20] sm:$0xff]  ;;  %v7389_v22 = vunpack.i.l.s16 %v8436_v7  ;;  %8054 = vmatpush.bf16.msra.mxu3 %v7991_v21  ;;  %1647 = vmatpush.bf16.msra.mxu1 %v7991_v21  ;;  %v8546_v62 = vld [vmem:[%s8434_s25 + $0x8] sm:$0xff]  ;;  %s8353_s12 = smov 64   ;;  %s12036_s24 = scalar_lea.vmem %s12130_s10, %s7980_s14 }
  0x12   : > { %v509_v9 = vand.u32 15, %v441_v4  ;;  %v641_v10 = vadd.s32 4294967294, %v453_v5  ;;  %v705_v11 = vadd.s32 4294967295, %v453_v5  ;;  %v467_v15 = vand.u32 15, %v8429_v6  ;;  %v8458_v20 = vld [vmem:[%s8434_s25] sm:$0xff]  ;;  %1562 = vmatpush.bf16.msra.mxu0 %v7995_v25  ;;  %8052 = vmatpush.bf16.msra.mxu2 %v7995_v25  ;;  %v8550_v5 = vld [vmem:[%s8434_s25 + $0x28] sm:$0xff] }
  0x13   : > { %v495_v26 = vand.u32 15, %v8439_v8  ;;  %v523_v27 = vand.u32 15, %v8442_v12  ;;  %v938_v28 = vrot.slane %v8458_v20, 7  ;;  %v943_v31 = vrot.slane %v8448_v14, 7 }
  0x14   : > { %v649_v17 = vadd.s32 4294967294, %v509_v9  ;;  %v713_v18 = vadd.s32 4294967295, %v509_v9  ;;  %vm657_vm3 = vcmp.ge.s32.totalorder %v641_v10, 0  ;;  %vm721_vm4 = vcmp.ge.s32.totalorder %v705_v11, 0 }
  0x15   : > { %vm1084_vm5 = vmpackc.low %vm657_vm3, %vm657_vm3  ;;  %v707_v24 = vadd.s32 4294967295, %v467_v15  ;;  %v945_v32 = vrot.slane %v8452_v16, 7  ;;  %vm8485_vm12 = vcmp.ne.s32.totalorder %v7389_v22, %v8465_v23  ;;  %v711_v41 = vadd.s32 4294967295, %v495_v26  ;;  %1898 = vmatpush.bf16.msrb.mxu3 %v7994_v43  ;;  %2133 = vmatpush.bf16.msrb.mxu1 %v8002_v49 }
  0x16   : > { %vm665_vm6 = vcmp.ge.s32.totalorder %v649_v17, 0  ;;  %vm729_vm7 = vcmp.ge.s32.totalorder %v713_v18, 0  ;;  %vm1252_vm8 = vmpackc.low %vm721_vm4, %vm721_vm4  ;;  %v1100_v29 = vsel %vm1084_vm5, 65537, %v12149_v2  ;;  %v8502_v46 = vsel %vm12131_vm2, 0, %v938_v28  ;;  %1813 = vmatpush.bf16.msrb.mxu2 %v7998_v42  ;;  %2008 = vmatpush.bf16.msrb.mxu0 %v8000_v48 }
  0x17   : > { %vm1092_vm9 = vmpackc.low %vm665_vm6, %vm665_vm6  ;;  %v1268_v30 = vsel %vm1252_vm8, 65537, %v12149_v2  ;;  %vm723_vm10 = vcmp.ge.s32.totalorder %v707_v24, 0  ;;  %v1116_v34 = vunpack.c.l.b16 %v1100_v29  ;;  %v8516_v50 = vsel %vm12131_vm2, %v943_v31, %v945_v32 }
  0x18   : > { %v1108_v33 = vsel %vm1092_vm9, 65537, %v12149_v2  ;;  %vm1260_vm11 = vmpackc.low %vm729_vm7, %vm729_vm7  ;;  %v1284_v38 = vunpack.c.l.b16 %v1268_v30  ;;  %12302 = vst [vmem:[#allocation5_spill] sm:$0xff] %v8516_v50  ;;  %v715_v52 = vadd.s32 4294967295, %v523_v27  ;;  %vm727_vm4 = vcmp.ge.s32.totalorder %v711_v41, 0 }
  0x19   : > { %v1124_v35 = vunpack.c.l.b16 %v1108_v33  ;;  %v1276_v37 = vsel %vm1260_vm11, 65537, %v12149_v2  ;;  %v7388_v40 = vunpack.i.l.s16 %v1116_v34  ;;  %vm1254_vm13 = vmpackc.low %vm723_vm10, %vm723_vm10  ;;  %vm12134_vm8 = vsmask.f32 256 }
  0x1a   : > { %v1292_v45 = vunpack.c.l.b16 %v1276_v37  ;;  %v1300_v47 = vpack.c.b16 %v8436_v7, %v1284_v38  ;;  %v1270_v51 = vsel %vm1254_vm13, 65537, %v12149_v2  ;;  %vm1258_vm5 = vmpackc.low %vm727_vm4, %vm727_vm4  ;;  %vm731_vm6 = vcmp.ge.s32.totalorder %v715_v52, 0 }
  0x1b   : > { %v7396_v44 = vunpack.i.l.s16 %v1124_v35  ;;  %vm1144_vm14 = vcmp.ne.s32.totalorder %v7388_v40, %v8481_v36  ;;  %v1286_v54 = vunpack.c.l.b16 %v1270_v51  ;;  %v1274_v0 = vsel %vm1258_vm5, 65537, %v12149_v2  ;;  %vm1262_vm7 = vmpackc.low %vm731_vm6, %vm731_vm6 }
  0x1c   : > { %vm8525_vm1 = vmpackc.low %vm8485_vm12, %vm1144_vm14  ;;  %v1310_v55 = vshrl.u32 %v1300_v47, 16  ;;  %v1313_v58 = vshll.u32 %v1300_v47, 16  ;;  %v1304_v60 = vpack.c.b16 %v8436_v7, %v1292_v45  ;;  %v1278_v10 = vsel %vm1262_vm7, 65537, %v12149_v2 }
  0x1d   : > { %vm1172_vm15 = vcmp.ne.s32.totalorder %v7396_v44, %v8481_v36  ;;  %v12304_v53 = vsel %vm8525_vm1, 4294967295, %v12303_v53  ;;  %v1196_v57 = vsel %vm8525_vm1, %v8502_v46, 0  ;;  %v1301_v61 = vpack.c.b16 %v8436_v7, %v1286_v54 }
  0x1e   : > { %12305 = vst [vmem:[#allocation6_spill] sm:$0xff] %v12304_v53  ;;  %vm8531_vm3 = vmpackc.low %vm8485_vm12, %vm1172_vm15  ;;  %7432 = vmatmul.msk.bf16.vlgmr.msra.gmra.mxu1 %vm12133_vm0, %v1196_v57  ;;  %v1312_v63 = vrot.slane %v1310_v55, 7  ;;  %v1290_v11 = vunpack.c.l.b16 %v1274_v0  ;;  %v1294_v17 = vunpack.c.l.b16 %v1278_v10  ;;  %v1341_v18 = vshrl.u32 %v1304_v60, 16 }
  0x1f   : > { %v12307_v56 = vsel %vm8531_vm3, 4294967295, %v12306_v56  ;;  %v1200_v59 = vsel %vm8531_vm3, %v8516_v50, 0  ;;  %v1317_v3 = vshrl.u32 %v1301_v61, 16  ;;  %v1320_v4 = vshll.u32 %v1301_v61, 16 }
  0x20   : > { %12308 = vst [vmem:[#allocation7_spill] sm:$0xff] %v12307_v56  ;;  %7436 = vmatmul.msk.bf16.vlgmr.msra.gmra.mxu3 %vm12133_vm0, %v1200_v59  ;;  %v1315_v9 = vor.u32 %v1313_v58, %v1312_v63  ;;  %v939_v19 = vrot.slane %v8546_v62, 7  ;;  %v8557_v24 = vpack.c.b16 %v8436_v7, %v1290_v11  ;;  %v1344_v25 = vshll.u32 %v1304_v60, 16  ;;  %v7997_v62 = vld [vmem:[%s12123_s3 + $0x10] sm:$0xff] }
  0x21   : > { %v8553_v13 = vrot.slane %v1317_v3, 7  ;;  %v947_v30 = vrot.slane %v8550_v5, 7  ;;  %v1305_v33 = vpack.c.b16 %v8436_v7, %v1294_v17  ;;  %v1343_v35 = vrot.slane %v1341_v18, 7  ;;  %1814 = vmatpush.bf16.msrb.mxu2 %v7997_v62 }
  0x22   : > { %v1372_v21 = vunpack.c.l.b16 %v1315_v9  ;;  %v1373_v22 = vunpack.c.h.b16 %v1315_v9  ;;  %v1333_v34 = vshrl.u32 %v8557_v24, 16  ;;  %v12309_v38 = vmov 0 }
  0x23   : > { %v1322_v29 = vor.u32 %v1320_v4, %v8553_v13  ;;  %vm12132_vm13 = vsmask.f32 7424  ;;  %v1349_v40 = vshrl.u32 %v1305_v33, 16  ;;  %v651_v41 = vadd.s32 4294967294, %v523_v27 }
  0x24   : > { %vm1376_vm9 = vcmp.ne.s32.totalorder %v1372_v21, %v8481_v36  ;;  %vm1377_vm10 = vcmp.ne.s32.totalorder %v1373_v22, %v8465_v23  ;;  %v8575_v45 = vrot.slane %v1333_v34, 7  ;;  %v8582_v47 = vsel %vm12131_vm2, %v938_v28, %v939_v19 }
  0x25   : > { %v1323_v37 = vsel %vm12134_vm8, %v1312_v63, %v1322_v29  ;;  %vm8566_vm11 = vmpackc.low %vm1377_vm10, %vm1376_vm9  ;;  %v1346_v51 = vor.u32 %v1344_v25, %v1343_v35  ;;  %v8591_v12 = vsel %vm12131_vm2, %v945_v32, %v947_v30  ;;  %v437_v27 = vadd.s32 32, %v8422_v1 }
  0x26   : > { %v12310_v38 = vsel %vm8566_vm11, 4294967295, %v12309_v38  ;;  %v1379_v42 = vunpack.c.l.b16 %v1323_v37  ;;  %v1380_v43 = vunpack.c.h.b16 %v1323_v37  ;;  %v1435_v44 = vsel %vm8566_vm11, %v8502_v46, 0  ;;  %12312 = vst [vmem:[#allocation9_spill] sm:$0xff] %v8591_v12 }
  0x27   : > { %12311 = vst [vmem:[#allocation8_spill] sm:$0xff] %v12310_v38  ;;  %v1451_v48 = vshrl.u32 %v1435_v44, 16  ;;  %v1453_v49 = vshll.u32 %v1435_v44, 16  ;;  %v12313_v20 = vmov 0  ;;  %v1347_v52 = vsel %vm12134_vm8, %v8575_v45, %v1346_v51 }
  0x28   : > { %vm1383_vm14 = vcmp.ne.s32.totalorder %v1379_v42, %v8481_v36  ;;  %vm1384_vm15 = vcmp.ne.s32.totalorder %v1380_v43, %v8465_v23  ;;  %v8600_v54 = vrot.slane %v1349_v40, 7  ;;  %v1352_v55 = vshll.u32 %v1305_v33, 16 }
  0x29   : > { %vm8594_vm4 = vmpackc.low %vm1384_vm15, %vm1383_vm14  ;;  %v1455_v28 = vrot.slane %v1453_v49, 1  ;;  %v1400_v32 = vunpack.c.l.b16 %v1347_v52  ;;  %v1401_v57 = vunpack.c.h.b16 %v1347_v52  ;;  %vm667_vm5 = vcmp.ge.s32.totalorder %v651_v41, 0 }
  0x2a   : > { %v12314_v20 = vsel %vm8594_vm4, 4294967295, %v12313_v20  ;;  %v8605_v16 = vsel %vm8594_vm4, %v8582_v47, 0  ;;  %v1354_v60 = vor.u32 %v1352_v55, %v8600_v54  ;;  %vm1094_vm6 = vmpackc.low %vm667_vm5, %vm667_vm5  ;;  %v643_v61 = vadd.s32 4294967294, %v467_v15  ;;  %v8666_v55 = vld [vmem:[%s8434_s25 + $0x10] sm:$0xff] }
  0x2b   : > { %12315 = vst [vmem:[#allocation10_spill] sm:$0xff] %v12314_v20  ;;  %v1456_v58 = vor.u32 %v1455_v28, %v1451_v48  ;;  %v1458_v59 = vshll.u32 %v8605_v16, 16  ;;  %vm1404_vm7 = vcmp.ne.s32.totalorder %v1400_v32, %v8481_v36  ;;  %vm1405_vm9 = vcmp.ne.s32.totalorder %v1401_v57, %v8465_v23 }
  0x2c   : > { %v1110_v63 = vsel %vm1094_vm6, 65537, %v12149_v2  ;;  %v481_v0 = vand.u32 15, %v437_v27  ;;  %v1355_v4 = vsel %vm12134_vm8, %v1343_v35, %v1354_v60  ;;  %vm8617_vm10 = vmpackc.low %vm1405_vm9, %vm1404_vm7  ;;  %v12316_v9 = vmov 0 }
  0x2d   : > { %v8614_v3 = vrot.slane %v1458_v59, 1  ;;  %v12317_v9 = vsel %vm8617_vm10, 4294967295, %v12316_v9  ;;  %v1126_v10 = vunpack.c.l.b16 %v1110_v63  ;;  %vm659_vm14 = vcmp.ge.s32.totalorder %v643_v61, 0  ;;  %v8677_v63 = vld [vmem:[%s8434_s25 + $0x30] sm:$0xff] }
  0x2e   : > { %12318 = vst [vmem:[#allocation11_spill] sm:$0xff] %v12317_v9  ;;  %v1407_v11 = vunpack.c.l.b16 %v1355_v4  ;;  %v1408_v6 = vunpack.c.h.b16 %v1355_v4  ;;  %v1439_v15 = vsel %vm8617_vm10, %v8516_v50, 0  ;;  %vm1086_vm15 = vmpackc.low %vm659_vm14, %vm659_vm14  ;;  %v709_v17 = vadd.s32 4294967295, %v481_v0 }
  0x2f   : > { %v1461_v18 = vsel %vm12132_vm13, %v1456_v58, %v8614_v3  ;;  %v1482_v21 = vshll.u32 %v1439_v15, 16  ;;  %v1486_v22 = vshrl.u32 %v1439_v15, 16  ;;  %v7398_v25 = vunpack.i.l.s16 %v1126_v10 }
  0x30   : > { %7416 = vmatmul.msk.bf16.vlgmr.msra.gmra.mxu0 %vm12133_vm0, %v1461_v18  ;;  %vm1411_vm5 = vcmp.ne.s32.totalorder %v1407_v11, %v8481_v36  ;;  %vm1412_vm6 = vcmp.ne.s32.totalorder %v1408_v6, %v8465_v23  ;;  %v1102_v29 = vsel %vm1086_vm15, 65537, %v12149_v2  ;;  %vm725_vm7 = vcmp.ge.s32.totalorder %v709_v17, 0 }
  0x31   : > { %vm8630_vm9 = vmpackc.low %vm1412_vm6, %vm1411_vm5  ;;  %v12319_v33 = vmov 0  ;;  %v8634_v34 = vrot.slane %v1482_v21, 1  ;;  %vm1179_vm14 = vcmp.ne.s32.totalorder %v7398_v25, %v8481_v36  ;;  %v1118_v35 = vunpack.c.l.b16 %v1102_v29 }
  0x32   : > { %v12320_v33 = vsel %vm8630_vm9, 4294967295, %v12319_v33  ;;  %v8640_v37 = vsel %vm8630_vm9, %v8591_v12, 0  ;;  %vm8644_vm2 = vmpackc.low %vm8485_vm12, %vm1179_vm14  ;;  %v12322_v40 = vmov 0  ;;  %v445_v41 = vadd.s32 96, %v8422_v1 }
  0x33   : > { %12321 = vst [vmem:[#allocation12_spill] sm:$0xff] %v12320_v33  ;;  %v12323_v40 = vsel %vm8644_vm2, 4294967295, %v12322_v40  ;;  %v1488_v42 = vor.u32 %v1486_v22, %v8634_v34  ;;  %v1490_v43 = vshll.u32 %v8640_v37, 16  ;;  %v1201_v44 = vsel %vm8644_vm2, %v8591_v12, 0  ;;  %vm1256_vm15 = vmpackc.low %vm725_vm7, %vm725_vm7 }
  0x34   : > { %12324 = vst [vmem:[#allocation13_spill] sm:$0xff] %v12323_v40  ;;  %v7390_v48 = vunpack.i.l.s16 %v1118_v35  ;;  %7437 = vmatmul.msk.bf16.gmra.mxu3 %vm12133_vm0, %v1201_v44  ;;  %v1272_v49 = vsel %vm1256_vm15, 65537, %v12149_v2  ;;  %v537_v51 = vand.u32 15, %v445_v41  ;;  %v12325_v52 = vmov 0 }
  0x35   : > { %v8656_v27 = vrot.slane %v1490_v43, 1  ;;  %v1288_v28 = vunpack.c.l.b16 %v1272_v49  ;;  %v645_v58 = vadd.s32 4294967294, %v481_v0  ;;  %v1336_v10 = vshll.u32 %v8557_v24, 16 }
  0x36   : > { %vm1151_vm5 = vcmp.ne.s32.totalorder %v7390_v48, %v8481_v36  ;;  %v717_v32 = vadd.s32 4294967295, %v537_v51  ;;  %v653_v57 = vadd.s32 4294967294, %v537_v51  ;;  %v447_v11 = vadd.s32 112, %v8422_v1 }
  0x37   : > { %vm8661_vm6 = vmpackc.low %vm8485_vm12, %vm1151_vm5  ;;  %v1493_v59 = vsel %vm12132_vm13, %v1488_v42, %v8656_v27  ;;  %v1302_v61 = vpack.c.b16 %v8436_v7, %v1288_v28  ;;  %vm661_vm15 = vcmp.ge.s32.totalorder %v645_v58, 0  ;;  %v941_v6 = vrot.slane %v8666_v55, 7 }
  0x38   : > { %v12326_v52 = vsel %vm8661_vm6, 4294967295, %v12325_v52  ;;  %v1197_v60 = vsel %vm8661_vm6, %v8582_v47, 0  ;;  %7420 = vmatmul.msk.bf16.vlgmr.msra.gmra.mxu2 %vm12133_vm0, %v1493_v59  ;;  %vm733_vm7 = vcmp.ge.s32.totalorder %v717_v32, 0  ;;  %vm669_vm14 = vcmp.ge.s32.totalorder %v653_v57, 0 }
  0x39   : > { %12327 = vst [vmem:[#allocation14_spill] sm:$0xff] %v12326_v52  ;;  %7433 = vmatmul.msk.bf16.gmra.mxu1 %vm12133_vm0, %v1197_v60  ;;  %v1325_v4 = vshrl.u32 %v1302_v61, 16  ;;  %v1328_v0 = vshll.u32 %v1302_v61, 16  ;;  %vm1264_vm5 = vmpackc.low %vm733_vm7, %vm733_vm7  ;;  %v1462_v15 = vshrl.u32 %v8605_v16, 16  ;;  %v1338_v25 = vor.u32 %v1336_v10, %v8575_v45 }
  0x3a   : > { %v1280_v17 = vsel %vm1264_vm5, 65537, %v12149_v2  ;;  %vm1096_vm13 = vmpackc.low %vm669_vm14, %vm669_vm14  ;;  %v949_v29 = vrot.slane %v8677_v63, 7  ;;  %v551_v41 = vand.u32 15, %v447_v11  ;;  %v12331_v10 = vmov 0  ;;  %v8001_v11 = vld [vmem:[%s12123_s3 + $0x20] sm:$0xff] }
  0x3b   : > { %v1327_v18 = vrot.slane %v1325_v4, 7  ;;  %v1296_v21 = vunpack.c.l.b16 %v1280_v17  ;;  %v1112_v22 = vsel %vm1096_vm13, 65537, %v12149_v2  ;;  %vm1088_vm0 = vmpackc.low %vm661_vm15, %vm661_vm15  ;;  %vm12328_vm13 = vcmask 1040384   ;;  %2134 = vmatpush.bf16.msrb.mxu1 %v8001_v11 }
  0x3c   : > { %v1128_v35 = vunpack.c.l.b16 %v1112_v22  ;;  %v1104_v24 = vsel %vm1088_vm0, 65537, %v12149_v2  ;;  %v8695_v48 = vsel %vm12328_vm13, %v939_v19, %v941_v6  ;;  %v719_v51 = vadd.s32 4294967295, %v551_v41  ;;  %v7993_v19 = vld [vmem:[%s12123_s3] sm:$0xff]  ;;  %vm12329_vm7 = vmmov %vm12328_vm13 }
  0x3d   : > { %v1330_v42 = vor.u32 %v1328_v0, %v1327_v18  ;;  %v1306_v43 = vpack.c.b16 %v8436_v7, %v1296_v21  ;;  %v1120_v16 = vunpack.c.l.b16 %v1104_v24  ;;  %v1339_v44 = vsel %vm12134_vm8, %v1327_v18, %v1338_v25  ;;  %1899 = vmatpush.bf16.msrb.mxu3 %v7993_v19  ;;  %v8813_v19 = vld [vmem:[%s8788_s18 + $0x8] sm:$0xff] }
  0x3e   : > { %v7400_v45 = vunpack.i.l.s16 %v1128_v35  ;;  %v1393_v49 = vunpack.c.l.b16 %v1339_v44  ;;  %v1394_v61 = vunpack.c.h.b16 %v1339_v44  ;;  %v8714_v4 = vsel %vm12329_vm7, %v947_v30, %v949_v29 }
  0x3f   : > { %v1331_v28 = vsel %vm12134_vm8, %v8553_v13, %v1330_v42  ;;  %v1357_v32 = vshrl.u32 %v1306_v43, 16  ;;  %v1360_v57 = vshll.u32 %v1306_v43, 16  ;;  %v7392_v58 = vunpack.i.l.s16 %v1120_v16  ;;  %v7999_v13 = vld [vmem:[%s12122_s2 + $0x20] sm:$0xff]  ;;  %12330 = vst [vmem:[#allocation15_spill] sm:$0xff] %v8714_v4 }
  0x40   : > { %v1386_v59 = vunpack.c.l.b16 %v1331_v28  ;;  %v1387_v60 = vunpack.c.h.b16 %v1331_v28  ;;  %vm1186_vm0 = vcmp.ne.s32.totalorder %v7400_v45, %v8481_v36  ;;  %v12334_v30 = vmov 0  ;;  %2009 = vmatpush.bf16.msrb.mxu0 %v7999_v13 }
  0x41   : > { %v8716_v0 = vrot.slane %v1357_v32, 7  ;;  %vm8720_vm14 = vmpackc.low %vm8485_vm12, %vm1186_vm0  ;;  %vm1158_vm15 = vcmp.ne.s32.totalorder %v7392_v58, %v8481_v36  ;;  %v655_v17 = vadd.s32 4294967294, %v551_v41  ;;  %v12337_v18 = vmov 0 }
  0x42   : > { %v12332_v10 = vsel %vm8720_vm14, 4294967295, %v12331_v10  ;;  %vm1390_vm13 = vcmp.ne.s32.totalorder %v1386_v59, %v8481_v36  ;;  %vm1391_vm7 = vcmp.ne.s32.totalorder %v1387_v60, %v8465_v23  ;;  %v1202_v5 = vsel %vm8720_vm14, %v8714_v4, 0  ;;  %vm8735_vm0 = vmpackc.low %vm8485_vm12, %vm1158_vm15 }
  0x43   : > { %12333 = vst [vmem:[#allocation16_spill] sm:$0xff] %v12332_v10  ;;  %v12335_v30 = vsel %vm8735_vm0, 4294967295, %v12334_v30  ;;  %vm8739_vm5 = vmpackc.low %vm1391_vm7, %vm1390_vm13  ;;  %v1362_v21 = vor.u32 %v1360_v57, %v8716_v0  ;;  %v647_v22 = vadd.s32 4294967294, %v495_v26  ;;  %vm12340_vm15 = vcmask 261120  }
  0x44   : > { %12336 = vst [vmem:[#allocation17_spill] sm:$0xff] %v12335_v30  ;;  %v12338_v18 = vsel %vm8739_vm5, 4294967295, %v12337_v18  ;;  %v8749_v25 = vsel %vm8739_vm5, %v8695_v48, 0  ;;  %7438 = vmatmul.msk.bf16.gmra.mxu3 %vm12340_vm15, %v1202_v5  ;;  %vm8753_vm8 = vcmp.ne.s32.totalorder %v1393_v49, %v8481_v36  ;;  %vm1398_vm13 = vcmp.ne.s32.totalorder %v1394_v61, %v8465_v23 }
  0x45   : > { %12339 = vst [vmem:[#allocation18_spill] sm:$0xff] %v12338_v18  ;;  %vm671_vm7 = vcmp.ge.s32.totalorder %v655_v17, 0  ;;  %v1464_v8 = vor.u32 %v1462_v15, %v8614_v3  ;;  %v1466_v26 = vshll.u32 %v8749_v25, 16  ;;  %vm12343_vm14 = vsmask.f32 256 }
  0x46   : > { %v1363_v24 = vsel %vm12343_vm14, %v8600_v54, %v1362_v21  ;;  %v1198_v41 = vsel %vm8735_vm0, %v8695_v48, 0  ;;  %vm12344_vm15 = vcmp.ge.s32.totalorder %v719_v51, 0  ;;  %v1494_v16 = vshrl.u32 %v8640_v37, 16  ;;  %vm1098_vm2 = vmpackc.low %vm671_vm7, %vm671_vm7  ;;  %v8781_v37 = vld [vmem:[%s8434_s25 + $0x38] sm:$0xff] }
  0x47   : > { %vm1266_vm9 = vmpackc.low %vm12344_vm15, %vm12344_vm15  ;;  %v1414_v42 = vunpack.c.l.b16 %v1363_v24  ;;  %v1415_v43 = vunpack.c.h.b16 %v1363_v24  ;;  %v1468_v15 = vrot.slane %v1466_v26, 1  ;;  %v12345_v54 = vmov 0  ;;  %v8834_v26 = vld [vmem:[%s8788_s18 + $0x10] sm:$0xff]  ;;  %v8837_v24 = vld [vmem:[%s8788_s18 + $0x18] sm:$0xff] }
  0x48   : > { %v1282_v3 = vsel %vm1266_vm9, 65537, %v12149_v2  ;;  %vm8772_vm14 = vmpackc.low %vm1398_vm13, %vm8753_vm8  ;;  %v1114_v45 = vsel %vm1098_vm2, 65537, %v12149_v2  ;;  %vm663_vm15 = vcmp.ge.s32.totalorder %v647_v22, 0  ;;  %vm12348_vm5 = vcmask 261120   ;;  %3616 = vrot.lane.b32.xlu1 %v8834_v26, %s8351_s20 }
  0x49   : > { %v12346_v54 = vsel %vm8772_vm14, 4294967295, %v12345_v54  ;;  %v1298_v44 = vunpack.c.l.b16 %v1282_v3  ;;  %vm1418_vm10 = vcmp.ne.s32.totalorder %v1414_v42, %v8481_v36  ;;  %vm1419_vm3 = vcmp.ne.s32.totalorder %v1415_v43, %v8465_v23  ;;  %7434 = vmatmul.msk.bf16.gmra.mxu1 %vm12348_vm5, %v1198_v41  ;;  %vm1090_vm9 = vmpackc.low %vm663_vm15, %vm663_vm15 }
  0x4a   : > { %12347 = vst [vmem:[#allocation19_spill] sm:$0xff] %v12346_v54  ;;  %v1130_v49 = vunpack.c.l.b16 %v1114_v45  ;;  %vm12349_vm8 = vsmask.f32 7424  ;;  %vm8791_vm2 = vmpackc.low %vm1419_vm3, %vm1418_vm10  ;;  %v12350_v28 = vmov 0  ;;  %vm12353_vm5 = vcmask 1040384  }
  0x4b   : > { %v1469_v51 = vsel %vm12349_vm8, %v1464_v8, %v1468_v15  ;;  %v12351_v28 = vsel %vm8791_vm2, 4294967295, %v12350_v28  ;;  %v8800_v32 = vsel %vm12353_vm5, %v941_v6, %v943_v31  ;;  %v1307_v57 = vpack.c.b16 %v8436_v7, %v1298_v44  ;;  %v8810_v6 = vld [vmem:[%s8788_s18] sm:$0xff]  ;;  %vm12359_vm7 = vmmov %vm12349_vm8 }
  0x4c   : > { %12352 = vst [vmem:[#allocation20_spill] sm:$0xff] %v12351_v28  ;;  %v1106_v58 = vsel %vm1090_vm9, 65537, %v12149_v2  ;;  %vm12355_vm13 = vcmask 261120   ;;  %v1441_v59 = vsel %vm8791_vm2, %v8714_v4, 0  ;;  %v7402_v60 = vunpack.i.l.s16 %v1130_v49  ;;  %vm12361_vm8 = vmmov %vm12353_vm5  ;;  %3612 = vrot.lane.b32.xlu0 %v8810_v6, %s8351_s20 }
  0x4d   : > { %12354 = vst [vmem:[#allocation21_spill] sm:$0xff] %v8800_v32  ;;  %7417 = vmatmul.msk.bf16.gmra.mxu0 %vm12355_vm13, %v1469_v51  ;;  %v1122_v61 = vunpack.c.l.b16 %v1106_v58  ;;  %v1496_v62 = vor.u32 %v1494_v16, %v8656_v27  ;;  %v1498_v14 = vshll.u32 %v1441_v59, 16  ;;  %v1365_v55 = vshrl.u32 %v1307_v57, 16  ;;  %vm12360_vm9 = vmmov %vm12355_vm13 }
  0x4e   : > { %v1368_v31 = vshll.u32 %v1307_v57, 16  ;;  %v8818_v13 = vsel %vm8772_vm14, %v8800_v32, 0  ;;  %v951_v11 = vrot.slane %v8781_v37, 7  ;;  %vm1193_vm3 = vcmp.ne.s32.totalorder %v7402_v60, %v8481_v36 }
  0x4f   : > { %v7394_v5 = vunpack.i.l.s16 %v1122_v61  ;;  %v1500_v27 = vrot.slane %v1498_v14, 1  ;;  %v1367_v17 = vrot.slane %v1365_v55, 7  ;;  %v1470_v21 = vshrl.u32 %v8749_v25, 16  ;;  %vm8825_vm10 = vmpackc.low %vm8485_vm12, %vm1193_vm3 }
  0x50   : > { %v12356_v22 = vmov 0  ;;  %v968_v35 = vpack.c.bf16 %v8810_v6, %v8810_v6  ;;  %v969_v8 = vpack.c.bf16 %v8813_v19, %v8813_v19  ;;  %v1474_v25 = vshll.u32 %v8818_v13, 16  ;;  %3618 = vrot.lane.b32.xlu1 %v8837_v24, %s8351_s20 }
  0x51   : > { %v12357_v22 = vsel %vm8825_vm10, 4294967295, %v12356_v22  ;;  %v1501_v41 = vsel %vm12359_vm7, %v1496_v62, %v1500_v27  ;;  %v1370_v42 = vor.u32 %v1368_v31, %v1367_v17  ;;  %vm1165_vm15 = vcmp.ne.s32.totalorder %v7394_v5, %v8481_v36 }
  0x52   : > { %12358 = vst [vmem:[#allocation22_spill] sm:$0xff] %v12357_v22  ;;  %7421 = vmatmul.msk.bf16.gmra.mxu2 %vm12360_vm9, %v1501_v41  ;;  %v8846_v43 = vsel %vm12361_vm8, %v949_v29, %v951_v11  ;;  %vm12362_vm5 = vsmask.f32 256  ;;  %v970_v44 = vpack.c.bf16 %v8834_v26, %v8834_v26  ;;  %v971_v45 = vpack.c.bf16 %v8837_v24, %v8837_v24  ;;  %vm8859_vm13 = vmpackc.low %vm8485_vm12, %vm1165_vm15 }
  0x53   : > { %v1371_v16 = vsel %vm12362_vm5, %v8716_v0, %v1370_v42  ;;  %v1203_v3 = vsel %vm8825_vm10, %v8846_v43, 0  ;;  %v12363_v63 = vmov 0  ;;  %v1000_v29 = vunpack.c.l.b16 %v968_v35  ;;  %vm12370_vm15 = vmmov %vm12360_vm9  ;;  %v8880_v42 = vld [vmem:[%s8788_s18 + $0x20] sm:$0xff] }
  0x54   : > { %v1421_v37 = vunpack.c.l.b16 %v1371_v16  ;;  %v1422_v49 = vunpack.c.h.b16 %v1371_v16  ;;  %v12364_v63 = vsel %vm8859_vm13, 4294967295, %v12363_v63  ;;  %v1001_v0 = vunpack.c.l.b16 %v969_v8  ;;  %7439 = vmatmul.msk.bf16.gmra.mxu3 %vm12360_vm9, %v1203_v3  ;;  %vm12371_vm5 = vmmov %vm12360_vm9  ;;  %v8883_v16 = vld [vmem:[%s8788_s18 + $0x28] sm:$0xff]  ;;  %3620 = vrot.lane.b32.xlu2 %v8880_v42, %s8351_s20 }
  0x55   : > { %12365 = vst [vmem:[#allocation23_spill] sm:$0xff] %v12364_v63  ;;  %v1472_v51 = vor.u32 %v1470_v21, %v1468_v15  ;;  %v1476_v57 = vrot.slane %v1474_v25, 1  ;;  %v1002_v58 = vunpack.c.l.b16 %v970_v44  ;;  %v1003_v60 = vunpack.c.l.b16 %v971_v45  ;;  %3614 = vrot.lane.b32.xlu0 %v8813_v19, %s8351_s20 }
  0x56   : > { %vm1425_vm3 = vcmp.ne.s32.totalorder %v1421_v37, %v8481_v36  ;;  %vm1426_vm7 = vcmp.ne.s32.totalorder %v1422_v49, %v8465_v23  ;;  %v12366_v61 = vmov 0  ;;  %v1502_v39 = vshrl.u32 %v1441_v59, 16 }
  0x57   : > { %vm8866_vm8 = vmpackc.low %vm1426_vm7, %vm1425_vm3  ;;  %v1199_v15 = vsel %vm8859_vm13, %v8800_v32, 0  ;;  %v1016_v14 = vpack.c.b16 %v1001_v0, %v1000_v29  ;;  %v1017_v55 = vpack.c.b16 %v1003_v60, %v1002_v58  ;;  %vm12369_vm12 = vsmask.f32 7424  ;;  %v8004_v0 = vld [vmem:[%s12122_s2 + $0x38] sm:$0xff] }
  0x58   : > { %v12367_v61 = vsel %vm8866_vm8, 4294967295, %v12366_v61  ;;  %v1442_v62 = vsel %vm8866_vm8, %v8846_v43, 0  ;;  %v1477_v31 = vsel %vm12369_vm12, %v1472_v51, %v1476_v57  ;;  %v1428_v21 = vunpack.c.l.b16 %v1367_v17  ;;  %vm12372_vm9 = vmmov %vm12369_vm12  ;;  %v8006_v51 = vld [vmem:[%s12123_s3 + $0x38] sm:$0xff]  ;;  %2552 = vmatpush.bf16.msra.mxu2 %v8004_v0 }
  0x59   : > { %12368 = vst [vmem:[#allocation24_spill] sm:$0xff] %v12367_v61  ;;  %v1506_v5 = vshll.u32 %v1442_v62, 16  ;;  %7435 = vmatmul.msk.bf16.gmra.mxu1 %vm12370_vm15, %v1199_v15  ;;  %v1429_v35 = vunpack.c.h.b16 %v1367_v17  ;;  %v1504_v8 = vor.u32 %v1502_v39, %v1500_v27  ;;  %v1024_v41 = vrot.slane %v1016_v14, 7  ;;  %v8010_v39 = vld [vmem:[%s12123_s3 + $0x48] sm:$0xff]  ;;  %2747 = vmatpush.bf16.msra.mxu3 %v8006_v51 }
  0x5a   : > { %v1025_v25 = vrot.slane %v1017_v55, 7  ;;  %vm1432_vm3 = vcmp.ne.s32.totalorder %v1428_v21, %v8481_v36  ;;  %vm12373_vm12 = vcmask 1040384   ;;  %v972_v17 = vpack.c.bf16 %v8880_v42, %v8880_v42  ;;  %3197 = vmatpush.bf16.msra.mxu1 %v8010_v39 }
  0x5b   : > { %v1508_v59 = vrot.slane %v1506_v5, 1  ;;  %vm1433_vm7 = vcmp.ne.s32.totalorder %v1429_v35, %v8465_v23  ;;  %v8889_v44 = vsel %vm12373_vm12, 0, %v1024_v41  ;;  %vm12374_vm15 = vmmov %vm12373_vm12  ;;  %v973_v45 = vpack.c.bf16 %v8883_v16, %v8883_v16 }
  0x5c   : > { %v8892_v27 = vsel %vm12374_vm15, %v1024_v41, %v1025_v25  ;;  %v1478_v37 = vshrl.u32 %v8818_v13, 16  ;;  %vm8902_vm10 = vmpackc.low %vm1433_vm7, %vm1432_vm3  ;;  %v12376_v29 = vmov 0  ;;  %v8008_v13 = vld [vmem:[%s12122_s2 + $0x48] sm:$0xff]  ;;  %v2074_v58 = vrot.slane %v8889_v44, 1  ;;  %3622 = vrot.lane.b32.xlu2 %v8883_v16, %s8351_s20 }
  0x5d   : > { %7418 = vmatmul.msk.bf16.gmra.mxu0 %vm12371_vm5, %v1477_v31  ;;  %v1509_v3 = vsel %vm12372_vm9, %v1504_v8, %v1508_v59  ;;  %vm12375_vm5 = vmmov %vm12373_vm12  ;;  %v12377_v29 = vsel %vm8902_vm10, 4294967295, %v12376_v29  ;;  %vm12379_vm9 = vcmask 261120   ;;  %v2075_v60 = vrot.slane %v8892_v27, 1 }
  0x5e   : > { %v8900_v49 = vsel %vm12375_vm5, %v951_v11, 0  ;;  %12378 = vst [vmem:[#allocation25_spill] sm:$0xff] %v12377_v29  ;;  %v1208_v11 = vsel %vm8525_vm1, %v8889_v44, 0  ;;  %vm12181_vm3 = vcmask 1046528   ;;  %v1004_v14 = vunpack.c.l.b16 %v972_v17  ;;  %3056 = vmatpush.bf16.msra.mxu0 %v8008_v13  ;;  %vm12380_vm7 = vmmov %vm12379_vm9 }
  0x5f   : > { %v1443_v15 = vsel %vm8902_vm10, %v8900_v49, 0  ;;  %v1005_v55 = vunpack.c.l.b16 %v973_v45  ;;  %v1480_v31 = vor.u32 %v1478_v37, %v1476_v57  ;;  %v1510_v5 = vshrl.u32 %v1442_v62, 16  ;;  %vm12382_vm15 = vmmov %vm12380_vm7  ;;  %v8934_v57 = vld [vmem:[%s8788_s18 + $0x30] sm:$0xff]  ;;  %v8937_v37 = vld [vmem:[%s8788_s18 + $0x38] sm:$0xff] }
  0x60   : > { %v1514_v21 = vshll.u32 %v1443_v15, 16  ;;  %v2076_v35 = vsel %vm12181_vm3, %v2074_v58, %v2075_v60  ;;  %vm12381_vm12 = vsmask.f32 7424  ;;  %vm12383_vm5 = vmmov %vm12380_vm7  ;;  %v1689_v0 = vsel %vm8566_vm11, %v8889_v44, 0  ;;  %3624 = vrot.lane.b32.xlu0 %v8934_v57, %s8351_s20  ;;  %3626 = vrot.lane.b32.xlu1 %v8937_v37, %s8351_s20 }
  0x61   : > { %v1018_v8 = vpack.c.b16 %v1005_v55, %v1004_v14  ;;  %v1485_v41 = vsel %vm12381_vm12, %v1480_v31, %v8634_v34  ;;  %v974_v34 = vpack.c.bf16 %v8934_v57, %v8934_v57  ;;  %v1706_v13 = vshll.u32 %v1689_v0, 16 }
  0x62   : > { %7422 = vmatmul.msk.bf16.gmra.mxu2 %vm12379_vm9, %v1509_v3  ;;  %v1512_v3 = vor.u32 %v1510_v5, %v1508_v59  ;;  %v1516_v17 = vrot.slane %v1514_v21, 1  ;;  %vm12384_vm9 = vmmov %vm12381_vm12  ;;  %v975_v59 = vpack.c.bf16 %v8937_v37, %v8937_v37  ;;  %v1949_v14 = vrot.slane %v8502_v46, 1 }
  0x63   : > { %v1027_v45 = vrot.slane %v1018_v8, 7  ;;  %vm12386_vm12 = vmmov %vm12383_vm5  ;;  %v1006_v39 = vunpack.c.l.b16 %v974_v34  ;;  %v1950_v55 = vrot.slane %v8582_v47, 1  ;;  %v1704_v31 = vshrl.u32 %v1689_v0, 16  ;;  %v8966_v34 = vld [vmem:[%s8788_s18 + $0x40] sm:$0xff] }
  0x64   : > { %7468 = vmatmul.msk.bf16.vlgmr.msrb.gmra.mxu3 %vm12380_vm7, %v1208_v11  ;;  %v1517_v62 = vsel %vm12384_vm9, %v1512_v3, %v1516_v17  ;;  %vm12385_vm7 = vcmask 1040384   ;;  %v1209_v11 = vsel %vm8661_vm6, %v8892_v27, 0  ;;  %v1007_v15 = vunpack.c.l.b16 %v975_v59  ;;  %vm12388_vm9 = vmmov %vm12383_vm5  ;;  %v8969_v59 = vld [vmem:[%s8788_s18 + $0x48] sm:$0xff] }
  0x65   : > { %v8944_v51 = vsel %vm12385_vm7, %v1025_v25, %v1027_v45  ;;  %v1690_v25 = vsel %vm8594_vm4, %v8892_v27, 0  ;;  %v1708_v5 = vrot.slane %v1706_v13, 1  ;;  %vm12389_vm7 = vsmask.f32 7424 }
  0x66   : > { %v2077_v58 = vrot.slane %v8944_v51, 1  ;;  %v1711_v21 = vshll.u32 %v1690_v25, 16  ;;  %v1019_v8 = vpack.c.b16 %v1007_v15, %v1006_v39  ;;  %v1210_v39 = vsel %vm8735_vm0, %v8944_v51, 0 }
  0x67   : > { %v1709_v3 = vor.u32 %v1708_v5, %v1704_v31  ;;  %v1952_v5 = vrot.slane %v8695_v48, 1  ;;  %v1956_v20 = vrot.slane %v8516_v50, 1  ;;  %v12411_v50 = vmov 0  }
  0x68   : > { %v1713_v17 = vrot.slane %v1711_v21, 1  ;;  %v1715_v21 = vshrl.u32 %v1690_v25, 16  ;;  %v9158_v19 = vadd.s32 40, %v8422_v1  ;;  %v12436_v57 = vrot.slane %v8591_v12, 1  ;;  %3628 = vrot.lane.b32.xlu0 %v8966_v34, %s8351_s20  ;;  %3630 = vrot.lane.b32.xlu1 %v8969_v59, %s8351_s20 }
  0x69   : > { %7508 = vmatmul.msk.bf16.vlgmr.msrb.gmra.mxu1 %vm12382_vm15, %v2076_v35  ;;  %vm12387_vm15 = vmmov %vm12383_vm5  ;;  %v2078_v35 = vsel %vm12181_vm3, %v2075_v60, %v2077_v58  ;;  %v976_v60 = vpack.c.bf16 %v8966_v34, %v8966_v34 }
  0x6a   : > { %v1714_v0 = vsel %vm12389_vm7, %v1709_v3, %v1713_v17  ;;  %v1953_v3 = vsel %vm12181_vm3, %v1950_v55, %v1952_v5  ;;  %vm12393_vm7 = vmmov %vm12388_vm9 }
  0x6d   : > { %7419 = vmatmul.msk.bf16.gmra.mxu0 %vm12383_vm5, %v1485_v41  ;;  %v1951_v41 = vsel %vm12181_vm3, %v1949_v14, %v1950_v55  ;;  %v1008_v14 = vunpack.c.l.b16 %v976_v60  ;;  %v8994_v60 = vld [vmem:[%s8788_s18 + $0x50] sm:$0xff] }
  0x70   : > { %3632 = vrot.lane.b32.xlu0 %v8994_v60, %s8351_s20 }
  0x72   : > { %7423 = vmatmul.msk.bf16.gmra.mxu2 %vm12386_vm12, %v1517_v62  ;;  %v1029_v62 = vrot.slane %v1019_v8, 7  ;;  %vm12390_vm12 = vcmask 1040384  }
  0x74   : > { %7469 = vmatmul.msk.bf16.gmra.mxu3 %vm12387_vm15, %v1209_v11  ;;  %v8973_v13 = vsel %vm12390_vm12, %v1027_v45, %v1029_v62  ;;  %v977_v11 = vpack.c.bf16 %v8969_v59, %v8969_v59  ;;  %vm12391_vm15 = vmmov %vm12383_vm5 }
  0x75   : > { %v2079_v15 = vrot.slane %v8973_v13, 1  ;;  %vm12394_vm12 = vmmov %vm12393_vm7 }
  0x76   : > { %v1009_v31 = vunpack.c.l.b16 %v977_v11  ;;  %v8997_v11 = vld [vmem:[%s8788_s18 + $0x58] sm:$0xff] }
  0x77   : > { %v2080_v8 = vsel %vm12181_vm3, %v2077_v58, %v2079_v15  ;;  %v978_v58 = vpack.c.bf16 %v8994_v60, %v8994_v60  ;;  %v979_v55 = vpack.c.bf16 %v8997_v11, %v8997_v11  ;;  %3634 = vrot.lane.b32.xlu1 %v8997_v11, %s8351_s20 }
  0x79   : > { %7509 = vmatmul.msk.bf16.gmra.mxu1 %vm12383_vm5, %v2078_v35  ;;  %vm12392_vm5 = vnez %v12338_v18  ;;  %v9021_v18 = vadd.s32 8, %v8422_v1 }
  0x7a   : > { %v1691_v45 = vsel %vm12392_vm5, %v8944_v51, 0 }
  0x7b   : > { %v1719_v35 = vshll.u32 %v1691_v45, 16 }
  0x7d   : > { %7488 = vmatmul.msk.bf16.vlgmr.msrb.gmra.mxu0 %vm12388_vm9, %v1951_v41  ;;  %v1020_v41 = vpack.c.b16 %v1009_v31, %v1008_v14  ;;  %v1721_v2 = vrot.slane %v1719_v35, 1  ;;  %v1692_v31 = vsel %vm8772_vm14, %v8973_v13, 0  ;;  %v1954_v35 = vrot.slane %v8800_v32, 1 }
  0x7e   : > { %v12174_v32 = vrot.slane %v8591_v12, 1 }
  0x7f   : > { %v1031_v30 = vrot.slane %v1020_v41, 7  ;;  %v1727_v41 = vshll.u32 %v1692_v31, 16 }
  0x81   : > { %v1729_v54 = vrot.slane %v1727_v41, 1 }
  0x82   : > { %7452 = vmatmul.msk.bf16.vlgmr.msrb.gmra.mxu2 %vm12391_vm15, %v1714_v0  ;;  %v1717_v0 = vor.u32 %v1715_v21, %v1713_v17  ;;  %vm12395_vm15 = vsmask.f32 7424  ;;  %v1211_v17 = vsel %vm8859_vm13, %v8973_v13, 0  ;;  %v1011_v21 = vunpack.c.l.b16 %v979_v55  ;;  %v9025_v55 = vld [vmem:[%s8788_s18 + $0x60] sm:$0xff] }
  0x83   : > { %3636 = vrot.lane.b32.xlu0 %v9025_v55, %s8351_s20 }
  0x84   : > { %7470 = vmatmul.msk.bf16.gmra.mxu3 %vm12388_vm9, %v1210_v39  ;;  %v1722_v39 = vsel %vm12395_vm15, %v1717_v0, %v1721_v2  ;;  %vm12396_vm9 = vcmask 1040384   ;;  %vm12399_vm15 = vmmov %vm12393_vm7 }
  0x85   : > { %v9001_v25 = vsel %vm12396_vm9, %v1029_v62, %v1031_v30  ;;  %v1010_v62 = vunpack.c.l.b16 %v978_v58  ;;  %vm12400_vm9 = vmmov %vm12393_vm7 }
  0x86   : > { %12397 = vst [vmem:[#allocation26_spill] sm:$0xff] %v9001_v25  ;;  %v2081_v14 = vrot.slane %v9001_v25, 1 }
  0x87   : > { %v1021_v0 = vpack.c.b16 %v1011_v21, %v1010_v62  ;;  %v8003_v21 = vld [vmem:[%s12122_s2 + $0x30] sm:$0xff] }
  0x88   : > { %2553 = vmatpush.bf16.msra.mxu2 %v8003_v21 }
  0x89   : > { %7510 = vmatmul.msk.bf16.gmra.mxu1 %vm12393_vm7, %v2080_v8  ;;  %v1723_v8 = vshrl.u32 %v1691_v45, 16  ;;  %v1033_v58 = vrot.slane %v1021_v0, 7  ;;  %v8009_v0 = vld [vmem:[%s12123_s3 + $0x40] sm:$0xff] }
  0x8a   : > { %3198 = vmatpush.bf16.msra.mxu1 %v8009_v0 }
  0x8b   : > { %v1725_v63 = vor.u32 %v1723_v8, %v1721_v2  ;;  %v980_v2 = vpack.c.bf16 %v9025_v55, %v9025_v55 }
  0x8d   : > { %7489 = vmatmul.msk.bf16.gmra.mxu0 %vm12394_vm12, %v1953_v3  ;;  %vm12398_vm12 = vmmov %vm12393_vm7  ;;  %v2082_v3 = vsel %vm12181_vm3, %v2079_v15, %v2081_v14  ;;  %v12159_v15 = vand.u32 15, %v9021_v18  ;;  %v1012_v52 = vunpack.c.l.b16 %v980_v2  ;;  %v1957_v2 = vsel %vm12181_vm3, %v1954_v35, %v1956_v20 }
  0x92   : > { %7453 = vmatmul.msk.bf16.gmra.mxu2 %vm12393_vm7, %v1722_v39  ;;  %v1955_v39 = vsel %vm12181_vm3, %v1952_v5, %v1954_v35  ;;  %vm12401_vm7 = vsmask.f32 7424 }
  0x93   : > { %v1730_v45 = vsel %vm12401_vm7, %v1725_v63, %v1729_v54  ;;  %v8005_v63 = vld [vmem:[%s12123_s3 + $0x30] sm:$0xff]  ;;  %vm12406_vm7 = vnez %v12317_v9 }
  0x94   : > { %7471 = vmatmul.msk.bf16.gmra.mxu3 %vm12398_vm12, %v1211_v17  ;;  %v9028_v17 = vld [vmem:[%s8788_s18 + $0x68] sm:$0xff]  ;;  %vm12402_vm12 = vcmask 1040384  }
  0x95   : > { %v9033_v5 = vsel %vm12402_vm12, %v1031_v30, %v1033_v58  ;;  %v981_v62 = vpack.c.bf16 %v9028_v17, %v9028_v17  ;;  %v8007_v30 = vld [vmem:[%s12122_s2 + $0x40] sm:$0xff]  ;;  %2748 = vmatpush.bf16.msra.mxu3 %v8005_v63  ;;  %3638 = vrot.lane.b32.xlu1 %v9028_v17, %s8351_s20 }
  0x96   : > { %12403 = vst [vmem:[#allocation27_spill] sm:$0xff] %v9033_v5  ;;  %3057 = vmatpush.bf16.msra.mxu0 %v8007_v30 }
  0x99   : > { %7511 = vmatmul.msk.bf16.gmra.mxu1 %vm12399_vm15, %v2082_v3  ;;  %vm12404_vm15 = vmmov %vm12400_vm9  ;;  %v2083_v3 = vrot.slane %v9033_v5, 1 }
  0x9a   : > { %vm12407_vm12 = vmmov %vm12404_vm15 }
  0x9b   : > { %v1649_v41 = vpop.f32.mrf.mxu1  ;;  %v2084_v9 = vsel %vm12181_vm3, %v2081_v14, %v2083_v3 }
  0x9d   : > { %7490 = vmatmul.msk.bf16.gmra.mxu0 %vm12400_vm9, %v1955_v39  ;;  %vm12405_vm9 = vnez %v12307_v56  ;;  %v770_v39 = vadd.s32 1, %v12159_v15  ;;  %v1013_v56 = vunpack.c.l.b16 %v981_v62  ;;  %v1731_v15 = vshrl.u32 %v1692_v31, 16  ;;  %v9078_v31 = vld [vmem:[%s8788_s18 + $0x78] sm:$0xff] }
  0x9e   : > { %v1212_v8 = vsel %vm12405_vm9, %v9001_v25, 0  ;;  %vm12408_vm9 = vmmov %vm12407_vm12  ;;  %3642 = vrot.lane.b32.xlu1 %v9078_v31, %s8351_s20 }
  0x9f   : > { %v1022_v21 = vpack.c.b16 %v1013_v56, %v1012_v52  ;;  %v1733_v62 = vor.u32 %v1731_v15, %v1729_v54  ;;  %vm12409_vm14 = vmmov %vm12408_vm9  ;;  %v983_v15 = vpack.c.bf16 %v9078_v31, %v9078_v31 }
  0xa1   : > { %v1035_v30 = vrot.slane %v1022_v21, 7  ;;  %v9095_v21 = vadd.s32 24, %v8422_v1 }
  0xa2   : > { %7454 = vmatmul.msk.bf16.gmra.mxu2 %vm12404_vm15, %v1730_v45  ;;  %v9061_v45 = vsel %vm12406_vm7, %v9001_v25, 0  ;;  %vm802_vm15 = vcmp.lt.s32.totalorder %v770_v39, 16 }
  0xa3   : > { %v9064_v38 = vpop.f32.mrf.mxu3  ;;  %v1735_v53 = vshll.u32 %v9061_v45, 16  ;;  %vm2225_vm7 = vmpackc.low %vm802_vm15, %vm802_vm15  ;;  %v9072_v0 = vpop.f32.mrf.mxu1  ;;  %vm12416_vm15 = vnez %v12320_v33  ;;  %v12430_v28 = vand.u32 15, %v9095_v21 }
  0xa4   : > { %7472 = vmatmul.msk.bf16.gmra.mxu3 %vm12407_vm12, %v1212_v8  ;;  %12410 = vst [vmem:[#allocation28_spill] sm:$0xff] %v9072_v0  ;;  %v9075_v8 = vld [vmem:[%s8788_s18 + $0x70] sm:$0xff]  ;;  %v2241_v14 = vsel %vm2225_vm7, 65537, %v12411_v50  ;;  %vm12412_vm12 = vsmask.f32 7424  ;;  %vm12415_vm7 = vnez %v12323_v40 }
  0xa5   : > { %v1737_v63 = vrot.slane %v1735_v53, 1  ;;  %v982_v54 = vpack.c.bf16 %v9075_v8, %v9075_v8  ;;  %v2257_v39 = vunpack.c.l.b16 %v2241_v14  ;;  %v12171_v14 = vand.u32 15, %v9095_v21  ;;  %3640 = vrot.lane.b32.xlu0 %v9075_v8, %s8351_s20 }
  0xa7   : > { %v1738_v56 = vsel %vm12412_vm12, %v1733_v62, %v1737_v63  ;;  %v1014_v62 = vunpack.c.l.b16 %v982_v54  ;;  %vm12417_vm12 = vmmov %vm12409_vm14  ;;  %v772_v40 = vadd.s32 1, %v12171_v14  ;;  %v1959_v14 = vsel %vm12181_vm3, %v1956_v20, %v12174_v32 }
  0xa9   : > { %7512 = vmatmul.msk.bf16.gmra.mxu1 %vm12408_vm9, %v2084_v9  ;;  %vm12413_vm9 = vcmask 1040384  }
  0xaa   : > { %v9087_v53 = vsel %vm12413_vm9, %v1033_v58, %v1035_v30  ;;  %v9104_v58 = vsel %vm12416_vm15, %v9033_v5, 0  ;;  %vm804_vm9 = vcmp.lt.s32.totalorder %v772_v40, 16  ;;  %vm12419_vm15 = vmmov %vm12417_vm12 }
  0xab   : > { %v9082_v35 = vpop.f32.mrf.mxu3  ;;  %12414 = vst [vmem:[#allocation29_spill] sm:$0xff] %v9087_v53  ;;  %v1743_v25 = vshll.u32 %v9104_v58, 16  ;;  %v12418_v54 = vrot.slane %v9087_v53, 1  ;;  %v9163_v24 = vsel %vm8791_vm2, %v9087_v53, 0 }
  0xad   : > { %7491 = vmatmul.msk.bf16.gmra.mxu0 %vm12409_vm14, %v1957_v2  ;;  %v1564_v52 = vpop.f32.mrf.mxu0  ;;  %v1739_v2 = vshrl.u32 %v9061_v45, 16  ;;  %v1745_v26 = vrot.slane %v1743_v25, 1 }
  0xae   : > { %v9084_v9 = vadd.f32 %v1649_v41, %v1564_v52  ;;  %v1213_v41 = vsel %vm12415_vm7, %v9033_v5, 0  ;;  %v1015_v52 = vunpack.c.l.b16 %v983_v15  ;;  %v2086_v15 = vsel %vm12181_vm3, %v2083_v3, %v12418_v54 }
  0xaf   : > { %v1741_v3 = vor.u32 %v1739_v2, %v1737_v63  ;;  %vm12438_vm7 = vcmask 261120  }
  0xb2   : > { %7455 = vmatmul.msk.bf16.gmra.mxu2 %vm12409_vm14, %v1738_v56  ;;  %v2272_v56 = vpack.c.b16 %v2257_v39, %v8436_v7  ;;  %v1023_v39 = vpack.c.b16 %v1015_v52, %v1014_v62  ;;  %vm2227_vm14 = vmpackc.low %vm804_vm9, %vm804_vm9  ;;  %vm12421_vm9 = vsmask.f32 7424 }
  0xb3   : > { %v2243_v6 = vsel %vm2227_vm14, 65537, %v12411_v50  ;;  %v1746_v32 = vsel %vm12421_vm9, %v1741_v3, %v1745_v26  ;;  %vm12424_vm14 = vmmov %vm12417_vm12  ;;  %vm12177_vm9 = vsmask.f32 1280 }
  0xb4   : > { %7473 = vmatmul.msk.bf16.gmra.mxu3 %vm12417_vm12, %v1213_v41  ;;  %v2282_v45 = vshrl.u32 %v2272_v56, 16  ;;  %v2285_v41 = vshll.u32 %v2272_v56, 16  ;;  %v2259_v62 = vunpack.c.l.b16 %v2243_v6  ;;  %v9133_v40 = vrot.slane %v1023_v39, 7 }
  0xb6   : > { %v9114_v33 = vpop.f32.mrf.mxu1  ;;  %v2284_v42 = vrot.slane %v2282_v45, 6  ;;  %v2287_v52 = vrot.slane %v2285_v41, 7  ;;  %v2273_v54 = vpack.c.b16 %v2259_v62, %v8436_v7 }
  0xb7   : > { %v9128_v5 = vpop.f32.mrf.mxu3 }
  0xb8   : > { %v2290_v25 = vshrl.u32 %v2273_v54, 16  ;;  %v2293_v2 = vshll.u32 %v2273_v54, 16  ;;  %v1751_v54 = vshll.u32 %v9163_v24, 16 }
  0xb9   : > { %7513 = vmatmul.msk.bf16.gmra.mxu1 %vm12417_vm12, %v2086_v15  ;;  %v9140_v15 = vpop.f32.mrf.mxu0  ;;  %vm12425_vm12 = vnez %v12332_v10  ;;  %v836_v10 = vadd.s32 2, %v12430_v28 }
  0xba   : > { %12422 = vst [vmem:[#allocation31_spill] sm:$0xff] %v9140_v15  ;;  %v2292_v39 = vrot.slane %v2290_v25, 6  ;;  %v2295_v45 = vrot.slane %v2293_v2, 7  ;;  %v12428_v2 = vand.u32 15, %v9021_v18  ;;  %v12431_v18 = vand.u32 15, %v9158_v19 }
  0xbb   : > { %v1584_v56 = vpop.f32.mrf.mxu2  ;;  %vm868_vm2 = vcmp.lt.s32.totalorder %v836_v10, 16 }
  0xbc   : > { %v9137_v20 = vadd.f32 %v9064_v38, %v1584_v56  ;;  %v2288_v38 = vor.u32 %v2287_v52, %v2284_v42  ;;  %v9169_v41 = vor.u32 %v2295_v45, %v2292_v39  ;;  %v1960_v42 = vrot.slane %v8714_v4, 1  ;;  %vm2841_vm5 = vmpackc.low %vm868_vm2, %vm868_vm2 }
  0xbd   : > { %7492 = vmatmul.msk.bf16.gmra.mxu0 %vm12419_vm15, %v1959_v14  ;;  %vm12423_vm15 = vcmask 1040384   ;;  %v1747_v52 = vshrl.u32 %v9104_v58, 16  ;;  %v834_v39 = vadd.s32 2, %v12428_v2  ;;  %v9220_v2 = vrot.slane %v1751_v54, 1 }
  0xbe   : > { %12420 = vst [vmem:[#allocation30_spill] sm:$0xff] %v9137_v20  ;;  %v9142_v0 = vpop.f32.mrf.mxu1  ;;  %v9150_v63 = vsel %vm12423_vm15, %v1035_v30, %v9133_v40  ;;  %v1214_v30 = vsel %vm12425_vm12, %v9087_v53, 0  ;;  %v2352_v6 = vunpack.c.l.b16 %v2288_v38  ;;  %v2353_v3 = vunpack.c.h.b16 %v2288_v38  ;;  %vm12427_vm15 = vmmov %vm12424_vm14 }
  0xbf   : > { %v9154_v14 = vpop.f32.mrf.mxu3  ;;  %v12182_v16 = vrot.slane %v9150_v63, 1  ;;  %v2297_v25 = vsel %vm12177_vm9, %v2288_v38, %v9169_v41  ;;  %v774_v38 = vadd.s32 1, %v12431_v18  ;;  %v1961_v21 = vsel %vm12181_vm3, %v12436_v57, %v1960_v42 }
  0xc0   : > { %vm9204_vm9 = vcmp.ne.s32.totalorder %v2353_v3, %v8465_v23  ;;  %v1749_v3 = vor.u32 %v1747_v52, %v1745_v26  ;;  %v2857_v10 = vsel %vm2841_vm5, 65537, %v12411_v50  ;;  %v9235_v26 = vsel %vm8866_vm8, %v9150_v63, 0 }
  0xc1   : > { %v12442_v52 = vmov 0  ;;  %v12184_v54 = vrot.slane %v8846_v43, 1  ;;  %vm12447_vm5 = vsmask.f32 7424  ;;  %v9292_v20 = vadd.s32 56, %v8422_v1 }
  0xc2   : > { %7456 = vmatmul.msk.bf16.gmra.mxu2 %vm12424_vm14, %v1746_v32  ;;  %v12429_v32 = vrot.slane %v9087_v53, 1  ;;  %vm866_vm14 = vcmp.lt.s32.totalorder %v834_v39, 16  ;;  %v1754_v18 = vsel %vm12447_vm5, %v1749_v3, %v9220_v2 }
  0xc3   : > { %v1586_v62 = vpop.f32.mrf.mxu2  ;;  %vm2839_vm12 = vmpackc.low %vm866_vm14, %vm866_vm14 }
  0xc4   : > { %v9175_v56 = vadd.f32 %v9082_v35, %v1586_v62  ;;  %7474 = vmatmul.msk.bf16.gmra.mxu3 %vm12427_vm15, %v1214_v30  ;;  %v2088_v58 = vsel %vm12181_vm3, %v12429_v32, %v12182_v16  ;;  %v2359_v35 = vunpack.c.l.b16 %v2297_v25  ;;  %v2360_v62 = vunpack.c.h.b16 %v2297_v25 }
  0xc5   : > { %vm9199_vm15 = vcmp.ne.s32.totalorder %v2352_v6, %v8481_v36  ;;  %v2855_v6 = vsel %vm2839_vm12, 65537, %v12411_v50  ;;  %vm806_vm3 = vcmp.lt.s32.totalorder %v774_v38, 16  ;;  %v1755_v32 = vshrl.u32 %v9163_v24, 16 }
  0xc6   : > { %12426 = vst [vmem:[#allocation32_spill] sm:$0xff] %v9175_v56  ;;  %v9183_v45 = vpop.f32.mrf.mxu1  ;;  %vm2363_vm13 = vcmp.ne.s32.totalorder %v2359_v35, %v8481_v36  ;;  %vm2364_vm0 = vcmp.ne.s32.totalorder %v2360_v62, %v8465_v23  ;;  %v2871_v39 = vunpack.c.l.b16 %v2855_v6  ;;  %vm9226_vm14 = vmpackc.low %vm9204_vm9, %vm9199_vm15  ;;  %vm12451_vm9 = vcmask 1046528  }
  0xc7   : > { %v9211_v37 = vpop.f32.mrf.mxu3  ;;  %vm9237_vm2 = vmpackc.low %vm2364_vm0, %vm2363_vm13  ;;  %v2611_v62 = vsel %vm9226_vm14, %v8889_v44, 0  ;;  %vm12448_vm0 = vcmask 1040384   ;;  %vm12193_vm13 = vcmask 1041408   ;;  %vm12452_vm15 = vnez %v12357_v22 }
  0xc8   : > { %v12443_v52 = vsel %vm9237_vm2, 4294967295, %v12442_v52  ;;  %vm9242_vm12 = vmpackc.low %vm806_vm3, %vm806_vm3  ;;  %v2886_v30 = vpack.c.b16 %v2871_v39, %v8436_v7  ;;  %v9262_v57 = vsel %vm12448_vm0, %v9133_v40, 0  ;;  %v2612_v34 = vsel %vm9237_vm2, %v8892_v27, 0 }
  0xc9   : > { %7514 = vmatmul.msk.bf16.gmra.mxu1 %vm12438_vm7, %v2088_v58  ;;  %12444 = vst [vmem:[#allocation35_spill] sm:$0xff] %v12443_v52  ;;  %v2873_v58 = vunpack.c.l.b16 %v2857_v10  ;;  %v2245_v24 = vsel %vm9242_vm12, 65537, %v12411_v50  ;;  %vm12449_vm3 = vmmov %vm12438_vm7  ;;  %v1963_v39 = vsel %vm12451_vm9, %v1960_v42, %v12184_v54  ;;  %v2089_v16 = vrot.slane %v9262_v57, 1 }
  0xca   : > { %v1569_v28 = vpop.f32.mrf.mxu0  ;;  %v2895_v59 = vrot.slane %v2886_v30, 6  ;;  %v1215_v30 = vsel %vm12452_vm15, %v9150_v63, 0  ;;  %v2626_v35 = vshrl.u32 %v2611_v62, 16  ;;  %v2629_v61 = vshll.u32 %v2611_v62, 16  ;;  %vm12456_vm12 = vmmov %vm12451_vm9 }
  0xcb   : > { %v9214_v25 = vadd.f32 %v9114_v33, %v1569_v28  ;;  %v12439_v33 = vmov 0  ;;  %v1759_v28 = vshll.u32 %v9235_v26, 16  ;;  %v2634_v56 = vshrl.u32 %v2612_v34, 16 }
  0xcc   : > { %v12440_v33 = vsel %vm9226_vm14, 4294967295, %v12439_v33  ;;  %v2910_v54 = vunpack.c.l.b16 %v2895_v59  ;;  %v2911_v4 = vunpack.c.h.b16 %v2895_v59  ;;  %v1757_v60 = vor.u32 %v1755_v32, %v9220_v2 }
  0xcd   : > { %12437 = vst [vmem:[#allocation33_spill] sm:$0xff] %v9214_v25  ;;  %7493 = vmatmul.msk.bf16.gmra.mxu0 %vm12438_vm7, %v1961_v21  ;;  %v9265_v21 = vpack.c.b16 %v2873_v58, %v8436_v7  ;;  %v2261_v58 = vunpack.c.l.b16 %v2245_v24  ;;  %vm12454_vm7 = vmmov %vm12449_vm3  ;;  %v12457_v25 = vand.u32 15, %v9158_v19  ;;  %v9323_v11 = vrot.slane %v1759_v28, 1 }
  0xce   : > { %12441 = vst [vmem:[#allocation34_spill] sm:$0xff] %v12440_v33  ;;  %v9251_v38 = vpop.f32.mrf.mxu1  ;;  %vm2914_vm5 = vcmp.ne.s32.totalorder %v2910_v54, %v8481_v36  ;;  %vm2915_vm0 = vcmp.ne.s32.totalorder %v2911_v4, %v8465_v23  ;;  %vm12458_vm9 = vmmov %vm12454_vm7  ;;  %v1697_v17 = vsel %vm8902_vm10, %v9262_v57, 0 }
  0xcf   : > { %v9267_v3 = vpop.f32.mrf.mxu3  ;;  %v12192_v10 = vrot.slane %v9265_v21, 6  ;;  %v838_v15 = vadd.s32 2, %v12457_v25  ;;  %vm12459_vm15 = vmmov %vm12458_vm9  ;;  %v12464_v25 = vmov 0 }
  0xd0   : > { %vm9327_vm8 = vmpackc.low %vm2915_vm0, %vm2914_vm5 }
  0xd2   : > { %v1571_v6 = vpop.f32.mrf.mxu0  ;;  %7457 = vmatmul.msk.bf16.gmra.mxu2 %vm12449_vm3, %v1754_v18  ;;  %v2637_v18 = vshll.u32 %v2612_v34, 16  ;;  %vm870_vm3 = vcmp.lt.s32.totalorder %v838_v15, 16 }
  0xd3   : > { %v9277_v40 = vadd.f32 %v9142_v0, %v1571_v6  ;;  %v2897_v0 = vsel %vm12193_vm13, %v2895_v59, %v12192_v10  ;;  %v2274_v6 = vpack.c.b16 %v2261_v58, %v8436_v7  ;;  %v12455_v10 = vrot.slane %v9150_v63, 1  ;;  %vm2843_vm13 = vmpackc.low %vm870_vm3, %vm870_vm3 }
  0xd4   : > { %v2917_v24 = vunpack.c.l.b16 %v2897_v0  ;;  %7475 = vmatmul.msk.bf16.gmra.mxu3 %vm12454_vm7, %v1215_v30  ;;  %v2918_v62 = vunpack.c.h.b16 %v2897_v0  ;;  %v2631_v59 = vrot.slane %v2629_v61, 2  ;;  %v2639_v30 = vrot.slane %v2637_v18, 2 }
  0xd5   : > { %12450 = vst [vmem:[#allocation36_spill] sm:$0xff] %v9277_v40  ;;  %v1589_v42 = vpop.f32.mrf.mxu2  ;;  %v2299_v34 = vshrl.u32 %v2274_v6, 16  ;;  %v2302_v12 = vshll.u32 %v2274_v6, 16  ;;  %v2090_v58 = vsel %vm12456_vm12, %v12455_v10, %v2089_v16  ;;  %v2628_v40 = vrot.slane %v2626_v35, 1 }
  0xd6   : > { %v9295_v22 = vadd.f32 %v9128_v5, %v1589_v42  ;;  %v9298_v53 = vpop.f32.mrf.mxu1  ;;  %v2636_v5 = vrot.slane %v2634_v56, 1  ;;  %v502_v61 = vand.u32 15, %v9292_v20  ;;  %vm2921_vm7 = vcmp.ne.s32.totalorder %v2917_v24, %v8481_v36 }
  0xd7   : > { %v2301_v0 = vrot.slane %v2299_v34, 6  ;;  %v2304_v6 = vrot.slane %v2302_v12, 7  ;;  %vm2922_vm12 = vcmp.ne.s32.totalorder %v2918_v62, %v8465_v23  ;;  %v2859_v4 = vsel %vm2843_vm13, 65537, %v12411_v50 }
  0xd8   : > { %12453 = vst [vmem:[#allocation37_spill] sm:$0xff] %v9295_v22  ;;  %v9309_v22 = vpop.f32.mrf.mxu3  ;;  %v12460_v20 = vmov 0  ;;  %v2875_v16 = vunpack.c.l.b16 %v2859_v4  ;;  %vm9334_vm3 = vmpackc.low %vm2922_vm12, %vm2921_vm7  ;;  %v776_v2 = vadd.s32 1, %v502_v61  ;;  %v9341_v32 = vor.u32 %v2639_v30, %v2636_v5 }
  0xd9   : > { %7515 = vmatmul.msk.bf16.gmra.mxu1 %vm12458_vm9, %v2090_v58  ;;  %v9320_v12 = vor.u32 %v2304_v6, %v2301_v0  ;;  %v12461_v20 = vsel %vm9327_vm8, 4294967295, %v12460_v20  ;;  %vm12463_vm9 = vsmask.f32 1280  ;;  %v12465_v25 = vsel %vm9334_vm3, 4294967295, %v12464_v25 }
  0xda   : > { %v1574_v42 = vpop.f32.mrf.mxu0  ;;  %12462 = vst [vmem:[#allocation38_spill] sm:$0xff] %v12461_v20  ;;  %vm12468_vm13 = vsmask.f32 7424  ;;  %vm808_vm12 = vcmp.lt.s32.totalorder %v776_v2, 16  ;;  %v1964_v62 = vrot.slane %v8900_v49, 1  ;;  %v9388_v0 = vadd.s32 72, %v8422_v1 }
  0xdb   : > { %v9315_v19 = vadd.f32 %v9183_v45, %v1574_v42  ;;  %v2306_v15 = vsel %vm12463_vm9, %v9169_v41, %v9320_v12  ;;  %v2632_v45 = vor.u32 %v2631_v59, %v2628_v40  ;;  %12466 = vst [vmem:[#allocation39_spill] sm:$0xff] %v12465_v25  ;;  %v1762_v10 = vsel %vm12468_vm13, %v1757_v60, %v9323_v11  ;;  %vm2231_vm13 = vmpackc.low %vm808_vm12, %vm808_vm12 }
  0xdc   : > { %v2366_v28 = vunpack.c.l.b16 %v2306_v15  ;;  %v3115_v41 = vsel %vm9327_vm8, %v8889_v44, 0  ;;  %v9360_v40 = vpack.c.b16 %v2875_v16, %v8436_v7  ;;  %v9365_v44 = vsel %vm9226_vm14, %v8502_v46, 0 }
  0xdd   : > { %7494 = vmatmul.msk.bf16.gmra.mxu0 %vm12459_vm15, %v1963_v39  ;;  %v1591_v56 = vpop.f32.mrf.mxu2  ;;  %v2367_v39 = vunpack.c.h.b16 %v2306_v15  ;;  %vm12196_vm15 = vsmask.f32 6400  ;;  %vm12472_vm9 = vcmask 261120   ;;  %v3138_v59 = vrot.slane %v3115_v41, 2 }
  0xde   : > { %v9339_v54 = vadd.f32 %v9154_v14, %v1591_v56  ;;  %v9345_v35 = vpop.f32.mrf.mxu1  ;;  %v3116_v14 = vsel %vm9334_vm3, %v8892_v27, 0  ;;  %vm2370_vm5 = vcmp.ne.s32.totalorder %v2366_v28, %v8481_v36  ;;  %v12469_v27 = vmov 0  ;;  %vm12475_vm12 = vmmov %vm12472_vm9 }
  0xdf   : > { %vm2371_vm0 = vcmp.ne.s32.totalorder %v2367_v39, %v8465_v23  ;;  %v2641_v34 = vsel %vm12196_vm15, %v2632_v45, %v9341_v32  ;;  %v2898_v58 = vrot.slane %v9360_v40, 6  ;;  %v9384_v5 = vrot.slane %v3116_v14, 2 }
  0xe0   : > { %12467 = vst [vmem:[#allocation40_spill] sm:$0xff] %v9339_v54  ;;  %v9367_v18 = vpop.f32.mrf.mxu3  ;;  %vm9372_vm7 = vmpackc.low %vm2371_vm0, %vm2370_vm5  ;;  %v2247_v30 = vsel %vm2231_vm13, 65537, %v12411_v50  ;;  %vm12195_vm5 = vcmask 1045504   ;;  %v12473_v6 = vrot.slane %v9265_v21, 6  ;;  %vm12474_vm0 = vcmask 1041408  }
  0xe1   : > { %v12470_v27 = vsel %vm9372_vm7, 4294967295, %v12469_v27  ;;  %v2263_v60 = vunpack.c.l.b16 %v2247_v30  ;;  %v1763_v15 = vshrl.u32 %v9235_v26, 16  ;;  %v1767_v16 = vshll.u32 %v1697_v17, 16 }
  0xe2   : > { %v1576_v55 = vpop.f32.mrf.mxu0  ;;  %12471 = vst [vmem:[#allocation41_spill] sm:$0xff] %v12470_v27  ;;  %7458 = vmatmul.msk.bf16.gmra.mxu2 %vm12472_vm9, %v1762_v10  ;;  %v2899_v42 = vsel %vm12474_vm0, %v12473_v6, %v2898_v58  ;;  %v840_v39 = vadd.s32 2, %v502_v61  ;;  %v516_v10 = vand.u32 15, %v9388_v0  ;;  %v12476_v21 = vrot.slane %v8846_v43, 1 }
  0xe3   : > { %v9378_v24 = vadd.f32 %v9251_v38, %v1576_v55  ;;  %v2613_v38 = vsel %vm9372_vm7, %v8944_v51, 0  ;;  %v2924_v56 = vunpack.c.l.b16 %v2899_v42  ;;  %v2925_v45 = vunpack.c.h.b16 %v2899_v42 }
  0xe4   : > { %7548 = vmatmul.msk.bf16.vlgmr.msra.gmra.mxu3 %vm12475_vm12, %v2641_v34  ;;  %v2275_v28 = vpack.c.b16 %v2263_v60, %v8436_v7  ;;  %vm12477_vm9 = vcmask 1046528   ;;  %v3140_v26 = vsel %vm12195_vm5, %v3138_v59, %v9384_v5  ;;  %v2643_v55 = vshrl.u32 %v2613_v38, 16 }
  0xe5   : > { %v1594_v4 = vpop.f32.mrf.mxu2  ;;  %v1965_v41 = vsel %vm12477_vm9, %v12476_v21, %v1964_v62  ;;  %v2646_v17 = vshll.u32 %v2613_v38, 16  ;;  %vm872_vm13 = vcmp.lt.s32.totalorder %v840_v39, 16  ;;  %v778_v34 = vadd.s32 1, %v516_v10 }
  0xe6   : > { %v9400_v2 = vadd.f32 %v9211_v37, %v1594_v4  ;;  %v9408_v14 = vpop.f32.mrf.mxu1  ;;  %v2308_v37 = vshrl.u32 %v2275_v28, 16  ;;  %v2311_v61 = vshll.u32 %v2275_v28, 16  ;;  %v1765_v30 = vor.u32 %v1763_v15, %v9323_v11  ;;  %vm2845_vm9 = vmpackc.low %vm872_vm13, %vm872_vm13 }
  0xe7   : > { %v1769_v6 = vrot.slane %v1767_v16, 1  ;;  %vm2928_vm0 = vcmp.ne.s32.totalorder %v2924_v56, %v8481_v36  ;;  %vm2929_vm12 = vcmp.ne.s32.totalorder %v2925_v45, %v8465_v23  ;;  %v2431_v8 = vshrl.u32 %v9365_v44, 16 }
  0xe8   : > { %v9419_v42 = vpop.f32.mrf.mxu3  ;;  %vm12478_vm5 = vcmask 261120   ;;  %v2416_v59 = vsel %vm9237_vm2, %v8582_v47, 0  ;;  %v2310_v11 = vrot.slane %v2308_v37, 6  ;;  %v2645_v38 = vrot.slane %v2643_v55, 1  ;;  %vm9433_vm13 = vmpackc.low %vm2929_vm12, %vm2928_vm0 }
  0xe9   : > { %7588 = vmatmul.msk.bf16.vlgmr.msra.gmra.mxu1 %vm12478_vm5, %v3140_v26  ;;  %v2648_v60 = vrot.slane %v2646_v17, 2  ;;  %v2313_v4 = vrot.slane %v2311_v61, 7  ;;  %v2861_v15 = vsel %vm2845_vm9, 65537, %v12411_v50  ;;  %vm12479_vm15 = vmmov %vm12478_vm5  ;;  %v12480_v16 = vmov 0 }
  0xea   : > { %v1579_v62 = vpop.f32.mrf.mxu0  ;;  %v12481_v16 = vsel %vm9433_vm13, 4294967295, %v12480_v16  ;;  %vm810_vm10 = vcmp.lt.s32.totalorder %v778_v34, 16  ;;  %v2434_v56 = vshll.u32 %v9365_v44, 16  ;;  %vm12483_vm5 = vsmask.f32 7424 }
  0xeb   : > { %v9425_v31 = vadd.f32 %v9298_v53, %v1579_v62  ;;  %12482 = vst [vmem:[#allocation42_spill] sm:$0xff] %v12481_v16  ;;  %v2877_v53 = vunpack.c.l.b16 %v2861_v15  ;;  %v1770_v28 = vsel %vm12483_vm5, %v1765_v30, %v1769_v6  ;;  %v2439_v39 = vshrl.u32 %v2416_v59, 16  ;;  %vm2233_vm6 = vmpackc.low %vm810_vm10, %vm810_vm10 }
  0xec   : > { %v9439_v21 = vor.u32 %v2313_v4, %v2310_v11  ;;  %v2442_v55 = vshll.u32 %v2416_v59, 16  ;;  %v2249_v17 = vsel %vm2233_vm6, 65537, %v12411_v50  ;;  %v9450_v61 = vrot.slane %v2431_v8, 1 }
  0xed   : > { %7495 = vmatmul.msk.bf16.gmra.mxu0 %vm12479_vm15, %v1965_v41  ;;  %v1596_v45 = vpop.f32.mrf.mxu2  ;;  %v9445_v41 = vpack.c.b16 %v2877_v53, %v8436_v7  ;;  %v9452_v44 = vor.u32 %v2648_v60, %v2645_v38  ;;  %vm12485_vm15 = vsmask.f32 1280  ;;  %v2265_v62 = vunpack.c.l.b16 %v2249_v17 }
  0xee   : > { %v9442_v26 = vadd.f32 %v9267_v3, %v1596_v45  ;;  %v9448_v37 = vpop.f32.mrf.mxu1  ;;  %v2315_v34 = vsel %vm12485_vm15, %v9320_v12, %v9439_v21  ;;  %v3117_v3 = vsel %vm9433_vm13, %v8944_v51, 0  ;;  %v9463_v8 = vrot.slane %v2434_v56, 2 }
  0xef   : > { %v2373_v30 = vunpack.c.l.b16 %v2315_v34  ;;  %v2374_v6 = vunpack.c.h.b16 %v2315_v34  ;;  %v12199_v59 = vrot.slane %v9445_v41, 6  ;;  %v2973_v38 = vsel %vm9327_vm8, %v8502_v46, 0 }
  0xf0   : > { %12484 = vst [vmem:[#allocation43_spill] sm:$0xff] %v9442_v26  ;;  %v9461_v4 = vpop.f32.mrf.mxu3  ;;  %v2974_v12 = vsel %vm9334_vm3, %v8582_v47, 0  ;;  %v2276_v60 = vpack.c.b16 %v2265_v62, %v8436_v7  ;;  %vm12486_vm6 = vcmask 261120   ;;  %vm12487_vm12 = vcmask 1041408  }
  0xf1   : > { %vm2377_vm10 = vcmp.ne.s32.totalorder %v2373_v30, %v8481_v36  ;;  %vm2378_vm0 = vcmp.ne.s32.totalorder %v2374_v6, %v8465_v23  ;;  %v2901_v46 = vsel %vm12487_vm12, %v2898_v58, %v12199_v59  ;;  %vm12488_vm9 = vsmask.f32 6400  ;;  %vm12492_vm15 = vmmov %vm12486_vm6 }
  0xf2   : > { %v1581_v11 = vpop.f32.mrf.mxu0  ;;  %7459 = vmatmul.msk.bf16.gmra.mxu2 %vm12486_vm6, %v1770_v28  ;;  %v2650_v47 = vsel %vm12488_vm9, %v9341_v32, %v9452_v44  ;;  %v9486_v15 = vrot.slane %v3117_v3, 2  ;;  %vm9488_vm5 = vmpackc.low %vm2378_vm0, %vm2377_vm10  ;;  %v12489_v53 = vmov 0  ;;  %v2320_v56 = vshll.u32 %v2276_v60, 16 }
  0xf3   : > { %v9474_v51 = vadd.f32 %v9345_v35, %v1581_v11  ;;  %v12490_v53 = vsel %vm9488_vm5, 4294967295, %v12489_v53  ;;  %v2317_v35 = vshrl.u32 %v2276_v60, 16  ;;  %v2441_v45 = vrot.slane %v2439_v39, 1 }
  0xf4   : > { %12491 = vst [vmem:[#allocation44_spill] sm:$0xff] %v12490_v53  ;;  %v2444_v28 = vrot.slane %v2442_v55, 2  ;;  %v2614_v40 = vsel %vm9488_vm5, %v8973_v13, 0  ;;  %v9496_v58 = vadd.s32 88, %v8422_v1  ;;  %v2997_v34 = vrot.slane %v2973_v38, 2  ;;  %7549 = vmatmul.msk.bf16.gmra.mxu3 %vm12492_vm15, %v2650_v47 }
  0xf5   : > { %v1599_v17 = vpop.f32.mrf.mxu2  ;;  %v9498_v32 = vrot.slane %v2974_v12, 2  ;;  %v2931_v62 = vunpack.c.l.b16 %v2901_v46  ;;  %v2932_v3 = vunpack.c.h.b16 %v2901_v46  ;;  %v2319_v39 = vrot.slane %v2317_v35, 6 }
  0xf6   : > { %v9501_v30 = vadd.f32 %v9309_v22, %v1599_v17  ;;  %v2322_v55 = vrot.slane %v2320_v56, 7  ;;  %v842_v6 = vadd.s32 2, %v516_v10  ;;  %v9506_v11 = vpop.f32.mrf.mxu1  ;;  %vm12493_vm6 = vcmask 1045504  }
  0xf7   : > { %v3142_v38 = vsel %vm12493_vm6, %v9384_v5, %v9486_v15  ;;  %v2652_v12 = vshrl.u32 %v2614_v40, 16  ;;  %v2655_v60 = vshll.u32 %v2614_v40, 16  ;;  %v12202_v46 = vand.u32 15, %v9496_v58  ;;  %vm12494_vm0 = vmmov %vm12493_vm6 }
  0xf8   : > { %v9512_v59 = vor.u32 %v2322_v55, %v2319_v39  ;;  %vm874_vm10 = vcmp.lt.s32.totalorder %v842_v6, 16  ;;  %v2999_v47 = vsel %vm12494_vm0, %v2997_v34, %v9498_v32  ;;  %v9516_v35 = vpop.f32.mrf.mxu3  ;;  %vm2935_vm12 = vcmp.ne.s32.totalorder %v2931_v62, %v8481_v36 }
  0xf9   : > { %vm2936_vm9 = vcmp.ne.s32.totalorder %v2932_v3, %v8465_v23  ;;  %vm2847_vm15 = vmpackc.low %vm874_vm10, %vm874_vm10  ;;  %v780_v5 = vadd.s32 1, %v12202_v46  ;;  %v2437_v10 = vor.u32 %v9463_v8, %v9450_v61  ;;  %vm12495_vm6 = vcmask 261120  }
  0xfa   : > { %v2011_v22 = vpop.f32.mrf.mxu0  ;;  %7589 = vmatmul.msk.bf16.gmra.mxu1 %vm12495_vm6, %v3142_v38  ;;  %vm12496_vm0 = vsmask.f32 1280  ;;  %v9531_v40 = vor.u32 %v2444_v28, %v2441_v45  ;;  %v2654_v17 = vrot.slane %v2652_v12, 1  ;;  %v2657_v34 = vrot.slane %v2655_v60, 2  ;;  %vm12497_vm10 = vmmov %vm12495_vm6 }
  0xfb   : > { %v9523_v0 = vadd.f32 %v2011_v22, %v9084_v9  ;;  %v2324_v56 = vsel %vm12496_vm0, %v9439_v21, %v9512_v59  ;;  %vm9534_vm8 = vmpackc.low %vm2936_vm9, %vm2935_vm12  ;;  %v12498_v3 = vmov 0  ;;  %v2863_v61 = vsel %vm2847_vm15, 65537, %v12411_v50  ;;  %v12505_v22 = vld [vmem:[#allocation31_spill] sm:$0xff] }
  0xfc   : > { %v2380_v62 = vunpack.c.l.b16 %v2324_v56  ;;  %v12499_v3 = vsel %vm9534_vm8, 4294967295, %v12498_v3  ;;  %v2381_v9 = vunpack.c.h.b16 %v2324_v56  ;;  %vm812_vm3 = vcmp.lt.s32.totalorder %v780_v5, 16 }
  0xfd   : > { %7568 = vmatmul.msk.bf16.vlgmr.msra.gmra.mxu0 %vm12497_vm10, %v2999_v47  ;;  %12500 = vst [vmem:[#allocation45_spill] sm:$0xff] %v12499_v3  ;;  %v1601_v8 = vpop.f32.mrf.mxu2  ;;  %v2879_v39 = vunpack.c.l.b16 %v2863_v61  ;;  %vm2235_vm0 = vmpackc.low %vm812_vm3, %vm812_vm3  ;;  %v2417_v45 = vsel %vm9372_vm7, %v8695_v48, 0  ;;  %vm12502_vm9 = vsmask.f32 6400  ;;  %v9552_v38 = vor.u32 %v2657_v34, %v2654_v17  ;;  %v12506_v47 = vld [vmem:[#allocation28_spill] sm:$0xff] }
  0xfe   : > { %vm2384_vm6 = vcmp.ne.s32.totalorder %v2380_v62, %v8481_v36  ;;  %v9541_v21 = vadd.f32 %v9367_v18, %v1601_v8  ;;  %vm2385_vm12 = vcmp.ne.s32.totalorder %v2381_v9, %v8465_v23  ;;  %v2251_v28 = vsel %vm2235_vm0, 65537, %v12411_v50  ;;  %v9550_v6 = vpop.f32.mrf.mxu1  ;;  %v12507_v9 = vld [vmem:[#allocation26_spill] sm:$0xff]  ;;  %vm12508_vm3 = vmmov %vm12497_vm10 }
  0xff   : > { %v2446_v55 = vsel %vm12502_vm9, %v2437_v10, %v9531_v40  ;;  %vm9554_vm15 = vmpackc.low %vm2385_vm12, %vm2384_vm6  ;;  %v12503_v12 = vmov 0  ;;  %v9559_v18 = vpack.c.b16 %v2879_v39, %v8436_v7  ;;  %v2267_v60 = vunpack.c.l.b16 %v2251_v28 }
 0x100   : > { %12501 = vst [vmem:[#allocation46_spill] sm:$0xff] %v9541_v21  ;;  %v12504_v12 = vsel %vm9554_vm15, 4294967295, %v12503_v12  ;;  %v1652_v5 = vadd.f32 %v12506_v47, %v12505_v22  ;;  %v2975_v56 = vsel %vm9433_vm13, %v8695_v48, 0  ;;  %v3118_v10 = vsel %vm9534_vm8, %v8973_v13, 0  ;;  %v9569_v34 = vpop.f32.mrf.mxu3  ;;  %vm12509_vm10 = vmmov %vm12502_vm9 }
 0x101   : > { %v2448_v62 = vshrl.u32 %v2417_v45, 16  ;;  %v2615_v61 = vsel %vm9554_vm15, %v12507_v9, 0  ;;  %v12210_v39 = vrot.slane %v9559_v18, 6  ;;  %v2277_v48 = vpack.c.b16 %v2267_v60, %v8436_v7  ;;  %vm12512_vm0 = vmmov %vm12508_vm3 }
 0x102   : > { %v2013_v17 = vpop.f32.mrf.mxu0  ;;  %7528 = vmatmul.msk.bf16.vlgmr.msra.gmra.mxu2 %vm12508_vm3, %v2446_v55  ;;  %v9580_v28 = vadd.s32 104, %v8422_v1  ;;  %v2451_v13 = vshll.u32 %v2417_v45, 16  ;;  %v2659_v22 = vsel %vm12509_vm10, %v9452_v44, %v9552_v38  ;;  %v9585_v47 = vrot.slane %v2975_v56, 2 }
 0x103   : > { %v9575_v8 = vadd.f32 %v2013_v17, %v1652_v5  ;;  %v9587_v46 = vrot.slane %v3118_v10, 2  ;;  %v12510_v55 = vrot.slane %v9445_v41, 6  ;;  %vm12511_vm6 = vcmask 1041408  }
 0x104   : > { %v2326_v17 = vshrl.u32 %v2277_v48, 16  ;;  %v2329_v60 = vshll.u32 %v2277_v48, 16  ;;  %v12213_v16 = vand.u32 15, %v9580_v28  ;;  %v2661_v45 = vshrl.u32 %v2615_v61, 16  ;;  %7550 = vmatmul.msk.bf16.gmra.mxu3 %vm12512_vm0, %v2659_v22 }
 0x105   : > { %v2903_v5 = vsel %vm12511_vm6, %v12510_v55, %v12210_v39  ;;  %v1816_v20 = vpop.f32.mrf.mxu2  ;;  %v2664_v29 = vshll.u32 %v2615_v61, 16  ;;  %v12513_v52 = vand.u32 15, %v9496_v58  ;;  %v2450_v33 = vrot.slane %v2448_v62, 1 }
 0x106   : > { %v2938_v25 = vunpack.c.l.b16 %v2903_v5  ;;  %v2939_v27 = vunpack.c.h.b16 %v2903_v5  ;;  %v1902_v44 = vadd.f32 %v9419_v42, %v1816_v20  ;;  %v2328_v56 = vrot.slane %v2326_v17, 6  ;;  %v9599_v39 = vpop.f32.mrf.mxu1 }
 0x107   : > { %v2331_v10 = vrot.slane %v2329_v60, 7  ;;  %v844_v41 = vadd.s32 2, %v12513_v52  ;;  %v2453_v55 = vrot.slane %v2451_v13, 2  ;;  %vm12514_vm12 = vcmask 1045504  }
 0x108   : > { %v3144_v48 = vsel %vm12514_vm12, %v9486_v15, %v9587_v46  ;;  %v782_v61 = vadd.s32 1, %v12213_v16  ;;  %v9609_v20 = vadd.f32 %v9408_v14, %v1902_v44  ;;  %vm12515_vm3 = vmmov %vm12514_vm12  ;;  %v9614_v58 = vpop.f32.mrf.mxu3  ;;  %v2663_v62 = vrot.slane %v2661_v45, 1  ;;  %v12516_v15 = vld [vmem:[#allocation33_spill] sm:$0xff] }
 0x109   : > { %v9606_v5 = vor.u32 %v2331_v10, %v2328_v56  ;;  %vm876_vm9 = vcmp.lt.s32.totalorder %v844_v41, 16  ;;  %v3001_v52 = vsel %vm12515_vm3, %v9498_v32, %v9585_v47  ;;  %v2666_v13 = vrot.slane %v2664_v29, 2  ;;  %v12519_v56 = vld [vmem:[#allocation21_spill] sm:$0xff] }
 0x10a   : > { %v2016_v42 = vpop.f32.mrf.mxu0  ;;  %vm2849_vm10 = vmpackc.low %vm876_vm9, %vm876_vm9  ;;  %vm814_vm6 = vcmp.lt.s32.totalorder %v782_v61, 16  ;;  %7590 = vmatmul.msk.bf16.gmra.mxu1 %vm12512_vm0, %v3144_v48  ;;  %vm2942_vm12 = vcmp.ne.s32.totalorder %v2938_v25, %v8481_v36  ;;  %vm2943_vm13 = vcmp.ne.s32.totalorder %v2939_v27, %v8465_v23  ;;  %vm12517_vm7 = vsmask.f32 1280 }
 0x10b   : > { %v9617_v22 = vadd.f32 %v2016_v42, %v12516_v15  ;;  %v2333_v14 = vsel %vm12517_vm7, %v9512_v59, %v9606_v5  ;;  %vm2237_vm3 = vmpackc.low %vm814_vm6, %vm814_vm6  ;;  %v9625_v32 = vor.u32 %v2453_v55, %v2450_v33  ;;  %v2865_v60 = vsel %vm2849_vm10, 65537, %v12411_v50 }
 0x10c   : > { %v2387_v17 = vunpack.c.l.b16 %v2333_v14  ;;  %v2388_v29 = vunpack.c.h.b16 %v2333_v14  ;;  %vm12518_vm9 = vmmov %vm12512_vm0  ;;  %v2253_v45 = vsel %vm2237_vm3, 65537, %v12411_v50  ;;  %v2418_v25 = vsel %vm9488_vm5, %v12519_v56, 0 }
 0x10d   : > { %7569 = vmatmul.msk.bf16.gmra.mxu0 %vm12518_vm9, %v3001_v52  ;;  %v1818_v44 = vpop.f32.mrf.mxu2  ;;  %vm9633_vm0 = vmpackc.low %vm2943_vm13, %vm2942_vm12  ;;  %v12520_v27 = vmov 0  ;;  %v9640_v59 = vor.u32 %v2666_v13, %v2663_v62  ;;  %v12523_v10 = vmov 0  ;;  %v2881_v41 = vunpack.c.l.b16 %v2865_v60 }
 0x10e   : > { %v12521_v27 = vsel %vm9633_vm0, 4294967295, %v12520_v27  ;;  %vm2391_vm7 = vcmp.ne.s32.totalorder %v2387_v17, %v8481_v36  ;;  %vm2392_vm6 = vcmp.ne.s32.totalorder %v2388_v29, %v8465_v23  ;;  %v1904_v33 = vadd.f32 %v9461_v4, %v1818_v44  ;;  %v9649_v61 = vpop.f32.mrf.mxu1  ;;  %v12527_v17 = vld [vmem:[#allocation27_spill] sm:$0xff]  ;;  %vm12528_vm12 = vmmov %vm12518_vm9 }
 0x10f   : > { %12522 = vst [vmem:[#allocation31_spill] sm:$0xff] %v12521_v27  ;;  %vm9642_vm10 = vmpackc.low %vm2392_vm6, %vm2391_vm7  ;;  %v2269_v55 = vunpack.c.l.b16 %v2253_v45  ;;  %vm12526_vm13 = vsmask.f32 6400  ;;  %v2976_v42 = vsel %vm9534_vm8, %v12519_v56, 0  ;;  %v3119_v4 = vsel %vm9633_vm0, %v12507_v9, 0  ;;  %v12529_v9 = vld [vmem:[#allocation36_spill] sm:$0xff] }
 0x110   : > { %v12524_v10 = vsel %vm9642_vm10, 4294967295, %v12523_v10  ;;  %v2455_v48 = vsel %vm12526_vm13, %v9531_v40, %v9625_v32  ;;  %v9658_v52 = vpack.c.b16 %v2881_v41, %v8436_v7  ;;  %v9661_v15 = vpop.f32.mrf.mxu3  ;;  %v2457_v14 = vshrl.u32 %v2418_v25, 16  ;;  %vm12530_vm3 = vmmov %vm12526_vm13 }
 0x111   : > { %12525 = vst [vmem:[#allocation28_spill] sm:$0xff] %v12524_v10  ;;  %v2278_v62 = vpack.c.b16 %v2269_v55, %v8436_v7  ;;  %v2460_v40 = vshll.u32 %v2418_v25, 16  ;;  %v2616_v29 = vsel %vm9642_vm10, %v12527_v17, 0  ;;  %v9667_v60 = vadd.f32 %v9448_v37, %v1904_v33  ;;  %vm12533_vm7 = vmmov %vm12528_vm12 }
 0x112   : > { %v2018_v13 = vpop.f32.mrf.mxu0  ;;  %7529 = vmatmul.msk.bf16.gmra.mxu2 %vm12528_vm12, %v2455_v48  ;;  %v2668_v44 = vsel %vm12530_vm3, %v9552_v38, %v9640_v59  ;;  %v9676_v56 = vrot.slane %v2976_v42, 2  ;;  %v2904_v25 = vrot.slane %v9658_v52, 6  ;;  %v9679_v41 = vrot.slane %v3119_v4, 2 }
 0x113   : > { %v9671_v45 = vadd.f32 %v2018_v13, %v12529_v9  ;;  %v2335_v55 = vshrl.u32 %v2278_v62, 16  ;;  %v2338_v16 = vshll.u32 %v2278_v62, 16  ;;  %v9682_v37 = vadd.s32 120, %v8422_v1 }
 0x114   : > { %v2670_v33 = vshrl.u32 %v2616_v29, 16  ;;  %v2673_v48 = vshll.u32 %v2616_v29, 16  ;;  %v12531_v13 = vrot.slane %v9559_v18, 6  ;;  %vm12532_vm9 = vcmask 1041408   ;;  %7551 = vmatmul.msk.bf16.gmra.mxu3 %vm12533_vm7, %v2668_v44 }
 0x115   : > { %v1821_v38 = vpop.f32.mrf.mxu2  ;;  %v2337_v53 = vrot.slane %v2335_v55, 6  ;;  %v2340_v21 = vrot.slane %v2338_v16, 7  ;;  %v2459_v26 = vrot.slane %v2457_v14, 1  ;;  %v12534_v1 = vand.u32 15, %v9580_v28 }
 0x116   : > { %v2905_v9 = vsel %vm12532_vm9, %v12531_v13, %v2904_v25  ;;  %v1907_v4 = vadd.f32 %v9516_v35, %v1821_v38  ;;  %v12218_v29 = vand.u32 15, %v9682_v37  ;;  %v2462_v54 = vrot.slane %v2460_v40, 2  ;;  %v9697_v13 = vpop.f32.mrf.mxu1  ;;  %v12543_v38 = vld [vmem:[#allocation5_spill] sm:$0xff] }
 0x117   : > { %v2945_v42 = vunpack.c.l.b16 %v2905_v9  ;;  %v2946_v3 = vunpack.c.h.b16 %v2905_v9  ;;  %v846_v62 = vadd.s32 2, %v12534_v1  ;;  %vm12535_vm6 = vcmask 1045504  }
 0x118   : > { %v3003_v18 = vsel %vm12535_vm6, %v9585_v47, %v9676_v56  ;;  %vm12536_vm13 = vmmov %vm12535_vm6  ;;  %v9702_v35 = vor.u32 %v2340_v21, %v2337_v53  ;;  %v2672_v14 = vrot.slane %v2670_v33, 1  ;;  %v784_v28 = vadd.s32 1, %v12218_v29  ;;  %v9709_v55 = vpop.f32.mrf.mxu3 }
 0x119   : > { %v3146_v16 = vsel %vm12536_vm13, %v9587_v46, %v9679_v41  ;;  %vm878_vm12 = vcmp.lt.s32.totalorder %v846_v62, 16  ;;  %v9707_v44 = vadd.f32 %v9506_v11, %v1907_v4  ;;  %v2675_v47 = vrot.slane %v2673_v48, 2 }
 0x11a   : > { %v2021_v40 = vpop.f32.mrf.mxu0  ;;  %vm2949_vm3 = vcmp.ne.s32.totalorder %v2945_v42, %v8481_v36  ;;  %vm2950_vm9 = vcmp.ne.s32.totalorder %v2946_v3, %v8465_v23  ;;  %vm12537_vm7 = vsmask.f32 1280  ;;  %vm2851_vm6 = vmpackc.low %vm878_vm12, %vm878_vm12  ;;  %vm12538_vm13 = vcmask 261120  }
 0x11b   : > { %v2342_v53 = vsel %vm12537_vm7, %v9606_v5, %v9702_v35  ;;  %v9717_v46 = vadd.f32 %v2021_v40, %v9315_v19  ;;  %7591 = vmatmul.msk.bf16.gmra.mxu1 %vm12538_vm13, %v3146_v16  ;;  %v9720_v21 = vor.u32 %v2462_v54, %v2459_v26  ;;  %v2867_v48 = vsel %vm2851_vm6, 65537, %v12411_v50  ;;  %vm12539_vm8 = vmmov %vm12538_vm13 }
 0x11c   : > { %v2394_v11 = vunpack.c.l.b16 %v2342_v53  ;;  %v2395_v33 = vunpack.c.h.b16 %v2342_v53  ;;  %vm9724_vm5 = vmpackc.low %vm2950_vm9, %vm2949_vm3  ;;  %v12540_v3 = vmov 0  ;;  %v2883_v9 = vunpack.c.l.b16 %v2867_v48 }
 0x11d   : > { %7570 = vmatmul.msk.bf16.gmra.mxu0 %vm12539_vm8, %v3003_v18  ;;  %v12541_v3 = vsel %vm9724_vm5, 4294967295, %v12540_v3  ;;  %vm816_vm7 = vcmp.lt.s32.totalorder %v784_v28, 16  ;;  %v1823_v5 = vpop.f32.mrf.mxu2  ;;  %v2419_v19 = vsel %vm9554_vm15, %v12543_v38, 0  ;;  %v9731_v42 = vor.u32 %v2675_v47, %v2672_v14 }
 0x11e   : > { %12542 = vst [vmem:[#allocation26_spill] sm:$0xff] %v12541_v3  ;;  %vm9734_vm12 = vcmp.ne.s32.totalorder %v2394_v11, %v8481_v36  ;;  %vm2239_vm6 = vmpackc.low %vm816_vm7, %vm816_vm7  ;;  %v1909_v26 = vadd.f32 %v9569_v34, %v1823_v5  ;;  %vm2399_vm8 = vcmp.ne.s32.totalorder %v2395_v33, %v8465_v23  ;;  %v9741_v4 = vpack.c.b16 %v2883_v9, %v8436_v7  ;;  %v9747_v18 = vpop.f32.mrf.mxu1 }
 0x11f   : > { %v2255_v1 = vsel %vm2239_vm6, 65537, %v12411_v50  ;;  %vm12546_vm3 = vsmask.f32 6400  ;;  %v2466_v14 = vshrl.u32 %v2419_v19, 16  ;;  %v3120_v28 = vsel %vm9724_vm5, %v12527_v17, 0  ;;  %vm9760_vm9 = vmpackc.low %vm2399_vm8, %vm9734_vm12 }
 0x120   : > { %v2464_v62 = vsel %vm12546_vm3, %v9625_v32, %v9720_v21  ;;  %v2271_v16 = vunpack.c.l.b16 %v2255_v1  ;;  %v12219_v34 = vrot.slane %v9741_v4, 6  ;;  %v9754_v40 = vadd.f32 %v9550_v6, %v1909_v26  ;;  %v9756_v53 = vpop.f32.mrf.mxu3  ;;  %vm12550_vm7 = vmmov %vm12546_vm3  ;;  %v12552_v26 = vld [vmem:[#allocation29_spill] sm:$0xff] }
 0x121   : > { %v2469_v11 = vshll.u32 %v2419_v19, 16  ;;  %v12547_v32 = vmov 0  ;;  %v2677_v6 = vsel %vm12550_vm7, %v9640_v59, %v9731_v42  ;;  %v2977_v48 = vsel %vm9633_vm0, %v12543_v38, 0  ;;  %vm12553_vm6 = vmmov %vm12538_vm13 }
 0x122   : > { %v2023_v47 = vpop.f32.mrf.mxu0  ;;  %v12548_v32 = vsel %vm9760_vm9, 4294967295, %v12547_v32  ;;  %v2279_v33 = vpack.c.b16 %v2271_v16, %v8436_v7  ;;  %7530 = vmatmul.msk.bf16.gmra.mxu2 %vm12538_vm13, %v2464_v62  ;;  %v9775_v9 = vrot.slane %v3120_v28, 2  ;;  %vm12551_vm12 = vcmask 1041408  }
 0x123   : > { %12549 = vst [vmem:[#allocation33_spill] sm:$0xff] %v12548_v32  ;;  %v9767_v17 = vadd.f32 %v2023_v47, %v9378_v24  ;;  %v2907_v5 = vsel %vm12551_vm12, %v2904_v25, %v12219_v34  ;;  %v2468_v24 = vrot.slane %v2466_v14, 1  ;;  %v2617_v1 = vsel %vm9760_vm9, %v12552_v26, 0 }
 0x124   : > { %v2344_v19 = vshrl.u32 %v2279_v33, 16  ;;  %v2347_v54 = vshll.u32 %v2279_v33, 16  ;;  %v2471_v62 = vrot.slane %v2469_v11, 2  ;;  %v9785_v16 = vrot.slane %v2977_v48, 2  ;;  %7552 = vmatmul.msk.bf16.gmra.mxu3 %vm12553_vm6, %v2677_v6 }
 0x125   : > { %v1826_v59 = vpop.f32.mrf.mxu2  ;;  %v2952_v52 = vunpack.c.l.b16 %v2907_v5  ;;  %v2953_v29 = vunpack.c.h.b16 %v2907_v5  ;;  %v12554_v25 = vand.u32 15, %v9682_v37  ;;  %vm12555_vm8 = vcmask 1045504  }
 0x126   : > { %v2346_v38 = vrot.slane %v2344_v19, 6  ;;  %v2349_v28 = vrot.slane %v2347_v54, 7  ;;  %v1912_v47 = vadd.f32 %v9614_v58, %v1826_v59  ;;  %v9791_v14 = vpop.f32.mrf.mxu1  ;;  %v3148_v34 = vsel %vm12555_vm8, %v9679_v41, %v9775_v9  ;;  %vm12556_vm13 = vmmov %vm12555_vm8 }
 0x127   : > { %v848_v33 = vadd.s32 2, %v12554_v25  ;;  %v2679_v11 = vshrl.u32 %v2617_v1, 16  ;;  %v2682_v48 = vshll.u32 %v2617_v1, 16  ;;  %v9801_v19 = vor.u32 %v2471_v62, %v2468_v24 }
 0x128   : > { %v9796_v27 = vor.u32 %v2349_v28, %v2346_v38  ;;  %v9799_v58 = vadd.f32 %v9599_v39, %v1912_v47  ;;  %v3005_v37 = vsel %vm12556_vm13, %v9676_v56, %v9785_v16  ;;  %v9806_v5 = vpop.f32.mrf.mxu3  ;;  %vm12557_vm7 = vsmask.f32 1280  ;;  %vm12558_vm13 = vmmov %vm12553_vm6  ;;  %v12563_v47 = vld [vmem:[#allocation9_spill] sm:$0xff] }
 0x129   : > { %vm880_vm3 = vcmp.lt.s32.totalorder %v848_v33, 16  ;;  %vm2956_vm8 = vcmp.ne.s32.totalorder %v2952_v52, %v8481_v36  ;;  %vm2957_vm0 = vcmp.ne.s32.totalorder %v2953_v29, %v8465_v23  ;;  %v2681_v24 = vrot.slane %v2679_v11, 1 }
 0x12a   : > { %v2026_v6 = vpop.f32.mrf.mxu0  ;;  %v2351_v41 = vsel %vm12557_vm7, %v9702_v35, %v9796_v27  ;;  %vm2853_vm12 = vmpackc.low %vm880_vm3, %vm880_vm3  ;;  %v2684_v1 = vrot.slane %v2682_v48, 2  ;;  %v12559_v38 = vmov 0  ;;  %vm12562_vm15 = vsmask.f32 6400 }
 0x12b   : > { %v9812_v54 = vadd.f32 %v2026_v6, %v9425_v31  ;;  %7592 = vmatmul.msk.bf16.gmra.mxu1 %vm12553_vm6, %v3148_v34  ;;  %v2401_v39 = vunpack.c.l.b16 %v2351_v41  ;;  %v2402_v56 = vunpack.c.h.b16 %v2351_v41  ;;  %v2869_v59 = vsel %vm2853_vm12, 65537, %v12411_v50  ;;  %vm9819_vm3 = vmpackc.low %vm2957_vm0, %vm2956_vm8 }
 0x12c   : > { %v2885_v62 = vunpack.c.l.b16 %v2869_v59  ;;  %v12560_v38 = vsel %vm9819_vm3, 4294967295, %v12559_v38  ;;  %v2473_v34 = vsel %vm12562_vm15, %v9720_v21, %v9801_v19  ;;  %v2420_v52 = vsel %vm9642_vm10, %v12563_v47, 0  ;;  %vm12567_vm0 = vmmov %vm12558_vm13 }
 0x12d   : > { %7571 = vmatmul.msk.bf16.gmra.mxu0 %vm12558_vm13, %v3005_v37  ;;  %v1828_v35 = vpop.f32.mrf.mxu2  ;;  %12561 = vst [vmem:[#allocation21_spill] sm:$0xff] %v12560_v38  ;;  %vm2405_vm7 = vcmp.ne.s32.totalorder %v2401_v39, %v8481_v36  ;;  %vm2406_vm6 = vcmp.ne.s32.totalorder %v2402_v56, %v8465_v23  ;;  %v2685_v25 = vor.u32 %v2684_v1, %v2681_v24  ;;  %v12564_v21 = vmov 0  ;;  %vm12571_vm13 = vmmov %vm12567_vm0 }
 0x12e   : > { %v1914_v31 = vadd.f32 %v9661_v15, %v1828_v35  ;;  %v2893_v29 = vpack.c.b16 %v2885_v62, %v8436_v7  ;;  %v9830_v28 = vpop.f32.mrf.mxu1  ;;  %v3121_v15 = vsel %vm9819_vm3, %v12552_v26, 0  ;;  %vm9845_vm15 = vmpackc.low %vm2406_vm6, %vm2405_vm7  ;;  %v2475_v37 = vshrl.u32 %v2420_v52, 16 }
 0x12f   : > { %v12565_v21 = vsel %vm9845_vm15, 4294967295, %v12564_v21  ;;  %v2978_v26 = vsel %vm9724_vm5, %v12563_v47, 0  ;;  %vm12569_vm12 = vcmask 1041408   ;;  %v2478_v39 = vshll.u32 %v2420_v52, 16 }
 0x130   : > { %v9838_v33 = vrot.slane %v2893_v29, 6  ;;  %v9841_v11 = vadd.f32 %v9649_v61, %v1914_v31  ;;  %v9843_v48 = vpop.f32.mrf.mxu3  ;;  %12566 = vst [vmem:[#allocation27_spill] sm:$0xff] %v12565_v21  ;;  %v12568_v61 = vrot.slane %v9741_v4, 6  ;;  %vm12570_vm8 = vsmask.f32 6400 }
 0x131   : > { %v2686_v24 = vsel %vm12570_vm8, %v9731_v42, %v2685_v25  ;;  %v3149_v1 = vrot.slane %v3121_v15, 2  ;;  %v3006_v59 = vrot.slane %v2978_v26, 2  ;;  %v2477_v31 = vrot.slane %v2475_v37, 1  ;;  %v12574_v37 = vld [vmem:[#allocation30_spill] sm:$0xff] }
 0x132   : > { %v2028_v7 = vpop.f32.mrf.mxu0  ;;  %7531 = vmatmul.msk.bf16.gmra.mxu2 %vm12567_vm0, %v2473_v34  ;;  %v2909_v41 = vsel %vm12569_vm12, %v12568_v61, %v9838_v33  ;;  %v2480_v29 = vrot.slane %v2478_v39, 2  ;;  %vm12572_vm7 = vcmask 1045504   ;;  %vm12575_vm12 = vmmov %vm12571_vm13  ;;  %vm12580_vm5 = vsmask.f32 6400 }
 0x133   : > { %v9851_v6 = vadd.f32 %v2028_v7, %v9474_v51  ;;  %v2618_v51 = vsel %vm9845_vm15, %v9150_v63, 0  ;;  %v2959_v62 = vunpack.c.l.b16 %v2909_v41  ;;  %v2960_v4 = vunpack.c.h.b16 %v2909_v41  ;;  %vm12573_vm6 = vmmov %vm12572_vm7 }
 0x134   : > { %7553 = vmatmul.msk.bf16.gmra.mxu3 %vm12571_vm13, %v2686_v24  ;;  %v3150_v42 = vsel %vm12572_vm7, %v9775_v9, %v3149_v1  ;;  %v2688_v47 = vshrl.u32 %v2618_v51, 16  ;;  %v2691_v52 = vshll.u32 %v2618_v51, 16  ;;  %v3007_v26 = vsel %vm12573_vm6, %v9785_v16, %v3006_v59  ;;  %vm12576_vm13 = vmmov %vm12575_vm12 }
 0x135   : > { %v1831_v56 = vpop.f32.mrf.mxu2  ;;  %vm2963_vm0 = vcmp.ne.s32.totalorder %v2959_v62, %v8481_v36  ;;  %vm2964_vm8 = vcmp.ne.s32.totalorder %v2960_v4, %v8465_v23  ;;  %v2408_v9 = vunpack.c.l.b16 %v9796_v27  ;;  %v2481_v41 = vor.u32 %v2480_v29, %v2477_v31 }
 0x136   : > { %v1917_v35 = vadd.f32 %v9709_v55, %v1831_v56  ;;  %v9867_v34 = vpop.f32.mrf.mxu1  ;;  %v2690_v39 = vrot.slane %v2688_v47, 1  ;;  %v2693_v24 = vrot.slane %v2691_v52, 2  ;;  %vm9887_vm7 = vmpackc.low %vm2964_vm8, %vm2963_vm0  ;;  %v12577_v51 = vmov 0 }
 0x137   : > { %v12578_v51 = vsel %vm9887_vm7, 4294967295, %v12577_v51  ;;  %vm2412_vm6 = vcmp.ne.s32.totalorder %v2408_v9, %v8481_v36  ;;  %v2482_v62 = vsel %vm12580_vm5, %v9801_v19, %v2481_v41  ;;  %v3122_v29 = vsel %vm9887_vm7, %v9150_v63, 0  ;;  %vm12585_vm5 = vmmov %vm12576_vm13 }
 0x138   : > { %v9872_v15 = vadd.f32 %v9697_v13, %v1917_v35  ;;  %v9876_v55 = vpop.f32.mrf.mxu3  ;;  %v2409_v13 = vunpack.c.h.b16 %v9796_v27  ;;  %12579 = vst [vmem:[#allocation36_spill] sm:$0xff] %v12578_v51  ;;  %v12581_v35 = vld [vmem:[#allocation15_spill] sm:$0xff]  ;;  %v2694_v4 = vor.u32 %v2693_v24, %v2690_v39  ;;  %v12582_v19 = vmov 0 }
 0x139   : > { %v2421_v31 = vsel %vm9760_vm9, %v12581_v35, 0  ;;  %vm12586_vm8 = vsmask.f32 6400 }
 0x13a   : > { %v2031_v7 = vpop.f32.mrf.mxu0  ;;  %v2484_v52 = vshrl.u32 %v2421_v31, 16  ;;  %v2695_v63 = vsel %vm12586_vm8, %v2685_v25, %v2694_v4 }
 0x13b   : > { %v9880_v61 = vadd.f32 %v2031_v7, %v12574_v37  ;;  %7593 = vmatmul.msk.bf16.gmra.mxu1 %vm12575_vm12, %v3150_v42  ;;  %vm2413_vm12 = vcmp.ne.s32.totalorder %v2409_v13, %v8465_v23  ;;  %v2979_v7 = vsel %vm9819_vm3, %v12581_v35, 0 }
 0x13c   : > { %vm9911_vm0 = vmpackc.low %vm2413_vm12, %vm2412_vm6  ;;  %v3008_v13 = vrot.slane %v2979_v7, 2  ;;  %v2486_v24 = vrot.slane %v2484_v52, 1  ;;  %vm12588_vm6 = vcmask 1045504  }
 0x13d   : > { %7572 = vmatmul.msk.bf16.gmra.mxu0 %vm12576_vm13, %v3007_v26  ;;  %v1833_v16 = vpop.f32.mrf.mxu2  ;;  %v12583_v19 = vsel %vm9911_vm0, 4294967295, %v12582_v19  ;;  %v2487_v26 = vshll.u32 %v2421_v31, 16  ;;  %v2619_v37 = vsel %vm9911_vm0, %v9262_v57, 0  ;;  %vm12587_vm13 = vmmov %vm12585_vm5 }
 0x13e   : > { %v1919_v56 = vadd.f32 %v9756_v53, %v1833_v16  ;;  %v9896_v27 = vpop.f32.mrf.mxu1  ;;  %12584 = vst [vmem:[#allocation5_spill] sm:$0xff] %v12583_v19  ;;  %v2966_v16 = vunpack.c.l.b16 %v9838_v33  ;;  %v2697_v31 = vshrl.u32 %v2619_v37, 16  ;;  %vm12589_vm12 = vmmov %vm12588_vm6 }
 0x140   : > { %v9905_v53 = vadd.f32 %v9747_v18, %v1919_v56  ;;  %v9909_v47 = vpop.f32.mrf.mxu3  ;;  %v3151_v18 = vrot.slane %v3122_v29, 2  ;;  %v2967_v56 = vunpack.c.h.b16 %v9838_v33  ;;  %v2700_v29 = vshll.u32 %v2619_v37, 16 }
 0x141   : > { %vm2970_vm8 = vcmp.ne.s32.totalorder %v2966_v16, %v8481_v36  ;;  %v12592_v37 = vmov 0 }
 0x142   : > { %v9907_v42 = vpop.f32.mrf.mxu0  ;;  %7532 = vmatmul.msk.bf16.gmra.mxu2 %vm12585_vm5, %v2482_v62  ;;  %v2489_v62 = vrot.slane %v2487_v26, 2  ;;  %v3152_v25 = vsel %vm12588_vm6, %v3149_v1, %v3151_v18  ;;  %v2699_v1 = vrot.slane %v2697_v31, 1  ;;  %v2702_v26 = vrot.slane %v2700_v29, 2  ;;  %vm12591_vm6 = vmmov %vm12585_vm5 }
 0x144   : > { %7554 = vmatmul.msk.bf16.gmra.mxu3 %vm12587_vm13, %v2695_v63  ;;  %vm2971_vm13 = vcmp.ne.s32.totalorder %v2967_v56, %v8465_v23  ;;  %v2490_v33 = vor.u32 %v2489_v62, %v2486_v24  ;;  %v2422_v23 = vsel %vm9845_vm15, %v8846_v43, 0 }
 0x145   : > { %v1836_v9 = vpop.f32.mrf.mxu2  ;;  %vm9943_vm3 = vmpackc.low %vm2971_vm13, %vm2970_vm8  ;;  %v2493_v56 = vshrl.u32 %v2422_v23, 16  ;;  %v2496_v62 = vshll.u32 %v2422_v23, 16 }
 0x146   : > { %v1922_v39 = vadd.f32 %v9806_v5, %v1836_v9  ;;  %v9927_v35 = vpop.f32.mrf.mxu1  ;;  %v3009_v5 = vsel %vm12589_vm12, %v3006_v59, %v3008_v13  ;;  %v12590_v9 = vld [vmem:[#allocation37_spill] sm:$0xff]  ;;  %v12593_v37 = vsel %vm9943_vm3, 4294967295, %v12592_v37  ;;  %vm12595_vm12 = vsmask.f32 6400  ;;  %vm12597_vm13 = vmmov %vm12585_vm5 }
 0x147   : > { %12594 = vst [vmem:[#allocation29_spill] sm:$0xff] %v12593_v37  ;;  %v2491_v59 = vsel %vm12595_vm12, %v2481_v41, %v2490_v33  ;;  %v3123_v36 = vsel %vm9943_vm3, %v9262_v57, 0  ;;  %v2980_v41 = vsel %vm9887_vm7, %v8846_v43, 0  ;;  %vm12596_vm8 = vmmov %vm12595_vm12  ;;  %v2495_v57 = vrot.slane %v2493_v56, 1 }
 0x148   : > { %v9931_v50 = vadd.f32 %v9791_v14, %v1922_v39  ;;  %v1931_v52 = vpop.f32.mrf.mxu3  ;;  %v3153_v29 = vrot.slane %v3123_v36, 2 }
 0x14a   : > { %v2036_v7 = vpop.f32.mrf.mxu0 }
 0x14b   : > { %v9935_v63 = vadd.f32 %v2036_v7, %v12590_v9  ;;  %7594 = vmatmul.msk.bf16.gmra.mxu1 %vm12585_vm5, %v3152_v25  ;;  %v2703_v25 = vor.u32 %v2702_v26, %v2699_v1  ;;  %v2498_v1 = vrot.slane %v2496_v62, 2 }
 0x14d   : > { %7573 = vmatmul.msk.bf16.gmra.mxu0 %vm12591_vm6, %v3009_v5  ;;  %v9941_v14 = vpop.f32.mrf.mxu2  ;;  %v2704_v31 = vsel %vm12596_vm8, %v2694_v4, %v2703_v25  ;;  %v3010_v5 = vrot.slane %v2980_v41, 2  ;;  %vm12598_vm6 = vcmask 1045504   ;;  %vm12600_vm8 = vmmov %vm12585_vm5 }
 0x14e   : > { %v9948_v39 = vpop.f32.mrf.mxu1  ;;  %vm12599_vm12 = vmmov %vm12598_vm6 }
 0x14f   : > { %v3011_v23 = vsel %vm12599_vm12, %v3008_v13, %v3010_v5 }
 0x150   : > { %v9958_v16 = vpop.f32.mrf.mxu3 }
 0x152   : > { %v9956_v24 = vpop.f32.mrf.mxu0  ;;  %7533 = vmatmul.msk.bf16.gmra.mxu2 %vm12585_vm5, %v2491_v59  ;;  %v3154_v59 = vsel %vm12598_vm6, %v3151_v18, %v3153_v29  ;;  %vm12602_vm6 = vmmov %vm12585_vm5 }
 0x154   : > { %7555 = vmatmul.msk.bf16.gmra.mxu3 %vm12597_vm13, %v2704_v31  ;;  %vm12601_vm13 = vsmask.f32 6400 }
 0x155   : > { %v1841_v7 = vpop.f32.mrf.mxu2 }
 0x156   : > { %v1927_v9 = vadd.f32 %v9876_v55, %v1841_v7  ;;  %v2171_v26 = vpop.f32.mrf.mxu1  ;;  %v2499_v55 = vor.u32 %v2498_v1, %v2495_v57 }
 0x158   : > { %v9969_v38 = vadd.f32 %v9867_v34, %v1927_v9  ;;  %v1936_v51 = vpop.f32.mrf.mxu3  ;;  %v2500_v36 = vsel %vm12601_vm13, %v2490_v33, %v2499_v55  ;;  %v2423_v34 = vsel %vm9911_vm0, %v8900_v49, 0 }
 0x159   : > { %v2502_v56 = vshrl.u32 %v2423_v34, 16  ;;  %v2505_v62 = vshll.u32 %v2423_v34, 16 }
 0x15a   : > { %v2041_v43 = vpop.f32.mrf.mxu0 }
 0x15b   : > { %v9973_v4 = vadd.f32 %v2041_v43, %v9400_v2  ;;  %7595 = vmatmul.msk.bf16.gmra.mxu1 %vm12585_vm5, %v3154_v59  ;;  %v2981_v2 = vsel %vm9943_vm3, %v8900_v49, 0  ;;  %v2504_v7 = vrot.slane %v2502_v56, 1  ;;  %v2507_v9 = vrot.slane %v2505_v62, 2 }
 0x15c   : > { %v3012_v33 = vrot.slane %v2981_v2, 2  ;;  %vm12642_vm3 = vcmask 1040384  }
 0x15d   : > { %7574 = vmatmul.msk.bf16.gmra.mxu0 %vm12600_vm8, %v3011_v23  ;;  %v9977_v25 = vpop.f32.mrf.mxu2  ;;  %v2508_v37 = vor.u32 %v2507_v9, %v2504_v7  ;;  %vm12603_vm8 = vmmov %vm12601_vm13 }
 0x15e   : > { %v9980_v18 = vpop.f32.mrf.mxu1  ;;  %v3013_v23 = vsel %vm12599_vm12, %v3010_v5, %v3012_v33  ;;  %vm12604_vm13 = vmmov %vm12585_vm5 }
 0x160   : > { %v9987_v41 = vpop.f32.mrf.mxu3 }
 0x162   : > { %v9985_v13 = vpop.f32.mrf.mxu0  ;;  %7534 = vmatmul.msk.bf16.gmra.mxu2 %vm12602_vm6, %v2500_v36 }
 0x165   : > { %v1846_v31 = vpop.f32.mrf.mxu2 }
 0x166   : > { %v1932_v29 = vadd.f32 %v1931_v52, %v1846_v31  ;;  %v3200_v57 = vpop.f32.mrf.mxu1  ;;  %v2509_v52 = vsel %vm12603_vm8, %v2499_v55, %v2508_v37 }
 0x168   : > { %v9994_v1 = vadd.f32 %v9927_v35, %v1932_v29  ;;  %v2750_v43 = vpop.f32.mrf.mxu3 }
 0x169   : > { %v2790_v37 = vadd.f32 %v2750_v43, %v9609_v20 }
 0x16a   : > { %v2046_v59 = vpop.f32.mrf.mxu0 }
 0x16b   : > { %v9998_v36 = vadd.f32 %v2046_v59, %v9501_v30 }
 0x16d   : > { %7575 = vmatmul.msk.bf16.gmra.mxu0 %vm12585_vm5, %v3013_v23  ;;  %v10001_v49 = vpop.f32.mrf.mxu2  ;;  %v10016_v23 = vld [vmem:[%s12125_s5] ss:$0 sm:$0xff] }
 0x16e   : > { %v3202_v35 = vpop.f32.mrf.mxu1 }
 0x170   : > { %v2752_v2 = vpop.f32.mrf.mxu3 }
 0x171   : > { %v2791_v20 = vadd.f32 %v2752_v2, %v9667_v60 }
 0x172   : > { %v10004_v34 = vpop.f32.mrf.mxu0  ;;  %7535 = vmatmul.msk.bf16.gmra.mxu2 %vm12604_vm13, %v2509_v52 }
 0x175   : > { %v1851_v56 = vpop.f32.mrf.mxu2 }
 0x176   : > { %v1937_v62 = vadd.f32 %v1936_v51, %v1851_v56  ;;  %v3240_v56 = vadd.f32 %v3200_v57, %v2790_v37 }
 0x177   : > { %v3205_v33 = vpop.f32.mrf.mxu1 }
 0x178   : > { %v10007_v31 = vadd.f32 %v2171_v26, %v1937_v62  ;;  %v2755_v30 = vpop.f32.mrf.mxu3 }
 0x17a   : > { %v3059_v5 = vpop.f32.mrf.mxu0 }
 0x17d   : > { %v10009_v29 = vpop.f32.mrf.mxu2 }
 0x17f   : > { %v3207_v51 = vpop.f32.mrf.mxu1 }
 0x180   : > { %v2757_v9 = vpop.f32.mrf.mxu3 }
 0x182   : > { %v3061_v7 = vpop.f32.mrf.mxu0 }
 0x185   : > { %v2555_v59 = vpop.f32.mrf.mxu2 }
 0x186   : > { %v2595_v55 = vadd.f32 %v2555_v59, %v9523_v0 }
 0x187   : > { %v10024_v32 = vpop.f32.mrf.mxu1 }
 0x188   : > { %v3099_v26 = vadd.f32 %v3059_v5, %v2595_v55  ;;  %v2760_v21 = vpop.f32.mrf.mxu3  ;;  %v3241_v5 = vadd.f32 %v3202_v35, %v2791_v20 }
 0x18a   : > { %v3064_v52 = vpop.f32.mrf.mxu0  ;;  %v10019_v62 = vadd.f32 %v10016_v23, %v3099_v26 }
 0x18c   : > { %12605 = vst [vmem:[#allocation9_spill] sm:$0xff] %v10019_v62  ;;  %v3276_v3 = vadd.f32 %v10019_v62, %v3240_v56  ;;  %v2792_v56 = vadd.f32 %v2755_v30, %v9707_v44  ;;  %v2793_v44 = vadd.f32 %v2757_v9, %v9754_v40 }
 0x18d   : > { %v2557_v19 = vpop.f32.mrf.mxu2 }
 0x18e   : > { %v7596_v43 = vmul.f32 -1.442695, %v3276_v3  ;;  %v2596_v0 = vadd.f32 %v2557_v19, %v9575_v8 }
 0x18f   : > { %v10035_v20 = vpop.f32.mrf.mxu1 }
 0x190   : > { %8083 = vpow2.f32 %v7596_v43  ;;  %v3100_v59 = vadd.f32 %v3061_v7, %v2596_v0  ;;  %v2762_v8 = vpop.f32.mrf.mxu3  ;;  %v3242_v7 = vadd.f32 %v3205_v33, %v2792_v56  ;;  %v3243_v56 = vadd.f32 %v3207_v51, %v2793_v44 }
 0x192   : > { %v3066_v10 = vpop.f32.mrf.mxu0  ;;  %v10027_v57 = vadd.f32 %v10016_v23, %v3100_v59 }
 0x194   : > { %v3277_v37 = vadd.f32 %v10027_v57, %v3241_v5 }
 0x195   : > { %v2560_v55 = vpop.f32.mrf.mxu2 }
 0x196   : > { %v8084_v26 = vpop.eup %8083  ;;  %v7597_v62 = vmul.f32 -1.442695, %v3277_v37  ;;  %v2597_v60 = vadd.f32 %v2560_v55, %v9617_v22 }
 0x197   : > { %v3340_v3 = vadd.f32 1.0, %v8084_v26  ;;  %v8012_v26 = vld [vmem:[%s12124_s4 + $0x8] sm:$0xff] }
 0x198   : > { %8085 = vpow2.f32 %v7597_v62  ;;  %v3101_v19 = vadd.f32 %v3064_v52, %v2597_v60  ;;  %v10040_v33 = vpop.f32.mrf.mxu3  ;;  %3832 = vmatpush.bf16.msrb.mxu2 %v8012_v26 }
 0x199   : > { %8087 = vrcp.f32 %v3340_v3  ;;  %v3367_v9 = vand.u32 2147483648, %v3340_v3  ;;  %vm3361_vm12 = vweird.f32 %v3340_v3 }
 0x19a   : > { %v3069_v2 = vpop.f32.mrf.mxu0  ;;  %v10033_v35 = vadd.f32 %v10016_v23, %v3101_v19  ;;  %v10049_v19 = vpop.f32.mrf.mxu1 }
 0x19b   : > { %v3368_v26 = vor.u32 1.1754944e-38, %v3367_v9 }
 0x19c   : > { %12606 = vst [vmem:[#allocation30_spill] sm:$0xff] %v10033_v35  ;;  %v3278_v43 = vadd.f32 %v10033_v35, %v3242_v7  ;;  %v2794_v7 = vadd.f32 %v2760_v21, %v9799_v58 }
 0x19d   : > { %v2562_v0 = vpop.f32.mrf.mxu2 }
 0x19e   : > { %v8086_v59 = vpop.eup %8085  ;;  %v7598_v30 = vmul.f32 -1.442695, %v3278_v43  ;;  %v2598_v22 = vadd.f32 %v2562_v0, %v9671_v45  ;;  %v3613_v0 = vpop.permute.xlu0 %3612  ;;  %v3244_v21 = vadd.f32 %v10024_v32, %v2794_v7 }
 0x19f   : > { %v8088_v5 = vpop.eup %8087  ;;  %v3341_v62 = vadd.f32 1.0, %v8086_v59  ;;  %v3365_v59 = vand.u32 2147483647, %v3340_v3 }
 0x1a0   : > { %8089 = vpow2.f32 %v7598_v30  ;;  %v3102_v52 = vadd.f32 %v3066_v10, %v2598_v22  ;;  %v3357_v37 = vmul.f32 %v8088_v5, %v3340_v3  ;;  %vm3362_vm6 = vweird.f32 %v8088_v5 }
 0x1a1   : > { %8091 = vrcp.f32 %v3341_v62  ;;  %vm3363_vm5 = vmor %vm3361_vm12, %vm3362_vm6  ;;  %vm3366_vm8 = vcmp.eq.f32.partialorder %v3365_v59, 8.507059e+37  ;;  %v3382_v9 = vand.u32 2147483648, %v3341_v62  ;;  %vm3376_vm6 = vweird.f32 %v3341_v62 }
 0x1a2   : > { %v3071_v55 = vpop.f32.mrf.mxu0  ;;  %v10046_v60 = vadd.f32 %v10016_v23, %v3102_v52  ;;  %v3358_v40 = vsub.f32 1.0, %v3357_v37 }
 0x1a4   : > { %v3279_v45 = vadd.f32 %v10046_v60, %v3243_v56  ;;  %v3359_v10 = vmul.f32 %v8088_v5, %v3358_v40 }
 0x1a5   : > { %v2565_v43 = vpop.f32.mrf.mxu2 }
 0x1a6   : > { %v8090_v30 = vpop.eup %8089  ;;  %v7599_v22 = vmul.f32 -1.442695, %v3279_v45  ;;  %v2599_v51 = vadd.f32 %v2565_v43, %v9717_v46  ;;  %v3360_v44 = vadd.f32 %v8088_v5, %v3359_v10  ;;  %v10062_v10 = vpop.f32.mrf.mxu3  ;;  %v3380_v43 = vand.u32 2147483647, %v3341_v62 }
 0x1a7   : > { %v8092_v52 = vpop.eup %8091  ;;  %v10053_v37 = vadd.f32 1.0, %v8090_v30  ;;  %v2795_v30 = vadd.f32 %v2762_v8, %v9841_v11 }
 0x1a8   : > { %8093 = vpow2.f32 %v7599_v22  ;;  %v3103_v56 = vadd.f32 %v3069_v2, %v2599_v51  ;;  %v3364_v40 = vsel %vm3363_vm5, %v8088_v5, %v3360_v44  ;;  %v3372_v35 = vmul.f32 %v8092_v52, %v3341_v62  ;;  %v10068_v44 = vpop.f32.mrf.mxu1 }
 0x1a9   : > { %8095 = vrcp.f32 %v10053_v37  ;;  %v10060_v46 = vsel %vm3366_vm8, %v3368_v26, %v3364_v40  ;;  %vm3377_vm13 = vweird.f32 %v8092_v52  ;;  %v3615_v40 = vpop.permute.xlu0 %3614  ;;  %vm3381_vm5 = vcmp.eq.f32.partialorder %v3380_v43, 8.507059e+37 }
 0x1aa   : > { %v3074_v58 = vpop.f32.mrf.mxu0  ;;  %v10058_v45 = vadd.f32 %v10016_v23, %v3103_v56  ;;  %12607 = vst [vmem:[#allocation15_spill] sm:$0xff] %v10060_v46  ;;  %v3373_v3 = vsub.f32 1.0, %v3372_v35  ;;  %v3660_v59 = vmul.f32 %v3613_v0, %v10060_v46  ;;  %vm3378_vm12 = vmor %vm3376_vm6, %vm3377_vm13  ;;  %v3245_v62 = vadd.f32 %v10035_v20, %v2795_v30 }
 0x1ab   : > { %v3397_v20 = vand.u32 2147483648, %v10053_v37  ;;  %vm3391_vm13 = vweird.f32 %v10053_v37 }
 0x1ac   : > { %v3280_v2 = vadd.f32 %v10058_v45, %v3244_v21  ;;  %v3374_v5 = vmul.f32 %v8092_v52, %v3373_v3  ;;  %v3383_v21 = vor.u32 1.1754944e-38, %v3382_v9  ;;  %v3676_v3 = vpack.c.bf16 %v3660_v59, %v3660_v59 }
 0x1ad   : > { %v2567_v22 = vpop.f32.mrf.mxu2 }
 0x1ae   : > { %v8094_v32 = vpop.eup %8093  ;;  %v7600_v7 = vmul.f32 -1.442695, %v3280_v2  ;;  %v2600_v51 = vadd.f32 %v2567_v22, %v9767_v17  ;;  %v3375_v35 = vadd.f32 %v8092_v52, %v3374_v5  ;;  %v3708_v59 = vunpack.c.l.b16 %v3676_v3 }
 0x1af   : > { %v8096_v26 = vpop.eup %8095  ;;  %v10070_v56 = vadd.f32 1.0, %v8094_v32  ;;  %v2796_v32 = vadd.f32 %v10040_v33, %v9872_v15  ;;  %v3395_v15 = vand.u32 2147483647, %v10053_v37 }
 0x1b0   : > { %8097 = vpow2.f32 %v7600_v7  ;;  %v3104_v11 = vadd.f32 %v3071_v55, %v2600_v51  ;;  %v3379_v8 = vsel %vm3378_vm12, %v8092_v52, %v3375_v35  ;;  %v3387_v0 = vmul.f32 %v8096_v26, %v10053_v37  ;;  %v10086_v51 = vpop.f32.mrf.mxu3  ;;  %v10094_v3 = vpop.f32.mrf.mxu1  ;;  %v8016_v37 = vld [vmem:[%s12124_s4 + $0x28] sm:$0xff] }
 0x1b1   : > { %8099 = vrcp.f32 %v10070_v56  ;;  %v10074_v17 = vsel %vm3381_vm5, %v3383_v21, %v3379_v8  ;;  %vm3392_vm8 = vweird.f32 %v8096_v26  ;;  %vm3396_vm12 = vcmp.eq.f32.partialorder %v3395_v15, 8.507059e+37  ;;  %4268 = vmatpush.bf16.msrb.mxu0 %v8016_v37 }
 0x1b2   : > { %12608 = vst [vmem:[#allocation37_spill] sm:$0xff] %v10074_v17  ;;  %v10076_v2 = vpop.f32.mrf.mxu0  ;;  %v10080_v5 = vadd.f32 %v10016_v23, %v3104_v11  ;;  %v3661_v43 = vmul.f32 %v3615_v40, %v10074_v17  ;;  %v3388_v9 = vsub.f32 1.0, %v3387_v0  ;;  %v3617_v11 = vpop.permute.xlu1 %3616  ;;  %vm10097_vm6 = vmor %vm3391_vm13, %vm3392_vm8  ;;  %v2797_v15 = vadd.f32 %v10062_v10, %v9905_v53 }
 0x1b3   : > { %vm3406_vm8 = vweird.f32 %v10070_v56 }
 0x1b4   : > { %v3281_v55 = vadd.f32 %v10080_v5, %v3245_v62  ;;  %v3677_v52 = vpack.c.bf16 %v3661_v43, %v3661_v43  ;;  %v3389_v22 = vmul.f32 %v8096_v26, %v3388_v9 }
 0x1b5   : > { %v2570_v7 = vpop.f32.mrf.mxu2 }
 0x1b6   : > { %v8098_v30 = vpop.eup %8097  ;;  %v7601_v35 = vmul.f32 -1.442695, %v3281_v55  ;;  %v3709_v21 = vunpack.c.l.b16 %v3677_v52  ;;  %v2601_v40 = vadd.f32 %v2570_v7, %v9812_v54  ;;  %v3390_v8 = vadd.f32 %v8096_v26, %v3389_v22 }
 0x1b7   : > { %v8100_v0 = vpop.eup %8099  ;;  %v10090_v62 = vadd.f32 1.0, %v8098_v30  ;;  %v3246_v22 = vadd.f32 %v10049_v19, %v2796_v32  ;;  %v3398_v7 = vor.u32 1.1754944e-38, %v3397_v20  ;;  %v3412_v19 = vand.u32 2147483648, %v10070_v56 }
 0x1b8   : > { %8101 = vpow2.f32 %v7601_v35  ;;  %v3105_v33 = vadd.f32 %v3074_v58, %v2601_v40  ;;  %v3724_v9 = vpack.c.b16 %v3709_v21, %v3708_v59  ;;  %v3394_v54 = vsel %vm10097_vm6, %v8096_v26, %v3390_v8  ;;  %v8014_v58 = vld [vmem:[%s12124_s4 + $0x18] sm:$0xff]  ;;  %v10132_v37 = vpop.f32.mrf.mxu3 }
 0x1b9   : > { %8103 = vrcp.f32 %v10090_v62  ;;  %v3402_v52 = vmul.f32 %v8100_v0, %v10070_v56  ;;  %4079 = vmatpush.bf16.msrb.mxu3 %v8014_v58  ;;  %v10120_v21 = vsel %vm3396_vm12, %v3398_v7, %v3394_v54  ;;  %vm3407_vm5 = vweird.f32 %v8100_v0 }
 0x1ba   : > { %v10104_v55 = vpop.f32.mrf.mxu0  ;;  %v10115_v59 = vadd.f32 %v10016_v23, %v3105_v33  ;;  %v10117_v30 = vrot.slane %v3724_v9, 7  ;;  %12611 = vst [vmem:[#allocation47_spill] sm:$0xff] %v10120_v21  ;;  %v3410_v20 = vand.u32 2147483647, %v10070_v56  ;;  %v3619_v7 = vpop.permute.xlu1 %3618  ;;  %vm3408_vm13 = vmor %vm3406_vm8, %vm3407_vm5  ;;  %v3413_v53 = vor.u32 1.1754944e-38, %v3412_v19 }
 0x1bb   : > { %v3403_v26 = vsub.f32 1.0, %v3402_v52  ;;  %v3662_v52 = vmul.f32 %v3617_v11, %v10120_v21  ;;  %v8018_v11 = vld [vmem:[%s12124_s4 + $0x38] sm:$0xff]  ;;  %vm3421_vm5 = vweird.f32 %v10090_v62 }
 0x1bc   : > { %v3282_v35 = vadd.f32 %v10115_v59, %v3246_v22  ;;  %3747 = vrot.lane.b32.xlu2 %v10117_v30, %s8352_s30  ;;  %vm3411_vm6 = vcmp.eq.f32.partialorder %v3410_v20, 8.507059e+37  ;;  %4527 = vmatpush.bf16.msrb.mxu1 %v8018_v11 }
 0x1bd   : > { %v2572_v32 = vpop.f32.mrf.mxu2  ;;  %v3404_v40 = vmul.f32 %v8100_v0, %v3403_v26  ;;  %v3247_v26 = vadd.f32 %v10068_v44, %v2797_v15  ;;  %v1924_v44 = vadd.f32 %v9843_v48, %v9941_v14  ;;  %v2798_v15 = vadd.f32 %v10086_v51, %v9931_v50 }
 0x1be   : > { %v8102_v8 = vpop.eup %8101  ;;  %v7602_v33 = vmul.f32 -1.442695, %v3282_v35  ;;  %v2602_v43 = vadd.f32 %v2572_v32, %v9851_v6  ;;  %v3678_v32 = vpack.c.bf16 %v3662_v52, %v3662_v52  ;;  %v3425_v52 = vand.u32 2147483647, %v10090_v62 }
 0x1bf   : > { %v8104_v9 = vpop.eup %8103  ;;  %v10129_v54 = vadd.f32 1.0, %v8102_v8  ;;  %v3405_v58 = vadd.f32 %v8100_v0, %v3404_v40 }
 0x1c0   : > { %8105 = vpow2.f32 %v7602_v33  ;;  %v3106_v22 = vadd.f32 %v10076_v2, %v2602_v43  ;;  %v3417_v10 = vmul.f32 %v8104_v9, %v10090_v62  ;;  %v10146_v2 = vpop.f32.mrf.mxu1  ;;  %vm3422_vm12 = vweird.f32 %v8104_v9 }
 0x1c1   : > { %8107 = vrcp.f32 %v10129_v54  ;;  %v3409_v6 = vsel %vm3408_vm13, %v8100_v0, %v3405_v58  ;;  %v3427_v0 = vand.u32 2147483648, %v10090_v62  ;;  %vm3423_vm8 = vmor %vm3421_vm5, %vm3422_vm12  ;;  %vm3426_vm13 = vcmp.eq.f32.partialorder %v3425_v52, 8.507059e+37 }
 0x1c2   : > { %v10144_v56 = vadd.f32 %v10016_v23, %v3106_v22  ;;  %v10148_v35 = vsel %vm3411_vm6, %v3413_v53, %v3409_v6  ;;  %v3418_v19 = vsub.f32 1.0, %v3417_v10  ;;  %v3081_v8 = vpop.f32.mrf.mxu0  ;;  %v3621_v22 = vpop.permute.xlu2 %3620  ;;  %v3248_v62 = vadd.f32 %v10094_v3, %v2798_v15 }
 0x1c3   : > { %12612 = vst [vmem:[#allocation48_spill] sm:$0xff] %v10148_v35  ;;  %v3663_v40 = vmul.f32 %v3619_v7, %v10148_v35  ;;  %v3428_v50 = vor.u32 1.1754944e-38, %v3427_v0  ;;  %v2185_v0 = vadd.f32 %v9830_v28, %v1924_v44  ;;  %vm12615_vm12 = vcmask 1040384  }
 0x1c4   : > { %v3283_v20 = vadd.f32 %v10144_v56, %v3247_v26  ;;  %v3419_v33 = vmul.f32 %v8104_v9, %v3418_v19  ;;  %v3710_v19 = vunpack.c.l.b16 %v3678_v32  ;;  %vm3436_vm5 = vweird.f32 %v10129_v54 }
 0x1c5   : > { %v3679_v43 = vpack.c.bf16 %v3663_v40, %v3663_v40  ;;  %v2575_v58 = vpop.f32.mrf.mxu2 }
 0x1c6   : > { %v8106_v7 = vpop.eup %8105  ;;  %v7603_v53 = vmul.f32 -1.442695, %v3283_v20  ;;  %v2603_v10 = vadd.f32 %v2575_v58, %v9880_v61  ;;  %v3420_v6 = vadd.f32 %v8104_v9, %v3419_v33  ;;  %v2775_v20 = vpop.f32.mrf.mxu3 }
 0x1c7   : > { %v8108_v11 = vpop.eup %8107  ;;  %v10160_v26 = vadd.f32 1.0, %v8106_v7  ;;  %v3711_v48 = vunpack.c.l.b16 %v3679_v43  ;;  %v12614_v7 = vld [vmem:[#allocation32_spill] sm:$0xff] }
 0x1c8   : > { %8109 = vpow2.f32 %v7603_v53  ;;  %v3107_v14 = vadd.f32 %v10104_v55, %v2603_v10  ;;  %v3424_v51 = vsel %vm3423_vm8, %v8104_v9, %v3420_v6  ;;  %v3432_v40 = vmul.f32 %v8108_v11, %v10129_v54  ;;  %v3225_v3 = vpop.f32.mrf.mxu1 }
 0x1c9   : > { %8111 = vrcp.f32 %v10160_v26  ;;  %v3725_v61 = vpack.c.b16 %v3711_v48, %v3710_v19  ;;  %v10170_v32 = vsel %vm3426_vm13, %v3428_v50, %v3424_v51  ;;  %v3440_v55 = vand.u32 2147483647, %v10129_v54 }
 0x1ca   : > { %v10168_v33 = vadd.f32 %v10016_v23, %v3107_v14  ;;  %12613 = vst [vmem:[#allocation49_spill] sm:$0xff] %v10170_v32  ;;  %v3433_v43 = vsub.f32 1.0, %v3432_v40  ;;  %v3442_v9 = vand.u32 2147483648, %v10129_v54  ;;  %v2060_v53 = vadd.f32 %v9907_v42, %v12614_v7  ;;  %v3084_v44 = vpop.f32.mrf.mxu0 }
 0x1cb   : > { %v10173_v58 = vrot.slane %v3725_v61, 7  ;;  %vm3437_vm6 = vweird.f32 %v8108_v11  ;;  %v2799_v10 = vadd.f32 %v10132_v37, %v2185_v0  ;;  %v3664_v6 = vmul.f32 %v3621_v22, %v10170_v32  ;;  %v3623_v37 = vpop.permute.xlu2 %3622 }
 0x1cc   : > { %v3284_v52 = vadd.f32 %v10168_v33, %v3248_v62  ;;  %v3434_v15 = vmul.f32 %v8108_v11, %v3433_v43  ;;  %vm3438_vm8 = vmor %vm3436_vm5, %vm3437_vm6  ;;  %vm3441_vm13 = vcmp.eq.f32.partialorder %v3440_v55, 8.507059e+37  ;;  %v3443_v22 = vor.u32 1.1754944e-38, %v3442_v9 }
 0x1cd   : > { %v2577_v19 = vpop.f32.mrf.mxu2  ;;  %v3734_v28 = vsel %vm12615_vm12, %v10117_v30, %v10173_v58  ;;  %v3680_v43 = vpack.c.bf16 %v3664_v6, %v3664_v6  ;;  %v3249_v54 = vadd.f32 %v10146_v2, %v2799_v10  ;;  %v3457_v6 = vand.u32 2147483648, %v10160_v26 }
 0x1ce   : > { %v8110_v48 = vpop.eup %8109  ;;  %v7604_v50 = vmul.f32 -1.442695, %v3284_v52  ;;  %v2604_v14 = vadd.f32 %v2577_v19, %v2060_v53  ;;  %3749 = vrot.lane.b32.xlu2 %v3734_v28, %s8352_s30  ;;  %v3435_v42 = vadd.f32 %v8108_v11, %v3434_v15  ;;  %v2777_v55 = vpop.f32.mrf.mxu3  ;;  %v2800_v15 = vadd.f32 %v2775_v20, %v9969_v38 }
 0x1cf   : > { %v8112_v51 = vpop.eup %8111  ;;  %v10187_v40 = vadd.f32 1.0, %v8110_v48  ;;  %v3712_v19 = vunpack.c.l.b16 %v3680_v43  ;;  %vm3451_vm12 = vweird.f32 %v10160_v26  ;;  %v3455_v38 = vand.u32 2147483647, %v10160_v26 }
 0x1d0   : > { %8113 = vpow2.f32 %v7604_v50  ;;  %v3108_v61 = vadd.f32 %v3081_v8, %v2604_v14  ;;  %v3439_v30 = vsel %vm3438_vm8, %v8108_v11, %v3435_v42  ;;  %v3447_v62 = vmul.f32 %v8112_v51, %v10160_v26 }
 0x1d1   : > { %8115 = vrcp.f32 %v10187_v40  ;;  %v10192_v0 = vsel %vm3441_vm13, %v3443_v22, %v3439_v30  ;;  %vm3452_vm6 = vweird.f32 %v8112_v51  ;;  %vm3456_vm8 = vcmp.eq.f32.partialorder %v3455_v38, 8.507059e+37 }
 0x1d2   : > { %12616 = vst [vmem:[#allocation32_spill] sm:$0xff] %v10192_v0  ;;  %v10196_v7 = vadd.f32 %v10016_v23, %v3108_v61  ;;  %v3665_v53 = vmul.f32 %v3623_v37, %v10192_v0  ;;  %v3448_v52 = vsub.f32 1.0, %v3447_v62  ;;  %v1929_v37 = vadd.f32 %v9909_v47, %v9977_v25  ;;  %v3227_v61 = vpop.f32.mrf.mxu1  ;;  %v3086_v30 = vpop.f32.mrf.mxu0  ;;  %vm3453_vm5 = vmor %vm3451_vm12, %vm3452_vm6 }
 0x1d3   : > { %vm12619_vm13 = vcmask 1040384   ;;  %vm3466_vm12 = vweird.f32 %v10187_v40 }
 0x1d4   : > { %v3285_v9 = vadd.f32 %v10196_v7, %v3249_v54  ;;  %v3681_v8 = vpack.c.bf16 %v3665_v53, %v3665_v53  ;;  %v3449_v11 = vmul.f32 %v8112_v51, %v3448_v52  ;;  %v3250_v54 = vadd.f32 %v3225_v3, %v2800_v15  ;;  %v12617_v52 = vld [vmem:[#allocation40_spill] sm:$0xff] }
 0x1d5   : > { %v2580_v28 = vpop.f32.mrf.mxu2  ;;  %v3458_v53 = vor.u32 1.1754944e-38, %v3457_v6  ;;  %v2062_v26 = vadd.f32 %v9956_v24, %v12617_v52  ;;  %v3472_v15 = vand.u32 2147483648, %v10187_v40 }
 0x1d6   : > { %v8114_v48 = vpop.eup %8113  ;;  %v7605_v2 = vmul.f32 -1.442695, %v3285_v9  ;;  %v3713_v10 = vunpack.c.l.b16 %v3681_v8  ;;  %v2605_v50 = vadd.f32 %v2580_v28, %v9935_v63  ;;  %v3450_v14 = vadd.f32 %v8112_v51, %v3449_v11  ;;  %v3625_v11 = vpop.permute.xlu0 %3624 }
 0x1d7   : > { %v8116_v42 = vpop.eup %8115  ;;  %v10205_v22 = vadd.f32 1.0, %v8114_v48  ;;  %v2187_v9 = vadd.f32 %v9896_v27, %v1929_v37  ;;  %v3470_v27 = vand.u32 2147483647, %v10187_v40 }
 0x1d8   : > { %8117 = vpow2.f32 %v7605_v2  ;;  %v3726_v20 = vpack.c.b16 %v3713_v10, %v3712_v19  ;;  %v3109_v62 = vadd.f32 %v3084_v44, %v2605_v50  ;;  %v3454_v63 = vsel %vm3453_vm5, %v8112_v51, %v3450_v14  ;;  %v2780_v19 = vpop.f32.mrf.mxu3 }
 0x1d9   : > { %8119 = vrcp.f32 %v10205_v22  ;;  %v3462_v43 = vmul.f32 %v8116_v42, %v10187_v40  ;;  %v10221_v51 = vsel %vm3456_vm8, %v3458_v53, %v3454_v63  ;;  %vm3467_vm6 = vweird.f32 %v8116_v42  ;;  %v8011_v53 = vld [vmem:[%s12124_s4] sm:$0xff] }
 0x1da   : > { %v10212_v47 = vrot.slane %v3726_v20, 7  ;;  %v10215_v25 = vadd.f32 %v10016_v23, %v3109_v62  ;;  %12618 = vst [vmem:[#allocation40_spill] sm:$0xff] %v10221_v51  ;;  %v2801_v48 = vadd.f32 %v2777_v55, %v2187_v9  ;;  %v3666_v37 = vmul.f32 %v3625_v11, %v10221_v51  ;;  %v3627_v20 = vpop.permute.xlu1 %3626  ;;  %vm3468_vm5 = vmor %vm3466_vm12, %vm3467_vm6  ;;  %v3230_v55 = vpop.f32.mrf.mxu1  ;;  %3833 = vmatpush.bf16.msrb.mxu2 %v8011_v53 }
 0x1db   : > { %v3463_v44 = vsub.f32 1.0, %v3462_v43  ;;  %v3473_v62 = vor.u32 1.1754944e-38, %v3472_v15  ;;  %v3089_v43 = vpop.f32.mrf.mxu0  ;;  %vm3471_vm8 = vcmp.eq.f32.partialorder %v3470_v27, 8.507059e+37  ;;  %vm3481_vm6 = vweird.f32 %v10205_v22 }
 0x1dc   : > { %v3286_v8 = vadd.f32 %v10215_v25, %v3250_v54  ;;  %v3736_v3 = vsel %vm12619_vm13, %v10173_v58, %v10212_v47  ;;  %v3251_v52 = vadd.f32 %v3227_v61, %v2801_v48  ;;  %v3682_v9 = vpack.c.bf16 %v3666_v37, %v3666_v37 }
 0x1dd   : > { %v2582_v28 = vpop.f32.mrf.mxu2  ;;  %3751 = vrot.lane.b32.xlu2 %v3736_v3, %s8352_s30  ;;  %v3464_v24 = vmul.f32 %v8116_v42, %v3463_v44  ;;  %v1934_v3 = vadd.f32 %v9958_v16, %v10001_v49  ;;  %v2802_v61 = vadd.f32 %v2780_v19, %v9994_v1 }
 0x1de   : > { %v8118_v6 = vpop.eup %8117  ;;  %v7606_v2 = vmul.f32 -1.442695, %v3286_v8  ;;  %v2606_v10 = vadd.f32 %v2582_v28, %v2062_v26  ;;  %v3487_v8 = vand.u32 2147483648, %v10205_v22 }
 0x1df   : > { %v8120_v50 = vpop.eup %8119  ;;  %v10229_v14 = vadd.f32 1.0, %v8118_v6  ;;  %v3465_v58 = vadd.f32 %v8116_v42, %v3464_v24  ;;  %v3485_v24 = vand.u32 2147483647, %v10205_v22 }
 0x1e0   : > { %8121 = vpow2.f32 %v7606_v2  ;;  %v3110_v38 = vadd.f32 %v3086_v30, %v2606_v10  ;;  %v3477_v63 = vmul.f32 %v8120_v50, %v10205_v22  ;;  %vm3482_vm13 = vweird.f32 %v8120_v50 }
 0x1e1   : > { %8123 = vrcp.f32 %v10229_v14  ;;  %v3469_v54 = vsel %vm3468_vm5, %v8116_v42, %v3465_v58  ;;  %v3714_v58 = vunpack.c.l.b16 %v3682_v9  ;;  %vm3483_vm12 = vmor %vm3481_vm6, %vm3482_vm13  ;;  %v3488_v16 = vor.u32 1.1754944e-38, %v3487_v8  ;;  %v12624_v8 = vld [vmem:[#allocation43_spill] sm:$0xff] }
 0x1e2   : > { %v10239_v40 = vadd.f32 %v10016_v23, %v3110_v38  ;;  %v10241_v30 = vsel %vm3471_vm8, %v3473_v62, %v3469_v54  ;;  %v3478_v26 = vsub.f32 1.0, %v3477_v63  ;;  %v2782_v38 = vpop.f32.mrf.mxu3  ;;  %vm3486_vm5 = vcmp.eq.f32.partialorder %v3485_v24, 8.507059e+37  ;;  %v3629_v63 = vpop.permute.xlu0 %3628 }
 0x1e3   : > { %12621 = vst [vmem:[#allocation51_spill] sm:$0xff] %v10241_v30  ;;  %v3667_v44 = vmul.f32 %v3627_v20, %v10241_v30  ;;  %v3252_v62 = vadd.f32 %v3230_v55, %v2802_v61  ;;  %v2064_v55 = vadd.f32 %v9985_v13, %v12624_v8  ;;  %vm12625_vm13 = vcmask 1040384   ;;  %v10756_v30 = vld [vmem:[%s8434_s25 + $0x18] sm:$0xff] }
 0x1e4   : > { %12620 = vst [vmem:[#allocation50_spill] sm:$0xff] %v10239_v40  ;;  %v3287_v42 = vadd.f32 %v10239_v40, %v3251_v52  ;;  %v3479_v11 = vmul.f32 %v8120_v50, %v3478_v26  ;;  %v2189_v52 = vadd.f32 %v9948_v39, %v1934_v3  ;;  %v3232_v26 = vpop.f32.mrf.mxu1  ;;  %vm3496_vm6 = vweird.f32 %v10229_v14 }
 0x1e5   : > { %v3683_v15 = vpack.c.bf16 %v3667_v44, %v3667_v44  ;;  %v2585_v28 = vpop.f32.mrf.mxu2  ;;  %v3502_v44 = vand.u32 2147483648, %v10229_v14 }
 0x1e6   : > { %v8122_v27 = vpop.eup %8121  ;;  %v7607_v6 = vmul.f32 -1.442695, %v3287_v42  ;;  %v2607_v48 = vadd.f32 %v2585_v28, %v9973_v4  ;;  %v3480_v2 = vadd.f32 %v8120_v50, %v3479_v11  ;;  %v2803_v61 = vadd.f32 %v2782_v38, %v2189_v52 }
 0x1e7   : > { %v8124_v10 = vpop.eup %8123  ;;  %v10252_v37 = vadd.f32 1.0, %v8122_v27  ;;  %v3715_v20 = vunpack.c.l.b16 %v3683_v15 }
 0x1e8   : > { %8125 = vpow2.f32 %v7607_v6  ;;  %v3111_v1 = vadd.f32 %v3089_v43, %v2607_v48  ;;  %v3484_v49 = vsel %vm3483_vm12, %v8120_v50, %v3480_v2  ;;  %v3492_v19 = vmul.f32 %v8124_v10, %v10229_v14  ;;  %v3091_v50 = vpop.f32.mrf.mxu0  ;;  %v3631_v2 = vpop.permute.xlu1 %3630 }
 0x1e9   : > { %8127 = vrcp.f32 %v10252_v37  ;;  %v3727_v4 = vpack.c.b16 %v3715_v20, %v3714_v58  ;;  %v10260_v54 = vsel %vm3486_vm5, %v3488_v16, %v3484_v49  ;;  %v3500_v43 = vand.u32 2147483647, %v10229_v14  ;;  %v8015_v14 = vld [vmem:[%s12124_s4 + $0x20] sm:$0xff] }
 0x1ea   : > { %v10258_v22 = vadd.f32 %v10016_v23, %v3111_v1  ;;  %12623 = vst [vmem:[#allocation53_spill] sm:$0xff] %v10260_v54  ;;  %v3493_v53 = vsub.f32 1.0, %v3492_v19  ;;  %vm3497_vm8 = vweird.f32 %v8124_v10  ;;  %v3668_v15 = vmul.f32 %v3629_v63, %v10260_v54  ;;  %v2785_v16 = vpop.f32.mrf.mxu3  ;;  %v8013_v19 = vld [vmem:[%s12124_s4 + $0x10] sm:$0xff]  ;;  %4269 = vmatpush.bf16.msrb.mxu0 %v8015_v14 }
 0x1eb   : > { %v10263_v9 = vrot.slane %v3727_v4, 7  ;;  %vm3498_vm12 = vmor %vm3496_vm6, %vm3497_vm8  ;;  %vm3501_vm5 = vcmp.eq.f32.partialorder %v3500_v43, 8.507059e+37  ;;  %v3503_v58 = vor.u32 1.1754944e-38, %v3502_v44  ;;  %v3253_v4 = vadd.f32 %v3232_v26, %v2803_v61  ;;  %4080 = vmatpush.bf16.msrb.mxu3 %v8013_v19 }
 0x1ec   : > { %12622 = vst [vmem:[#allocation52_spill] sm:$0xff] %v10258_v22  ;;  %v3288_v42 = vadd.f32 %v10258_v22, %v3252_v62  ;;  %v3494_v11 = vmul.f32 %v8124_v10, %v3493_v53  ;;  %v3684_v1 = vpack.c.bf16 %v3668_v15, %v3668_v15  ;;  %v2804_v8 = vadd.f32 %v2785_v16, %v10007_v31  ;;  %v12631_v16 = vld [vmem:[#allocation46_spill] sm:$0xff]  ;;  %v12782_v22 = vld [vmem:[#allocation9_spill] sm:$0xff] }
 0x1ed   : > { %v2587_v28 = vpop.f32.mrf.mxu2  ;;  %v3738_v39 = vsel %vm12625_vm13, %v10212_v47, %v10263_v9  ;;  %vm3511_vm13 = vweird.f32 %v10252_v37  ;;  %v3515_v31 = vand.u32 2147483647, %v10252_v37 }
 0x1ee   : > { %v8126_v3 = vpop.eup %8125  ;;  %v7608_v24 = vmul.f32 -1.442695, %v3288_v42  ;;  %v2608_v27 = vadd.f32 %v2587_v28, %v2064_v55  ;;  %3753 = vrot.lane.b32.xlu2 %v3738_v39, %s8352_s30  ;;  %v3495_v6 = vadd.f32 %v8124_v10, %v3494_v11  ;;  %v3235_v55 = vpop.f32.mrf.mxu1  ;;  %v3716_v42 = vunpack.c.l.b16 %v3684_v1 }
 0x1ef   : > { %v10276_v13 = vpop.eup %8127  ;;  %v10278_v48 = vadd.f32 1.0, %v8126_v3  ;;  %v3517_v11 = vand.u32 2147483648, %v10252_v37  ;;  %v2066_v1 = vadd.f32 %v10004_v34, %v12631_v16 }
 0x1f0   : > { %8129 = vpow2.f32 %v7608_v24  ;;  %v3112_v38 = vadd.f32 %v3091_v50, %v2608_v27  ;;  %v3499_v20 = vsel %vm3498_vm12, %v8124_v10, %v3495_v6  ;;  %v3507_v47 = vmul.f32 %v10276_v13, %v10252_v37  ;;  %v8017_v10 = vld [vmem:[%s12124_s4 + $0x30] sm:$0xff]  ;;  %v3094_v52 = vpop.f32.mrf.mxu0 }
 0x1f1   : > { %8131 = vrcp.f32 %v10278_v48  ;;  %v10283_v49 = vsel %vm3501_vm5, %v3503_v58, %v3499_v20  ;;  %4528 = vmatpush.bf16.msrb.mxu1 %v8017_v10  ;;  %vm3512_vm8 = vweird.f32 %v10276_v13  ;;  %v1939_v27 = vadd.f32 %v9987_v41, %v10009_v29 }
 0x1f2   : > { %12626 = vst [vmem:[#allocation43_spill] sm:$0xff] %v10283_v49  ;;  %v10295_v62 = vadd.f32 %v10016_v23, %v3112_v38  ;;  %v3669_v63 = vmul.f32 %v3631_v2, %v10283_v49  ;;  %v3508_v53 = vsub.f32 1.0, %v3507_v47  ;;  %vm10313_vm6 = vmor %vm3511_vm13, %vm3512_vm8  ;;  %v3254_v29 = vadd.f32 %v3235_v55, %v2804_v8  ;;  %v2787_v19 = vpop.f32.mrf.mxu3 }
 0x1f3   : > { %v3518_v47 = vor.u32 1.1754944e-38, %v3517_v11  ;;  %v2191_v14 = vadd.f32 %v9980_v18, %v1939_v27  ;;  %vm3516_vm12 = vcmp.eq.f32.partialorder %v3515_v31, 8.507059e+37  ;;  %vm12633_vm5 = vcmask 1040384  }
 0x1f4   : > { %12627 = vst [vmem:[#allocation54_spill] sm:$0xff] %v10295_v62  ;;  %v3289_v50 = vadd.f32 %v10295_v62, %v3253_v4  ;;  %v3685_v43 = vpack.c.bf16 %v3669_v63, %v3669_v63  ;;  %v3509_v44 = vmul.f32 %v10276_v13, %v3508_v53  ;;  %v3530_v18 = vand.u32 2147483647, %v10278_v48 }
 0x1f5   : > { %v2590_v26 = vpop.f32.mrf.mxu2  ;;  %v2805_v8 = vadd.f32 %v2787_v19, %v2191_v14  ;;  %vm3526_vm13 = vweird.f32 %v10278_v48 }
 0x1f6   : > { %v8130_v61 = vpop.eup %8129  ;;  %v7609_v15 = vmul.f32 -1.442695, %v3289_v50  ;;  %v3717_v28 = vunpack.c.l.b16 %v3685_v43  ;;  %v2609_v39 = vadd.f32 %v2590_v26, %v9998_v36  ;;  %v3510_v3 = vadd.f32 %v10276_v13, %v3509_v44 }
 0x1f7   : > { %v8132_v24 = vpop.eup %8131  ;;  %v10307_v6 = vadd.f32 1.0, %v8130_v61  ;;  %v3237_v61 = vpop.f32.mrf.mxu1 }
 0x1f8   : > { %8133 = vpow2.f32 %v7609_v15  ;;  %v3728_v2 = vpack.c.b16 %v3717_v28, %v3716_v42  ;;  %v3113_v58 = vadd.f32 %v3094_v52, %v2609_v39  ;;  %v3514_v41 = vsel %vm10313_vm6, %v10276_v13, %v3510_v3  ;;  %v3633_v13 = vpop.permute.xlu0 %3632  ;;  %v3096_v34 = vpop.f32.mrf.mxu0 }
 0x1f9   : > { %8135 = vrcp.f32 %v10307_v6  ;;  %v3522_v36 = vmul.f32 %v8132_v24, %v10278_v48  ;;  %v10331_v63 = vsel %vm3516_vm12, %v3518_v47, %v3514_v41  ;;  %v3532_v52 = vand.u32 2147483648, %v10278_v48  ;;  %v3635_v39 = vpop.permute.xlu1 %3634 }
 0x1fa   : > { %v10322_v20 = vrot.slane %v3728_v2, 7  ;;  %v10325_v37 = vadd.f32 %v10016_v23, %v3113_v58  ;;  %12632 = vst [vmem:[#allocation46_spill] sm:$0xff] %v10331_v63  ;;  %vm3527_vm8 = vweird.f32 %v8132_v24  ;;  %vm3531_vm12 = vcmp.eq.f32.partialorder %v3530_v18, 8.507059e+37 }
 0x1fb   : > { %v3523_v10 = vsub.f32 1.0, %v3522_v36  ;;  %vm3528_vm6 = vmor %vm3526_vm13, %vm3527_vm8  ;;  %v3533_v3 = vor.u32 1.1754944e-38, %v3532_v52  ;;  %v3255_v2 = vadd.f32 %v3237_v61, %v2805_v8  ;;  %vm3541_vm8 = vweird.f32 %v10307_v6 }
 0x1fc   : > { %12630 = vst [vmem:[#allocation55_spill] sm:$0xff] %v10325_v37  ;;  %v3290_v4 = vadd.f32 %v10325_v37, %v3254_v29  ;;  %v3740_v53 = vsel %vm12633_vm5, %v10263_v9, %v10322_v20  ;;  %v3670_v9 = vmul.f32 %v3633_v13, %v10331_v63  ;;  %v10738_v63 = vld [vmem:[%s8434_s25 + $0x10] sm:$0xff] }
 0x1fd   : > { %v2592_v50 = vpop.f32.mrf.mxu2  ;;  %3755 = vrot.lane.b32.xlu2 %v3740_v53, %s8352_s30  ;;  %v3524_v43 = vmul.f32 %v8132_v24, %v3523_v10 }
 0x1fe   : > { %v8134_v44 = vpop.eup %8133  ;;  %v7610_v55 = vmul.f32 -1.442695, %v3290_v4  ;;  %v2610_v42 = vadd.f32 %v2592_v50, %v2066_v1  ;;  %v3686_v48 = vpack.c.bf16 %v3670_v9, %v3670_v9  ;;  %v3547_v1 = vand.u32 2147483648, %v10307_v6 }
 0x1ff   : > { %v8136_v26 = vpop.eup %8135  ;;  %v10339_v11 = vadd.f32 1.0, %v8134_v44  ;;  %v3525_v15 = vadd.f32 %v8132_v24, %v3524_v43 }
 0x200   : > { %8137 = vpow2.f32 %v7610_v55  ;;  %v3114_v28 = vadd.f32 %v3096_v34, %v2610_v42  ;;  %v3537_v27 = vmul.f32 %v8136_v26, %v10307_v6  ;;  %vm3542_vm5 = vweird.f32 %v8136_v26  ;;  %v3637_v8 = vpop.permute.xlu0 %3636 }
 0x201   : > { %8139 = vrcp.f32 %v10339_v11  ;;  %v3529_v31 = vsel %vm3528_vm6, %v8132_v24, %v3525_v15  ;;  %v3718_v13 = vunpack.c.l.b16 %v3686_v48  ;;  %vm3543_vm13 = vmor %vm3541_vm8, %vm3542_vm5  ;;  %v3548_v43 = vor.u32 1.1754944e-38, %v3547_v1 }
 0x202   : > { %v10347_v58 = vadd.f32 %v10016_v23, %v3114_v28  ;;  %v10349_v38 = vsel %vm3531_vm12, %v3533_v3, %v3529_v31  ;;  %v3538_v41 = vsub.f32 1.0, %v3537_v27  ;;  %v3545_v23 = vand.u32 2147483647, %v10307_v6  ;;  %v3639_v27 = vpop.permute.xlu1 %3638 }
 0x203   : > { %12635 = vst [vmem:[#allocation57_spill] sm:$0xff] %v10349_v38  ;;  %v3671_v36 = vmul.f32 %v3635_v39, %v10349_v38  ;;  %v3562_v6 = vand.u32 2147483648, %v10339_v11  ;;  %v3560_v61 = vand.u32 2147483647, %v10339_v11  ;;  %vm12637_vm5 = vcmask 1040384  }
 0x204   : > { %12634 = vst [vmem:[#allocation56_spill] sm:$0xff] %v10347_v58  ;;  %v3291_v29 = vadd.f32 %v10347_v58, %v3255_v2  ;;  %v3539_v47 = vmul.f32 %v8136_v26, %v3538_v41  ;;  %vm3546_vm6 = vcmp.eq.f32.partialorder %v3545_v23, 8.507059e+37  ;;  %vm3556_vm8 = vweird.f32 %v10339_v11  ;;  %v8021_v58 = vld [vmem:[%s12126_s6] sm:$0xff] }
 0x205   : > { %v3687_v16 = vpack.c.bf16 %v3671_v36, %v3671_v36  ;;  %v3563_v31 = vor.u32 1.1754944e-38, %v3562_v6 }
 0x206   : > { %v8138_v14 = vpop.eup %8137  ;;  %v7611_v24 = vmul.f32 -1.442695, %v3291_v29  ;;  %v3540_v19 = vadd.f32 %v8136_v26, %v3539_v47 }
 0x207   : > { %v8140_v10 = vpop.eup %8139  ;;  %v3354_v4 = vadd.f32 1.0, %v8138_v14  ;;  %v3719_v53 = vunpack.c.l.b16 %v3687_v16 }
 0x208   : > { %8141 = vpow2.f32 %v7611_v24  ;;  %v3544_v52 = vsel %vm3543_vm13, %v8136_v26, %v3540_v19  ;;  %v3552_v50 = vmul.f32 %v8140_v10, %v10339_v11  ;;  %vm3557_vm12 = vweird.f32 %v8140_v10 }
 0x209   : > { %8143 = vrcp.f32 %v3354_v4  ;;  %v3729_v34 = vpack.c.b16 %v3719_v53, %v3718_v13  ;;  %v10357_v55 = vsel %vm3546_vm6, %v3548_v43, %v3544_v52  ;;  %vm3558_vm13 = vmor %vm3556_vm8, %vm3557_vm12  ;;  %vm3561_vm6 = vcmp.eq.f32.partialorder %v3560_v61, 8.507059e+37  ;;  %v3641_v61 = vpop.permute.xlu0 %3640 }
 0x20a   : > { %v3553_v18 = vsub.f32 1.0, %v3552_v50  ;;  %12636 = vst [vmem:[#allocation58_spill] sm:$0xff] %v10357_v55  ;;  %v3672_v15 = vmul.f32 %v3637_v8, %v10357_v55  ;;  %vm12639_vm12 = vmmov %vm12637_vm5  ;;  %vm3571_vm8 = vweird.f32 %v3354_v4 }
 0x20b   : > { %v3741_v44 = vrot.slane %v3729_v34, 7  ;;  %v3575_v34 = vand.u32 2147483647, %v3354_v4 }
 0x20c   : > { %v3554_v42 = vmul.f32 %v8140_v10, %v3553_v18  ;;  %v3688_v36 = vpack.c.bf16 %v3672_v15, %v3672_v15 }
 0x20d   : > { %v3742_v26 = vsel %vm12637_vm5, %v10322_v20, %v3741_v44  ;;  %v8020_v20 = vld [vmem:[%s12124_s4 + $0x48] sm:$0xff] }
 0x20e   : > { %v8142_v9 = vpop.eup %8141  ;;  %3757 = vrot.lane.b32.xlu0 %v3742_v26, %s8352_s30  ;;  %v3555_v28 = vadd.f32 %v8140_v10, %v3554_v42  ;;  %4732 = vmatpush.bf16.msra.mxu2 %v8020_v20  ;;  %v3720_v1 = vunpack.c.l.b16 %v3688_v36  ;;  %v3643_v20 = vpop.permute.xlu1 %3642 }
 0x20f   : > { %v8144_v39 = vpop.eup %8143  ;;  %v3355_v3 = vadd.f32 1.0, %v8142_v9 }
 0x210   : > { %v3559_v2 = vsel %vm3558_vm13, %v8140_v10, %v3555_v28  ;;  %v3567_v41 = vmul.f32 %v8144_v39, %v3354_v4  ;;  %vm3572_vm5 = vweird.f32 %v8144_v39  ;;  %v3577_v10 = vand.u32 2147483648, %v3354_v4 }
 0x211   : > { %v10366_v48 = vsel %vm3561_vm6, %v3563_v31, %v3559_v2  ;;  %8145 = vrcp.f32 %v3355_v3  ;;  %vm12641_vm13 = vcmask 261120   ;;  %vm3573_vm6 = vmor %vm3571_vm8, %vm3572_vm5  ;;  %v3592_v15 = vand.u32 2147483648, %v3355_v3 }
 0x212   : > { %12638 = vst [vmem:[#allocation59_spill] sm:$0xff] %v10366_v48  ;;  %v3673_v29 = vmul.f32 %v3639_v27, %v10366_v48  ;;  %v3568_v47 = vsub.f32 1.0, %v3567_v41  ;;  %v3578_v8 = vor.u32 1.1754944e-38, %v3577_v10  ;;  %v3590_v4 = vand.u32 2147483647, %v3355_v3 }
 0x213   : > { %v3593_v36 = vor.u32 1.1754944e-38, %v3592_v15 }
 0x214   : > { %v3689_v11 = vpack.c.bf16 %v3673_v29, %v3673_v29  ;;  %v3569_v16 = vmul.f32 %v8144_v39, %v3568_v47  ;;  %vm3591_vm8 = vcmp.eq.f32.partialorder %v3590_v4, 8.507059e+37 }
 0x216   : > { %v3721_v14 = vunpack.c.l.b16 %v3689_v11  ;;  %v3748_v24 = vpop.permute.xlu2 %3747  ;;  %v3570_v23 = vadd.f32 %v8144_v39, %v3569_v16 }
 0x217   : > { %v10373_v19 = vsel %vm12639_vm12, 0, %v3748_v24  ;;  %v8146_v13 = vpop.eup %8145  ;;  %vm3576_vm12 = vcmp.eq.f32.partialorder %v3575_v34, 8.507059e+37 }
 0x218   : > { %v3730_v53 = vpack.c.b16 %v3721_v14, %v3720_v1  ;;  %v3778_v50 = vsel %vm8525_vm1, %v10373_v19, 0  ;;  %v3574_v18 = vsel %vm3573_vm6, %v8144_v39, %v3570_v23  ;;  %v3582_v6 = vmul.f32 %v8146_v13, %v3355_v3 }
 0x219   : > { %7620 = vmatmul.msk.bf16.vlgmr.msrb.gmra.mxu2 %vm12641_vm13, %v3778_v50  ;;  %v10380_v26 = vsel %vm3576_vm12, %v3578_v8, %v3574_v18  ;;  %vm3587_vm1 = vweird.f32 %v8146_v13  ;;  %v3955_v39 = vsel %vm8566_vm11, %v10373_v19, 0  ;;  %v4209_v23 = vrot.slane %v10373_v19, 1 }
 0x21a   : > { %v3743_v43 = vrot.slane %v3730_v53, 7  ;;  %12643 = vst [vmem:[#allocation6_spill] sm:$0xff] %v10380_v26  ;;  %v3583_v9 = vsub.f32 1.0, %v3582_v6  ;;  %v3674_v27 = vmul.f32 %v3641_v61, %v10380_v26  ;;  %v3972_v47 = vshll.u32 %v3955_v39, 16 }
 0x21b   : > { %v3970_v53 = vshrl.u32 %v3955_v39, 16  ;;  %vm12655_vm6 = vcmask 1040384  }
 0x21c   : > { %v3744_v42 = vsel %vm12642_vm3, %v3741_v44, %v3743_v43  ;;  %v3584_v28 = vmul.f32 %v8146_v13, %v3583_v9  ;;  %v4391_v44 = vsel %vm9226_vm14, %v10373_v19, 0  ;;  %vm3586_vm3 = vweird.f32 %v3355_v3 }
 0x21d   : > { %3759 = vrot.lane.b32.xlu1 %v3744_v42, %s8352_s30  ;;  %vm3588_vm5 = vmor %vm3586_vm3, %vm3587_vm1  ;;  %v4406_v11 = vshrl.u32 %v4391_v44, 16  ;;  %v3690_v16 = vpack.c.bf16 %v3674_v27, %v3674_v27  ;;  %v4409_v24 = vshll.u32 %v4391_v44, 16  ;;  %v3974_v52 = vrot.slane %v3972_v47, 1  ;;  %v12649_v27 = vld [vmem:[#allocation14_spill] sm:$0xff] }
 0x21e   : > { %v3585_v41 = vadd.f32 %v8146_v13, %v3584_v28  ;;  %vm12650_vm11 = vnez %v12649_v27  ;;  %vm12651_vm14 = vcmask 1046528   ;;  %vm12657_vm1 = vsmask.f32 6400 }
 0x21f   : > { %v4408_v50 = vrot.slane %v4406_v11, 1  ;;  %v3722_v3 = vunpack.c.l.b16 %v3690_v16  ;;  %v4411_v9 = vrot.slane %v4409_v24, 2  ;;  %v3975_v44 = vor.u32 %v3974_v52, %v3970_v53  ;;  %v12659_v53 = vld [vmem:[#allocation18_spill] sm:$0xff] }
 0x220   : > { %v3589_v29 = vsel %vm3588_vm5, %v8146_v13, %v3585_v41  ;;  %vm12660_vm5 = vnez %v12659_v53 }
 0x221   : > { %v10390_v1 = vsel %vm3591_vm8, %v3593_v36, %v3589_v29  ;;  %v4412_v47 = vor.u32 %v4411_v9, %v4408_v50 }
 0x222   : > { %12646 = vst [vmem:[#allocation8_spill] sm:$0xff] %v10390_v1  ;;  %v3675_v14 = vmul.f32 %v3643_v20, %v10390_v1 }
 0x224   : > { %v3691_v10 = vpack.c.bf16 %v3675_v14, %v3675_v14 }
 0x226   : > { %v3723_v18 = vunpack.c.l.b16 %v3691_v10 }
 0x228   : > { %v10394_v34 = vpop.permute.xlu2 %3749  ;;  %v3731_v2 = vpack.c.b16 %v3723_v18, %v3722_v3  ;;  %v12661_v3 = vld [vmem:[#allocation41_spill] sm:$0xff] }
 0x229   : > { %v3956_v8 = vsel %vm8594_vm4, %v10394_v34, 0  ;;  %v4210_v6 = vrot.slane %v10394_v34, 1  ;;  %v4392_v61 = vsel %vm9237_vm2, %v10394_v34, 0  ;;  %v3779_v31 = vsel %vm12650_vm11, %v10394_v34, 0  ;;  %vm12652_vm4 = vmmov %vm12641_vm13  ;;  %v12663_v18 = vld [vmem:[#allocation17_spill] sm:$0xff] }
 0x22a   : > { %v3977_v15 = vshll.u32 %v3956_v8, 16  ;;  %v4414_v28 = vshrl.u32 %v4392_v61, 16  ;;  %v4417_v4 = vshll.u32 %v4392_v61, 16  ;;  %7621 = vmatmul.msk.bf16.gmra.mxu2 %vm12652_vm4, %v3779_v31  ;;  %vm12653_vm13 = vmmov %vm12652_vm4  ;;  %v3745_v29 = vrot.slane %v3731_v2, 7 }
 0x22b   : > { %v4211_v39 = vsel %vm12651_vm14, %v4209_v23, %v4210_v6  ;;  %vm12654_vm2 = vsmask.f32 7424  ;;  %vm12656_vm12 = vmmov %vm12652_vm4  ;;  %v3981_v50 = vshrl.u32 %v3956_v8, 16  ;;  %vm12662_vm8 = vnez %v12661_v3 }
 0x22c   : > { %v4416_v41 = vrot.slane %v4414_v28, 1  ;;  %v4419_v20 = vrot.slane %v4417_v4, 2  ;;  %7660 = vmatmul.msk.bf16.vlgmr.msrb.gmra.mxu0 %vm12653_vm13, %v4211_v39  ;;  %v3979_v36 = vrot.slane %v3977_v15, 1  ;;  %3763 = vrot.lane.b32.xlu0 %v3745_v29, %s8352_s30  ;;  %v3746_v14 = vsel %vm12655_vm6, %v3743_v43, %v3745_v29  ;;  %vm12658_vm3 = vmmov %vm12652_vm4  ;;  %v12672_v29 = vld [vmem:[#allocation19_spill] sm:$0xff] }
 0x22d   : > { %3761 = vrot.lane.b32.xlu2 %v3746_v14, %s8352_s30  ;;  %vm12664_vm11 = vnez %v12663_v18  ;;  %vm12665_vm4 = vmmov %vm12658_vm3 }
 0x22e   : > { %v3980_v11 = vsel %vm12654_vm2, %v3975_v44, %v3979_v36  ;;  %v4420_v16 = vor.u32 %v4419_v20, %v4416_v41  ;;  %v3983_v28 = vor.u32 %v3981_v50, %v3979_v36  ;;  %vm12666_vm13 = vmmov %vm12658_vm3  ;;  %v12670_v41 = vld [vmem:[#allocation23_spill] sm:$0xff] }
 0x22f   : > { %7640 = vmatmul.msk.bf16.vlgmr.msrb.gmra.mxu3 %vm12656_vm12, %v3980_v11  ;;  %vm12667_vm6 = vmmov %vm12658_vm3  ;;  %v12674_v11 = vld [vmem:[#allocation44_spill] sm:$0xff] }
 0x230   : > { %v4421_v24 = vsel %vm12657_vm1, %v4412_v47, %v4420_v16  ;;  %vm12668_vm12 = vmmov %vm12657_vm1 }
 0x231   : > { %7680 = vmatmul.msk.bf16.vlgmr.msrb.gmra.mxu1 %vm12658_vm3, %v4421_v24  ;;  %vm12669_vm1 = vmmov %vm12658_vm3  ;;  %vm12671_vm3 = vnez %v12670_v41 }
 0x237   : > { %v10416_v23 = vpop.permute.xlu2 %3751 }
 0x238   : > { %v4212_v10 = vrot.slane %v10416_v23, 1  ;;  %v3957_v52 = vsel %vm12660_vm5, %v10416_v23, 0  ;;  %v4393_v43 = vsel %vm12662_vm8, %v10416_v23, 0  ;;  %v3780_v13 = vsel %vm12664_vm11, %v10416_v23, 0  ;;  %vm12676_vm11 = vmmov %vm12651_vm14 }
 0x239   : > { %v3985_v42 = vshll.u32 %v3957_v52, 16  ;;  %v4423_v61 = vshrl.u32 %v4393_v43, 16  ;;  %v4426_v9 = vshll.u32 %v4393_v43, 16  ;;  %vm12673_vm5 = vnez %v12672_v29 }
 0x23a   : > { %v4213_v15 = vsel %vm12651_vm14, %v4210_v6, %v4212_v10  ;;  %7622 = vmatmul.msk.bf16.gmra.mxu2 %vm12665_vm4, %v3780_v13  ;;  %v8019_v6 = vld [vmem:[%s12124_s4 + $0x40] sm:$0xff]  ;;  %vm12675_vm8 = vnez %v12674_v11  ;;  %v3989_v14 = vshrl.u32 %v3957_v52, 16  ;;  %vm12677_vm14 = vmmov %vm12669_vm1 }
 0x23b   : > { %v3987_v4 = vrot.slane %v3985_v42, 1  ;;  %v4425_v27 = vrot.slane %v4423_v61, 1  ;;  %v4428_v31 = vrot.slane %v4426_v9, 2  ;;  %4733 = vmatpush.bf16.msra.mxu2 %v8019_v6  ;;  %vm12678_vm4 = vmmov %vm12669_vm1 }
 0x23c   : > { %7661 = vmatmul.msk.bf16.gmra.mxu0 %vm12666_vm13, %v4213_v15  ;;  %vm12679_vm13 = vmmov %vm12654_vm2 }
 0x23d   : > { %v3988_v8 = vsel %vm12654_vm2, %v3983_v28, %v3987_v4  ;;  %v4429_v39 = vor.u32 %v4428_v31, %v4425_v27  ;;  %v3991_v43 = vor.u32 %v3989_v14, %v3987_v4  ;;  %vm12680_vm2 = vmmov %vm12669_vm1  ;;  %v12683_v28 = vld [vmem:[#allocation11_spill] sm:$0xff] }
 0x23f   : > { %7641 = vmatmul.msk.bf16.gmra.mxu3 %vm12667_vm6, %v3988_v8  ;;  %v4430_v2 = vsel %vm12668_vm12, %v4420_v16, %v4429_v39  ;;  %vm12681_vm6 = vmmov %vm12668_vm12  ;;  %v12686_v8 = vld [vmem:[#allocation7_spill] sm:$0xff] }
 0x240   : > { %vm12682_vm12 = vmmov %vm12669_vm1 }
 0x241   : > { %7681 = vmatmul.msk.bf16.gmra.mxu1 %vm12669_vm1, %v4430_v2  ;;  %vm12684_vm1 = vnez %v12683_v28 }
 0x248   : > { %v10438_v44 = vpop.permute.xlu2 %3753 }
 0x249   : > { %v3781_v20 = vsel %vm12671_vm3, %v10438_v44, 0  ;;  %v4214_v36 = vrot.slane %v10438_v44, 1  ;;  %v3958_v47 = vsel %vm12673_vm5, %v10438_v44, 0  ;;  %v4394_v16 = vsel %vm12675_vm8, %v10438_v44, 0  ;;  %vm12688_vm8 = vmmov %vm12676_vm11 }
 0x24a   : > { %v3993_v24 = vshll.u32 %v3958_v47, 16  ;;  %v4432_v53 = vshrl.u32 %v4394_v16, 16  ;;  %v4435_v50 = vshll.u32 %v4394_v16, 16  ;;  %7623 = vmatmul.msk.bf16.gmra.mxu2 %vm12677_vm14, %v3781_v20  ;;  %v3997_v27 = vshrl.u32 %v3958_v47, 16  ;;  %vm12690_vm14 = vmmov %vm12680_vm2 }
 0x24b   : > { %v4215_v3 = vsel %vm12676_vm11, %v4212_v10, %v4214_v36  ;;  %vm12685_vm3 = vnez %v12504_v12  ;;  %vm12687_vm5 = vnez %v12686_v8  ;;  %vm12689_vm11 = vmmov %vm12680_vm2 }
 0x24c   : > { %7662 = vmatmul.msk.bf16.gmra.mxu0 %vm12678_vm4, %v4215_v3  ;;  %v3995_v18 = vrot.slane %v3993_v24, 1  ;;  %v4434_v13 = vrot.slane %v4432_v53, 1  ;;  %v4437_v42 = vrot.slane %v4435_v50, 2  ;;  %vm12691_vm4 = vmmov %vm12679_vm13 }
 0x24e   : > { %v3996_v61 = vsel %vm12679_vm13, %v3991_v43, %v3995_v18  ;;  %v4438_v9 = vor.u32 %v4437_v42, %v4434_v13  ;;  %v3999_v29 = vor.u32 %v3997_v27, %v3995_v18  ;;  %vm12692_vm13 = vmmov %vm12680_vm2  ;;  %v12697_v43 = vld [vmem:[#allocation12_spill] sm:$0xff] }
 0x24f   : > { %7642 = vmatmul.msk.bf16.gmra.mxu3 %vm12680_vm2, %v3996_v61  ;;  %vm12693_vm2 = vmmov %vm12681_vm6 }
 0x250   : > { %v4439_v52 = vsel %vm12681_vm6, %v4429_v39, %v4438_v9  ;;  %vm12694_vm6 = vmmov %vm12689_vm11 }
 0x251   : > { %7682 = vmatmul.msk.bf16.gmra.mxu1 %vm12682_vm12, %v4439_v52 }
 0x257   : > { %v10457_v15 = vpop.permute.xlu2 %3755 }
 0x258   : > { %v4216_v10 = vrot.slane %v10457_v15, 1  ;;  %v3959_v4 = vsel %vm12684_vm1, %v10457_v15, 0  ;;  %v4395_v31 = vsel %vm12685_vm3, %v10457_v15, 0  ;;  %v3782_v2 = vsel %vm12687_vm5, %v10457_v15, 0  ;;  %vm12700_vm3 = vmmov %vm12694_vm6 }
 0x259   : > { %v4001_v39 = vshll.u32 %v3959_v4, 16  ;;  %v4441_v6 = vshrl.u32 %v4395_v31, 16  ;;  %v4444_v41 = vshll.u32 %v4395_v31, 16  ;;  %vm12698_vm1 = vnez %v12697_v43  ;;  %vm12701_vm5 = vmmov %vm12688_vm8 }
 0x25a   : > { %v4217_v20 = vsel %vm12688_vm8, %v4214_v36, %v4216_v10  ;;  %7624 = vmatmul.msk.bf16.gmra.mxu2 %vm12689_vm11, %v3782_v2  ;;  %v12695_v36 = vld [vmem:[#allocation13_spill] sm:$0xff]  ;;  %v4005_v61 = vshrl.u32 %v3959_v4, 16  ;;  %vm12702_vm8 = vmmov %vm12700_vm3 }
 0x25b   : > { %v4003_v11 = vrot.slane %v4001_v39, 1  ;;  %v4443_v16 = vrot.slane %v4441_v6, 1  ;;  %v4446_v14 = vrot.slane %v4444_v41, 2  ;;  %vm12696_vm12 = vnez %v12695_v36  ;;  %vm12703_vm11 = vmmov %vm12691_vm4 }
 0x25c   : > { %7663 = vmatmul.msk.bf16.gmra.mxu0 %vm12690_vm14, %v4217_v20  ;;  %vm12704_vm14 = vmmov %vm12700_vm3 }
 0x25d   : > { %v4004_v12 = vsel %vm12691_vm4, %v3999_v29, %v4003_v11  ;;  %v4447_v47 = vor.u32 %v4446_v14, %v4443_v16  ;;  %v4007_v31 = vor.u32 %v4005_v61, %v4003_v11  ;;  %vm12706_vm4 = vmmov %vm12700_vm3  ;;  %v12707_v29 = vld [vmem:[#allocation16_spill] sm:$0xff] }
 0x25e   : > { %v12709_v16 = vld [vmem:[#allocation20_spill] sm:$0xff] }
 0x25f   : > { %7643 = vmatmul.msk.bf16.gmra.mxu3 %vm12692_vm13, %v4004_v12  ;;  %v4448_v24 = vsel %vm12693_vm2, %v4438_v9, %v4447_v47  ;;  %vm12708_vm13 = vnez %v12707_v29 }
 0x261   : > { %7683 = vmatmul.msk.bf16.gmra.mxu1 %vm12694_vm6, %v4448_v24  ;;  %vm12712_vm6 = vmmov %vm12700_vm3 }
 0x280   : > { %v10476_v53 = vpop.permute.xlu0 %3757 }
 0x281   : > { %v3783_v50 = vsel %vm12696_vm12, %v10476_v53, 0  ;;  %v4218_v3 = vrot.slane %v10476_v53, 1  ;;  %v3960_v18 = vsel %vm12698_vm1, %v10476_v53, 0  ;;  %v4396_v42 = vsel %vm9642_vm10, %v10476_v53, 0  ;;  %vm12705_vm10 = vmmov %vm12693_vm2 }
 0x282   : > { %7625 = vmatmul.msk.bf16.gmra.mxu2 %vm12700_vm3, %v3783_v50  ;;  %v4009_v9 = vshll.u32 %v3960_v18, 16  ;;  %v4450_v52 = vshrl.u32 %v4396_v42, 16  ;;  %v4453_v28 = vshll.u32 %v4396_v42, 16  ;;  %vm12710_vm2 = vnez %v12709_v16  ;;  %vm12713_vm12 = vmmov %vm12701_vm5  ;;  %v12722_v16 = vld [vmem:[#allocation22_spill] sm:$0xff] }
 0x283   : > { %v4219_v27 = vsel %vm12701_vm5, %v4216_v10, %v4218_v3  ;;  %v4013_v36 = vshrl.u32 %v3960_v18, 16  ;;  %vm12714_vm1 = vmmov %vm12700_vm3 }
 0x284   : > { %7664 = vmatmul.msk.bf16.gmra.mxu0 %vm12702_vm8, %v4219_v27  ;;  %v4011_v8 = vrot.slane %v4009_v9, 1  ;;  %v4452_v2 = vrot.slane %v4450_v52, 1  ;;  %v4455_v39 = vrot.slane %v4453_v28, 2  ;;  %vm12715_vm3 = vmmov %vm12703_vm11 }
 0x285   : > { %vm12716_vm5 = vmmov %vm12714_vm1 }
 0x286   : > { %v4012_v6 = vsel %vm12703_vm11, %v4007_v31, %v4011_v8  ;;  %v4456_v41 = vor.u32 %v4455_v39, %v4452_v2  ;;  %v4015_v42 = vor.u32 %v4013_v36, %v4011_v8  ;;  %vm12718_vm8 = vmmov %vm12714_vm1  ;;  %v12720_v39 = vld [vmem:[#allocation24_spill] sm:$0xff] }
 0x287   : > { %7644 = vmatmul.msk.bf16.gmra.mxu3 %vm12704_vm14, %v4012_v6  ;;  %v10513_v31 = vpop.permute.xlu2 %3761  ;;  %vm12721_vm11 = vnez %v12720_v39  ;;  %vm12723_vm14 = vnez %v12722_v16  ;;  %v12734_v39 = vld [vmem:[#allocation25_spill] sm:$0xff] }
 0x288   : > { %v4457_v20 = vsel %vm12705_vm10, %v4447_v47, %v4456_v41  ;;  %v3962_v6 = vsel %vm12721_vm11, %v10513_v31, 0  ;;  %v3785_v12 = vsel %vm12723_vm14, %v10513_v31, 0  ;;  %vm12741_vm14 = vmmov %vm12714_vm1 }
 0x289   : > { %7684 = vmatmul.msk.bf16.gmra.mxu1 %vm12706_vm4, %v4457_v20  ;;  %vm12726_vm4 = vmmov %vm12714_vm1 }
 0x28f   : > { %v10495_v4 = vpop.permute.xlu1 %3759 }
 0x290   : > { %v3784_v10 = vsel %vm12708_vm13, %v10495_v4, 0  ;;  %v4220_v11 = vrot.slane %v10495_v4, 1  ;;  %v3961_v14 = vsel %vm12710_vm2, %v10495_v4, 0  ;;  %v4397_v24 = vsel %vm9760_vm9, %v10495_v4, 0  ;;  %vm12717_vm9 = vmmov %vm12705_vm10 }
 0x291   : > { %v4017_v47 = vshll.u32 %v3961_v14, 16  ;;  %v4459_v50 = vshrl.u32 %v4397_v24, 16  ;;  %v4462_v43 = vshll.u32 %v4397_v24, 16  ;;  %v4222_v24 = vrot.slane %v10513_v31, 1  ;;  %vm12724_vm10 = vmmov %vm12714_vm1 }
 0x292   : > { %7626 = vmatmul.msk.bf16.gmra.mxu2 %vm12712_vm6, %v3784_v10  ;;  %v4221_v13 = vsel %vm12713_vm12, %v4218_v3, %v4220_v11  ;;  %v4398_v3 = vsel %vm9845_vm15, %v10513_v31, 0  ;;  %v4021_v10 = vshrl.u32 %v3961_v14, 16  ;;  %vm12725_vm15 = vmmov %vm12713_vm12  ;;  %vm12727_vm13 = vcmask 1040384  }
 0x293   : > { %v4019_v61 = vrot.slane %v4017_v47, 1  ;;  %v4461_v9 = vrot.slane %v4459_v50, 1  ;;  %v4464_v52 = vrot.slane %v4462_v43, 2  ;;  %v4468_v20 = vshrl.u32 %v4398_v3, 16  ;;  %vm12728_vm2 = vmmov %vm12715_vm3 }
 0x294   : > { %7665 = vmatmul.msk.bf16.gmra.mxu0 %vm12714_vm1, %v4221_v13  ;;  %v4471_v29 = vshll.u32 %v4398_v3, 16  ;;  %v4223_v13 = vsel %vm12725_vm15, %v4220_v11, %v4222_v24  ;;  %vm12729_vm6 = vmmov %vm12714_vm1  ;;  %v12732_v3 = vld [vmem:[#allocation39_spill] sm:$0xff] }
 0x295   : > { %v4020_v28 = vsel %vm12715_vm3, %v4015_v42, %v4019_v61  ;;  %v4465_v27 = vor.u32 %v4464_v52, %v4461_v9  ;;  %v4023_v36 = vor.u32 %v4021_v10, %v4019_v61  ;;  %v4470_v47 = vrot.slane %v4468_v20, 1  ;;  %vm12730_vm12 = vmmov %vm12717_vm9 }
 0x296   : > { %v4473_v50 = vrot.slane %v4471_v29, 2  ;;  %vm12733_vm3 = vnez %v12732_v3  ;;  %v12736_v29 = vld [vmem:[#allocation38_spill] sm:$0xff]  ;;  %vm12740_vm11 = vmmov %vm12725_vm15 }
 0x297   : > { %7645 = vmatmul.msk.bf16.gmra.mxu3 %vm12716_vm5, %v4020_v28  ;;  %v4466_v18 = vsel %vm12717_vm9, %v4456_v41, %v4465_v27  ;;  %v4025_v41 = vshll.u32 %v3962_v6, 16  ;;  %vm12735_vm5 = vnez %v12734_v39  ;;  %vm12737_vm9 = vnez %v12736_v29  ;;  %vm12743_vm15 = vmmov %vm12714_vm1 }
 0x298   : > { %v4474_v28 = vor.u32 %v4473_v50, %v4470_v47  ;;  %v4650_v10 = vsel %vm12737_vm9, %v10373_v19, 0 }
 0x299   : > { %7685 = vmatmul.msk.bf16.gmra.mxu1 %vm12718_vm8, %v4466_v18  ;;  %v4027_v9 = vrot.slane %v4025_v41, 1  ;;  %v4673_v47 = vrot.slane %v4650_v10, 2  ;;  %vm12739_vm8 = vmmov %vm12714_vm1  ;;  %v4029_v18 = vshrl.u32 %v3962_v6, 16 }
 0x29a   : > { %v4475_v61 = vsel %vm12730_vm12, %v4465_v27, %v4474_v28 }
 0x29b   : > { %v4028_v52 = vsel %vm12728_vm2, %v4023_v36, %v4027_v9 }
 0x29c   : > { %v3835_v8 = vpop.f32.mrf.mxu2 }
 0x29d   : > { %3891 = vrot.lane.b32.xlu1 %v3835_v8, %s8353_s12  ;;  %v4651_v8 = vsel %vm12733_vm3, %v10394_v34, 0 }
 0x29e   : > { %v3764_v43 = vpop.permute.xlu0 %3763  ;;  %v4674_v16 = vrot.slane %v4651_v8, 2 }
 0x29f   : > { %v10532_v14 = vsel %vm12727_vm13, %v3764_v43, 0  ;;  %vm12745_vm13 = vmmov %vm12714_vm1 }
 0x2a0   : > { %v4399_v11 = vsel %vm9911_vm0, %v10532_v14, 0  ;;  %v3963_v20 = vsel %vm12735_vm5, %v10532_v14, 0  ;;  %v4224_v50 = vrot.slane %v10532_v14, 1  ;;  %vm12738_vm0 = vcmask 1045504   ;;  %vm12753_vm5 = vmmov %vm12739_vm8 }
 0x2a1   : > { %v4477_v27 = vshrl.u32 %v4399_v11, 16  ;;  %v4480_v41 = vshll.u32 %v4399_v11, 16  ;;  %vm12752_vm3 = vmmov %vm12738_vm0 }
 0x2a2   : > { %7627 = vmatmul.msk.bf16.gmra.mxu2 %vm12724_vm10, %v3785_v12  ;;  %v4033_v12 = vshll.u32 %v3963_v20, 16  ;;  %v4225_v11 = vsel %vm12740_vm11, %v4222_v24, %v4224_v50  ;;  %vm12742_vm10 = vmmov %vm12728_vm2  ;;  %v12746_v24 = vld [vmem:[#allocation42_spill] sm:$0xff]  ;;  %v12750_v50 = vld [vmem:[#allocation45_spill] sm:$0xff] }
 0x2a3   : > { %v4479_v34 = vrot.slane %v4477_v27, 1  ;;  %vm12747_vm2 = vnez %v12746_v24 }
 0x2a4   : > { %7666 = vmatmul.msk.bf16.gmra.mxu0 %vm12726_vm4, %v4223_v13  ;;  %v3837_v42 = vpop.f32.mrf.mxu2  ;;  %v4482_v13 = vrot.slane %v4480_v41, 2  ;;  %vm12744_vm4 = vmmov %vm12730_vm12 }
 0x2a5   : > { %3893 = vrot.lane.b32.xlu2 %v3837_v42, %s8353_s12  ;;  %vm12749_vm12 = vmmov %vm12714_vm1 }
 0x2a6   : > { %v4483_v3 = vor.u32 %v4482_v13, %v4479_v34 }
 0x2a7   : > { %7646 = vmatmul.msk.bf16.gmra.mxu3 %vm12729_vm6, %v4028_v52  ;;  %v4675_v52 = vsel %vm12738_vm0, %v4673_v47, %v4674_v16  ;;  %vm12748_vm6 = vmmov %vm12738_vm0 }
 0x2a8   : > { %v4484_v20 = vsel %vm12744_vm4, %v4474_v28, %v4483_v3  ;;  %vm12763_vm4 = vmmov %vm12738_vm0 }
 0x2a9   : > { %v4271_v2 = vpop.f32.mrf.mxu0  ;;  %7686 = vmatmul.msk.bf16.gmra.mxu1 %vm12714_vm1, %v4475_v61  ;;  %v4035_v61 = vrot.slane %v4033_v12, 1  ;;  %vm12751_vm1 = vnez %v12750_v50 }
 0x2ad   : > { %4327 = vrot.lane.b32.xlu2 %v4271_v2, %s8353_s12  ;;  %v3840_v43 = vpop.f32.mrf.mxu2  ;;  %v4031_v2 = vor.u32 %v4029_v18, %v4027_v9  ;;  %v4652_v9 = vsel %vm12747_vm2, %v10416_v23, 0  ;;  %vm12766_vm2 = vmmov %vm12738_vm0 }
 0x2ae   : > { %v4530_v36 = vpop.f32.mrf.mxu1  ;;  %v4676_v27 = vrot.slane %v4652_v9, 2 }
 0x2af   : > { %4586 = vrot.lane.b32.xlu1 %v4530_v36, %s8353_s12  ;;  %v4036_v8 = vsel %vm12742_vm10, %v4031_v2, %v4035_v61  ;;  %vm12760_vm10 = vmmov %vm12753_vm5 }
 0x2b0   : > { %v4677_v12 = vsel %vm12748_vm6, %v4674_v16, %v4676_v27  ;;  %vm12767_vm6 = vmmov %vm12753_vm5 }
 0x2b1   : > { %v4273_v42 = vpop.f32.mrf.mxu0 }
 0x2b2   : > { %v4082_v19 = vpop.f32.mrf.mxu3  ;;  %4329 = vrot.lane.b32.xlu0 %v4273_v42, %s8353_s12  ;;  %7700 = vmatmul.msk.bf16.vlgmr.msra.gmra.mxu2 %vm12739_vm8, %v4675_v52  ;;  %vm12756_vm8 = vmmov %vm12753_vm5 }
 0x2b4   : > { %7667 = vmatmul.msk.bf16.gmra.mxu0 %vm12741_vm14, %v4225_v11  ;;  %vm12759_vm14 = vmmov %vm12738_vm0 }
 0x2b5   : > { %3895 = vrot.lane.b32.xlu2 %v3840_v43, %s8353_s12  ;;  %v3842_v39 = vpop.f32.mrf.mxu2  ;;  %v4653_v43 = vsel %vm12751_vm1, %v10438_v44, 0  ;;  %vm12771_vm1 = vmmov %vm12753_vm5 }
 0x2b6   : > { %v4532_v10 = vpop.f32.mrf.mxu1  ;;  %v4678_v13 = vrot.slane %v4653_v43, 2 }
 0x2b7   : > { %7647 = vmatmul.msk.bf16.gmra.mxu3 %vm12743_vm15, %v4036_v8 }
 0x2b8   : > { %v4679_v42 = vsel %vm12752_vm3, %v4676_v27, %v4678_v13  ;;  %vm12773_vm3 = vmmov %vm12771_vm1 }
 0x2b9   : > { %v4276_v29 = vpop.f32.mrf.mxu0  ;;  %7687 = vmatmul.msk.bf16.gmra.mxu1 %vm12745_vm13, %v4484_v20  ;;  %vm12764_vm13 = vmmov %vm12753_vm5 }
 0x2ba   : > { %v4084_v6 = vpop.f32.mrf.mxu3  ;;  %4138 = vrot.lane.b32.xlu0 %v4082_v19, %s8353_s12  ;;  %v12754_v19 = vld [vmem:[#allocation31_spill] sm:$0xff] }
 0x2bb   : > { %4140 = vrot.lane.b32.xlu1 %v4084_v6, %s8353_s12  ;;  %vm12755_vm9 = vnez %v12754_v19  ;;  %v12757_v6 = vld [vmem:[#allocation26_spill] sm:$0xff] }
 0x2bc   : > { %v4654_v18 = vsel %vm12755_vm9, %v10457_v15, 0  ;;  %vm12758_vm11 = vnez %v12757_v6  ;;  %vm12775_vm9 = vmmov %vm12771_vm1 }
 0x2bd   : > { %4588 = vrot.lane.b32.xlu2 %v4532_v10, %s8353_s12  ;;  %v3845_v28 = vpop.f32.mrf.mxu2  ;;  %v4680_v2 = vrot.slane %v4654_v18, 2  ;;  %v4655_v24 = vsel %vm12758_vm11, %v10476_v53, 0  ;;  %v12761_v53 = vld [vmem:[#allocation21_spill] sm:$0xff] }
 0x2be   : > { %v4535_v47 = vpop.f32.mrf.mxu1  ;;  %v4682_v9 = vrot.slane %v4655_v24, 2  ;;  %vm12762_vm15 = vnez %v12761_v53 }
 0x2c1   : > { %v4278_v41 = vpop.f32.mrf.mxu0 }
 0x2c2   : > { %3897 = vrot.lane.b32.xlu0 %v3842_v39, %s8353_s12  ;;  %v4087_v36 = vpop.f32.mrf.mxu3  ;;  %7701 = vmatmul.msk.bf16.gmra.mxu2 %vm12749_vm12, %v4677_v12  ;;  %v4681_v39 = vsel %vm12738_vm0, %v4678_v13, %v4680_v2  ;;  %vm12770_vm12 = vmmov %vm12738_vm0 }
 0x2c3   : > { %4333 = vrot.lane.b32.xlu1 %v4278_v41, %s8353_s12  ;;  %v4683_v41 = vsel %vm12759_vm14, %v4680_v2, %v4682_v9  ;;  %vm12776_vm0 = vmmov %vm12771_vm1 }
 0x2c4   : > { %vm12784_vm11 = vmmov %vm12776_vm0 }
 0x2c5   : > { %4590 = vrot.lane.b32.xlu2 %v4535_v47, %s8353_s12  ;;  %v3847_v16 = vpop.f32.mrf.mxu2  ;;  %v4656_v47 = vsel %vm12762_vm15, %v10495_v4, 0  ;;  %vm12785_vm14 = vmmov %vm12776_vm0 }
 0x2c6   : > { %v4537_v52 = vpop.f32.mrf.mxu1  ;;  %v4684_v50 = vrot.slane %v4656_v47, 2  ;;  %vm12788_vm15 = vmmov %vm12776_vm0 }
 0x2c9   : > { %v4281_v23 = vpop.f32.mrf.mxu0 }
 0x2ca   : > { %4331 = vrot.lane.b32.xlu0 %v4276_v29, %s8353_s12  ;;  %v4089_v34 = vpop.f32.mrf.mxu3 }
 0x2cb   : > { %4142 = vrot.lane.b32.xlu1 %v4087_v36, %s8353_s12 }
 0x2cd   : > { %4144 = vrot.lane.b32.xlu2 %v4089_v34, %s8353_s12  ;;  %v3850_v44 = vpop.f32.mrf.mxu2 }
 0x2ce   : > { %v4540_v3 = vpop.f32.mrf.mxu1 }
 0x2d1   : > { %v4283_v61 = vpop.f32.mrf.mxu0 }
 0x2d2   : > { %3899 = vrot.lane.b32.xlu0 %v3845_v28, %s8353_s12  ;;  %7702 = vmatmul.msk.bf16.gmra.mxu2 %vm12753_vm5, %v4679_v42  ;;  %v4092_v11 = vpop.f32.mrf.mxu3  ;;  %vm12774_vm5 = vmmov %vm12771_vm1 }
 0x2d3   : > { %3901 = vrot.lane.b32.xlu1 %v3847_v16, %s8353_s12  ;;  %v4685_v16 = vsel %vm12763_vm4, %v4682_v9, %v4684_v50  ;;  %vm12789_vm4 = vmmov %vm12776_vm0 }
 0x2d5   : > { %4337 = vrot.lane.b32.xlu2 %v4283_v61, %s8353_s12  ;;  %v3852_v8 = vpop.f32.mrf.mxu2 }
 0x2d6   : > { %v4542_v15 = vpop.f32.mrf.mxu1 }
 0x2d9   : > { %v4286_v20 = vpop.f32.mrf.mxu0 }
 0x2da   : > { %4592 = vrot.lane.b32.xlu0 %v4537_v52, %s8353_s12  ;;  %v4094_v29 = vpop.f32.mrf.mxu3 }
 0x2db   : > { %4335 = vrot.lane.b32.xlu1 %v4281_v23, %s8353_s12 }
 0x2dd   : > { %4146 = vrot.lane.b32.xlu2 %v4092_v11, %s8353_s12  ;;  %v3855_v10 = vpop.f32.mrf.mxu2 }
 0x2de   : > { %v4545_v12 = vpop.f32.mrf.mxu1 }
 0x2e1   : > { %v4288_v27 = vpop.f32.mrf.mxu0 }
 0x2e2   : > { %4594 = vrot.lane.b32.xlu0 %v4540_v3, %s8353_s12  ;;  %7703 = vmatmul.msk.bf16.gmra.mxu2 %vm12756_vm8, %v4681_v39  ;;  %v4097_v36 = vpop.f32.mrf.mxu3  ;;  %vm12780_vm8 = vmmov %vm12776_vm0 }
 0x2e3   : > { %3903 = vrot.lane.b32.xlu1 %v3850_v44, %s8353_s12  ;;  %v4657_v44 = vsel %vm9887_vm7, %v10513_v31, 0  ;;  %v12768_v31 = vld [vmem:[#allocation29_spill] sm:$0xff] }
 0x2e4   : > { %v4686_v18 = vrot.slane %v4657_v44, 2  ;;  %vm12769_vm7 = vnez %v12768_v31 }
 0x2e5   : > { %3905 = vrot.lane.b32.xlu2 %v3852_v8, %s8353_s12  ;;  %v3857_v28 = vpop.f32.mrf.mxu2 }
 0x2e6   : > { %v4547_v23 = vpop.f32.mrf.mxu1  ;;  %v4687_v3 = vsel %vm12766_vm2, %v4684_v50, %v4686_v18  ;;  %vm12791_vm2 = vmmov %vm12776_vm0 }
 0x2ea   : > { %4148 = vrot.lane.b32.xlu0 %v4094_v29, %s8353_s12  ;;  %v4099_v34 = vpop.f32.mrf.mxu3 }
 0x2eb   : > { %4596 = vrot.lane.b32.xlu1 %v4542_v15, %s8353_s12 }
 0x2ed   : > { %4339 = vrot.lane.b32.xlu2 %v4286_v20, %s8353_s12  ;;  %v4658_v20 = vsel %vm12769_vm7, %v10532_v14, 0  ;;  %vm12793_vm7 = vmmov %vm12776_vm0 }
 0x2ee   : > { %v4688_v6 = vrot.slane %v4658_v20, 2  ;;  %v12772_v20 = vmov 0  }
 0x2f2   : > { %4341 = vrot.lane.b32.xlu0 %v4288_v27, %s8353_s12  ;;  %7704 = vmatmul.msk.bf16.gmra.mxu2 %vm12760_vm10, %v4683_v41  ;;  %v4689_v41 = vsel %vm12770_vm12, %v4686_v18, %v4688_v6  ;;  %vm12787_vm10 = vmmov %vm12776_vm0 }
 0x2f3   : > { %3907 = vrot.lane.b32.xlu1 %v3855_v10, %s8353_s12  ;;  %vm12797_vm12 = vmmov %vm12776_vm0 }
 0x2f5   : > { %3909 = vrot.lane.b32.xlu2 %v3857_v28, %s8353_s12 }
 0x2fa   : > { %4150 = vrot.lane.b32.xlu0 %v4097_v36, %s8353_s12 }
 0x2fb   : > { %4598 = vrot.lane.b32.xlu1 %v4545_v12, %s8353_s12 }
 0x2fd   : > { %4600 = vrot.lane.b32.xlu2 %v4547_v23, %s8353_s12 }
 0x2ff   : > { %v10623_v11 = vpop.permute.xlu2 %3893 }
 0x301   : > { %v4291_v43 = vpop.f32.mrf.mxu0 }
 0x302   : > { %7705 = vmatmul.msk.bf16.gmra.mxu2 %vm12764_vm13, %v4685_v16  ;;  %vm12790_vm13 = vmmov %vm12776_vm0 }
 0x303   : > { %4152 = vrot.lane.b32.xlu1 %v4099_v34, %s8353_s12  ;;  %v8026_v34 = vld [vmem:[%s12126_s6 + $0x18] sm:$0xff] }
 0x304   : > { %5109 = vmatpush.bf16.msra.mxu3 %v8026_v34 }
 0x305   : > { %v3860_v13 = vpop.f32.mrf.mxu2  ;;  %4343 = vrot.lane.b32.xlu2 %v4291_v43, %s8353_s12 }
 0x306   : > { %v4550_v42 = vpop.f32.mrf.mxu1 }
 0x307   : > { %v10635_v15 = vpop.permute.xlu2 %4327 }
 0x309   : > { %v4293_v52 = vpop.f32.mrf.mxu0 }
 0x30a   : > { %v4102_v4 = vpop.f32.mrf.mxu3  ;;  %4345 = vrot.lane.b32.xlu0 %v4293_v52, %s8353_s12 }
 0x30b   : > { %3911 = vrot.lane.b32.xlu1 %v3860_v13, %s8353_s12 }
 0x30d   : > { %v3862_v19 = vpop.f32.mrf.mxu2 }
 0x30e   : > { %3913 = vrot.lane.b32.xlu2 %v3862_v19, %s8353_s12  ;;  %v4552_v2 = vpop.f32.mrf.mxu1  ;;  %v8025_v19 = vld [vmem:[%s12126_s6 + $0x10] sm:$0xff] }
 0x30f   : > { %v10640_v27 = vpop.permute.xlu1 %3891  ;;  %v10644_v14 = vpop.permute.xlu2 %3895  ;;  %5110 = vmatpush.bf16.msra.mxu3 %v8025_v19 }
 0x311   : > { %v4296_v24 = vpop.f32.mrf.mxu0 }
 0x312   : > { %v4104_v8 = vpop.f32.mrf.mxu3  ;;  %4154 = vrot.lane.b32.xlu0 %v4102_v4, %s8353_s12  ;;  %7706 = vmatmul.msk.bf16.gmra.mxu2 %vm12767_vm6, %v4687_v3  ;;  %vm12792_vm6 = vmmov %vm12776_vm0 }
 0x313   : > { %4602 = vrot.lane.b32.xlu1 %v4550_v42, %s8353_s12  ;;  %5111 = vmatmul.bf16.vlgmr.msra.gmra.mxu3 %v12772_v20 }
 0x315   : > { %v10629_v39 = vpop.f32.mrf.mxu2 }
 0x316   : > { %4604 = vrot.lane.b32.xlu2 %v4552_v2, %s8353_s12  ;;  %v4555_v10 = vpop.f32.mrf.mxu1 }
 0x317   : > { %v10655_v23 = vpop.permute.xlu2 %4588 }
 0x319   : > { %v4298_v42 = vpop.f32.mrf.mxu0 }
 0x31a   : > { %v4107_v29 = vpop.f32.mrf.mxu3 }
 0x31b   : > { %4156 = vrot.lane.b32.xlu1 %v4104_v8, %s8353_s12  ;;  %4158 = vrot.lane.b32.xlu0 %v4107_v29, %s8353_s12 }
 0x31d   : > { %v3867_v9 = vpop.f32.mrf.mxu2 }
 0x31e   : > { %4347 = vrot.lane.b32.xlu2 %v4296_v24, %s8353_s12  ;;  %v4557_v12 = vpop.f32.mrf.mxu1 }
 0x31f   : > { %v10665_v13 = vpop.permute.xlu2 %4590 }
 0x321   : > { %v10649_v36 = vpop.permute.xlu1 %4586  ;;  %v4301_v2 = vpop.f32.mrf.mxu0 }
 0x322   : > { %7707 = vmatmul.msk.bf16.gmra.mxu2 %vm12771_vm1, %v4689_v41  ;;  %v4109_v4 = vpop.f32.mrf.mxu3  ;;  %vm12798_vm1 = vmmov %vm12776_vm0 }
 0x324   : > { %v10651_v53 = vpop.permute.xlu0 %4329 }
 0x325   : > { %v10646_v28 = vpop.f32.mrf.mxu2 }
 0x326   : > { %4608 = vrot.lane.b32.xlu2 %v4557_v12, %s8353_s12  ;;  %v4560_v48 = vpop.f32.mrf.mxu1 }
 0x327   : > { %v10676_v18 = vpop.permute.xlu2 %4144 }
 0x329   : > { %v4303_v41 = vpop.f32.mrf.mxu0 }
 0x32a   : > { %v4112_v8 = vpop.f32.mrf.mxu3 }
 0x32c   : > { %v10659_v43 = vpop.permute.xlu0 %4138 }
 0x32d   : > { %v10653_v47 = vpop.f32.mrf.mxu2  ;;  %v10657_v50 = vpop.permute.xlu1 %4140 }
 0x32f   : > { %v10685_v6 = vpop.permute.xlu2 %4337 }
 0x334   : > { %v10669_v44 = vpop.permute.xlu0 %3897 }
 0x335   : > { %v4735_v16 = vpop.f32.mrf.mxu2  ;;  %v10667_v52 = vpop.permute.xlu1 %4333 }
 0x336   : > { %4791 = vrot.lane.b32.xlu0 %v4735_v16, %s8353_s12  ;;  %v8022_v16 = vld [vmem:[%s12126_s6 + $0x8] sm:$0xff] }
 0x337   : > { %5170 = vmatpush.bf16.msra.mxu0 %v8022_v16  ;;  %v4114_v16 = vpop.f32.mrf.mxu3 }
 0x33b   : > { %5171 = vmatpush.bf16.msra.mxu0 %v8021_v58  ;;  %v3939_v58 = vadd.f32 %v10640_v27, %v12782_v22 }
 0x33c   : > { %v10683_v29 = vpop.permute.xlu0 %4331 }
 0x33d   : > { %v4737_v61 = vpop.f32.mrf.mxu2  ;;  %v10678_v3 = vpop.permute.xlu1 %4142  ;;  %v4186_v62 = vadd.f32 %v10659_v43, %v3939_v58 }
 0x33e   : > { %4349 = vrot.lane.b32.xlu0 %v4298_v42, %s8353_s12  ;;  %4793 = vrot.lane.b32.xlu1 %v4737_v61, %s8353_s12  ;;  %v10702_v61 = vpop.permute.xlu2 %4146 }
 0x33f   : > { %5172 = vmatmul.bf16.vlgmr.msra.gmra.mxu0 %v12772_v20  ;;  %v4375_v40 = vadd.f32 %v10635_v15, %v4186_v62 }
 0x341   : > { %v4634_v62 = vadd.f32 %v10649_v36, %v4375_v40  ;;  %v3942_v40 = vadd.f32 %v10669_v44, %v10046_v60 }
 0x343   : > { %v4189_v60 = vadd.f32 %v10676_v18, %v3942_v40  ;;  %v8030_v18 = vld [vmem:[%s12126_s6 + $0x28] sm:$0xff] }
 0x344   : > { %v10695_v34 = vpop.permute.xlu0 %3899  ;;  %5387 = vmatpush.bf16.msrb.mxu3 %v8030_v18 }
 0x345   : > { %v4740_v31 = vpop.f32.mrf.mxu2  ;;  %v10687_v12 = vpop.permute.xlu1 %3901 }
 0x346   : > { %4162 = vrot.lane.b32.xlu0 %v4112_v8, %s8353_s12  ;;  %4160 = vrot.lane.b32.xlu1 %v4109_v4, %s8353_s12  ;;  %v10698_v4 = vld [vmem:[%s8434_s25] sm:$0xff] }
 0x347   : > { %7720 = vmatmul.msk.bf16.gmra.mxu3 %vm12773_vm3, %v10698_v4  ;;  %vm12803_vm3 = vmmov %vm12776_vm0 }
 0x34c   : > { %v10708_v8 = vpop.permute.xlu0 %4592 }
 0x34d   : > { %v4742_v24 = vpop.f32.mrf.mxu2  ;;  %v10706_v19 = vpop.permute.xlu1 %4335 }
 0x34e   : > { %4795 = vrot.lane.b32.xlu1 %v4740_v31, %s8353_s12  ;;  %4797 = vrot.lane.b32.xlu2 %v4742_v24, %s8353_s12  ;;  %v10714_v24 = vpop.permute.xlu2 %3905 }
 0x34f   : > { %4353 = vrot.lane.b32.xlu0 %v4303_v41, %s8353_s12  ;;  %5177 = vmatmul.bf16.gmra.mxu0 %v12772_v20 }
 0x354   : > { %v10723_v1 = vpop.permute.xlu0 %4594 }
 0x355   : > { %v4745_v42 = vpop.f32.mrf.mxu2  ;;  %v10716_v41 = vpop.permute.xlu1 %3903 }
 0x356   : > { %4606 = vrot.lane.b32.xlu1 %v4555_v10, %s8353_s12  ;;  %3917 = vrot.lane.b32.xlu2 %v3867_v9, %s8353_s12  ;;  %v10719_v9 = vld [vmem:[%s8434_s25 + $0x8] sm:$0xff] }
 0x357   : > { %7721 = vmatmul.msk.bf16.gmra.mxu3 %vm12774_vm5, %v10719_v9  ;;  %vm12804_vm5 = vmmov %vm12776_vm0 }
 0x35c   : > { %v10733_v26 = vpop.permute.xlu0 %4148 }
 0x35d   : > { %v4747_v31 = vpop.f32.mrf.mxu2 }
 0x35e   : > { %3915 = vrot.lane.b32.xlu1 %v10629_v39, %s8353_s12  ;;  %4799 = vrot.lane.b32.xlu2 %v4745_v42, %s8353_s12  ;;  %v10728_v39 = vpop.permute.xlu2 %4339  ;;  %v10730_v42 = vpop.permute.xlu1 %4596 }
 0x35f   : > { %4801 = vrot.lane.b32.xlu0 %v4747_v31, %s8353_s12  ;;  %7735 = vmatmul.msk.bf16.gmra.mxu0 %vm12785_vm14, %v10698_v4  ;;  %vm12816_vm14 = vmmov %vm12776_vm0 }
 0x365   : > { %v4750_v10 = vpop.f32.mrf.mxu2 }
 0x366   : > { %4164 = vrot.lane.b32.xlu1 %v4114_v16, %s8353_s12  ;;  %4351 = vrot.lane.b32.xlu2 %v4301_v2, %s8353_s12  ;;  %v10735_v55 = vpop.permute.xlu2 %3909  ;;  %v10742_v2 = vpop.permute.xlu1 %3907 }
 0x367   : > { %4803 = vrot.lane.b32.xlu0 %v4750_v10, %s8353_s12  ;;  %7722 = vmatmul.msk.bf16.gmra.mxu3 %vm12775_vm9, %v10738_v63  ;;  %v10746_v16 = vpop.permute.xlu0 %4341  ;;  %vm12806_vm9 = vmmov %vm12776_vm0 }
 0x36d   : > { %v4752_v31 = vpop.f32.mrf.mxu2 }
 0x36e   : > { %4805 = vrot.lane.b32.xlu1 %v4752_v31, %s8353_s12  ;;  %v10748_v31 = vpop.permute.xlu2 %4600  ;;  %v10751_v49 = vpop.permute.xlu1 %4598 }
 0x36f   : > { %v10753_v54 = vpop.permute.xlu0 %4150  ;;  %7736 = vmatmul.msk.bf16.gmra.mxu0 %vm12788_vm15, %v10719_v9  ;;  %vm12823_vm15 = vmmov %vm12776_vm0 }
 0x375   : > { %v4755_v38 = vpop.f32.mrf.mxu2 }
 0x376   : > { %4610 = vrot.lane.b32.xlu1 %v4560_v48, %s8353_s12  ;;  %4807 = vrot.lane.b32.xlu0 %v4755_v38, %s8353_s12  ;;  %v10761_v38 = vpop.permute.xlu2 %4343  ;;  %v10763_v48 = vpop.permute.xlu1 %4152 }
 0x377   : > { %7723 = vmatmul.msk.bf16.gmra.mxu3 %vm12776_vm0, %v10756_v30 }
 0x37c   : > { %v10765_v51 = vpop.permute.xlu0 %4345 }
 0x37d   : > { %v4757_v10 = vpop.f32.mrf.mxu2 }
 0x37e   : > { %4809 = vrot.lane.b32.xlu1 %v4757_v10, %s8353_s12  ;;  %v10771_v0 = vpop.permute.xlu2 %3913  ;;  %v10773_v32 = vpop.permute.xlu1 %3911 }
 0x37f   : > { %12777 = vst [vmem:[#allocation34_spill] sm:$0xff] %v10771_v0  ;;  %7737 = vmatmul.msk.bf16.gmra.mxu0 %vm12790_vm13, %v10738_v63  ;;  %vm12825_vm13 = vmmov %vm12776_vm0 }
 0x380   : > { %12778 = vst [vmem:[#allocation10_spill] sm:$0xff] %v10773_v32  ;;  %v10802_v32 = vld [vmem:[%s8434_s25 + $0x28] sm:$0xff] }
 0x381   : > { %12783 = vst [vmem:[#allocation18_spill] sm:$0xff] %v10802_v32 }
 0x384   : > { %v10781_v35 = vpop.permute.xlu0 %4154 }
 0x385   : > { %v4760_v37 = vpop.f32.mrf.mxu2 }
 0x386   : > { %4811 = vrot.lane.b32.xlu0 %v4760_v37, %s8353_s12  ;;  %v10777_v37 = vld [vmem:[%s8434_s25 + $0x20] sm:$0xff]  ;;  %v10785_v21 = vpop.permute.xlu2 %4604  ;;  %v10789_v17 = vpop.permute.xlu1 %4602 }
 0x387   : > { %12779 = vst [vmem:[#allocation35_spill] sm:$0xff] %v10777_v37  ;;  %7724 = vmatmul.msk.bf16.gmra.mxu3 %vm12780_vm8, %v10777_v37  ;;  %v10796_v37 = vpop.f32.mrf.mxu3  ;;  %vm12814_vm8 = vmmov %vm12776_vm0 }
 0x388   : > { %12781 = vst [vmem:[#allocation14_spill] sm:$0xff] %v10785_v21  ;;  %v3940_v21 = vadd.f32 %v10623_v11, %v10027_v57  ;;  %v4562_v11 = vpop.f32.mrf.mxu1 }
 0x38d   : > { %v4762_v10 = vpop.f32.mrf.mxu2  ;;  %v10793_v0 = vpop.permute.xlu0 %4158 }
 0x38e   : > { %4813 = vrot.lane.b32.xlu1 %v4762_v10, %s8353_s12  ;;  %v10806_v22 = vpop.permute.xlu2 %4347  ;;  %v10812_v15 = vpop.permute.xlu1 %4156 }
 0x38f   : > { %v4119_v58 = vpop.f32.mrf.mxu3  ;;  %7738 = vmatmul.msk.bf16.gmra.mxu0 %vm12792_vm6, %v10756_v30  ;;  %vm12832_vm6 = vmmov %vm12776_vm0 }
 0x395   : > { %v10783_v10 = vpop.f32.mrf.mxu2 }
 0x397   : > { %7725 = vmatmul.msk.bf16.gmra.mxu3 %vm12784_vm11, %v10802_v32  ;;  %vm12815_vm11 = vmmov %vm12776_vm0 }
 0x39d   : > { %v4767_v46 = vpop.f32.mrf.mxu2 }
 0x39e   : > { %4817 = vrot.lane.b32.xlu1 %v4767_v46, %s8353_s12  ;;  %v4187_v46 = vadd.f32 %v10657_v50, %v3940_v21  ;;  %v10817_v21 = vpop.permute.xlu2 %4608 }
 0x3a0   : > { %v4376_v57 = vadd.f32 %v10651_v53, %v4187_v46  ;;  %v12786_v53 = vld [vmem:[#allocation30_spill] sm:$0xff] }
 0x3a1   : > { %v3941_v46 = vadd.f32 %v10644_v14, %v12786_v53  ;;  %v4378_v14 = vadd.f32 %v10667_v52, %v4189_v60  ;;  %v8024_v53 = vld [vmem:[%s12127_s7 + $0x8] sm:$0xff] }
 0x3a2   : > { %v4635_v32 = vadd.f32 %v10655_v23, %v4376_v57  ;;  %5318 = vmatpush.bf16.msrb.mxu2 %v8024_v53 }
 0x3a3   : > { %v4188_v44 = vadd.f32 %v10678_v3, %v3941_v46  ;;  %v3944_v46 = vadd.f32 %v10687_v12, %v10080_v5  ;;  %v8028_v5 = vld [vmem:[%s12127_s7 + $0x18] sm:$0xff] }
 0x3a4   : > { %5257 = vmatpush.bf16.msra.mxu1 %v8028_v5  ;;  %v12795_v5 = vld [vmem:[#allocation14_spill] sm:$0xff] }
 0x3a5   : > { %v10822_v36 = vpop.f32.mrf.mxu2  ;;  %v4377_v57 = vadd.f32 %v10683_v29, %v4188_v44  ;;  %v4191_v60 = vadd.f32 %v10733_v26, %v3944_v46  ;;  %v10873_v44 = vpop.f32.mrf.mxu3  ;;  %v8032_v26 = vld [vmem:[%s12127_s7 + $0x28] sm:$0xff]  ;;  %v3947_v46 = vadd.f32 %v10742_v2, %v10168_v33 }
 0x3a6   : > { %3919 = vrot.lane.b32.xlu1 %v10646_v28, %s8353_s12  ;;  %5472 = vmatpush.bf16.msrb.mxu0 %v8032_v26 }
 0x3a7   : > { %v4380_v12 = vadd.f32 %v10685_v6, %v4191_v60  ;;  %v3946_v6 = vadd.f32 %v10714_v24, %v10144_v56 }
 0x3a8   : > { %v4792_v27 = vpop.permute.xlu0 %4791 }
 0x3a9   : > { %v4839_v43 = vadd.f32 %v4792_v27, %v4634_v62  ;;  %v10831_v62 = vld [vmem:[%s8434_s25 + $0x30] sm:$0xff] }
 0x3aa   : > { %7726 = vmatmul.msk.bf16.gmra.mxu3 %vm12787_vm10, %v10831_v62  ;;  %vm12817_vm10 = vmmov %vm12776_vm0 }
 0x3ab   : > { %8147 = vtanh.f32 %v4839_v43 }
 0x3ae   : > { %4168 = vrot.lane.b32.xlu1 %v4119_v58, %s8353_s12  ;;  %v4637_v58 = vadd.f32 %v10708_v8, %v4378_v14 }
 0x3b0   : > { %v4794_v50 = vpop.permute.xlu1 %4793  ;;  %v10828_v23 = vpop.permute.xlu0 %4349 }
 0x3b1   : > { %v8148_v28 = vpop.eup %8147  ;;  %v4840_v20 = vadd.f32 %v4794_v50, %v4635_v32  ;;  %v4565_v32 = vpop.f32.mrf.mxu1 }
 0x3b2   : > { %4919 = vrot.lane.b32.xlu2 %v8148_v28, %s8353_s12  ;;  %v4772_v50 = vpop.f32.mrf.mxu2  ;;  %v8029_v28 = vld [vmem:[%s12126_s6 + $0x20] sm:$0xff] }
 0x3b3   : > { %8149 = vtanh.f32 %v4840_v20  ;;  %v4798_v20 = vpop.permute.xlu2 %4797  ;;  %5388 = vmatpush.bf16.msrb.mxu3 %v8029_v28 }
 0x3b4   : > { %v4842_v3 = vadd.f32 %v4798_v20, %v4637_v58 }
 0x3b6   : > { %4614 = vrot.lane.b32.xlu1 %v4565_v32, %s8353_s12  ;;  %8151 = vtanh.f32 %v4842_v3  ;;  %v3945_v3 = vadd.f32 %v10716_v41, %v10115_v59  ;;  %v4306_v59 = vpop.f32.mrf.mxu0  ;;  %v4193_v41 = vadd.f32 %v10763_v48, %v3946_v6  ;;  %v12801_v6 = vmov 0  }
 0x3b8   : > { %v10838_v27 = vpop.permute.xlu1 %4160  ;;  %v10851_v52 = vpop.permute.xlu0 %4162 }
 0x3b9   : > { %v8150_v43 = vpop.eup %8149 }
 0x3ba   : > { %4612 = vrot.lane.b32.xlu2 %v4562_v11, %s8353_s12  ;;  %4921 = vrot.lane.b32.xlu0 %v8150_v43, %s8353_s12  ;;  %v4636_v11 = vadd.f32 %v10665_v13, %v4377_v57  ;;  %v3943_v13 = vadd.f32 %v10695_v34, %v10058_v45  ;;  %v4639_v57 = vadd.f32 %v10730_v42, %v4380_v12  ;;  %v4567_v12 = vpop.f32.mrf.mxu1 }
 0x3bb   : > { %v10855_v8 = vpop.permute.xlu2 %3917  ;;  %7786 = vmatmul.msk.bf16.vlgmr.msrb.gmra.mxu3 %vm12789_vm4, %v10698_v4  ;;  %vm12824_vm4 = vmmov %vm12776_vm0 }
 0x3bc   : > { %v4190_v43 = vadd.f32 %v10702_v61, %v3943_v13 }
 0x3be   : > { %4821 = vrot.lane.b32.xlu1 %v4772_v50, %s8353_s12  ;;  %v4379_v45 = vadd.f32 %v10706_v19, %v4190_v43  ;;  %v10892_v19 = vpop.f32.mrf.mxu3  ;;  %v4308_v13 = vpop.f32.mrf.mxu0 }
 0x3c0   : > { %v4796_v29 = vpop.permute.xlu1 %4795  ;;  %v4638_v4 = vadd.f32 %v10723_v1, %v4379_v45  ;;  %v4192_v1 = vadd.f32 %v10753_v54, %v3945_v3 }
 0x3c1   : > { %v4841_v40 = vadd.f32 %v4796_v29, %v4636_v11  ;;  %v10876_v14 = vpop.permute.xlu0 %4353  ;;  %v4382_v11 = vadd.f32 %v10746_v16, %v4193_v41  ;;  %v4194_v16 = vadd.f32 %v10781_v35, %v3947_v46 }
 0x3c2   : > { %4815 = vrot.lane.b32.xlu0 %v10783_v10, %s8353_s12  ;;  %v8152_v10 = vpop.eup %8151 }
 0x3c3   : > { %8153 = vtanh.f32 %v4841_v40  ;;  %v4800_v34 = vpop.permute.xlu2 %4799  ;;  %v4641_v48 = vadd.f32 %v10748_v31, %v4382_v11  ;;  %v4383_v2 = vadd.f32 %v10761_v38, %v4194_v16 }
 0x3c4   : > { %v4843_v61 = vadd.f32 %v4800_v34, %v4638_v4 }
 0x3c6   : > { %8155 = vtanh.f32 %v4843_v61 }
 0x3c8   : > { %v10871_v32 = vpop.permute.xlu1 %4606 }
 0x3c9   : > { %v8154_v20 = vpop.eup %8153 }
 0x3ca   : > { %4923 = vrot.lane.b32.xlu2 %v8154_v20, %s8353_s12  ;;  %4925 = vrot.lane.b32.xlu0 %v8152_v10, %s8353_s12 }
 0x3cb   : > { %7787 = vmatmul.msk.bf16.gmra.mxu3 %vm12791_vm2, %v10719_v9  ;;  %vm12831_vm2 = vmmov %vm12776_vm0 }
 0x3cc   : > { %v8156_v54 = vpop.eup %8155 }
 0x3d0   : > { %v10890_v58 = vpop.permute.xlu1 %3915 }
 0x3d1   : > { %v4802_v18 = vpop.permute.xlu0 %4801 }
 0x3d2   : > { %v4844_v50 = vadd.f32 %v4802_v18, %v4639_v57  ;;  %3921 = vrot.lane.b32.xlu2 %v10653_v47, %s8353_s12  ;;  %4166 = vrot.lane.b32.xlu0 %v10796_v37, %s8353_s12  ;;  %v4381_v47 = vadd.f32 %v10728_v39, %v4192_v1  ;;  %v10911_v37 = vpop.f32.mrf.mxu3  ;;  %v12800_v57 = vld [vmem:[#allocation34_spill] sm:$0xff] }
 0x3d4   : > { %8157 = vtanh.f32 %v4844_v50  ;;  %v4640_v56 = vadd.f32 %v10751_v49, %v4381_v47  ;;  %v3948_v49 = vadd.f32 %v10735_v55, %v10196_v7  ;;  %v4642_v7 = vadd.f32 %v10789_v17, %v4383_v2  ;;  %v8023_v17 = vld [vmem:[%s12127_s7] sm:$0xff] }
 0x3d5   : > { %5319 = vmatpush.bf16.msrb.mxu2 %v8023_v17  ;;  %v12810_v17 = vld [vmem:[#allocation52_spill] sm:$0xff] }
 0x3d6   : > { %v4195_v31 = vadd.f32 %v10812_v15, %v3948_v49  ;;  %v12794_v15 = vld [vmem:[#allocation10_spill] sm:$0xff]  ;;  %v8031_v49 = vld [vmem:[%s12127_s7 + $0x20] sm:$0xff] }
 0x3d7   : > { %v3949_v45 = vadd.f32 %v12794_v15, %v10215_v25  ;;  %v12796_v25 = vld [vmem:[#allocation35_spill] sm:$0xff]  ;;  %5473 = vmatpush.bf16.msrb.mxu0 %v8031_v49  ;;  %v8285_v49 = vld [vmem:[%s8788_s18 + $0x10] sm:$0xff] }
 0x3d8   : > { %v10909_v42 = vpop.permute.xlu1 %4164  ;;  %v4384_v35 = vadd.f32 %v10765_v51, %v4195_v31  ;;  %7739 = vmatmul.msk.bf16.gmra.mxu0 %vm12797_vm12, %v12796_v25  ;;  %5320 = vmatmul.bf16.vlgmr.msrb.gmra.mxu2 %v12801_v6  ;;  %vm12839_vm12 = vmmov %vm12776_vm0 }
 0x3d9   : > { %v4804_v29 = vpop.permute.xlu0 %4803  ;;  %v4196_v34 = vadd.f32 %v10793_v0, %v3949_v45  ;;  %v12799_v0 = vld [vmem:[#allocation50_spill] sm:$0xff]  ;;  %v8282_v45 = vld [vmem:[%s8788_s18] sm:$0xff] }
 0x3da   : > { %v8158_v28 = vpop.eup %8157  ;;  %4927 = vrot.lane.b32.xlu2 %v8156_v54, %s8353_s12  ;;  %v4845_v24 = vadd.f32 %v4804_v29, %v4640_v56  ;;  %v10918_v39 = vpop.f32.mrf.mxu3  ;;  %v4643_v38 = vadd.f32 %v12795_v5, %v4384_v35  ;;  %v3950_v18 = vadd.f32 %v12800_v57, %v12799_v0 }
 0x3db   : > { %4929 = vrot.lane.b32.xlu0 %v8158_v28, %s8353_s12  ;;  %7788 = vmatmul.msk.bf16.gmra.mxu3 %vm12793_vm7, %v10738_v63  ;;  %v4385_v51 = vadd.f32 %v10806_v22, %v4196_v34  ;;  %v4352_v56 = vpop.permute.xlu2 %4351  ;;  %v12809_v34 = vld [vmem:[#allocation37_spill] sm:$0xff]  ;;  %vm12833_vm7 = vmmov %vm12776_vm0 }
 0x3dc   : > { %8159 = vtanh.f32 %v4845_v24  ;;  %v12802_v24 = vld [vmem:[#allocation18_spill] sm:$0xff] }
 0x3dd   : > { %v4644_v3 = vadd.f32 %v10871_v32, %v4385_v51  ;;  %v3951_v51 = vadd.f32 %v10890_v58, %v12810_v17 }
 0x3e0   : > { %v4806_v40 = vpop.permute.xlu1 %4805 }
 0x3e1   : > { %v4846_v53 = vadd.f32 %v4806_v40, %v4641_v48  ;;  %v12805_v40 = vld [vmem:[#allocation54_spill] sm:$0xff] }
 0x3e2   : > { %4355 = vrot.lane.b32.xlu2 %v4306_v59, %s8353_s12  ;;  %v8160_v33 = vpop.eup %8159  ;;  %v10935_v20 = vpop.f32.mrf.mxu3 }
 0x3e3   : > { %8161 = vtanh.f32 %v4846_v53  ;;  %4357 = vrot.lane.b32.xlu0 %v4308_v13, %s8353_s12  ;;  %v3952_v53 = vadd.f32 %v10855_v8, %v12805_v40 }
 0x3e5   : > { %v4199_v13 = vadd.f32 %v10909_v42, %v3952_v53 }
 0x3e7   : > { %v4388_v16 = vadd.f32 %v10876_v14, %v4199_v13  ;;  %v11038_v13 = vld [vmem:[%s8434_s25 + $0x38] sm:$0xff] }
 0x3e8   : > { %v10933_v10 = vpop.permute.xlu1 %4610  ;;  %v4808_v43 = vpop.permute.xlu0 %4807  ;;  %7740 = vmatmul.msk.bf16.gmra.mxu0 %vm12803_vm3, %v12802_v24  ;;  %5325 = vmatmul.bf16.gmra.mxu2 %v12801_v6  ;;  %vm12841_vm3 = vmmov %vm12776_vm0 }
 0x3e9   : > { %v8162_v60 = vpop.eup %8161  ;;  %v4847_v55 = vadd.f32 %v4808_v43, %v4642_v7  ;;  %v12807_v43 = vld [vmem:[#allocation15_spill] sm:$0xff] }
 0x3ea   : > { %4931 = vrot.lane.b32.xlu2 %v8160_v33, %s8353_s12  ;;  %v10945_v61 = vpop.f32.mrf.mxu3  ;;  %v10993_v33 = vpop.f32.mrf.mxu0  ;;  %v4871_v7 = vsub.f32 1.0, %v12807_v43 }
 0x3eb   : > { %4933 = vrot.lane.b32.xlu0 %v8162_v60, %s8353_s12  ;;  %8163 = vtanh.f32 %v4847_v55  ;;  %7789 = vmatmul.msk.bf16.gmra.mxu3 %vm12798_vm1, %v10756_v30  ;;  %vm12840_vm1 = vmmov %vm12776_vm0 }
 0x3ec   : > { %v4887_v5 = vmul.f32 %v8282_v45, %v4871_v7  ;;  %v8286_v45 = vld [vmem:[%s8788_s18 + $0x18] sm:$0xff] }
 0x3f0   : > { %v4810_v26 = vpop.permute.xlu1 %4809 }
 0x3f1   : > { %v4848_v4 = vadd.f32 %v4810_v26, %v4643_v38  ;;  %v8164_v50 = vpop.eup %8163 }
 0x3f2   : > { %4616 = vrot.lane.b32.xlu2 %v4567_v12, %s8353_s12  ;;  %v10963_v47 = vpop.f32.mrf.mxu3  ;;  %v10999_v35 = vpop.f32.mrf.mxu0 }
 0x3f3   : > { %8165 = vtanh.f32 %v4848_v4  ;;  %4819 = vrot.lane.b32.xlu0 %v10822_v36, %s8353_s12  ;;  %v4197_v36 = vadd.f32 %v10838_v27, %v3950_v18  ;;  %v8027_v27 = vld [vmem:[%s12127_s7 + $0x10] sm:$0xff]  ;;  %v4872_v4 = vsub.f32 1.0, %v12809_v34  ;;  %v4198_v18 = vadd.f32 %v10851_v52, %v3951_v51 }
 0x3f4   : > { %5258 = vmatpush.bf16.msra.mxu1 %v8027_v27 }
 0x3f5   : > { %v4386_v22 = vadd.f32 %v10828_v23, %v4197_v36 }
 0x3f7   : > { %v4645_v54 = vadd.f32 %v10817_v21, %v4386_v22  ;;  %5259 = vmatmul.bf16.vlgmr.msra.gmra.mxu1 %v12801_v6  ;;  %v4387_v22 = vadd.f32 %v4352_v56, %v4198_v18 }
 0x3f8   : > { %v4812_v1 = vpop.permute.xlu0 %4811 }
 0x3f9   : > { %v8166_v59 = vpop.eup %8165  ;;  %v4849_v41 = vadd.f32 %v4812_v1, %v4644_v3  ;;  %v8283_v3 = vld [vmem:[%s8788_s18 + $0x8] sm:$0xff]  ;;  %v4646_v52 = vadd.f32 %v10933_v10, %v4387_v22  ;;  %v12822_v22 = vld [vmem:[#allocation49_spill] sm:$0xff] }
 0x3fa   : > { %4935 = vrot.lane.b32.xlu2 %v8164_v50, %s8353_s12  ;;  %v10969_v11 = vpop.f32.mrf.mxu3  ;;  %v11013_v12 = vpop.f32.mrf.mxu0  ;;  %v4888_v50 = vmul.f32 %v8283_v3, %v4872_v4  ;;  %v12818_v10 = vld [vmem:[#allocation48_spill] sm:$0xff] }
 0x3fb   : > { %8167 = vtanh.f32 %v4849_v41  ;;  %4937 = vrot.lane.b32.xlu0 %v8166_v59, %s8353_s12  ;;  %7790 = vmatmul.msk.bf16.gmra.mxu3 %vm12804_vm5, %v12796_v25  ;;  %vm12847_vm5 = vmmov %vm12776_vm0 }
 0x400   : > { %v4814_v28 = vpop.permute.xlu1 %4813 }
 0x401   : > { %v8168_v32 = vpop.eup %8167  ;;  %v4850_v29 = vadd.f32 %v4814_v28, %v4645_v54 }
 0x402   : > { %4939 = vrot.lane.b32.xlu1 %v8168_v32, %s8353_s12  ;;  %v10981_v21 = vpop.f32.mrf.mxu3  ;;  %v11033_v32 = vpop.f32.mrf.mxu0 }
 0x403   : > { %8169 = vtanh.f32 %v4850_v29 }
 0x409   : > { %v8170_v23 = vpop.eup %8169 }
 0x40a   : > { %4941 = vrot.lane.b32.xlu2 %v8170_v23, %s8353_s12  ;;  %v10987_v46 = vpop.f32.mrf.mxu3  ;;  %v12813_v23 = vld [vmem:[#allocation47_spill] sm:$0xff]  ;;  %v11054_v7 = vpop.f32.mrf.mxu0 }
 0x40b   : > { %7791 = vmatmul.msk.bf16.gmra.mxu3 %vm12806_vm9, %v12802_v24  ;;  %vm12848_vm9 = vmmov %vm12776_vm0 }
 0x40c   : > { %v4920_v48 = vpop.permute.xlu2 %4919 }
 0x40d   : > { %v4967_v15 = vmul.f32 %v4920_v48, %v12807_v43  ;;  %v4873_v48 = vsub.f32 1.0, %v12813_v23 }
 0x40f   : > { %v11009_v26 = vadd.f32 %v4967_v15, %v4887_v5 }
 0x410   : > { %v4818_v8 = vpop.permute.xlu1 %4817 }
 0x411   : > { %12808 = vst [vmem:[#allocation41_spill] sm:$0xff] %v11009_v26  ;;  %v4999_v1 = vpack.c.bf16 %v11009_v26, %v11009_v26 }
 0x412   : > { %v10997_v42 = vpop.f32.mrf.mxu3 }
 0x413   : > { %v5031_v28 = vunpack.c.l.b16 %v4999_v1 }
 0x414   : > { %v4613_v31 = vpop.permute.xlu2 %4612 }
 0x415   : > { %v4647_v2 = vadd.f32 %v4613_v31, %v4388_v16  ;;  %v4874_v16 = vsub.f32 1.0, %v12818_v10  ;;  %v4889_v31 = vmul.f32 %v8285_v49, %v4873_v48 }
 0x417   : > { %v4852_v60 = vadd.f32 %v4818_v8, %v4647_v2  ;;  %v4890_v5 = vmul.f32 %v8286_v45, %v4874_v16  ;;  %v8034_v16 = vld [vmem:[%s12126_s6 + $0x38] sm:$0xff] }
 0x418   : > { %5554 = vmatpush.bf16.msrb.mxu1 %v8034_v16 }
 0x419   : > { %8171 = vtanh.f32 %v4852_v60  ;;  %v11050_v60 = vpop.permute.xlu1 %3919 }
 0x41a   : > { %v11003_v55 = vpop.f32.mrf.mxu3 }
 0x41b   : > { %7792 = vmatmul.msk.bf16.gmra.mxu3 %vm12776_vm0, %v10831_v62 }
 0x41f   : > { %v8172_v14 = vpop.eup %8171 }
 0x420   : > { %4945 = vrot.lane.b32.xlu1 %v8172_v14, %s8353_s12 }
 0x422   : > { %v11018_v0 = vpop.f32.mrf.mxu3 }
 0x424   : > { %v4924_v38 = vpop.permute.xlu2 %4923 }
 0x425   : > { %v4969_v56 = vmul.f32 %v4924_v38, %v12813_v23  ;;  %v12826_v23 = vld [vmem:[#allocation32_spill] sm:$0xff] }
 0x426   : > { %v4876_v48 = vsub.f32 1.0, %v12826_v23 }
 0x427   : > { %v11052_v14 = vadd.f32 %v4969_v56, %v4889_v31  ;;  %v8036_v56 = vld [vmem:[%s12127_s7 + $0x38] sm:$0xff] }
 0x428   : > { %6215 = vrot.lane.b32.xlu1 %v11009_v26, %s8351_s20  ;;  %5636 = vmatpush.bf16.msra.mxu2 %v8036_v56  ;;  %v8040_v56 = vld [vmem:[%s12127_s7 + $0x48] sm:$0xff] }
 0x429   : > { %12819 = vst [vmem:[#allocation19_spill] sm:$0xff] %v11052_v14  ;;  %5800 = vmatpush.bf16.msra.mxu0 %v8040_v56 }
 0x42a   : > { %v11031_v54 = vpop.f32.mrf.mxu3 }
 0x42b   : > { %12812 = vst [vmem:[#allocation23_spill] sm:$0xff] %v11031_v54  ;;  %7793 = vmatmul.msk.bf16.gmra.mxu3 %vm12814_vm8, %v11038_v13  ;;  %vm12852_vm8 = vmmov %vm12776_vm0 }
 0x42c   : > { %v4922_v57 = vpop.permute.xlu0 %4921  ;;  %v11027_v41 = vpop.permute.xlu2 %3921 }
 0x42d   : > { %v4968_v36 = vmul.f32 %v4922_v57, %v12809_v34  ;;  %v5001_v34 = vpack.c.bf16 %v11052_v14, %v11052_v14 }
 0x42f   : > { %v11025_v59 = vadd.f32 %v4968_v36, %v4888_v50  ;;  %v5033_v57 = vunpack.c.l.b16 %v5001_v34  ;;  %v4169_v36 = vpop.permute.xlu1 %4168 }
 0x431   : > { %12811 = vst [vmem:[#allocation17_spill] sm:$0xff] %v11025_v59  ;;  %v5000_v58 = vpack.c.bf16 %v11025_v59, %v11025_v59 }
 0x432   : > { %v11048_v8 = vpop.f32.mrf.mxu3 }
 0x433   : > { %v5032_v27 = vunpack.c.l.b16 %v5000_v58  ;;  %v4875_v58 = vsub.f32 1.0, %v12822_v22 }
 0x434   : > { %v4816_v29 = vpop.permute.xlu0 %4815  ;;  %v4928_v2 = vpop.permute.xlu2 %4927 }
 0x435   : > { %v4851_v40 = vadd.f32 %v4816_v29, %v4646_v52  ;;  %v5047_v53 = vpack.c.b16 %v5032_v27, %v5031_v28  ;;  %v5174_v52 = vadd.f32 %v10993_v33, %v10873_v44  ;;  %v11076_v28 = vpop.f32.mrf.mxu0  ;;  %v4971_v27 = vmul.f32 %v4928_v2, %v12822_v22  ;;  %v8288_v2 = vld [vmem:[%s8788_s18 + $0x28] sm:$0xff] }
 0x437   : > { %8173 = vtanh.f32 %v4851_v40  ;;  %7753 = vmatmul.msk.bf16.gmra.mxu1 %vm12815_vm11, %v5047_v53  ;;  %7768 = vmatmul.msk.bf16.gmra.mxu2 %vm12816_vm14, %v5047_v53  ;;  %v8287_v40 = vld [vmem:[%s8788_s18 + $0x20] sm:$0xff]  ;;  %v4615_v45 = vpop.permute.xlu1 %4614  ;;  %vm12853_vm11 = vmmov %vm12776_vm0 }
 0x438   : > { %7806 = vmatmul.msk.bf16.vlgmr.msrb.gmra.mxu0 %vm12817_vm10, %v5047_v53  ;;  %v4891_v53 = vmul.f32 %v8287_v40, %v4875_v58  ;;  %vm12854_vm14 = vmmov %vm12776_vm0 }
 0x439   : > { %vm12855_vm10 = vmmov %vm12776_vm0 }
 0x43a   : > { %v11067_v51 = vpop.f32.mrf.mxu3  ;;  %v11089_v33 = vadd.f32 %v4971_v27, %v4891_v53 }
 0x43b   : > { %12821 = vst [vmem:[#allocation11_spill] sm:$0xff] %v11067_v51 }
 0x43c   : > { %v4926_v43 = vpop.permute.xlu0 %4925  ;;  %v11069_v3 = vpop.permute.xlu2 %4355  ;;  %12827 = vst [vmem:[#allocation7_spill] sm:$0xff] %v11089_v33  ;;  %v5003_v34 = vpack.c.bf16 %v11089_v33, %v11089_v33 }
 0x43d   : > { %v8174_v15 = vpop.eup %8173  ;;  %v4970_v38 = vmul.f32 %v4926_v43, %v12818_v10  ;;  %v8038_v10 = vld [vmem:[%s12126_s6 + $0x48] sm:$0xff]  ;;  %v4892_v43 = vmul.f32 %v8288_v2, %v4876_v48 }
 0x43e   : > { %4943 = vrot.lane.b32.xlu0 %v8174_v15, %s8353_s12  ;;  %5718 = vmatpush.bf16.msra.mxu3 %v8038_v10  ;;  %v5035_v58 = vunpack.c.l.b16 %v5003_v34 }
 0x43f   : > { %v11061_v4 = vadd.f32 %v4970_v38, %v4890_v5  ;;  %v12828_v5 = vld [vmem:[#allocation56_spill] sm:$0xff] }
 0x440   : > { %v3954_v38 = vadd.f32 %v11027_v41, %v12828_v5  ;;  %v5179_v41 = vadd.f32 %v11013_v12, %v10911_v37  ;;  %v8289_v37 = vld [vmem:[%s8788_s18 + $0x30] sm:$0xff]  ;;  %v12835_v5 = vld [vmem:[#allocation55_spill] sm:$0xff] }
 0x441   : > { %12820 = vst [vmem:[#allocation44_spill] sm:$0xff] %v11061_v4  ;;  %v5002_v17 = vpack.c.bf16 %v11061_v4, %v11061_v4  ;;  %6221 = vrot.lane.b32.xlu1 %v11061_v4, %s8351_s20 }
 0x442   : > { %v5390_v29 = vpop.f32.mrf.mxu3  ;;  %v4201_v27 = vadd.f32 %v4169_v36, %v3954_v38  ;;  %v4822_v36 = vpop.permute.xlu1 %4821 }
 0x443   : > { %v5034_v18 = vunpack.c.l.b16 %v5002_v17  ;;  %v11087_v44 = vadd.f32 %v5390_v29, %v5174_v52  ;;  %v12830_v29 = vld [vmem:[#allocation40_spill] sm:$0xff] }
 0x444   : > { %v4167_v50 = vpop.permute.xlu0 %4166  ;;  %v4932_v49 = vpop.permute.xlu2 %4931 }
 0x445   : > { %v11071_v1 = vpack.c.b16 %v5034_v18, %v5033_v57  ;;  %v11108_v57 = vpop.f32.mrf.mxu0  ;;  %v4973_v16 = vmul.f32 %v4932_v49, %v12830_v29  ;;  %v3953_v49 = vadd.f32 %v11050_v60, %v12835_v5 }
 0x447   : > { %7754 = vmatmul.msk.bf16.gmra.mxu1 %vm12823_vm15, %v11071_v1  ;;  %7769 = vmatmul.msk.bf16.gmra.mxu2 %vm12824_vm4, %v11071_v1  ;;  %vm12857_vm15 = vmmov %vm12776_vm0 }
 0x448   : > { %7807 = vmatmul.msk.bf16.gmra.mxu0 %vm12825_vm13, %v11071_v1  ;;  %vm12858_vm4 = vmmov %vm12776_vm0 }
 0x449   : > { %vm12860_vm13 = vmmov %vm12776_vm0 }
 0x44a   : > { %v11110_v18 = vpop.f32.mrf.mxu3 }
 0x44c   : > { %v4617_v10 = vpop.permute.xlu2 %4616 }
 0x44d   : > { %v4930_v31 = vpop.permute.xlu0 %4929  ;;  %v11133_v34 = vpop.f32.mrf.mxu0 }
 0x44e   : > { %v4972_v15 = vmul.f32 %v4930_v31, %v12826_v23  ;;  %v4877_v23 = vsub.f32 1.0, %v12830_v29  ;;  %v8290_v29 = vld [vmem:[%s8788_s18 + $0x38] sm:$0xff] }
 0x450   : > { %v11106_v17 = vadd.f32 %v4972_v15, %v4892_v43  ;;  %v4893_v12 = vmul.f32 %v8289_v37, %v4877_v23  ;;  %v12834_v43 = vld [vmem:[#allocation51_spill] sm:$0xff] }
 0x451   : > { %v4878_v15 = vsub.f32 1.0, %v12834_v43 }
 0x452   : > { %12829 = vst [vmem:[#allocation13_spill] sm:$0xff] %v11106_v17  ;;  %v5004_v22 = vpack.c.bf16 %v11106_v17, %v11106_v17  ;;  %v5395_v2 = vpop.f32.mrf.mxu3 }
 0x453   : > { %v4894_v23 = vmul.f32 %v8290_v29, %v4878_v15  ;;  %v5184_v15 = vadd.f32 %v11054_v7, %v10935_v20  ;;  %v8291_v20 = vld [vmem:[%s8788_s18 + $0x40] sm:$0xff] }
 0x454   : > { %v5036_v52 = vunpack.c.l.b16 %v5004_v22  ;;  %v11135_v22 = vadd.f32 %v5395_v2, %v5179_v41  ;;  %v12838_v2 = vld [vmem:[#allocation53_spill] sm:$0xff] }
 0x455   : > { %v4358_v48 = vpop.permute.xlu0 %4357  ;;  %v11151_v37 = vpop.f32.mrf.mxu0 }
 0x456   : > { %v11117_v40 = vpack.c.b16 %v5036_v52, %v5035_v58  ;;  %v4390_v53 = vadd.f32 %v4358_v48, %v4201_v27  ;;  %v4200_v58 = vadd.f32 %v4167_v50, %v3953_v49  ;;  %v11137_v52 = vadd.f32 %v4973_v16, %v4893_v12 }
 0x458   : > { %v4649_v31 = vadd.f32 %v4617_v10, %v4390_v53  ;;  %7755 = vmatmul.msk.bf16.gmra.mxu1 %vm12831_vm2, %v11117_v40  ;;  %7770 = vmatmul.msk.bf16.gmra.mxu2 %vm12832_vm6, %v11117_v40  ;;  %12836 = vst [vmem:[#allocation12_spill] sm:$0xff] %v11137_v52  ;;  %v4389_v53 = vadd.f32 %v11069_v3, %v4200_v58  ;;  %v4936_v3 = vpop.permute.xlu2 %4935  ;;  %v12842_v58 = vld [vmem:[#allocation43_spill] sm:$0xff]  ;;  %vm12864_vm2 = vmmov %vm12776_vm0 }
 0x459   : > { %7808 = vmatmul.msk.bf16.gmra.mxu0 %vm12833_vm7, %v11117_v40  ;;  %v5005_v60 = vpack.c.bf16 %v11137_v52, %v11137_v52  ;;  %vm12868_vm6 = vmmov %vm12776_vm0 }
 0x45a   : > { %v4854_v38 = vadd.f32 %v4822_v36, %v4649_v31  ;;  %v11146_v31 = vpop.f32.mrf.mxu3  ;;  %v4648_v36 = vadd.f32 %v4615_v45, %v4389_v53  ;;  %vm12870_vm7 = vmmov %vm12776_vm0 }
 0x45b   : > { %v5037_v56 = vunpack.c.l.b16 %v5005_v60  ;;  %v8292_v60 = vld [vmem:[%s8788_s18 + $0x48] sm:$0xff] }
 0x45c   : > { %8175 = vtanh.f32 %v4854_v38  ;;  %v4975_v38 = vmul.f32 %v4936_v3, %v12838_v2 }
 0x45d   : > { %v4934_v27 = vpop.permute.xlu0 %4933 }
 0x45e   : > { %v4974_v48 = vmul.f32 %v4934_v27, %v12834_v43  ;;  %v4879_v43 = vsub.f32 1.0, %v12838_v2  ;;  %v4880_v27 = vsub.f32 1.0, %v12842_v58  ;;  %v12845_v2 = vld [vmem:[#allocation46_spill] sm:$0xff] }
 0x460   : > { %v11144_v10 = vadd.f32 %v4974_v48, %v4894_v23  ;;  %v4895_v7 = vmul.f32 %v8291_v20, %v4879_v43  ;;  %v4881_v43 = vsub.f32 1.0, %v12845_v2  ;;  %v5189_v20 = vadd.f32 %v11108_v57, %v10963_v47 }
 0x462   : > { %12837 = vst [vmem:[#allocation28_spill] sm:$0xff] %v11144_v10  ;;  %v8176_v41 = vpop.eup %8175  ;;  %v5006_v50 = vpack.c.bf16 %v11144_v10, %v11144_v10  ;;  %v5400_v45 = vpop.f32.mrf.mxu3  ;;  %v11171_v23 = vadd.f32 %v4975_v38, %v4895_v7 }
 0x463   : > { %4949 = vrot.lane.b32.xlu0 %v8176_v41, %s8353_s12  ;;  %v11167_v29 = vadd.f32 %v5400_v45, %v5184_v15  ;;  %v4896_v41 = vmul.f32 %v8292_v60, %v4880_v27 }
 0x464   : > { %v5038_v16 = vunpack.c.l.b16 %v5006_v50  ;;  %12843 = vst [vmem:[#allocation16_spill] sm:$0xff] %v11171_v23  ;;  %v4942_v45 = vpop.permute.xlu2 %4941 }
 0x465   : > { %v4820_v12 = vpop.permute.xlu0 %4819 }
 0x466   : > { %v11156_v5 = vpack.c.b16 %v5038_v16, %v5037_v56  ;;  %v4853_v49 = vadd.f32 %v4820_v12, %v4648_v36  ;;  %v11175_v56 = vpop.f32.mrf.mxu0  ;;  %v5007_v16 = vpack.c.bf16 %v11171_v23, %v11171_v23 }
 0x468   : > { %8177 = vtanh.f32 %v4853_v49  ;;  %7756 = vmatmul.msk.bf16.gmra.mxu1 %vm12839_vm12, %v11156_v5  ;;  %7771 = vmatmul.msk.bf16.gmra.mxu2 %vm12840_vm1, %v11156_v5  ;;  %v5039_v15 = vunpack.c.l.b16 %v5007_v16  ;;  %v8294_v16 = vld [vmem:[%s8788_s18 + $0x58] sm:$0xff]  ;;  %vm12871_vm12 = vmmov %vm12776_vm0 }
 0x469   : > { %7809 = vmatmul.msk.bf16.gmra.mxu0 %vm12841_vm3, %v11156_v5  ;;  %vm12872_vm1 = vmmov %vm12776_vm0 }
 0x46a   : > { %v11182_v3 = vpop.f32.mrf.mxu3  ;;  %vm12873_vm3 = vmmov %vm12776_vm0 }
 0x46b   : > { %6219 = vrot.lane.b32.xlu0 %v11052_v14, %s8351_s20 }
 0x46d   : > { %v4938_v48 = vpop.permute.xlu0 %4937 }
 0x46e   : > { %v8178_v53 = vpop.eup %8177  ;;  %v4976_v50 = vmul.f32 %v4938_v48, %v12842_v58  ;;  %v12846_v58 = vld [vmem:[#allocation57_spill] sm:$0xff]  ;;  %v5198_v47 = vpop.f32.mrf.mxu0 }
 0x46f   : > { %4947 = vrot.lane.b32.xlu2 %v8178_v53, %s8353_s12  ;;  %v4882_v27 = vsub.f32 1.0, %v12846_v58  ;;  %v8035_v53 = vld [vmem:[%s12127_s7 + $0x30] sm:$0xff]  ;;  %v4978_v60 = vmul.f32 %v4942_v45, %v12846_v58 }
 0x470   : > { %v11180_v36 = vadd.f32 %v4976_v50, %v4896_v41  ;;  %v8293_v41 = vld [vmem:[%s8788_s18 + $0x50] sm:$0xff]  ;;  %5637 = vmatpush.bf16.msra.mxu2 %v8035_v53 }
 0x471   : > { %v4897_v50 = vmul.f32 %v8293_v41, %v4881_v43  ;;  %v5194_v41 = vadd.f32 %v11151_v37, %v10981_v21  ;;  %v8039_v21 = vld [vmem:[%s12127_s7 + $0x40] sm:$0xff] }
 0x472   : > { %12844 = vst [vmem:[#allocation20_spill] sm:$0xff] %v11180_v36  ;;  %v5008_v12 = vpack.c.bf16 %v11180_v36, %v11180_v36  ;;  %v5405_v57 = vpop.f32.mrf.mxu3  ;;  %5801 = vmatpush.bf16.msra.mxu0 %v8039_v21 }
 0x473   : > { %6225 = vrot.lane.b32.xlu0 %v11106_v17, %s8351_s20  ;;  %v8296_v17 = vld [vmem:[%s8788_s18 + $0x60] sm:$0xff] }
 0x474   : > { %v5040_v49 = vunpack.c.l.b16 %v5008_v12  ;;  %v4940_v38 = vpop.permute.xlu1 %4939  ;;  %v4898_v12 = vmul.f32 %v8294_v16, %v4882_v27  ;;  %v8033_v16 = vld [vmem:[%s12126_s6 + $0x30] sm:$0xff] }
 0x475   : > { %v4977_v48 = vmul.f32 %v4940_v38, %v12845_v2  ;;  %5555 = vmatpush.bf16.msrb.mxu1 %v8033_v16 }
 0x476   : > { %v11192_v7 = vpack.c.b16 %v5040_v49, %v5039_v15  ;;  %v11211_v15 = vadd.f32 %v5405_v57, %v5189_v20  ;;  %v11215_v43 = vadd.f32 %v4978_v60, %v4898_v12  ;;  %v11225_v27 = vpop.f32.mrf.mxu0  ;;  %v5321_v20 = vpop.f32.mrf.mxu2  ;;  %v8037_v57 = vld [vmem:[%s12126_s6 + $0x40] sm:$0xff] }
 0x477   : > { %6217 = vrot.lane.b32.xlu2 %v11025_v59, %s8351_s20  ;;  %v11209_v2 = vadd.f32 %v4977_v48, %v4897_v50  ;;  %12851 = vst [vmem:[#allocation24_spill] sm:$0xff] %v11225_v27  ;;  %v5260_v48 = vpop.f32.mrf.mxu1  ;;  %5719 = vmatpush.bf16.msra.mxu3 %v8037_v57 }
 0x478   : > { %7757 = vmatmul.msk.bf16.gmra.mxu1 %vm12847_vm5, %v11192_v7  ;;  %7772 = vmatmul.msk.bf16.gmra.mxu2 %vm12848_vm9, %v11192_v7  ;;  %12850 = vst [vmem:[#allocation27_spill] sm:$0xff] %v11215_v43  ;;  %v5010_v38 = vpack.c.bf16 %v11215_v43, %v11215_v43  ;;  %v5322_v60 = vadd.f32 %v5321_v20, %v5260_v48  ;;  %vm12874_vm5 = vmmov %vm12776_vm0 }
 0x479   : > { %7810 = vmatmul.msk.bf16.gmra.mxu0 %vm12776_vm0, %v11192_v7  ;;  %12849 = vst [vmem:[#allocation33_spill] sm:$0xff] %v11209_v2  ;;  %v5009_v49 = vpack.c.bf16 %v11209_v2, %v11209_v2  ;;  %vm12875_vm9 = vmmov %vm12776_vm0 }
 0x47a   : > { %v11223_v45 = vpop.f32.mrf.mxu3  ;;  %v5042_v53 = vunpack.c.l.b16 %v5010_v38  ;;  %7864 = vmatmul.msk.bf16.vlgmr.msra.gmra.mxu3 %vm12855_vm10, %v10738_v63  ;;  %vm12883_vm10 = vmmov %vm12776_vm0 }
 0x47b   : > { %6229 = vrot.lane.b32.xlu0 %v11144_v10, %s8351_s20  ;;  %v5041_v58 = vunpack.c.l.b16 %v5009_v49  ;;  %v12863_v10 = vld [vmem:[#allocation58_spill] sm:$0xff] }
 0x47d   : > { %v11231_v50 = vpack.c.b16 %v5042_v53, %v5041_v58  ;;  %v5199_v58 = vadd.f32 %v5198_v47, %v10997_v42 }
 0x47e   : > { %v5203_v49 = vpop.f32.mrf.mxu0  ;;  %v11269_v63 = vpop.f32.mrf.mxu2 }
 0x47f   : > { %6223 = vrot.lane.b32.xlu2 %v11089_v33, %s8351_s20  ;;  %v5204_v42 = vadd.f32 %v5203_v49, %v11018_v0  ;;  %v4883_v33 = vsub.f32 1.0, %v12863_v10  ;;  %v8295_v0 = vld [vmem:[%s8788_s18 + $0x68] sm:$0xff] }
 0x482   : > { %v5410_v37 = vpop.f32.mrf.mxu3 }
 0x483   : > { %6233 = vrot.lane.b32.xlu0 %v11180_v36, %s8351_s20  ;;  %v11250_v12 = vadd.f32 %v5410_v37, %v5194_v41 }
 0x486   : > { %v11263_v20 = vpop.f32.mrf.mxu0  ;;  %v5326_v47 = vpop.f32.mrf.mxu2 }
 0x487   : > { %6227 = vrot.lane.b32.xlu2 %v11137_v52, %s8351_s20  ;;  %12856 = vst [vmem:[#allocation22_spill] sm:$0xff] %v11263_v20  ;;  %v4899_v52 = vmul.f32 %v8296_v17, %v4883_v33  ;;  %v8298_v20 = vld [vmem:[%s8788_s18 + $0x78] sm:$0xff] }
 0x488   : > { %7758 = vmatmul.msk.bf16.gmra.mxu1 %vm12852_vm8, %v11231_v50  ;;  %7773 = vmatmul.msk.bf16.gmra.mxu2 %vm12853_vm11, %v11231_v50  ;;  %vm12880_vm8 = vmmov %vm12776_vm0 }
 0x489   : > { %7811 = vmatmul.msk.bf16.gmra.mxu0 %vm12854_vm14, %v11231_v50  ;;  %vm12881_vm11 = vmmov %vm12776_vm0 }
 0x48a   : > { %v11258_v38 = vpop.f32.mrf.mxu3  ;;  %7865 = vmatmul.msk.bf16.gmra.mxu3 %vm12858_vm4, %v10756_v30  ;;  %vm12882_vm14 = vmmov %vm12776_vm0 }
 0x48b   : > { %6237 = vrot.lane.b32.xlu0 %v11215_v43, %s8351_s20  ;;  %vm12885_vm4 = vmmov %vm12776_vm0 }
 0x48e   : > { %v5208_v41 = vpop.f32.mrf.mxu0  ;;  %v11292_v36 = vpop.f32.mrf.mxu2 }
 0x48f   : > { %6231 = vrot.lane.b32.xlu2 %v11171_v23, %s8351_s20 }
 0x492   : > { %v5415_v48 = vpop.f32.mrf.mxu3  ;;  %v4946_v16 = vpop.permute.xlu1 %4945 }
 0x493   : > { %v11267_v53 = vadd.f32 %v5415_v48, %v5199_v58  ;;  %v11279_v58 = vpop.f32.mrf.mxu1 }
 0x497   : > { %6235 = vrot.lane.b32.xlu2 %v11209_v2, %s8351_s20  ;;  %v11284_v2 = vpop.f32.mrf.mxu0 }
 0x498   : > { %7845 = vmatmul.msk.bf16.vlgmr.msra.gmra.mxu2 %vm12857_vm15, %v11071_v1  ;;  %v12861_v1 = vld [vmem:[#allocation59_spill] sm:$0xff]  ;;  %12862 = vst [vmem:[#allocation39_spill] sm:$0xff] %v11284_v2  ;;  %vm12884_vm15 = vmmov %vm12776_vm0 }
 0x499   : > { %v4884_v21 = vsub.f32 1.0, %v12861_v1  ;;  %v4980_v30 = vmul.f32 %v4946_v16, %v12861_v1 }
 0x49a   : > { %v11273_v57 = vpop.f32.mrf.mxu3  ;;  %7866 = vmatmul.msk.bf16.gmra.mxu3 %vm12864_vm2, %v12796_v25  ;;  %vm12888_vm2 = vmmov %vm12776_vm0 }
 0x49b   : > { %12859 = vst [vmem:[#allocation5_spill] sm:$0xff] %v11273_v57  ;;  %v4900_v49 = vmul.f32 %v8295_v0, %v4884_v21 }
 0x49d   : > { %v11290_v43 = vadd.f32 %v4980_v30, %v4900_v49  ;;  %v5209_v49 = vadd.f32 %v5208_v41, %v11048_v8 }
 0x49f   : > { %12865 = vst [vmem:[#allocation25_spill] sm:$0xff] %v11290_v43  ;;  %v5012_v16 = vpack.c.bf16 %v11290_v43, %v11290_v43 }
 0x4a1   : > { %v5044_v33 = vunpack.c.l.b16 %v5012_v16 }
 0x4a2   : > { %v5420_v37 = vpop.f32.mrf.mxu3 }
 0x4a3   : > { %v11281_v48 = vadd.f32 %v5420_v37, %v5204_v42 }
 0x4a8   : > { %7846 = vmatmul.msk.bf16.gmra.mxu2 %vm12860_vm13, %v11117_v40  ;;  %vm12886_vm13 = vmmov %vm12776_vm0 }
 0x4aa   : > { %v11296_v37 = vpop.f32.mrf.mxu3  ;;  %7867 = vmatmul.msk.bf16.gmra.mxu3 %vm12872_vm1, %v12802_v24  ;;  %vm12894_vm1 = vmmov %vm12776_vm0 }
 0x4ab   : > { %12866 = vst [vmem:[#allocation38_spill] sm:$0xff] %v11296_v37 }
 0x4b0   : > { %v4944_v23 = vpop.permute.xlu0 %4943 }
 0x4b1   : > { %v4979_v42 = vmul.f32 %v4944_v23, %v12863_v10 }
 0x4b2   : > { %v5425_v23 = vpop.f32.mrf.mxu3 }
 0x4b3   : > { %v11300_v1 = vadd.f32 %v4979_v42, %v4899_v52  ;;  %v11311_v42 = vadd.f32 %v5425_v23, %v5209_v49 }
 0x4b4   : > { %v5265_v21 = vpop.f32.mrf.mxu1 }
 0x4b5   : > { %12867 = vst [vmem:[#allocation42_spill] sm:$0xff] %v11300_v1  ;;  %v5011_v25 = vpack.c.bf16 %v11300_v1, %v11300_v1  ;;  %v5327_v30 = vadd.f32 %v5326_v47, %v5265_v21  ;;  %v5475_v0 = vpop.f32.mrf.mxu0 }
 0x4b6   : > { %v11305_v4 = vadd.f32 %v5475_v0, %v5322_v60  ;;  %12869 = vst [vmem:[#allocation45_spill] sm:$0xff] %v11311_v42  ;;  %v11442_v42 = vld [vmem:[%s12129_s9] ss:$0 sm:$0xff] }
 0x4b7   : > { %v5043_v17 = vunpack.c.l.b16 %v5011_v25 }
 0x4b8   : > { %7847 = vmatmul.msk.bf16.gmra.mxu2 %vm12868_vm6, %v11156_v5  ;;  %vm12890_vm6 = vmmov %vm12776_vm0 }
 0x4b9   : > { %v11309_v10 = vpack.c.b16 %v5044_v33, %v5043_v17  ;;  %v12876_v17 = vld [vmem:[#allocation6_spill] sm:$0xff] }
 0x4ba   : > { %v5331_v52 = vpop.f32.mrf.mxu2  ;;  %7868 = vmatmul.msk.bf16.gmra.mxu3 %vm12875_vm9, %v10831_v62  ;;  %v4885_v23 = vsub.f32 1.0, %v12876_v17  ;;  %vm12900_vm9 = vmmov %vm12776_vm0 }
 0x4bb   : > { %7759 = vmatmul.msk.bf16.gmra.mxu1 %vm12870_vm7, %v11309_v10  ;;  %7812 = vmatmul.msk.bf16.gmra.mxu0 %vm12871_vm12, %v11309_v10  ;;  %vm12892_vm7 = vmmov %vm12776_vm0 }
 0x4bc   : > { %v11317_v8 = vpop.f32.mrf.mxu1  ;;  %vm12893_vm12 = vmmov %vm12776_vm0 }
 0x4bd   : > { %v11319_v60 = vpop.f32.mrf.mxu0 }
 0x4c2   : > { %v11323_v41 = vpop.f32.mrf.mxu2 }
 0x4c4   : > { %v5270_v47 = vpop.f32.mrf.mxu1 }
 0x4c5   : > { %v5332_v16 = vadd.f32 %v5331_v52, %v5270_v47  ;;  %v5480_v21 = vpop.f32.mrf.mxu0  ;;  %v12877_v52 = vld [vmem:[#allocation8_spill] sm:$0xff] }
 0x4c6   : > { %v11325_v25 = vadd.f32 %v5480_v21, %v5327_v30  ;;  %v4886_v47 = vsub.f32 1.0, %v12877_v52  ;;  %v8297_v21 = vld [vmem:[%s8788_s18 + $0x70] sm:$0xff] }
 0x4c7   : > { %v4901_v14 = vmul.f32 %v8297_v21, %v4885_v23  ;;  %v8299_v23 = vld [vmem:[%s8434_s25 + $0x10] sm:$0xff]  ;;  %v8300_v21 = vld [vmem:[%s8434_s25 + $0x18] sm:$0xff] }
 0x4c8   : > { %7848 = vmatmul.msk.bf16.gmra.mxu2 %vm12873_vm3, %v11192_v7  ;;  %v4902_v54 = vmul.f32 %v8298_v20, %v4886_v47  ;;  %vm12895_vm3 = vmmov %vm12776_vm0 }
 0x4c9   : > { %v4948_v33 = vpop.permute.xlu2 %4947 }
 0x4ca   : > { %v5336_v0 = vpop.f32.mrf.mxu2  ;;  %v4981_v30 = vmul.f32 %v4948_v33, %v12876_v17  ;;  %7869 = vmatmul.msk.bf16.gmra.mxu3 %vm12881_vm11, %v11038_v13 }
 0x4cb   : > { %7826 = vmatmul.msk.bf16.vlgmr.msrb.gmra.mxu1 %vm12874_vm5, %v10719_v9  ;;  %vm12896_vm5 = vmmov %vm12776_vm0 }
 0x4cc   : > { %v11331_v49 = vpop.f32.mrf.mxu1  ;;  %v11343_v9 = vadd.f32 %v4981_v30, %v4901_v14 }
 0x4cd   : > { %v11333_v24 = vpop.f32.mrf.mxu0 }
 0x4ce   : > { %12878 = vst [vmem:[#allocation31_spill] sm:$0xff] %v11343_v9  ;;  %v5013_v33 = vpack.c.bf16 %v11343_v9, %v11343_v9 }
 0x4d2   : > { %v11341_v59 = vpop.f32.mrf.mxu2 }
 0x4d5   : > { %v5275_v26 = vpop.f32.mrf.mxu1  ;;  %v4950_v2 = vpop.permute.xlu0 %4949 }
 0x4d6   : > { %v5337_v51 = vadd.f32 %v5336_v0, %v5275_v26  ;;  %v5485_v37 = vpop.f32.mrf.mxu0  ;;  %v4982_v43 = vmul.f32 %v4950_v2, %v12877_v52  ;;  %v5045_v26 = vunpack.c.l.b16 %v5013_v33 }
 0x4d7   : > { %v11347_v1 = vadd.f32 %v5485_v37, %v5332_v16 }
 0x4d8   : > { %v11351_v17 = vadd.f32 %v4982_v43, %v4902_v54  ;;  %7849 = vmatmul.msk.bf16.gmra.mxu2 %vm12776_vm0, %v11231_v50 }
 0x4da   : > { %12879 = vst [vmem:[#allocation26_spill] sm:$0xff] %v11351_v17  ;;  %v5014_v14 = vpack.c.bf16 %v11351_v17, %v11351_v17  ;;  %5750 = vmatmul.bf16.gmra.mxu3 %v12801_v6  ;;  %v8302_v17 = vld [vmem:[%s8434_s25 + $0x28] sm:$0xff] }
 0x4db   : > { %7827 = vmatmul.msk.bf16.gmra.mxu1 %vm12880_vm8, %v8299_v23  ;;  %v5341_v2 = vpop.f32.mrf.mxu2 }
 0x4dc   : > { %v5046_v20 = vunpack.c.l.b16 %v5014_v14 }
 0x4dd   : > { %v11359_v37 = vpop.f32.mrf.mxu1 }
 0x4de   : > { %v11363_v54 = vpop.f32.mrf.mxu0  ;;  %v5054_v43 = vpack.c.b16 %v5046_v20, %v5045_v26 }
 0x4e0   : > { %7813 = vmatmul.msk.bf16.gmra.mxu0 %vm12882_vm14, %v5054_v43 }
 0x4e3   : > { %v11366_v52 = vpop.f32.mrf.mxu2 }
 0x4e5   : > { %v5280_v16 = vpop.f32.mrf.mxu1 }
 0x4e6   : > { %v5342_v0 = vadd.f32 %v5341_v2, %v5280_v16  ;;  %v5490_v30 = vpop.f32.mrf.mxu0 }
 0x4e7   : > { %v11368_v47 = vadd.f32 %v5490_v30, %v5337_v51  ;;  %v8301_v30 = vld [vmem:[%s8434_s25 + $0x20] sm:$0xff] }
 0x4e8   : > { %7850 = vmatmul.msk.bf16.gmra.mxu2 %vm12883_vm10, %v11309_v10 }
 0x4ea   : > { %5755 = vmatmul.bf16.gmra.mxu3 %v12801_v6 }
 0x4eb   : > { %7828 = vmatmul.msk.bf16.gmra.mxu1 %vm12884_vm15, %v8300_v21  ;;  %v5346_v23 = vpop.f32.mrf.mxu2 }
 0x4ed   : > { %v11374_v33 = vpop.f32.mrf.mxu1 }
 0x4ee   : > { %v11377_v14 = vpop.f32.mrf.mxu0 }
 0x4f0   : > { %7882 = vmatmul.msk.bf16.vlgmr.msra.gmra.mxu0 %vm12885_vm4, %v11117_v40 }
 0x4f3   : > { %v11384_v16 = vpop.f32.mrf.mxu2 }
 0x4f4   : > { %12887 = vst [vmem:[#allocation21_spill] sm:$0xff] %v11384_v16 }
 0x4f5   : > { %v5285_v26 = vpop.f32.mrf.mxu1 }
 0x4f6   : > { %v5347_v20 = vadd.f32 %v5346_v23, %v5285_v26  ;;  %v5495_v51 = vpop.f32.mrf.mxu0 }
 0x4f7   : > { %v11381_v2 = vadd.f32 %v5495_v51, %v5342_v0 }
 0x4f8   : > { %7851 = vmatmul.msk.bf16.gmra.mxu2 %vm12886_vm13, %v5054_v43 }
 0x4fb   : > { %7829 = vmatmul.msk.bf16.gmra.mxu1 %vm12888_vm2, %v8301_v30  ;;  %v5351_v40 = vpop.f32.mrf.mxu2 }
 0x4fd   : > { %v11388_v21 = vpop.f32.mrf.mxu1 }
 0x4fe   : > { %12889 = vst [vmem:[#allocation36_spill] sm:$0xff] %v11388_v21  ;;  %v11391_v9 = vpop.f32.mrf.mxu0 }
 0x500   : > { %7883 = vmatmul.msk.bf16.gmra.mxu0 %vm12890_vm6, %v11156_v5 }
 0x503   : > { %v11408_v5 = vpop.f32.mrf.mxu2 }
 0x504   : > { %12897 = vst [vmem:[#allocation9_spill] sm:$0xff] %v11408_v5  ;;  %v11422_v5 = vpop.f32.mrf.mxu3 }
 0x505   : > { %v5290_v23 = vpop.f32.mrf.mxu1  ;;  %12903 = vst [vmem:[#allocation50_spill] sm:$0xff] %v11422_v5 }
 0x506   : > { %v5352_v0 = vadd.f32 %v5351_v40, %v5290_v23  ;;  %v5500_v26 = vpop.f32.mrf.mxu0 }
 0x507   : > { %v11395_v51 = vadd.f32 %v5500_v26, %v5347_v20 }
 0x508   : > { %5673 = vmatmul.bf16.gmra.mxu2 %v12801_v6 }
 0x509   : > { %12891 = vst [vmem:[#allocation29_spill] sm:$0xff] %v11395_v51 }
 0x50b   : > { %7830 = vmatmul.msk.bf16.gmra.mxu1 %vm12892_vm7, %v8302_v17  ;;  %v8042_v17 = vld [vmem:[#allocation2 + $0x8] sm:$0xff]  ;;  %v5356_v40 = vpop.f32.mrf.mxu2 }
 0x50c   : > { %6391 = vmatpush.bf16.msra.mxu1 %v8042_v17  ;;  %v5721_v17 = vpop.f32.mrf.mxu3 }
 0x50d   : > { %v11410_v20 = vpop.f32.mrf.mxu1 }
 0x50e   : > { %12898 = vst [vmem:[#allocation30_spill] sm:$0xff] %v11410_v20  ;;  %v11412_v30 = vpop.f32.mrf.mxu0 }
 0x50f   : > { %12899 = vst [vmem:[#allocation10_spill] sm:$0xff] %v11412_v30 }
 0x510   : > { %7884 = vmatmul.msk.bf16.gmra.mxu0 %vm12893_vm12, %v11192_v7  ;;  %v8041_v7 = vld [vmem:[#allocation2] sm:$0xff] }
 0x511   : > { %6392 = vmatpush.bf16.msra.mxu1 %v8041_v7 }
 0x513   : > { %v11424_v20 = vpop.f32.mrf.mxu2 }
 0x514   : > { %12904 = vst [vmem:[#allocation34_spill] sm:$0xff] %v11424_v20 }
 0x51b   : > { %7831 = vmatmul.msk.bf16.gmra.mxu1 %vm12894_vm1, %v10831_v62 }
 0x520   : > { %7885 = vmatmul.msk.bf16.gmra.mxu0 %vm12895_vm3, %v11231_v50 }
 0x52b   : > { %7832 = vmatmul.msk.bf16.gmra.mxu1 %vm12896_vm5, %v11038_v13 }
 0x530   : > { %7886 = vmatmul.msk.bf16.gmra.mxu0 %vm12900_vm9, %v11309_v10 }
 0x538   : > { %v5295_v62 = vpop.f32.mrf.mxu1  ;;  %v5505_v23 = vpop.f32.mrf.mxu0 }
 0x539   : > { %v5357_v50 = vadd.f32 %v5356_v40, %v5295_v62  ;;  %v11416_v26 = vadd.f32 %v5505_v23, %v5352_v0  ;;  %v5639_v40 = vpop.f32.mrf.mxu2  ;;  %v5723_v23 = vpop.f32.mrf.mxu3 }
 0x53b   : > { %12901 = vst [vmem:[#allocation14_spill] sm:$0xff] %v11416_v26  ;;  %5591 = vmatmul.bf16.gmra.mxu1 %v12801_v6 }
 0x540   : > { %7887 = vmatmul.msk.bf16.gmra.mxu0 %vm12776_vm0, %v5054_v43  ;;  %v11420_v13 = vpop.f32.mrf.mxu1  ;;  %v11428_v0 = vpop.f32.mrf.mxu0 }
 0x541   : > { %12902 = vst [vmem:[#allocation35_spill] sm:$0xff] %v11420_v13  ;;  %v5641_v43 = vpop.f32.mrf.mxu2  ;;  %v5726_v5 = vpop.f32.mrf.mxu3 }
 0x542   : > { %12905 = vst [vmem:[#allocation18_spill] sm:$0xff] %v11428_v0  ;;  %v5176_v0 = vadd.f32 %v10999_v35, %v10892_v19 }
 0x548   : > { %v5557_v10 = vpop.f32.mrf.mxu1 }
 0x549   : > { %v5644_v16 = vpop.f32.mrf.mxu2  ;;  %v5597_v21 = vadd.f32 %v5557_v10, %v11087_v44  ;;  %v5728_v19 = vpop.f32.mrf.mxu3 }
 0x54b   : > { %6393 = vmatmul.bf16.vlgmr.msra.gmra.mxu1 %v12801_v6  ;;  %v5761_v57 = vadd.f32 %v5721_v17, %v5597_v21 }
 0x54d   : > { %v11449_v44 = vadd.f32 %v11442_v42, %v5761_v57 }
 0x550   : > { %5832 = vmatmul.bf16.gmra.mxu0 %v12801_v6  ;;  %v5559_v7 = vpop.f32.mrf.mxu1 }
 0x551   : > { %v5646_v21 = vpop.f32.mrf.mxu2 }
 0x558   : > { %v5562_v62 = vpop.f32.mrf.mxu1 }
 0x559   : > { %v5599_v57 = vadd.f32 %v5562_v62, %v11135_v22 }
 0x55b   : > { %6398 = vmatmul.bf16.gmra.mxu1 %v12801_v6 }
 0x55d   : > { %v5510_v13 = vpop.f32.mrf.mxu0 }
 0x55e   : > { %v11431_v26 = vadd.f32 %v5510_v13, %v5357_v50  ;;  %v5431_v50 = vadd.f32 %v11110_v18, %v5176_v0  ;;  %v5679_v13 = vadd.f32 %v5639_v40, %v11305_v4 }
 0x560   : > { %12906 = vst [vmem:[#allocation54_spill] sm:$0xff] %v11431_v26  ;;  %5837 = vmatmul.bf16.gmra.mxu0 %v12801_v6  ;;  %v5564_v20 = vpop.f32.mrf.mxu1  ;;  %v5598_v10 = vadd.f32 %v5559_v7, %v5431_v50  ;;  %v5731_v7 = vpop.f32.mrf.mxu3 }
 0x562   : > { %v5762_v18 = vadd.f32 %v5723_v23, %v5598_v10  ;;  %v5763_v23 = vadd.f32 %v5726_v5, %v5599_v57 }
 0x564   : > { %v11467_v62 = vadd.f32 %v11442_v42, %v5763_v23 }
 0x565   : > { %v11434_v30 = vpop.f32.mrf.mxu0 }
 0x566   : > { %12907 = vst [vmem:[#allocation15_spill] sm:$0xff] %v11434_v30  ;;  %v5324_v30 = vadd.f32 %v11269_v63, %v11279_v58  ;;  %v11456_v63 = vadd.f32 %v11442_v42, %v5762_v18 }
 0x568   : > { %v5567_v51 = vpop.f32.mrf.mxu1  ;;  %v5516_v27 = vadd.f32 %v11319_v60, %v5324_v30  ;;  %v5649_v30 = vpop.f32.mrf.mxu2 }
 0x56a   : > { %v5680_v4 = vadd.f32 %v5641_v43, %v5516_v27 }
 0x56d   : > { %v5803_v26 = vpop.f32.mrf.mxu0 }
 0x56e   : > { %v5843_v35 = vadd.f32 %v5803_v26, %v5679_v13  ;;  %v5181_v26 = vadd.f32 %v11033_v32, %v10918_v39 }
 0x570   : > { %v5879_v17 = vadd.f32 %v11449_v44, %v5843_v35  ;;  %v11452_v6 = vpop.f32.mrf.mxu1  ;;  %v5433_v10 = vadd.f32 %v11146_v31, %v5181_v26  ;;  %v5681_v35 = vadd.f32 %v5644_v16, %v11325_v25  ;;  %v5733_v25 = vpop.f32.mrf.mxu3 }
 0x571   : > { %v5651_v26 = vpop.f32.mrf.mxu2 }
 0x572   : > { %v7888_v0 = vmul.f32 -1.442695, %v5879_v17  ;;  %v5600_v39 = vadd.f32 %v5564_v20, %v5433_v10  ;;  %v5329_v17 = vadd.f32 %v11292_v36, %v11317_v8 }
 0x574   : > { %8179 = vpow2.f32 %v7888_v0  ;;  %v5518_v31 = vadd.f32 %v11333_v24, %v5329_v17 }
 0x575   : > { %v5805_v40 = vpop.f32.mrf.mxu0 }
 0x576   : > { %v5844_v58 = vadd.f32 %v5805_v40, %v5680_v4  ;;  %v5764_v4 = vadd.f32 %v5728_v19, %v5600_v39  ;;  %v5186_v19 = vadd.f32 %v11076_v28, %v10945_v61  ;;  %v5683_v28 = vadd.f32 %v5649_v30, %v11347_v1 }
 0x577   : > { %v5334_v1 = vadd.f32 %v11323_v41, %v11331_v49 }
 0x578   : > { %v5880_v50 = vadd.f32 %v11456_v63, %v5844_v58  ;;  %v11462_v13 = vpop.f32.mrf.mxu1  ;;  %v5682_v58 = vadd.f32 %v5646_v21, %v5518_v31  ;;  %v11480_v8 = vadd.f32 %v11442_v42, %v5764_v4  ;;  %v5435_v17 = vadd.f32 %v11182_v3, %v5186_v19  ;;  %v6216_v19 = vpop.permute.xlu1 %6215 }
 0x57a   : > { %v8180_v60 = vpop.eup %8179  ;;  %v7889_v27 = vmul.f32 -1.442695, %v5880_v50  ;;  %v5601_v50 = vadd.f32 %v5567_v51, %v11167_v29 }
 0x57b   : > { %v5943_v43 = vadd.f32 1.0, %v8180_v60 }
 0x57c   : > { %8181 = vpow2.f32 %v7889_v27  ;;  %v5765_v10 = vadd.f32 %v5731_v7, %v5601_v50  ;;  %v5736_v7 = vpop.f32.mrf.mxu3 }
 0x57d   : > { %8183 = vrcp.f32 %v5943_v43  ;;  %v5808_v22 = vpop.f32.mrf.mxu0  ;;  %vm5964_vm11 = vweird.f32 %v5943_v43  ;;  %v5968_v39 = vand.u32 2147483647, %v5943_v43 }
 0x57e   : > { %v5845_v32 = vadd.f32 %v5808_v22, %v5681_v35  ;;  %v5970_v35 = vand.u32 2147483648, %v5943_v43 }
 0x57f   : > { %vm5969_vm10 = vcmp.eq.f32.partialorder %v5968_v39, 8.507059e+37 }
 0x580   : > { %v5881_v18 = vadd.f32 %v11467_v62, %v5845_v32  ;;  %v11472_v5 = vpop.f32.mrf.mxu1  ;;  %v5971_v4 = vor.u32 1.1754944e-38, %v5970_v35 }
 0x582   : > { %v8182_v0 = vpop.eup %8181  ;;  %v7890_v16 = vmul.f32 -1.442695, %v5881_v18 }
 0x583   : > { %v8184_v40 = vpop.eup %8183  ;;  %v11475_v57 = vadd.f32 1.0, %v8182_v0 }
 0x584   : > { %v5960_v20 = vmul.f32 %v8184_v40, %v5943_v43  ;;  %8185 = vpow2.f32 %v7890_v16  ;;  %vm5965_vm8 = vweird.f32 %v8184_v40  ;;  %v5602_v43 = vadd.f32 %v11452_v6, %v5435_v17  ;;  %v5654_v16 = vpop.f32.mrf.mxu2 }
 0x585   : > { %8187 = vrcp.f32 %v11475_v57  ;;  %v5810_v36 = vpop.f32.mrf.mxu0  ;;  %vm11490_vm14 = vmor %vm5964_vm11, %vm5965_vm8  ;;  %vm5979_vm4 = vweird.f32 %v11475_v57 }
 0x586   : > { %v5961_v60 = vsub.f32 1.0, %v5960_v20  ;;  %v5846_v24 = vadd.f32 %v5810_v36, %v5682_v58  ;;  %v11501_v58 = vadd.f32 %v11442_v42, %v5765_v10 }
 0x588   : > { %v5882_v23 = vadd.f32 %v11480_v8, %v5846_v24  ;;  %v11485_v27 = vpop.f32.mrf.mxu1  ;;  %v5962_v21 = vmul.f32 %v8184_v40, %v5961_v60  ;;  %v5983_v24 = vand.u32 2147483647, %v11475_v57 }
 0x58a   : > { %v8186_v29 = vpop.eup %8185  ;;  %v7891_v51 = vmul.f32 -1.442695, %v5882_v23  ;;  %v5963_v22 = vadd.f32 %v8184_v40, %v5962_v21  ;;  %v5520_v23 = vadd.f32 %v11363_v54, %v5334_v1  ;;  %v5766_v21 = vadd.f32 %v5733_v25, %v5602_v43  ;;  %v6218_v54 = vpop.permute.xlu2 %6217 }
 0x58b   : > { %v8188_v32 = vpop.eup %8187  ;;  %v11488_v18 = vadd.f32 1.0, %v8186_v29  ;;  %vm5984_vm2 = vcmp.eq.f32.partialorder %v5983_v24, 8.507059e+37 }
 0x58c   : > { %v5975_v0 = vmul.f32 %v8188_v32, %v11475_v57  ;;  %8189 = vpow2.f32 %v7891_v51  ;;  %v5967_v31 = vsel %vm11490_vm14, %v8184_v40, %v5963_v22  ;;  %v5985_v40 = vand.u32 2147483648, %v11475_v57 }
 0x58d   : > { %8191 = vrcp.f32 %v11488_v18  ;;  %v5813_v3 = vpop.f32.mrf.mxu0  ;;  %v11505_v30 = vsel %vm5969_vm10, %v5971_v4, %v5967_v31  ;;  %vm5980_vm15 = vweird.f32 %v8188_v32  ;;  %v5684_v51 = vadd.f32 %v5651_v26, %v5520_v23  ;;  %v5738_v31 = vpop.f32.mrf.mxu3 }
 0x58e   : > { %v5976_v20 = vsub.f32 1.0, %v5975_v0  ;;  %v5847_v50 = vadd.f32 %v5813_v3, %v5683_v28  ;;  %v6263_v41 = vmul.f32 %v6216_v19, %v11505_v30  ;;  %vm5981_vm13 = vmor %vm5979_vm4, %vm5980_vm15  ;;  %v5986_v39 = vor.u32 1.1754944e-38, %v5985_v40 }
 0x58f   : > { %v11519_v25 = vadd.f32 %v11442_v42, %v5766_v21  ;;  %v5603_v57 = vadd.f32 %v11462_v13, %v11211_v15  ;;  %vm5994_vm7 = vweird.f32 %v11488_v18 }
 0x590   : > { %v5883_v6 = vadd.f32 %v11501_v58, %v5847_v50  ;;  %v11509_v36 = vpop.f32.mrf.mxu1  ;;  %v5977_v60 = vmul.f32 %v8188_v32, %v5976_v20  ;;  %v6279_v4 = vpack.c.bf16 %v6263_v41, %v6263_v41  ;;  %v5656_v20 = vpop.f32.mrf.mxu2 }
 0x591   : > { %v5767_v40 = vadd.f32 %v5736_v7, %v5603_v57  ;;  %v5196_v7 = vadd.f32 %v11175_v56, %v10987_v46 }
 0x592   : > { %v8190_v10 = vpop.eup %8189  ;;  %v7892_v35 = vmul.f32 -1.442695, %v5883_v6  ;;  %v5978_v29 = vadd.f32 %v8188_v32, %v5977_v60  ;;  %v5998_v6 = vand.u32 2147483647, %v11488_v18  ;;  %v6000_v60 = vand.u32 2147483648, %v11488_v18 }
 0x593   : > { %v8192_v49 = vpop.eup %8191  ;;  %v11515_v22 = vadd.f32 1.0, %v8190_v10  ;;  %v6311_v23 = vunpack.c.l.b16 %v6279_v4  ;;  %v6220_v4 = vpop.permute.xlu0 %6219 }
 0x594   : > { %v5990_v17 = vmul.f32 %v8192_v49, %v11488_v18  ;;  %8193 = vpow2.f32 %v7892_v35  ;;  %v5982_v61 = vsel %vm5981_vm13, %v8188_v32, %v5978_v29  ;;  %v5191_v32 = vadd.f32 %v11133_v34, %v10969_v11 }
 0x595   : > { %8195 = vrcp.f32 %v11515_v22  ;;  %v5815_v28 = vpop.f32.mrf.mxu0  ;;  %v11524_v26 = vsel %vm5984_vm2, %v5986_v39, %v5982_v61  ;;  %vm5995_vm6 = vweird.f32 %v8192_v49  ;;  %v5685_v35 = vadd.f32 %v5654_v16, %v11368_v47 }
 0x596   : > { %v5991_v0 = vsub.f32 1.0, %v5990_v17  ;;  %v5848_v43 = vadd.f32 %v5815_v28, %v5684_v51  ;;  %v6264_v3 = vmul.f32 %v6218_v54, %v11524_v26  ;;  %v5437_v10 = vadd.f32 %v11223_v45, %v5191_v32  ;;  %vm11539_vm12 = vmor %vm5994_vm7, %vm5995_vm6 }
 0x597   : > { %v6001_v17 = vor.u32 1.1754944e-38, %v6000_v60  ;;  %v11549_v47 = vadd.f32 %v11442_v42, %v5767_v40  ;;  %vm5999_vm1 = vcmp.eq.f32.partialorder %v5998_v6, 8.507059e+37  ;;  %v5339_v54 = vadd.f32 %v11341_v59, %v11359_v37 }
 0x598   : > { %v5884_v50 = vadd.f32 %v11519_v25, %v5848_v43  ;;  %v11530_v1 = vpop.f32.mrf.mxu1  ;;  %v6280_v15 = vpack.c.bf16 %v6264_v3, %v6264_v3  ;;  %v5992_v13 = vmul.f32 %v8192_v49, %v5991_v0  ;;  %v5604_v39 = vadd.f32 %v11472_v5, %v5437_v10  ;;  %v5741_v5 = vpop.f32.mrf.mxu3 }
 0x599   : > { %v6013_v3 = vand.u32 2147483647, %v11515_v22  ;;  %v5522_v32 = vadd.f32 %v11377_v14, %v5339_v54  ;;  %vm6009_vm5 = vweird.f32 %v11515_v22 }
 0x59a   : > { %v8194_v24 = vpop.eup %8193  ;;  %v7893_v19 = vmul.f32 -1.442695, %v5884_v50  ;;  %v6312_v21 = vunpack.c.l.b16 %v6280_v15  ;;  %v5993_v11 = vadd.f32 %v8192_v49, %v5992_v13  ;;  %v5768_v50 = vadd.f32 %v5738_v31, %v5604_v39  ;;  %v5659_v13 = vpop.f32.mrf.mxu2 }
 0x59b   : > { %v8196_v34 = vpop.eup %8195  ;;  %v11537_v29 = vadd.f32 1.0, %v8194_v24  ;;  %v5686_v60 = vadd.f32 %v5656_v20, %v5522_v32  ;;  %v5605_v24 = vadd.f32 %v11485_v27, %v11250_v12  ;;  %vm6014_vm0 = vcmp.eq.f32.partialorder %v6013_v3, 8.507059e+37 }
 0x59c   : > { %v6005_v41 = vmul.f32 %v8196_v34, %v11515_v22  ;;  %8197 = vpow2.f32 %v7893_v19  ;;  %v6327_v18 = vpack.c.b16 %v6312_v21, %v6311_v23  ;;  %v5997_v51 = vsel %vm11539_vm12, %v8192_v49, %v5993_v11  ;;  %v6222_v21 = vpop.permute.xlu1 %6221 }
 0x59d   : > { %8199 = vrcp.f32 %v11537_v29  ;;  %v5818_v45 = vpop.f32.mrf.mxu0  ;;  %v11554_v57 = vsel %vm5999_vm1, %v6001_v17, %v5997_v51  ;;  %v6015_v49 = vand.u32 2147483648, %v11515_v22  ;;  %vm6010_vm3 = vweird.f32 %v8196_v34 }
 0x59e   : > { %v6006_v16 = vsub.f32 1.0, %v6005_v41  ;;  %v5849_v61 = vadd.f32 %v5818_v45, %v5685_v35  ;;  %6335 = vrot.lane.b32.xlu1 %v6327_v18, %s8352_s30  ;;  %v6265_v40 = vmul.f32 %v6220_v4, %v11554_v57  ;;  %vm6011_vm9 = vmor %vm6009_vm5, %vm6010_vm3  ;;  %v11571_v22 = vadd.f32 %v11442_v42, %v5768_v50 }
 0x59f   : > { %v6016_v23 = vor.u32 1.1754944e-38, %v6015_v49  ;;  %v5769_v41 = vadd.f32 %v5741_v5, %v5605_v24  ;;  %vm6024_vm11 = vweird.f32 %v11537_v29  ;;  %v6028_v17 = vand.u32 2147483647, %v11537_v29 }
 0x5a0   : > { %v5885_v28 = vadd.f32 %v11549_v47, %v5849_v61  ;;  %v11558_v0 = vpop.f32.mrf.mxu1  ;;  %v6007_v43 = vmul.f32 %v8196_v34, %v6006_v16  ;;  %v6281_v35 = vpack.c.bf16 %v6265_v40, %v6265_v40  ;;  %v6030_v16 = vand.u32 2147483648, %v11537_v29  ;;  %v5743_v54 = vpop.f32.mrf.mxu3 }
 0x5a1   : > { %v5687_v3 = vadd.f32 %v5659_v13, %v11381_v2  ;;  %v11601_v13 = vadd.f32 %v11442_v42, %v5769_v41  ;;  %vm6029_vm10 = vcmp.eq.f32.partialorder %v6028_v17, 8.507059e+37  ;;  %v5607_v41 = vadd.f32 %v11530_v1, %v11267_v53 }
 0x5a2   : > { %v8198_v15 = vpop.eup %8197  ;;  %v7894_v59 = vmul.f32 -1.442695, %v5885_v28  ;;  %v6008_v37 = vadd.f32 %v8196_v34, %v6007_v43  ;;  %v6313_v46 = vunpack.c.l.b16 %v6281_v35  ;;  %v5439_v43 = vadd.f32 %v11258_v38, %v5196_v7  ;;  %v5661_v32 = vpop.f32.mrf.mxu2 }
 0x5a3   : > { %v8200_v6 = vpop.eup %8199  ;;  %v11566_v19 = vadd.f32 1.0, %v8198_v15  ;;  %v6031_v2 = vor.u32 1.1754944e-38, %v6030_v16 }
 0x5a4   : > { %v6020_v14 = vmul.f32 %v8200_v6, %v11537_v29  ;;  %8201 = vpow2.f32 %v7894_v59  ;;  %v6012_v31 = vsel %vm6011_vm9, %v8196_v34, %v6008_v37  ;;  %vm6025_vm8 = vweird.f32 %v8200_v6 }
 0x5a5   : > { %8203 = vrcp.f32 %v11566_v19  ;;  %v5820_v20 = vpop.f32.mrf.mxu0  ;;  %v11574_v11 = vsel %vm6014_vm0, %v6016_v23, %v6012_v31  ;;  %vm11591_vm14 = vmor %vm6024_vm11, %vm6025_vm8  ;;  %v5606_v59 = vadd.f32 %v11509_v36, %v5439_v43  ;;  %v6043_v31 = vand.u32 2147483647, %v11566_v19  ;;  %v8044_v43 = vld [vmem:[#allocation2 + $0x18] sm:$0xff] }
 0x5a6   : > { %v6021_v12 = vsub.f32 1.0, %v6020_v14  ;;  %v5850_v27 = vadd.f32 %v5820_v20, %v5686_v60  ;;  %v6266_v10 = vmul.f32 %v6222_v21, %v11574_v11  ;;  %v5344_v60 = vadd.f32 %v11366_v52, %v11374_v33  ;;  %v6224_v21 = vpop.permute.xlu2 %6223  ;;  %6540 = vmatpush.bf16.msrb.mxu2 %v8044_v43 }
 0x5a7   : > { %vm6039_vm4 = vweird.f32 %v11566_v19  ;;  %vm6044_vm2 = vcmp.eq.f32.partialorder %v6043_v31, 8.507059e+37  ;;  %v12917_v31 = vld [vmem:[#allocation29_spill] sm:$0xff] }
 0x5a8   : > { %v5886_v34 = vadd.f32 %v11571_v22, %v5850_v27  ;;  %v5587_v18 = vpop.f32.mrf.mxu1  ;;  %v6282_v51 = vpack.c.bf16 %v6266_v10, %v6266_v10  ;;  %v6022_v39 = vmul.f32 %v8200_v6, %v6021_v12  ;;  %v5524_v20 = vadd.f32 %v11391_v9, %v5344_v60 }
 0x5a9   : > { %v11581_v45 = vadd.f32 %v5587_v18, %v11281_v48  ;;  %v5770_v12 = vadd.f32 %v5743_v54, %v5606_v59 }
 0x5aa   : > { %v8202_v61 = vpop.eup %8201  ;;  %v7895_v49 = vmul.f32 -1.442695, %v5886_v34  ;;  %v6314_v56 = vunpack.c.l.b16 %v6282_v51  ;;  %v6023_v5 = vadd.f32 %v8200_v6, %v6022_v39  ;;  %v5688_v7 = vadd.f32 %v5661_v32, %v5524_v20  ;;  %v5746_v51 = vpop.f32.mrf.mxu3 }
 0x5ab   : > { %v8204_v28 = vpop.eup %8203  ;;  %v11588_v4 = vadd.f32 1.0, %v8202_v61  ;;  %v11625_v17 = vadd.f32 %v11442_v42, %v5770_v12  ;;  %v5664_v53 = vpop.f32.mrf.mxu2 }
 0x5ac   : > { %v6035_v29 = vmul.f32 %v8204_v28, %v11566_v19  ;;  %8205 = vpow2.f32 %v7895_v49  ;;  %v6328_v50 = vpack.c.b16 %v6314_v56, %v6313_v46  ;;  %v6027_v15 = vsel %vm11591_vm14, %v8200_v6, %v6023_v5  ;;  %v12914_v56 = vld [vmem:[#allocation24_spill] sm:$0xff] }
 0x5ad   : > { %8207 = vrcp.f32 %v11588_v4  ;;  %v5823_v38 = vpop.f32.mrf.mxu0  ;;  %v11606_v24 = vsel %vm6029_vm10, %v6031_v2, %v6027_v15  ;;  %v6045_v6 = vand.u32 2147483648, %v11566_v19  ;;  %vm6040_vm15 = vweird.f32 %v8204_v28  ;;  %v6226_v19 = vpop.permute.xlu0 %6225 }
 0x5ae   : > { %v6036_v37 = vsub.f32 1.0, %v6035_v29  ;;  %v5851_v40 = vadd.f32 %v5823_v38, %v5687_v3  ;;  %6337 = vrot.lane.b32.xlu1 %v6328_v50, %s8352_s30  ;;  %v6267_v52 = vmul.f32 %v6224_v21, %v11606_v24  ;;  %vm6041_vm13 = vmor %vm6039_vm4, %vm6040_vm15  ;;  %v5201_v5 = vadd.f32 %v12914_v56, %v11003_v55  ;;  %v12915_v50 = vld [vmem:[#allocation45_spill] sm:$0xff] }
 0x5af   : > { %v6046_v18 = vor.u32 1.1754944e-38, %v6045_v6  ;;  %vm6054_vm7 = vweird.f32 %v11588_v4  ;;  %v6058_v59 = vand.u32 2147483647, %v11588_v4  ;;  %v6060_v55 = vand.u32 2147483648, %v11588_v4 }
 0x5b0   : > { %v5887_v36 = vadd.f32 %v11601_v13, %v5851_v40  ;;  %v11610_v23 = vpop.f32.mrf.mxu1  ;;  %v6037_v14 = vmul.f32 %v8204_v28, %v6036_v37  ;;  %v6283_v46 = vpack.c.bf16 %v6267_v52, %v6267_v52  ;;  %v5689_v21 = vadd.f32 %v5664_v53, %v12917_v31 }
 0x5b1   : > { %vm6059_vm1 = vcmp.eq.f32.partialorder %v6058_v59, 8.507059e+37  ;;  %v12922_v56 = vmov 0  }
 0x5b2   : > { %v8206_v27 = vpop.eup %8205  ;;  %v7896_v10 = vmul.f32 -1.442695, %v5887_v36  ;;  %v6038_v35 = vadd.f32 %v8204_v28, %v6037_v14  ;;  %v6315_v37 = vunpack.c.l.b16 %v6283_v46  ;;  %v12916_v36 = vld [vmem:[#allocation5_spill] sm:$0xff] }
 0x5b3   : > { %v11616_v33 = vpop.eup %8207  ;;  %v11620_v34 = vadd.f32 1.0, %v8206_v27  ;;  %v5441_v14 = vadd.f32 %v12916_v36, %v5201_v5  ;;  %v6228_v5 = vpop.permute.xlu2 %6227 }
 0x5b4   : > { %v6050_v9 = vmul.f32 %v11616_v33, %v11588_v4  ;;  %8209 = vpow2.f32 %v7896_v10  ;;  %v6042_v39 = vsel %vm6041_vm13, %v8204_v28, %v6038_v35  ;;  %v5771_v28 = vadd.f32 %v5746_v51, %v5607_v41  ;;  %v8043_v4 = vld [vmem:[#allocation2 + $0x10] sm:$0xff]  ;;  %v5748_v51 = vpop.f32.mrf.mxu3 }
 0x5b5   : > { %8211 = vrcp.f32 %v11620_v34  ;;  %v5825_v16 = vpop.f32.mrf.mxu0  ;;  %v11628_v61 = vsel %vm6044_vm2, %v6046_v18, %v6042_v39  ;;  %vm6055_vm6 = vweird.f32 %v11616_v33  ;;  %v5608_v52 = vadd.f32 %v11558_v0, %v5441_v14  ;;  %6541 = vmatpush.bf16.msrb.mxu2 %v8043_v4 }
 0x5b6   : > { %v6051_v1 = vsub.f32 1.0, %v6050_v9  ;;  %v5852_v54 = vadd.f32 %v5825_v16, %v5688_v7  ;;  %v6268_v49 = vmul.f32 %v6226_v19, %v11628_v61  ;;  %vm11649_vm12 = vmor %vm6054_vm7, %vm6055_vm6  ;;  %v6061_v41 = vor.u32 1.1754944e-38, %v6060_v55  ;;  %v12920_v19 = vld [vmem:[#allocation36_spill] sm:$0xff]  ;;  %v12921_v16 = vld [vmem:[#allocation21_spill] sm:$0xff] }
 0x5b7   : > { %v11660_v18 = vadd.f32 %v11442_v42, %v5771_v28  ;;  %v5349_v53 = vadd.f32 %v12921_v16, %v12920_v19  ;;  %v6075_v0 = vand.u32 2147483648, %v11620_v34  ;;  %v6073_v46 = vand.u32 2147483647, %v11620_v34  ;;  %v12923_v28 = vld [vmem:[#allocation10_spill] sm:$0xff] }
 0x5b8   : > { %v5888_v3 = vadd.f32 %v11625_v17, %v5852_v54  ;;  %v5592_v48 = vpop.f32.mrf.mxu1  ;;  %v6284_v32 = vpack.c.bf16 %v6268_v49, %v6268_v49  ;;  %v6052_v29 = vmul.f32 %v11616_v33, %v6051_v1  ;;  %v5666_v1 = vpop.f32.mrf.mxu2  ;;  %6542 = vmatmul.bf16.vlgmr.msrb.gmra.mxu2 %v12922_v56  ;;  %vm6069_vm5 = vweird.f32 %v11620_v34 }
 0x5b9   : > { %v11637_v15 = vadd.f32 %v5592_v48, %v12915_v50  ;;  %v5526_v43 = vadd.f32 %v12923_v28, %v5349_v53  ;;  %vm6074_vm0 = vcmp.eq.f32.partialorder %v6073_v46, 8.507059e+37 }
 0x5ba   : > { %v8210_v38 = vpop.eup %8209  ;;  %v7897_v2 = vmul.f32 -1.442695, %v5888_v3  ;;  %v6316_v40 = vunpack.c.l.b16 %v6284_v32  ;;  %v6053_v60 = vadd.f32 %v11616_v33, %v6052_v29  ;;  %v5772_v3 = vadd.f32 %v5748_v51, %v5608_v52 }
 0x5bb   : > { %v8212_v6 = vpop.eup %8211  ;;  %v11645_v20 = vadd.f32 1.0, %v8210_v38  ;;  %v5690_v55 = vadd.f32 %v5666_v1, %v5526_v43 }
 0x5bc   : > { %v6065_v27 = vmul.f32 %v8212_v6, %v11620_v34  ;;  %8213 = vpow2.f32 %v7897_v2  ;;  %v6329_v10 = vpack.c.b16 %v6316_v40, %v6315_v37  ;;  %v6057_v35 = vsel %vm11649_vm12, %v11616_v33, %v6053_v60  ;;  %v6230_v37 = vpop.permute.xlu0 %6229 }
 0x5bd   : > { %8215 = vrcp.f32 %v11645_v20  ;;  %v5828_v7 = vpop.f32.mrf.mxu0  ;;  %v11665_v33 = vsel %vm6059_vm1, %v6061_v41, %v6057_v35  ;;  %vm6070_vm3 = vweird.f32 %v8212_v6  ;;  %v6076_v2 = vor.u32 1.1754944e-38, %v6075_v0 }
 0x5be   : > { %v6066_v9 = vsub.f32 1.0, %v6065_v27  ;;  %v5853_v39 = vadd.f32 %v5828_v7, %v5689_v21  ;;  %6339 = vrot.lane.b32.xlu1 %v6329_v10, %s8352_s30  ;;  %v6269_v50 = vmul.f32 %v6228_v5, %v11665_v33  ;;  %vm6071_vm9 = vmor %vm6069_vm5, %vm6070_vm3  ;;  %v11676_v36 = vadd.f32 %v11442_v42, %v5772_v3  ;;  %v8046_v21 = vld [vmem:[#allocation2 + $0x28] sm:$0xff] }
 0x5bf   : > { %6689 = vmatpush.bf16.msrb.mxu3 %v8046_v21  ;;  %vm6084_vm11 = vweird.f32 %v11645_v20  ;;  %v6088_v7 = vand.u32 2147483647, %v11645_v20  ;;  %v6090_v41 = vand.u32 2147483648, %v11645_v20 }
 0x5c0   : > { %v5889_v54 = vadd.f32 %v11660_v18, %v5853_v39  ;;  %v6067_v49 = vmul.f32 %v8212_v6, %v6066_v9  ;;  %v11678_v14 = vpop.f32.mrf.mxu1  ;;  %v6285_v10 = vpack.c.bf16 %v6269_v50, %v6269_v50 }
 0x5c1   : > { %v6091_v5 = vor.u32 1.1754944e-38, %v6090_v41  ;;  %vm6089_vm10 = vcmp.eq.f32.partialorder %v6088_v7, 8.507059e+37 }
 0x5c2   : > { %v8214_v48 = vpop.eup %8213  ;;  %v7898_v32 = vmul.f32 -1.442695, %v5889_v54  ;;  %v6068_v29 = vadd.f32 %v8212_v6, %v6067_v49  ;;  %v6317_v39 = vunpack.c.l.b16 %v6285_v10  ;;  %v8048_v10 = vld [vmem:[#allocation2 + $0x38] sm:$0xff] }
 0x5c3   : > { %v8216_v59 = vpop.eup %8215  ;;  %v5952_v38 = vadd.f32 1.0, %v8214_v48  ;;  %6835 = vmatpush.bf16.msrb.mxu0 %v8048_v10 }
 0x5c4   : > { %v6080_v40 = vmul.f32 %v8216_v59, %v11645_v20  ;;  %8217 = vpow2.f32 %v7898_v32  ;;  %v6072_v60 = vsel %vm6071_vm9, %v8212_v6, %v6068_v29  ;;  %vm6085_vm8 = vweird.f32 %v8216_v59  ;;  %v6232_v32 = vpop.permute.xlu2 %6231 }
 0x5c5   : > { %8219 = vrcp.f32 %v5952_v38  ;;  %v5830_v34 = vpop.f32.mrf.mxu0  ;;  %v11680_v31 = vsel %vm6074_vm0, %v6076_v2, %v6072_v60  ;;  %vm6086_vm14 = vmor %vm6084_vm11, %vm6085_vm8  ;;  %v6105_v43 = vand.u32 2147483648, %v5952_v38  ;;  %v6103_v48 = vand.u32 2147483647, %v5952_v38 }
 0x5c6   : > { %v6081_v12 = vsub.f32 1.0, %v6080_v40  ;;  %v5854_v4 = vadd.f32 %v5830_v34, %v5690_v55  ;;  %v6270_v27 = vmul.f32 %v6230_v37, %v11680_v31  ;;  %vm6099_vm4 = vweird.f32 %v5952_v38  ;;  %v6234_v34 = vpop.permute.xlu0 %6233 }
 0x5c7   : > { %v6106_v37 = vor.u32 1.1754944e-38, %v6105_v43  ;;  %vm6104_vm2 = vcmp.eq.f32.partialorder %v6103_v48, 8.507059e+37  ;;  %vm12935_vm8 = vcmask 261120  }
 0x5c8   : > { %v5890_v35 = vadd.f32 %v11676_v36, %v5854_v4  ;;  %v6286_v6 = vpack.c.bf16 %v6270_v27, %v6270_v27  ;;  %v6082_v52 = vmul.f32 %v8216_v59, %v6081_v12  ;;  %v11687_v46 = vpop.f32.mrf.mxu1  ;;  %v12924_v4 = vld [vmem:[#allocation42_spill] sm:$0xff]  ;;  %vm12936_vm11 = vmmov %vm12935_vm8 }
 0x5ca   : > { %v8218_v51 = vpop.eup %8217  ;;  %v7899_v9 = vmul.f32 -1.442695, %v5890_v35  ;;  %v6318_v19 = vunpack.c.l.b16 %v6286_v6  ;;  %v6083_v16 = vadd.f32 %v8216_v59, %v6082_v52  ;;  %v8045_v35 = vld [vmem:[#allocation2 + $0x20] sm:$0xff] }
 0x5cb   : > { %v8220_v53 = vpop.eup %8219  ;;  %v5953_v0 = vadd.f32 1.0, %v8218_v51  ;;  %6690 = vmatpush.bf16.msrb.mxu3 %v8045_v35 }
 0x5cc   : > { %v6095_v1 = vmul.f32 %v8220_v53, %v5952_v38  ;;  %8221 = vpow2.f32 %v7899_v9  ;;  %v6330_v54 = vpack.c.b16 %v6318_v19, %v6317_v39  ;;  %v6087_v49 = vsel %vm6086_vm14, %v8216_v59, %v6083_v16  ;;  %vm12937_vm14 = vmmov %vm12935_vm8 }
 0x5cd   : > { %8223 = vrcp.f32 %v5953_v0  ;;  %v11690_v20 = vsel %vm6089_vm10, %v6091_v5, %v6087_v49  ;;  %vm6100_vm15 = vweird.f32 %v8220_v53  ;;  %vm6114_vm7 = vweird.f32 %v5953_v0  ;;  %vm12938_vm10 = vmmov %vm12935_vm8 }
 0x5ce   : > { %v6096_v28 = vsub.f32 1.0, %v6095_v1  ;;  %6341 = vrot.lane.b32.xlu1 %v6330_v54, %s8352_s30  ;;  %v6271_v59 = vmul.f32 %v6232_v32, %v11690_v20  ;;  %vm6101_vm13 = vmor %vm6099_vm4, %vm6100_vm15  ;;  %v6120_v41 = vand.u32 2147483648, %v5953_v0  ;;  %v6118_v19 = vand.u32 2147483647, %v5953_v0 }
 0x5cf   : > { %vm12939_vm15 = vmmov %vm12935_vm8 }
 0x5d0   : > { %v6097_v3 = vmul.f32 %v8220_v53, %v6096_v28  ;;  %v6287_v38 = vpack.c.bf16 %v6271_v59, %v6271_v59  ;;  %v11698_v6 = vpop.f32.mrf.mxu1  ;;  %v6121_v49 = vor.u32 1.1754944e-38, %v6120_v41  ;;  %v12925_v28 = vld [vmem:[#allocation26_spill] sm:$0xff]  ;;  %vm6119_vm1 = vcmp.eq.f32.partialorder %v6118_v19, 8.507059e+37  ;;  %v12927_v41 = vld [vmem:[#allocation31_spill] sm:$0xff]  ;;  %vm12940_vm4 = vmmov %vm12935_vm8 }
 0x5d1   : > { %v12929_v19 = vld [vmem:[#allocation22_spill] sm:$0xff] }
 0x5d2   : > { %v8222_v29 = vpop.eup %8221  ;;  %v6098_v50 = vadd.f32 %v8220_v53, %v6097_v3  ;;  %v6319_v51 = vunpack.c.l.b16 %v6287_v38 }
 0x5d3   : > { %v8224_v55 = vpop.eup %8223  ;;  %v5954_v2 = vadd.f32 1.0, %v8222_v29 }
 0x5d4   : > { %v6110_v40 = vmul.f32 %v8224_v55, %v5953_v0  ;;  %v6102_v60 = vsel %vm6101_vm13, %v8220_v53, %v6098_v50  ;;  %vm6115_vm6 = vweird.f32 %v8224_v55  ;;  %v6236_v0 = vpop.permute.xlu2 %6235  ;;  %vm12941_vm13 = vmmov %vm12940_vm4 }
 0x5d5   : > { %8225 = vrcp.f32 %v5954_v2  ;;  %v11693_v21 = vsel %vm6104_vm2, %v6106_v37, %v6102_v60  ;;  %vm6116_vm12 = vmor %vm6114_vm7, %vm6115_vm6  ;;  %v6135_v3 = vand.u32 2147483648, %v5954_v2  ;;  %v6133_v32 = vand.u32 2147483647, %v5954_v2 }
 0x5d6   : > { %v6111_v12 = vsub.f32 1.0, %v6110_v40  ;;  %6239 = vrot.lane.b32.xlu1 %v12924_v4, %s8351_s20  ;;  %v6272_v27 = vmul.f32 %v6234_v34, %v11693_v21  ;;  %vm6129_vm5 = vweird.f32 %v5954_v2  ;;  %v6238_v40 = vpop.permute.xlu0 %6237  ;;  %v12926_v34 = vld [vmem:[#allocation25_spill] sm:$0xff]  ;;  %vm12949_vm2 = vmmov %vm12940_vm4 }
 0x5d7   : > { %vm6134_vm0 = vcmp.eq.f32.partialorder %v6133_v32, 8.507059e+37  ;;  %vm12950_vm6 = vmmov %vm12949_vm2 }
 0x5d8   : > { %v6288_v52 = vpack.c.bf16 %v6272_v27, %v6272_v27  ;;  %v6112_v7 = vmul.f32 %v8224_v55, %v6111_v12  ;;  %v11705_v29 = vpop.f32.mrf.mxu1  ;;  %vm12951_vm7 = vmmov %vm12949_vm2 }
 0x5da   : > { %v6320_v9 = vunpack.c.l.b16 %v6288_v52  ;;  %v6113_v39 = vadd.f32 %v8224_v55, %v6112_v7  ;;  %v8047_v7 = vld [vmem:[#allocation2 + $0x30] sm:$0xff] }
 0x5db   : > { %v8226_v16 = vpop.eup %8225  ;;  %6836 = vmatpush.bf16.msrb.mxu0 %v8047_v7 }
 0x5dc   : > { %v6125_v53 = vmul.f32 %v8226_v16, %v5954_v2  ;;  %v6331_v1 = vpack.c.b16 %v6320_v9, %v6319_v51  ;;  %v6117_v54 = vsel %vm6116_vm12, %v8224_v55, %v6113_v39  ;;  %vm6130_vm3 = vweird.f32 %v8226_v16  ;;  %v5751_v51 = vpop.f32.mrf.mxu3  ;;  %v5833_v9 = vpop.f32.mrf.mxu0  ;;  %v12928_v39 = vld [vmem:[#allocation23_spill] sm:$0xff]  ;;  %vm12952_vm12 = vmmov %vm12949_vm2 }
 0x5dd   : > { %v11703_v43 = vsel %vm6119_vm1, %v6121_v49, %v6117_v54  ;;  %vm6131_vm9 = vmor %vm6129_vm5, %vm6130_vm3  ;;  %v6136_v55 = vor.u32 1.1754944e-38, %v6135_v3  ;;  %v12931_v54 = vld [vmem:[#allocation30_spill] sm:$0xff]  ;;  %v12932_v49 = vld [vmem:[#allocation9_spill] sm:$0xff] }
 0x5de   : > { %v6126_v5 = vsub.f32 1.0, %v6125_v53  ;;  %6245 = vrot.lane.b32.xlu1 %v12925_v28, %s8351_s20  ;;  %6343 = vrot.lane.b32.xlu2 %v6331_v1, %s8352_s30  ;;  %v6273_v59 = vmul.f32 %v6236_v0, %v11703_v43  ;;  %v12930_v53 = vld [vmem:[#allocation38_spill] sm:$0xff] }
 0x5df   : > { %v12933_v0 = vld [vmem:[#allocation18_spill] sm:$0xff] }
 0x5e0   : > { %v6127_v48 = vmul.f32 %v8226_v16, %v6126_v5  ;;  %v6289_v27 = vpack.c.bf16 %v6273_v59, %v6273_v59  ;;  %v6401_v35 = vpop.f32.mrf.mxu1  ;;  %v5354_v5 = vadd.f32 %v12932_v49, %v12931_v54  ;;  %v12943_v54 = vld [vmem:[#allocation39_spill] sm:$0xff] }
 0x5e2   : > { %v6128_v50 = vadd.f32 %v8226_v16, %v6127_v48  ;;  %v6321_v2 = vunpack.c.l.b16 %v6289_v27  ;;  %v12934_v27 = vld [vmem:[#allocation14_spill] sm:$0xff] }
 0x5e4   : > { %v6132_v37 = vsel %vm6131_vm9, %v8226_v16, %v6128_v50  ;;  %v5206_v16 = vadd.f32 %v12929_v19, %v12928_v39  ;;  %v5753_v32 = vpop.f32.mrf.mxu3  ;;  %v5528_v50 = vadd.f32 %v12933_v0, %v5354_v5  ;;  %v5835_v59 = vpop.f32.mrf.mxu0  ;;  %vm12955_vm9 = vmmov %vm12949_vm2 }
 0x5e5   : > { %v11708_v60 = vsel %vm6134_vm0, %v6136_v55, %v6132_v37  ;;  %vm12956_vm0 = vmmov %vm12949_vm2 }
 0x5e6   : > { %6450 = vrot.lane.b32.xlu1 %v11687_v46, %s8353_s12  ;;  %6241 = vrot.lane.b32.xlu2 %v12926_v34, %s8351_s20  ;;  %v6274_v12 = vmul.f32 %v6238_v40, %v11708_v60  ;;  %v5669_v46 = vpop.f32.mrf.mxu2  ;;  %v5443_v1 = vadd.f32 %v12930_v53, %v5206_v16 }
 0x5e8   : > { %v6290_v38 = vpack.c.bf16 %v6274_v12, %v6274_v12  ;;  %v5610_v3 = vadd.f32 %v11610_v23, %v5443_v1  ;;  %v8050_v23 = vld [vmem:[#allocation2 + $0x48] sm:$0xff]  ;;  %v12942_v1 = vld [vmem:[#allocation11_spill] sm:$0xff] }
 0x5e9   : > { %6981 = vmatpush.bf16.msrb.mxu1 %v8050_v23  ;;  %v5211_v49 = vadd.f32 %v12943_v54, %v12942_v1 }
 0x5ea   : > { %v6322_v10 = vunpack.c.l.b16 %v6290_v38  ;;  %v5774_v37 = vadd.f32 %v5753_v32, %v5610_v3  ;;  %v5691_v38 = vadd.f32 %v5669_v46, %v12934_v27  ;;  %v12947_v27 = vld [vmem:[#allocation15_spill] sm:$0xff] }
 0x5ec   : > { %v6332_v52 = vpack.c.b16 %v6322_v10, %v6321_v2  ;;  %v5773_v2 = vadd.f32 %v5751_v51, %v11581_v45  ;;  %v11729_v10 = vadd.f32 %v11442_v42, %v5774_v37  ;;  %v5756_v19 = vpop.f32.mrf.mxu3 }
 0x5ee   : > { %6456 = vrot.lane.b32.xlu1 %v6401_v35, %s8353_s12  ;;  %6345 = vrot.lane.b32.xlu0 %v6332_v52, %s8352_s30  ;;  %v5671_v48 = vpop.f32.mrf.mxu2  ;;  %v5855_v35 = vadd.f32 %v5833_v9, %v5691_v38  ;;  %v11736_v7 = vadd.f32 %v11442_v42, %v5773_v2  ;;  %v5838_v9 = vpop.f32.mrf.mxu0 }
 0x5ef   : > { %v5692_v55 = vadd.f32 %v5671_v48, %v5528_v50  ;;  %v12944_v48 = vld [vmem:[#allocation50_spill] sm:$0xff]  ;;  %v12945_v50 = vld [vmem:[#allocation35_spill] sm:$0xff] }
 0x5f0   : > { %v5891_v46 = vadd.f32 %v11736_v7, %v5855_v35  ;;  %v5445_v32 = vadd.f32 %v12944_v48, %v5211_v49 }
 0x5f1   : > { %v5856_v40 = vadd.f32 %v5835_v59, %v5692_v55  ;;  %v12946_v59 = vld [vmem:[#allocation34_spill] sm:$0xff] }
 0x5f2   : > { %v7900_v51 = vmul.f32 -1.442695, %v5891_v46  ;;  %v5359_v55 = vadd.f32 %v12946_v59, %v12945_v50  ;;  %v5612_v37 = vadd.f32 %v11678_v14, %v5445_v32 }
 0x5f3   : > { %v5892_v52 = vadd.f32 %v11729_v10, %v5856_v40 }
 0x5f4   : > { %v5530_v38 = vadd.f32 %v12947_v27, %v5359_v55 }
 0x5f5   : > { %v7901_v45 = vmul.f32 -1.442695, %v5892_v52 }
 0x5f6   : > { %6243 = vrot.lane.b32.xlu0 %v12927_v41, %s8351_s20  ;;  %v5674_v39 = vpop.f32.mrf.mxu2  ;;  %v5840_v2 = vpop.f32.mrf.mxu0 }
 0x5f7   : > { %8227 = vpow2.f32 %v7901_v45  ;;  %v12948_v45 = vld [vmem:[#allocation54_spill] sm:$0xff] }
 0x5f8   : > { %8229 = vpow2.f32 %v7900_v51  ;;  %v5693_v51 = vadd.f32 %v5674_v39, %v12948_v45 }
 0x5fa   : > { %v5857_v39 = vadd.f32 %v5838_v9, %v5693_v51 }
 0x5fd   : > { %v8228_v53 = vpop.eup %8227 }
 0x5fe   : > { %v5956_v5 = vadd.f32 1.0, %v8228_v53  ;;  %v8230_v3 = vpop.eup %8229  ;;  %v5676_v40 = vpop.f32.mrf.mxu2  ;;  %v5775_v53 = vadd.f32 %v5756_v19, %v11637_v15 }
 0x5ff   : > { %v11746_v0 = vadd.f32 1.0, %v8230_v3  ;;  %v5694_v23 = vadd.f32 %v5676_v40, %v5530_v38 }
 0x600   : > { %8231 = vrcp.f32 %v5956_v5  ;;  %vm6159_vm3 = vweird.f32 %v5956_v5  ;;  %v6163_v27 = vand.u32 2147483647, %v5956_v5 }
 0x601   : > { %8233 = vrcp.f32 %v11746_v0  ;;  %v5858_v46 = vadd.f32 %v5840_v2, %v5694_v23  ;;  %v6150_v51 = vand.u32 2147483648, %v11746_v0 }
 0x606   : > { %v8232_v52 = vpop.eup %8231 }
 0x607   : > { %v6155_v14 = vmul.f32 %v8232_v52, %v5956_v5  ;;  %v8234_v54 = vpop.eup %8233  ;;  %vm6160_vm1 = vweird.f32 %v8232_v52 }
 0x608   : > { %v6140_v3 = vmul.f32 %v8234_v54, %v11746_v0  ;;  %vm11780_vm5 = vmor %vm6159_vm3, %vm6160_vm1 }
 0x609   : > { %v6156_v49 = vsub.f32 1.0, %v6155_v14 }
 0x60a   : > { %v6141_v55 = vsub.f32 1.0, %v6140_v3 }
 0x60b   : > { %v6157_v59 = vmul.f32 %v8232_v52, %v6156_v49  ;;  %v6151_v49 = vor.u32 1.1754944e-38, %v6150_v51 }
 0x60c   : > { %v6142_v40 = vmul.f32 %v8234_v54, %v6141_v55 }
 0x60d   : > { %v6158_v9 = vadd.f32 %v8232_v52, %v6157_v59 }
 0x610   : > { %v6336_v12 = vpop.permute.xlu1 %6335 }
 0x611   : > { %7912 = vmatmul.msk.bf16.gmra.mxu1 %vm12935_vm8, %v6336_v12  ;;  %7926 = vmatmul.msk.bf16.gmra.mxu2 %vm12936_vm11, %v6336_v12  ;;  %vm6145_vm8 = vweird.f32 %v8234_v54  ;;  %vm12957_vm11 = vmmov %vm12956_vm0 }
 0x612   : > { %7941 = vmatmul.msk.bf16.vlgmr.msrb.gmra.mxu3 %vm12937_vm14, %v6336_v12  ;;  %v5758_v12 = vpop.f32.mrf.mxu3  ;;  %vm12958_vm14 = vmmov %vm12956_vm0 }
 0x613   : > { %v5776_v35 = vadd.f32 %v5758_v12, %v5612_v37  ;;  %v6165_v12 = vand.u32 2147483648, %v5956_v5 }
 0x615   : > { %v11758_v1 = vadd.f32 %v11442_v42, %v5776_v35  ;;  %v8303_v42 = vld [vmem:[%s12129_s9] ss:$0 sm:$0xff]  ;;  %v6162_v35 = vsel %vm11780_vm5, %v8232_v52, %v6158_v9  ;;  %v6166_v45 = vor.u32 1.1754944e-38, %v6165_v12  ;;  %v6148_v52 = vand.u32 2147483647, %v11746_v0 }
 0x616   : > { %v11772_v19 = vadd.f32 %v8303_v42, %v5775_v53 }
 0x617   : > { %v5894_v15 = vadd.f32 %v11758_v1, %v5858_v46  ;;  %v6143_v46 = vadd.f32 %v8234_v54, %v6142_v40 }
 0x618   : > { %v5893_v48 = vadd.f32 %v11772_v19, %v5857_v39 }
 0x619   : > { %v7903_v32 = vmul.f32 -1.442695, %v5894_v15 }
 0x61a   : > { %v7902_v37 = vmul.f32 -1.442695, %v5893_v48 }
 0x61b   : > { %8235 = vpow2.f32 %v7903_v32 }
 0x61c   : > { %8237 = vpow2.f32 %v7902_v37 }
 0x620   : > { %v6338_v16 = vpop.permute.xlu1 %6337 }
 0x621   : > { %7913 = vmatmul.msk.bf16.gmra.mxu1 %vm12938_vm10, %v6338_v16  ;;  %7927 = vmatmul.msk.bf16.gmra.mxu2 %vm12939_vm15, %v6338_v16  ;;  %v8236_v23 = vpop.eup %8235  ;;  %vm6164_vm10 = vcmp.eq.f32.partialorder %v6163_v27, 8.507059e+37  ;;  %vm6144_vm15 = vweird.f32 %v11746_v0  ;;  %v8049_v27 = vld [vmem:[#allocation2 + $0x40] sm:$0xff] }
 0x622   : > { %7942 = vmatmul.msk.bf16.gmra.mxu3 %vm12940_vm4, %v6338_v16  ;;  %7957 = vmatmul.msk.bf16.vlgmr.msrb.gmra.mxu0 %vm12941_vm13, %v6338_v16  ;;  %v5958_v53 = vadd.f32 1.0, %v8236_v23  ;;  %v11797_v14 = vsel %vm6164_vm10, %v6166_v45, %v6162_v35  ;;  %vm6146_vm4 = vmor %vm6144_vm15, %vm6145_vm8  ;;  %v8238_v39 = vpop.eup %8237  ;;  %vm6149_vm13 = vcmp.eq.f32.partialorder %v6148_v52, 8.507059e+37 }
 0x623   : > { %v6147_v42 = vsel %vm6146_vm4, %v8234_v54, %v6143_v46  ;;  %v5957_v3 = vadd.f32 1.0, %v8238_v39  ;;  %6982 = vmatpush.bf16.msrb.mxu1 %v8049_v27 }
 0x624   : > { %8239 = vrcp.f32 %v5958_v53  ;;  %v11800_v48 = vsel %vm6149_vm13, %v6151_v49, %v6147_v42  ;;  %v6195_v52 = vand.u32 2147483648, %v5958_v53  ;;  %vm6189_vm3 = vweird.f32 %v5958_v53 }
 0x625   : > { %8241 = vrcp.f32 %v5957_v3  ;;  %v6193_v39 = vand.u32 2147483647, %v5958_v53  ;;  %vm6174_vm15 = vweird.f32 %v5957_v3 }
 0x627   : > { %vm6194_vm10 = vcmp.eq.f32.partialorder %v6193_v39, 8.507059e+37 }
 0x62a   : > { %v8240_v40 = vpop.eup %8239 }
 0x62b   : > { %v6185_v2 = vmul.f32 %v8240_v40, %v5958_v53  ;;  %v8242_v54 = vpop.eup %8241  ;;  %vm6190_vm1 = vweird.f32 %v8240_v40  ;;  %v6180_v53 = vand.u32 2147483648, %v5957_v3 }
 0x62c   : > { %v6170_v35 = vmul.f32 %v8242_v54, %v5957_v3  ;;  %vm11814_vm5 = vmor %vm6189_vm3, %vm6190_vm1  ;;  %vm6175_vm8 = vweird.f32 %v8242_v54 }
 0x62d   : > { %v6186_v23 = vsub.f32 1.0, %v6185_v2  ;;  %vm6176_vm4 = vmor %vm6174_vm15, %vm6175_vm8 }
 0x62e   : > { %v6171_v45 = vsub.f32 1.0, %v6170_v35  ;;  %vm12972_vm1 = vmmov %vm12956_vm0 }
 0x62f   : > { %v6187_v46 = vmul.f32 %v8240_v40, %v6186_v23  ;;  %vm12973_vm3 = vmmov %vm12956_vm0 }
 0x630   : > { %v11754_v16 = vpop.permute.xlu1 %6339  ;;  %v6172_v51 = vmul.f32 %v8242_v54, %v6171_v45  ;;  %vm12976_vm8 = vmmov %vm12956_vm0 }
 0x631   : > { %7914 = vmatmul.msk.bf16.gmra.mxu1 %vm12949_vm2, %v11754_v16  ;;  %7928 = vmatmul.msk.bf16.gmra.mxu2 %vm12950_vm6, %v11754_v16  ;;  %vm12959_vm2 = vmmov %vm12956_vm0 }
 0x632   : > { %7943 = vmatmul.msk.bf16.gmra.mxu3 %vm12951_vm7, %v11754_v16  ;;  %7958 = vmatmul.msk.bf16.gmra.mxu0 %vm12952_vm12, %v11754_v16  ;;  %vm12960_vm6 = vmmov %vm12956_vm0 }
 0x633   : > { %vm12961_vm7 = vmmov %vm12956_vm0 }
 0x634   : > { %vm12962_vm12 = vmmov %vm12956_vm0 }
 0x635   : > { %vm12983_vm15 = vmmov %vm12956_vm0 }
 0x638   : > { %v11776_v50 = vpop.permute.xlu2 %6343 }
 0x63b   : > { %v6543_v42 = vpop.f32.mrf.mxu2 }
 0x640   : > { %v11778_v38 = vpop.permute.xlu1 %6341  ;;  %v6242_v5 = vpop.permute.xlu2 %6241 }
 0x641   : > { %7915 = vmatmul.msk.bf16.gmra.mxu1 %vm12955_vm9, %v11778_v38  ;;  %7929 = vmatmul.msk.bf16.gmra.mxu2 %vm12956_vm0, %v11778_v38  ;;  %v6276_v15 = vmul.f32 %v6242_v5, %v11797_v14  ;;  %v6188_v5 = vadd.f32 %v8240_v40, %v6187_v46  ;;  %vm12965_vm9 = vmmov %vm12956_vm0 }
 0x642   : > { %7944 = vmatmul.msk.bf16.gmra.mxu3 %vm12957_vm11, %v11778_v38  ;;  %7959 = vmatmul.msk.bf16.gmra.mxu0 %vm12958_vm14, %v11778_v38  ;;  %vm12966_vm11 = vmmov %vm12956_vm0 }
 0x643   : > { %v6292_v59 = vpack.c.bf16 %v6276_v15, %v6276_v15  ;;  %vm12967_vm14 = vmmov %vm12956_vm0 }
 0x645   : > { %v6324_v0 = vunpack.c.l.b16 %v6292_v59  ;;  %v6196_v59 = vor.u32 1.1754944e-38, %v6195_v52 }
 0x648   : > { %v6240_v32 = vpop.permute.xlu1 %6239 }
 0x649   : > { %v6275_v55 = vmul.f32 %v6240_v32, %v11800_v48  ;;  %v6192_v32 = vsel %vm11814_vm5, %v8240_v40, %v6188_v5  ;;  %vm12974_vm5 = vmmov %vm12956_vm0 }
 0x64b   : > { %v6291_v37 = vpack.c.bf16 %v6275_v55, %v6275_v55 }
 0x64d   : > { %v6323_v9 = vunpack.c.l.b16 %v6291_v37  ;;  %v6178_v37 = vand.u32 2147483647, %v5957_v3  ;;  %v6545_v3 = vpop.f32.mrf.mxu2 }
 0x64f   : > { %v6333_v12 = vpack.c.b16 %v6324_v0, %v6323_v9  ;;  %v11825_v0 = vsel %vm6194_vm10, %v6196_v59, %v6192_v32  ;;  %vm6179_vm13 = vcmp.eq.f32.partialorder %v6178_v37, 8.507059e+37  ;;  %vm12981_vm10 = vmmov %vm12956_vm0 }
 0x650   : > { %v6246_v55 = vpop.permute.xlu1 %6245 }
 0x651   : > { %7916 = vmatmul.msk.bf16.gmra.mxu1 %vm12959_vm2, %v11776_v50  ;;  %7930 = vmatmul.msk.bf16.gmra.mxu2 %vm12960_vm6, %v11776_v50  ;;  %v6278_v9 = vmul.f32 %v6246_v55, %v11825_v0  ;;  %vm12968_vm2 = vmmov %vm12956_vm0 }
 0x652   : > { %7945 = vmatmul.msk.bf16.gmra.mxu3 %vm12961_vm7, %v11776_v50  ;;  %7960 = vmatmul.msk.bf16.gmra.mxu0 %vm12962_vm12, %v11776_v50  ;;  %vm12969_vm6 = vmmov %vm12956_vm0 }
 0x653   : > { %6347 = vrot.lane.b32.xlu2 %v6333_v12, %s8352_s30  ;;  %v6181_v12 = vor.u32 1.1754944e-38, %v6180_v53  ;;  %v6294_v23 = vpack.c.bf16 %v6278_v9, %v6278_v9  ;;  %vm12970_vm7 = vmmov %vm12956_vm0 }
 0x654   : > { %vm12971_vm12 = vmmov %vm12956_vm0 }
 0x655   : > { %v6326_v45 = vunpack.c.l.b16 %v6294_v23 }
 0x65b   : > { %6452 = vrot.lane.b32.xlu2 %v11698_v6, %s8353_s12  ;;  %v6173_v6 = vadd.f32 %v8242_v54, %v6172_v51 }
 0x65d   : > { %v6177_v40 = vsel %vm6176_vm4, %v8242_v54, %v6173_v6  ;;  %vm12985_vm4 = vmmov %vm12956_vm0 }
 0x65e   : > { %v11828_v27 = vsel %vm6179_vm13, %v6181_v12, %v6177_v40  ;;  %v6451_v40 = vpop.permute.xlu1 %6450  ;;  %vm12988_vm13 = vmmov %vm12956_vm0 }
 0x660   : > { %v6346_v49 = vpop.permute.xlu0 %6345 }
 0x661   : > { %7917 = vmatmul.msk.bf16.gmra.mxu1 %vm12965_vm9, %v6346_v49  ;;  %7931 = vmatmul.msk.bf16.gmra.mxu2 %vm12956_vm0, %v6346_v49  ;;  %vm12975_vm9 = vmmov %vm12956_vm0 }
 0x662   : > { %7946 = vmatmul.msk.bf16.gmra.mxu3 %vm12966_vm11, %v6346_v49  ;;  %7961 = vmatmul.msk.bf16.gmra.mxu0 %vm12967_vm14, %v6346_v49  ;;  %vm12977_vm11 = vmmov %vm12956_vm0 }
 0x663   : > { %6599 = vrot.lane.b32.xlu2 %v6543_v42, %s8353_s12  ;;  %vm12979_vm14 = vmmov %vm12956_vm0 }
 0x668   : > { %v6244_v2 = vpop.permute.xlu0 %6243 }
 0x669   : > { %v6277_v35 = vmul.f32 %v6244_v2, %v11828_v27  ;;  %v6498_v2 = vadd.f32 %v6451_v40, %v11449_v44 }
 0x66b   : > { %v6293_v46 = vpack.c.bf16 %v6277_v35, %v6277_v35 }
 0x66d   : > { %v6325_v5 = vunpack.c.l.b16 %v6293_v46 }
 0x66f   : > { %v6334_v51 = vpack.c.b16 %v6326_v45, %v6325_v5 }
 0x671   : > { %6349 = vrot.lane.b32.xlu0 %v6334_v51, %s8352_s30  ;;  %7972 = vmatmul.msk.bf16.vlgmr.msrb.gmra.mxu1 %vm12968_vm2, %v11754_v16  ;;  %vm12989_vm2 = vmmov %vm12956_vm0 }
 0x679   : > { %6454 = vrot.lane.b32.xlu0 %v11705_v29, %s8353_s12 }
 0x681   : > { %6601 = vrot.lane.b32.xlu0 %v6545_v3, %s8353_s12  ;;  %7973 = vmatmul.msk.bf16.gmra.mxu1 %vm12969_vm6, %v11778_v38  ;;  %vm12992_vm6 = vmmov %vm12956_vm0 }
 0x68e   : > { %v6404_v54 = vpop.f32.mrf.mxu1 }
 0x68f   : > { %6458 = vrot.lane.b32.xlu2 %v6404_v54, %s8353_s12 }
 0x691   : > { %7974 = vmatmul.msk.bf16.gmra.mxu1 %vm12970_vm7, %v11776_v50  ;;  %vm12993_vm7 = vmmov %vm12956_vm0 }
 0x694   : > { %v6548_v52 = vpop.f32.mrf.mxu2 }
 0x695   : > { %v6692_v39 = vpop.f32.mrf.mxu3  ;;  %6603 = vrot.lane.b32.xlu1 %v6548_v52, %s8353_s12 }
 0x696   : > { %6748 = vrot.lane.b32.xlu0 %v6692_v39, %s8353_s12  ;;  %v6406_v16 = vpop.f32.mrf.mxu1 }
 0x69c   : > { %v6550_v29 = vpop.f32.mrf.mxu2 }
 0x69d   : > { %v6694_v15 = vpop.f32.mrf.mxu3  ;;  %6605 = vrot.lane.b32.xlu2 %v6550_v29, %s8353_s12 }
 0x69e   : > { %6750 = vrot.lane.b32.xlu1 %v6694_v15, %s8353_s12  ;;  %6460 = vrot.lane.b32.xlu0 %v6406_v16, %s8353_s12  ;;  %v6409_v38 = vpop.f32.mrf.mxu1 }
 0x69f   : > { %v6838_v6 = vpop.f32.mrf.mxu0 }
 0x6a1   : > { %7975 = vmatmul.msk.bf16.gmra.mxu1 %vm12971_vm12, %v6346_v49  ;;  %vm12995_vm12 = vmmov %vm12956_vm0 }
 0x6a4   : > { %v6553_v42 = vpop.f32.mrf.mxu2 }
 0x6a5   : > { %v6697_v50 = vpop.f32.mrf.mxu3 }
 0x6a6   : > { %6462 = vrot.lane.b32.xlu1 %v6409_v38, %s8353_s12  ;;  %6607 = vrot.lane.b32.xlu0 %v6553_v42, %s8353_s12  ;;  %v6411_v32 = vpop.f32.mrf.mxu1 }
 0x6a7   : > { %6752 = vrot.lane.b32.xlu2 %v6697_v50, %s8353_s12  ;;  %v6840_v37 = vpop.f32.mrf.mxu0 }
 0x6ac   : > { %v6555_v49 = vpop.f32.mrf.mxu2 }
 0x6ad   : > { %v6348_v59 = vpop.permute.xlu2 %6347  ;;  %v6699_v55 = vpop.f32.mrf.mxu3 }
 0x6ae   : > { %7932 = vmatmul.msk.bf16.gmra.mxu2 %vm12972_vm1, %v6348_v59  ;;  %7947 = vmatmul.msk.bf16.gmra.mxu3 %vm12973_vm3, %v6348_v59  ;;  %v6414_v53 = vpop.f32.mrf.mxu1  ;;  %vm12996_vm1 = vmmov %vm12956_vm0 }
 0x6af   : > { %7962 = vmatmul.msk.bf16.gmra.mxu0 %vm12974_vm5, %v6348_v59  ;;  %6894 = vrot.lane.b32.xlu1 %v6838_v6, %s8353_s12  ;;  %v6843_v5 = vpop.f32.mrf.mxu0  ;;  %vm12998_vm3 = vmmov %vm12956_vm0 }
 0x6b0   : > { %6754 = vrot.lane.b32.xlu0 %v6699_v55, %s8353_s12  ;;  %6464 = vrot.lane.b32.xlu2 %v6411_v32, %s8353_s12  ;;  %vm12999_vm5 = vmmov %vm12956_vm0 }
 0x6b1   : > { %7976 = vmatmul.msk.bf16.gmra.mxu1 %vm12975_vm9, %v6348_v59  ;;  %vm13000_vm9 = vmmov %vm12956_vm0 }
 0x6b4   : > { %v6558_v23 = vpop.f32.mrf.mxu2 }
 0x6b5   : > { %v6453_v9 = vpop.permute.xlu2 %6452  ;;  %v6702_v12 = vpop.f32.mrf.mxu3 }
 0x6b6   : > { %v6416_v35 = vpop.f32.mrf.mxu1 }
 0x6b7   : > { %6609 = vrot.lane.b32.xlu1 %v6555_v49, %s8353_s12  ;;  %v6845_v44 = vpop.f32.mrf.mxu0 }
 0x6b8   : > { %6466 = vrot.lane.b32.xlu0 %v6414_v53, %s8353_s12  ;;  %6896 = vrot.lane.b32.xlu2 %v6840_v37, %s8353_s12 }
 0x6bc   : > { %v6560_v3 = vpop.f32.mrf.mxu2 }
 0x6bd   : > { %v6600_v46 = vpop.permute.xlu2 %6599  ;;  %v6704_v51 = vpop.f32.mrf.mxu3 }
 0x6be   : > { %v11862_v45 = vadd.f32 %v6600_v46, %v6498_v2  ;;  %v6419_v54 = vpop.f32.mrf.mxu1  ;;  %v6499_v2 = vadd.f32 %v6453_v9, %v11456_v63 }
 0x6bf   : > { %6756 = vrot.lane.b32.xlu1 %v6702_v12, %s8353_s12  ;;  %v6848_v29 = vpop.f32.mrf.mxu0 }
 0x6c0   : > { %6898 = vrot.lane.b32.xlu0 %v6843_v5, %s8353_s12  ;;  %6611 = vrot.lane.b32.xlu2 %v6558_v23, %s8353_s12 }
 0x6c4   : > { %v6563_v16 = vpop.f32.mrf.mxu2 }
 0x6c5   : > { %v6707_v52 = vpop.f32.mrf.mxu3 }
 0x6c6   : > { %v6421_v39 = vpop.f32.mrf.mxu1 }
 0x6c7   : > { %6468 = vrot.lane.b32.xlu1 %v6416_v35, %s8353_s12  ;;  %v6850_v50 = vpop.f32.mrf.mxu0 }
 0x6c8   : > { %6613 = vrot.lane.b32.xlu0 %v6560_v3, %s8353_s12  ;;  %6758 = vrot.lane.b32.xlu2 %v6704_v51, %s8353_s12 }
 0x6cc   : > { %v6565_v42 = vpop.f32.mrf.mxu2 }
 0x6cd   : > { %v6709_v15 = vpop.f32.mrf.mxu3 }
 0x6ce   : > { %v6424_v38 = vpop.f32.mrf.mxu1 }
 0x6cf   : > { %6900 = vrot.lane.b32.xlu1 %v6845_v44, %s8353_s12  ;;  %v6853_v49 = vpop.f32.mrf.mxu0 }
 0x6d0   : > { %6760 = vrot.lane.b32.xlu0 %v6707_v52, %s8353_s12  ;;  %6470 = vrot.lane.b32.xlu2 %v6419_v54, %s8353_s12  ;;  %v6457_v52 = vpop.permute.xlu1 %6456 }
 0x6d4   : > { %v6568_v55 = vpop.f32.mrf.mxu2 }
 0x6d5   : > { %v6712_v6 = vpop.f32.mrf.mxu3 }
 0x6d6   : > { %v6426_v59 = vpop.f32.mrf.mxu1 }
 0x6d7   : > { %6615 = vrot.lane.b32.xlu1 %v6563_v16, %s8353_s12  ;;  %v6855_v5 = vpop.f32.mrf.mxu0 }
 0x6d8   : > { %6472 = vrot.lane.b32.xlu0 %v6421_v39, %s8353_s12  ;;  %6902 = vrot.lane.b32.xlu2 %v6848_v29, %s8353_s12 }
 0x6dc   : > { %v6570_v23 = vpop.f32.mrf.mxu2 }
 0x6dd   : > { %v6714_v37 = vpop.f32.mrf.mxu3 }
 0x6de   : > { %v6429_v40 = vpop.f32.mrf.mxu1 }
 0x6df   : > { %6762 = vrot.lane.b32.xlu1 %v6709_v15, %s8353_s12  ;;  %v6858_v63 = vpop.f32.mrf.mxu0 }
 0x6e0   : > { %6904 = vrot.lane.b32.xlu0 %v6850_v50, %s8353_s12  ;;  %6617 = vrot.lane.b32.xlu2 %v6565_v42, %s8353_s12 }
 0x6e3   : > { %v6350_v32 = vpop.permute.xlu0 %6349 }
 0x6e4   : > { %7948 = vmatmul.msk.bf16.gmra.mxu3 %vm12956_vm0, %v6350_v32  ;;  %7963 = vmatmul.msk.bf16.gmra.mxu0 %vm12976_vm8, %v6350_v32  ;;  %v6573_v54 = vpop.f32.mrf.mxu2  ;;  %vm13003_vm8 = vmmov %vm12956_vm0 }
 0x6e5   : > { %7977 = vmatmul.msk.bf16.gmra.mxu1 %vm12977_vm11, %v6350_v32  ;;  %v6717_v44 = vpop.f32.mrf.mxu3  ;;  %vm13004_vm11 = vmmov %vm12956_vm0 }
 0x6e6   : > { %v6431_v3 = vpop.f32.mrf.mxu1 }
 0x6e7   : > { %6474 = vrot.lane.b32.xlu1 %v6424_v38, %s8353_s12 }
 0x6e8   : > { %6619 = vrot.lane.b32.xlu0 %v6568_v55, %s8353_s12  ;;  %6764 = vrot.lane.b32.xlu2 %v6712_v6, %s8353_s12 }
 0x6e9   : > { %v6459_v12 = vpop.permute.xlu2 %6458 }
 0x6eb   : > { %v6455_v53 = vpop.permute.xlu0 %6454 }
 0x6ec   : > { %v6500_v16 = vadd.f32 %v6455_v53, %v11467_v62  ;;  %v6575_v29 = vpop.f32.mrf.mxu2 }
 0x6ed   : > { %v6719_v15 = vpop.f32.mrf.mxu3 }
 0x6ee   : > { %v6984_v39 = vpop.f32.mrf.mxu1 }
 0x6ef   : > { %6906 = vrot.lane.b32.xlu1 %v6853_v49, %s8353_s12 }
 0x6f0   : > { %6766 = vrot.lane.b32.xlu0 %v6714_v37, %s8353_s12  ;;  %6476 = vrot.lane.b32.xlu2 %v6426_v59, %s8353_s12 }
 0x6f3   : > { %v6602_v35 = vpop.permute.xlu0 %6601 }
 0x6f4   : > { %v6648_v46 = vadd.f32 %v6602_v35, %v6499_v2  ;;  %6872 = vmatmul.bf16.gmra.mxu0 %v12922_v56  ;;  %v6502_v2 = vadd.f32 %v6459_v12, %v11501_v58 }
 0x6f5   : > { %7013 = vmatmul.bf16.gmra.mxu1 %v12922_v56 }
 0x6f6   : > { %v6986_v55 = vpop.f32.mrf.mxu1 }
 0x6f7   : > { %6621 = vrot.lane.b32.xlu1 %v6570_v23, %s8353_s12  ;;  %v6606_v51 = vpop.permute.xlu2 %6605 }
 0x6f8   : > { %6478 = vrot.lane.b32.xlu0 %v6429_v40, %s8353_s12  ;;  %6908 = vrot.lane.b32.xlu2 %v6855_v5, %s8353_s12 }
 0x6fe   : > { %v11909_v23 = vpop.f32.mrf.mxu1 }
 0x6ff   : > { %6768 = vrot.lane.b32.xlu1 %v6717_v44, %s8353_s12 }
 0x700   : > { %6910 = vrot.lane.b32.xlu0 %v6858_v63, %s8353_s12  ;;  %6623 = vrot.lane.b32.xlu2 %v6573_v54, %s8353_s12  ;;  %v6501_v63 = vadd.f32 %v6457_v52, %v11480_v8 }
 0x701   : > { %v6753_v9 = vpop.permute.xlu2 %6752 }
 0x705   : > { %7018 = vmatmul.bf16.gmra.mxu1 %v12922_v56  ;;  %v6860_v56 = vpop.f32.mrf.mxu0 }
 0x707   : > { %6480 = vrot.lane.b32.xlu1 %v6431_v3, %s8353_s12  ;;  %v6604_v38 = vpop.permute.xlu1 %6603 }
 0x708   : > { %6625 = vrot.lane.b32.xlu0 %v6575_v29, %s8353_s12  ;;  %6770 = vrot.lane.b32.xlu2 %v6719_v15, %s8353_s12  ;;  %v6649_v42 = vadd.f32 %v6604_v38, %v6500_v16  ;;  %v6749_v50 = vpop.permute.xlu0 %6748  ;;  %v11913_v16 = vpop.f32.mrf.mxu1 }
 0x709   : > { %v11903_v32 = vadd.f32 %v6749_v50, %v11862_v45 }
 0x70a   : > { %v6465_v6 = vpop.permute.xlu2 %6464  ;;  %v6798_v59 = vadd.f32 %v6753_v9, %v6649_v42  ;;  %v6650_v9 = vadd.f32 %v6606_v51, %v6501_v63 }
 0x70f   : > { %6912 = vrot.lane.b32.xlu1 %v6860_v56, %s8353_s12 }
 0x710   : > { %v6751_v62 = vpop.permute.xlu1 %6750  ;;  %v6461_v49 = vpop.permute.xlu0 %6460 }
 0x711   : > { %v6797_v53 = vadd.f32 %v6751_v62, %v6648_v46  ;;  %v6503_v58 = vadd.f32 %v6461_v49, %v11519_v25 }
 0x712   : > { %v6897_v37 = vpop.permute.xlu2 %6896 }
 0x713   : > { %v11906_v40 = vadd.f32 %v6897_v37, %v6797_v53 }
 0x718   : > { %v6463_v35 = vpop.permute.xlu1 %6462  ;;  %v6608_v5 = vpop.permute.xlu0 %6607 }
 0x719   : > { %v6504_v45 = vadd.f32 %v6463_v35, %v11549_v47  ;;  %v6651_v3 = vadd.f32 %v6608_v5, %v6502_v2  ;;  %v11918_v47 = vpop.f32.mrf.mxu1 }
 0x71a   : > { %v6612_v54 = vpop.permute.xlu2 %6611 }
 0x71b   : > { %v6653_v44 = vadd.f32 %v6612_v54, %v6504_v45  ;;  %v6505_v45 = vadd.f32 %v6465_v6, %v11571_v22 }
 0x721   : > { %v11915_v46 = vpop.permute.xlu1 %6894  ;;  %v11927_v5 = vpop.f32.mrf.mxu1 }
 0x722   : > { %v6755_v29 = vpop.permute.xlu0 %6754  ;;  %v6759_v15 = vpop.permute.xlu2 %6758 }
 0x723   : > { %v6799_v38 = vadd.f32 %v6755_v29, %v6650_v9 }
 0x729   : > { %v6610_v12 = vpop.permute.xlu1 %6609 }
 0x72a   : > { %v6652_v42 = vadd.f32 %v6610_v12, %v6503_v58  ;;  %v6467_v50 = vpop.permute.xlu0 %6466  ;;  %v6471_v56 = vpop.permute.xlu2 %6470 }
 0x72c   : > { %v6863_v62 = vpop.f32.mrf.mxu0  ;;  %v6801_v53 = vadd.f32 %v6759_v15, %v6652_v42  ;;  %v6999_v42 = vpop.f32.mrf.mxu1 }
 0x72d   : > { %6914 = vrot.lane.b32.xlu2 %v6863_v62, %s8353_s12 }
 0x731   : > { %v6757_v8 = vpop.permute.xlu1 %6756  ;;  %v6578_v51 = vpop.f32.mrf.mxu2 }
 0x732   : > { %v6800_v52 = vadd.f32 %v6757_v8, %v6651_v3  ;;  %v6899_v37 = vpop.permute.xlu0 %6898  ;;  %v6722_v2 = vpop.f32.mrf.mxu3  ;;  %6627 = vrot.lane.b32.xlu1 %v6578_v51, %s8353_s12  ;;  %v6506_v8 = vadd.f32 %v6467_v50, %v11601_v13 }
 0x733   : > { %v11922_v35 = vadd.f32 %v6899_v37, %v6798_v59  ;;  %v6903_v25 = vpop.permute.xlu2 %6902  ;;  %6772 = vrot.lane.b32.xlu0 %v6722_v2, %s8353_s12 }
 0x734   : > { %v11925_v49 = vadd.f32 %v6903_v25, %v6800_v52  ;;  %v6865_v54 = vpop.f32.mrf.mxu0  ;;  %v7001_v51 = vpop.f32.mrf.mxu1 }
 0x735   : > { %7040 = vrot.lane.b32.xlu2 %v6984_v39, %s8353_s12 }
 0x739   : > { %v6469_v63 = vpop.permute.xlu1 %6468  ;;  %v6580_v58 = vpop.f32.mrf.mxu2 }
 0x73a   : > { %v6507_v3 = vadd.f32 %v6469_v63, %v11625_v17  ;;  %v6614_v9 = vpop.permute.xlu0 %6613  ;;  %v6724_v29 = vpop.f32.mrf.mxu3 }
 0x73b   : > { %v6654_v15 = vadd.f32 %v6614_v9, %v6505_v45  ;;  %v6618_v59 = vpop.permute.xlu2 %6617  ;;  %6916 = vrot.lane.b32.xlu0 %v6865_v54, %s8353_s12  ;;  %6774 = vrot.lane.b32.xlu1 %v6724_v29, %s8353_s12 }
 0x73c   : > { %v6656_v12 = vadd.f32 %v6618_v59, %v6507_v3  ;;  %v7004_v9 = vpop.f32.mrf.mxu1  ;;  %v6508_v59 = vadd.f32 %v6471_v56, %v11660_v18 }
 0x73d   : > { %6629 = vrot.lane.b32.xlu2 %v6580_v58, %s8353_s12 }
 0x741   : > { %v6901_v39 = vpop.permute.xlu1 %6900 }
 0x742   : > { %v11935_v62 = vadd.f32 %v6901_v39, %v6799_v38  ;;  %v6761_v22 = vpop.permute.xlu0 %6760 }
 0x743   : > { %v11937_v6 = vadd.f32 %v6761_v22, %v6653_v44  ;;  %v6765_v17 = vpop.permute.xlu2 %6764  ;;  %7042 = vrot.lane.b32.xlu0 %v6986_v55, %s8353_s12 }
 0x749   : > { %v6616_v52 = vpop.permute.xlu1 %6615 }
 0x74a   : > { %v6655_v37 = vadd.f32 %v6616_v52, %v6506_v8  ;;  %v6473_v2 = vpop.permute.xlu0 %6472 }
 0x74b   : > { %v6477_v25 = vpop.permute.xlu2 %6476  ;;  %v6509_v18 = vadd.f32 %v6473_v2, %v11676_v36 }
 0x74c   : > { %v6804_v45 = vadd.f32 %v6765_v17, %v6655_v37  ;;  %v7006_v17 = vpop.f32.mrf.mxu1 }
 0x751   : > { %v6763_v54 = vpop.permute.xlu1 %6762 }
 0x752   : > { %v6803_v63 = vadd.f32 %v6763_v54, %v6654_v15  ;;  %v6905_v3 = vpop.permute.xlu0 %6904 }
 0x753   : > { %v11941_v38 = vadd.f32 %v6905_v3, %v6801_v53  ;;  %v6909_v29 = vpop.permute.xlu2 %6908 }
 0x754   : > { %v11943_v44 = vadd.f32 %v6909_v29, %v6803_v63 }
 0x759   : > { %v6475_v55 = vpop.permute.xlu1 %6474 }
 0x75a   : > { %v6620_v58 = vpop.permute.xlu0 %6619  ;;  %v6510_v13 = vadd.f32 %v6475_v55, %v11736_v7 }
 0x75b   : > { %v6657_v50 = vadd.f32 %v6620_v58, %v6508_v59  ;;  %v6624_v39 = vpop.permute.xlu2 %6623 }
 0x75c   : > { %v11947_v22 = vadd.f32 %v6624_v39, %v6510_v13 }
 0x761   : > { %v11949_v8 = vpop.permute.xlu1 %6906  ;;  %v6868_v15 = vpop.f32.mrf.mxu0 }
 0x762   : > { %v6767_v52 = vpop.permute.xlu0 %6766  ;;  %6918 = vrot.lane.b32.xlu1 %v6868_v15, %s8353_s12  ;;  %v7009_v37 = vpop.f32.mrf.mxu1 }
 0x763   : > { %v11952_v53 = vadd.f32 %v6767_v52, %v6656_v12  ;;  %v6771_v29 = vpop.permute.xlu2 %6770 }
 0x767   : > { %v6727_v54 = vpop.f32.mrf.mxu3 }
 0x768   : > { %6776 = vrot.lane.b32.xlu2 %v6727_v54, %s8353_s12 }
 0x769   : > { %v6622_v7 = vpop.permute.xlu1 %6621  ;;  %v6870_v56 = vpop.f32.mrf.mxu0 }
 0x76a   : > { %v6658_v63 = vadd.f32 %v6622_v7, %v6509_v18  ;;  %v6479_v3 = vpop.permute.xlu0 %6478  ;;  %7044 = vrot.lane.b32.xlu1 %v11909_v23, %s8353_s12  ;;  %v7011_v55 = vpop.f32.mrf.mxu1  ;;  %v6511_v23 = vadd.f32 %v6477_v25, %v11729_v10 }
 0x76c   : > { %v6807_v59 = vadd.f32 %v6771_v29, %v6658_v63 }
 0x76f   : > { %v6729_v58 = vpop.f32.mrf.mxu3 }
 0x770   : > { %6778 = vrot.lane.b32.xlu0 %v6729_v58, %s8353_s12  ;;  %6920 = vrot.lane.b32.xlu2 %v6870_v56, %s8353_s12 }
 0x771   : > { %v6769_v12 = vpop.permute.xlu1 %6768  ;;  %v6873_v13 = vpop.f32.mrf.mxu0 }
 0x772   : > { %v6806_v36 = vadd.f32 %v6769_v12, %v6657_v50  ;;  %v6911_v2 = vpop.permute.xlu0 %6910  ;;  %v7014_v15 = vpop.f32.mrf.mxu1 }
 0x773   : > { %v11960_v39 = vadd.f32 %v6911_v2, %v6804_v45 }
 0x778   : > { %6922 = vrot.lane.b32.xlu0 %v6873_v13, %s8353_s12  ;;  %7046 = vrot.lane.b32.xlu2 %v11913_v16, %s8353_s12 }
 0x779   : > { %v6875_v52 = vpop.f32.mrf.mxu0  ;;  %v6481_v16 = vpop.permute.xlu1 %6480 }
 0x77a   : > { %v6626_v54 = vpop.permute.xlu0 %6625  ;;  %6924 = vrot.lane.b32.xlu1 %v6875_v52, %s8353_s12  ;;  %v7016_v45 = vpop.f32.mrf.mxu1 }
 0x77b   : > { %v11967_v18 = vadd.f32 %v6626_v54, %v6511_v23 }
 0x780   : > { %7048 = vrot.lane.b32.xlu0 %v11918_v47, %s8353_s12  ;;  %7052 = vrot.lane.b32.xlu2 %v6999_v42, %s8353_s12 }
 0x782   : > { %7050 = vrot.lane.b32.xlu1 %v11927_v5, %s8353_s12  ;;  %v7019_v10 = vpop.f32.mrf.mxu1  ;;  %v6942_v5 = vadd.f32 %v11915_v46, %v11903_v32 }
 0x787   : > { %v6915_v50 = vpop.permute.xlu2 %6914 }
 0x788   : > { %v11974_v7 = vadd.f32 %v6915_v50, %v6806_v36  ;;  %7054 = vrot.lane.b32.xlu0 %v7001_v51, %s8353_s12  ;;  %7058 = vrot.lane.b32.xlu2 %v7006_v17, %s8353_s12  ;;  %v6913_v51 = vpop.permute.xlu1 %6912  ;;  %v6512_v17 = vadd.f32 %v6479_v3, %v11772_v19 }
 0x78a   : > { %7056 = vrot.lane.b32.xlu1 %v7004_v9, %s8353_s12  ;;  %v7021_v25 = vpop.f32.mrf.mxu1 }
 0x78f   : > { %v7041_v47 = vpop.permute.xlu2 %7040 }
 0x790   : > { %7060 = vrot.lane.b32.xlu0 %v7009_v37, %s8353_s12  ;;  %7064 = vrot.lane.b32.xlu2 %v7014_v15, %s8353_s12  ;;  %v7088_v42 = vadd.f32 %v7041_v47, %v6942_v5 }
 0x792   : > { %7062 = vrot.lane.b32.xlu1 %v7011_v55, %s8353_s12  ;;  %8243 = vtanh.f32 %v7088_v42 }
 0x797   : > { %v6630_v12 = vpop.permute.xlu2 %6629 }
 0x798   : > { %7066 = vrot.lane.b32.xlu0 %v7016_v45, %s8353_s12  ;;  %7070 = vrot.lane.b32.xlu2 %v7021_v25, %s8353_s12  ;;  %v8244_v9 = vpop.eup %8243 }
 0x79a   : > { %7068 = vrot.lane.b32.xlu1 %v7019_v10, %s8353_s12  ;;  %v6951_v10 = vadd.f32 %v6913_v51, %v11952_v53 }
 0x7a0   : > { %7168 = vrot.lane.b32.xlu0 %v8244_v9, %s8353_s12 }
 0x7a4   : > { %v6628_v37 = vpop.permute.xlu1 %6627 }
 0x7a5   : > { %v6773_v56 = vpop.permute.xlu0 %6772  ;;  %v6661_v63 = vadd.f32 %v6628_v37, %v6512_v17  ;;  %v6513_v37 = vadd.f32 %v6481_v16, %v11758_v1 }
 0x7a6   : > { %v6808_v32 = vadd.f32 %v6773_v56, %v11947_v22 }
 0x7a7   : > { %v6662_v53 = vadd.f32 %v6630_v12, %v6513_v37  ;;  %v12980_v37 = vld [vmem:[#allocation17_spill] sm:$0xff] }
 0x7ad   : > { %v6917_v46 = vpop.permute.xlu0 %6916  ;;  %v11998_v3 = vpop.permute.xlu1 %6774 }
 0x7ae   : > { %v11990_v29 = vadd.f32 %v6917_v46, %v6807_v59 }
 0x7b5   : > { %v7043_v55 = vpop.permute.xlu0 %7042 }
 0x7b6   : > { %v7089_v58 = vadd.f32 %v7043_v55, %v11906_v40  ;;  %v6948_v40 = vadd.f32 %v11949_v8, %v11937_v6 }
 0x7b8   : > { %8245 = vtanh.f32 %v7089_v58 }
 0x7be   : > { %v8246_v13 = vpop.eup %8245 }
 0x7bf   : > { %7170 = vrot.lane.b32.xlu1 %v8246_v13, %s8353_s12 }
 0x7c2   : > { %v6777_v36 = vpop.permute.xlu2 %6776 }
 0x7c3   : > { %v11994_v2 = vadd.f32 %v6777_v36, %v6661_v63 }
 0x7ca   : > { %v11996_v19 = vpop.permute.xlu2 %6920 }
 0x7d2   : > { %v7047_v15 = vpop.permute.xlu2 %7046 }
 0x7d3   : > { %v7091_v22 = vadd.f32 %v7047_v15, %v11935_v62 }
 0x7d4   : > { %v6919_v59 = vpop.permute.xlu1 %6918 }
 0x7d5   : > { %8247 = vtanh.f32 %v7091_v22  ;;  %v6954_v6 = vadd.f32 %v6919_v59, %v6808_v32 }
 0x7da   : > { %v7053_v23 = vpop.permute.xlu2 %7052 }
 0x7db   : > { %v8248_v52 = vpop.eup %8247  ;;  %v7094_v54 = vadd.f32 %v7053_v23, %v6948_v40 }
 0x7dc   : > { %v7045_v45 = vpop.permute.xlu1 %7044  ;;  %7174 = vrot.lane.b32.xlu0 %v8248_v52, %s8353_s12 }
 0x7dd   : > { %8249 = vtanh.f32 %v7094_v54  ;;  %v7090_v50 = vadd.f32 %v7045_v45, %v11922_v35 }
 0x7df   : > { %8251 = vtanh.f32 %v7090_v50 }
 0x7e2   : > { %v6779_v47 = vpop.permute.xlu0 %6778  ;;  %v7059_v5 = vpop.permute.xlu2 %7058 }
 0x7e3   : > { %v8250_v62 = vpop.eup %8249  ;;  %v7097_v42 = vadd.f32 %v7059_v5, %v6951_v10  ;;  %v6811_v51 = vadd.f32 %v6779_v47, %v6662_v53 }
 0x7e4   : > { %7180 = vrot.lane.b32.xlu0 %v8250_v62, %s8353_s12 }
 0x7e5   : > { %v8252_v25 = vpop.eup %8251  ;;  %8253 = vtanh.f32 %v7097_v42 }
 0x7e6   : > { %7172 = vrot.lane.b32.xlu2 %v8252_v25, %s8353_s12 }
 0x7ea   : > { %v6923_v8 = vpop.permute.xlu0 %6922  ;;  %v7065_v9 = vpop.permute.xlu2 %7064 }
 0x7eb   : > { %v8254_v17 = vpop.eup %8253  ;;  %v7100_v35 = vadd.f32 %v7065_v9, %v6954_v6 }
 0x7ec   : > { %v6925_v56 = vpop.permute.xlu1 %6924  ;;  %7186 = vrot.lane.b32.xlu0 %v8254_v17, %s8353_s12  ;;  %v7121_v17 = vsub.f32 1.0, %v11524_v26 }
 0x7ed   : > { %8255 = vtanh.f32 %v7100_v35  ;;  %v6957_v63 = vadd.f32 %v6925_v56, %v6811_v51  ;;  %v7122_v51 = vsub.f32 1.0, %v11554_v57 }
 0x7ee   : > { %v7137_v35 = vmul.f32 %v7121_v17, %v12980_v37  ;;  %v7135_v37 = vsub.f32 1.0, %v11825_v0 }
 0x7f2   : > { %v7049_v46 = vpop.permute.xlu0 %7048  ;;  %v7071_v55 = vpop.permute.xlu2 %7070 }
 0x7f3   : > { %v8256_v58 = vpop.eup %8255  ;;  %v7092_v13 = vadd.f32 %v7049_v46, %v11925_v49  ;;  %v7103_v36 = vadd.f32 %v7071_v55, %v6957_v63  ;;  %v12982_v46 = vld [vmem:[#allocation19_spill] sm:$0xff] }
 0x7f4   : > { %v7051_v32 = vpop.permute.xlu1 %7050  ;;  %7192 = vrot.lane.b32.xlu0 %v8256_v58, %s8353_s12  ;;  %v7138_v55 = vmul.f32 %v7122_v51, %v12982_v46  ;;  %v7151_v51 = vmul.f32 %v7135_v37, %v12925_v28  ;;  %v13001_v28 = vld [vmem:[#allocation28_spill] sm:$0xff] }
 0x7f5   : > { %8257 = vtanh.f32 %v7092_v13  ;;  %v7093_v1 = vadd.f32 %v7051_v32, %v11941_v38 }
 0x7f6   : > { %8259 = vtanh.f32 %v7103_v36  ;;  %v7123_v36 = vsub.f32 1.0, %v11574_v11 }
 0x7f7   : > { %8261 = vtanh.f32 %v7093_v1  ;;  %v12984_v1 = vld [vmem:[#allocation44_spill] sm:$0xff] }
 0x7fa   : > { %v7055_v16 = vpop.permute.xlu0 %7054 }
 0x7fb   : > { %v8258_v15 = vpop.eup %8257  ;;  %v7095_v12 = vadd.f32 %v7055_v16, %v11943_v44  ;;  %v7139_v16 = vmul.f32 %v7123_v36, %v12984_v1  ;;  %v7127_v1 = vsub.f32 1.0, %v11680_v31 }
 0x7fc   : > { %v8260_v22 = vpop.eup %8259  ;;  %v7057_v59 = vpop.permute.xlu1 %7056  ;;  %7176 = vrot.lane.b32.xlu1 %v8258_v15, %s8353_s12 }
 0x7fd   : > { %v8262_v40 = vpop.eup %8261  ;;  %8263 = vtanh.f32 %v7095_v12  ;;  %v7096_v49 = vadd.f32 %v7057_v59, %v11960_v39  ;;  %7198 = vrot.lane.b32.xlu0 %v8260_v22, %s8353_s12  ;;  %v6809_v39 = vadd.f32 %v11998_v3, %v11967_v18  ;;  %v7120_v18 = vsub.f32 1.0, %v11505_v30  ;;  %v12986_v59 = vld [vmem:[#allocation12_spill] sm:$0xff] }
 0x7fe   : > { %7178 = vrot.lane.b32.xlu2 %v8262_v40, %s8353_s12  ;;  %v7126_v12 = vsub.f32 1.0, %v11665_v33  ;;  %v7125_v22 = vsub.f32 1.0, %v11628_v61 }
 0x7ff   : > { %8265 = vtanh.f32 %v7096_v49  ;;  %v6955_v50 = vadd.f32 %v11996_v19, %v6809_v39  ;;  %v12978_v19 = vld [vmem:[#allocation41_spill] sm:$0xff]  ;;  %v7128_v39 = vsub.f32 1.0, %v11690_v20 }
 0x800   : > { %v7136_v6 = vmul.f32 %v7120_v18, %v12978_v19  ;;  %v7142_v40 = vmul.f32 %v7126_v12, %v12986_v59  ;;  %v7133_v59 = vsub.f32 1.0, %v11797_v14 }
 0x802   : > { %v7061_v38 = vpop.permute.xlu0 %7060 }
 0x803   : > { %v8264_v23 = vpop.eup %8263  ;;  %v7098_v52 = vadd.f32 %v7061_v38, %v11974_v7  ;;  %v6956_v7 = vadd.f32 %v6923_v8, %v11994_v2 }
 0x804   : > { %v7063_v54 = vpop.permute.xlu1 %7062  ;;  %7182 = vrot.lane.b32.xlu1 %v8264_v23, %s8353_s12 }
 0x805   : > { %v8266_v44 = vpop.eup %8265  ;;  %8267 = vtanh.f32 %v7098_v52  ;;  %v7099_v45 = vadd.f32 %v7063_v54, %v11990_v29  ;;  %v12987_v52 = vld [vmem:[#allocation13_spill] sm:$0xff] }
 0x806   : > { %7184 = vrot.lane.b32.xlu2 %v8266_v44, %s8353_s12  ;;  %v7141_v54 = vmul.f32 %v7125_v22, %v12987_v52 }
 0x807   : > { %8269 = vtanh.f32 %v7099_v45  ;;  %v7129_v45 = vsub.f32 1.0, %v11693_v21 }
 0x80a   : > { %v7067_v10 = vpop.permute.xlu0 %7066 }
 0x80b   : > { %v8268_v47 = vpop.eup %8267  ;;  %v7101_v5 = vadd.f32 %v7067_v10, %v6955_v50  ;;  %v12990_v10 = vld [vmem:[#allocation20_spill] sm:$0xff] }
 0x80c   : > { %v7069_v62 = vpop.permute.xlu1 %7068  ;;  %7188 = vrot.lane.b32.xlu1 %v8268_v47, %s8353_s12 }
 0x80d   : > { %v8270_v42 = vpop.eup %8269  ;;  %8271 = vtanh.f32 %v7101_v5  ;;  %v7102_v29 = vadd.f32 %v7069_v62, %v6956_v7  ;;  %v12991_v62 = vld [vmem:[#allocation16_spill] sm:$0xff] }
 0x80e   : > { %7190 = vrot.lane.b32.xlu2 %v8270_v42, %s8353_s12 }
 0x80f   : > { %8273 = vtanh.f32 %v7102_v29  ;;  %v7132_v29 = vsub.f32 1.0, %v11800_v48 }
 0x812   : > { %v7169_v3 = vpop.permute.xlu0 %7168 }
 0x813   : > { %v8272_v25 = vpop.eup %8271  ;;  %v7216_v9 = vmul.f32 %v7169_v3, %v11505_v30  ;;  %v7131_v3 = vsub.f32 1.0, %v11708_v60 }
 0x814   : > { %7194 = vrot.lane.b32.xlu1 %v8272_v25, %s8353_s12 }
 0x815   : > { %v8274_v2 = vpop.eup %8273  ;;  %v7232_v8 = vadd.f32 %v7216_v9, %v7136_v6 }
 0x816   : > { %7196 = vrot.lane.b32.xlu2 %v8274_v2, %s8353_s12  ;;  %v12994_v2 = vld [vmem:[#allocation27_spill] sm:$0xff] }
 0x817   : > { %7248 = vst.msk [vmem:[%s12036_s24] sm:$0xff] %vm12979_vm14, %v7232_v8  ;;  %v7147_v8 = vmul.f32 %v7131_v3, %v12994_v2 }
 0x831   : > { %v7171_v30 = vpop.permute.xlu1 %7170 }
 0x832   : > { %v7217_v56 = vmul.f32 %v7171_v30, %v11524_v26  ;;  %v7124_v30 = vsub.f32 1.0, %v11606_v24 }
 0x834   : > { %v7233_v53 = vadd.f32 %v7217_v56, %v7137_v35  ;;  %v7134_v35 = vsub.f32 1.0, %v11828_v27 }
 0x836   : > { %7249 = vst.msk [vmem:[%s12036_s24 + $0x8] sm:$0xff] %vm12981_vm10, %v7233_v53 }
 0x840   : > { %v7173_v63 = vpop.permute.xlu2 %7172 }
 0x841   : > { %v7218_v58 = vmul.f32 %v7173_v63, %v11554_v57 }
 0x843   : > { %v7234_v13 = vadd.f32 %v7218_v58, %v7138_v55  ;;  %v7150_v58 = vmul.f32 %v7134_v35, %v12927_v41 }
 0x845   : > { %7250 = vst.msk [vmem:[%s12036_s24 + $0x10] sm:$0xff] %vm12983_vm15, %v7234_v13 }
 0x84e   : > { %v7175_v32 = vpop.permute.xlu0 %7174 }
 0x84f   : > { %v7219_v26 = vmul.f32 %v7175_v32, %v11574_v11 }
 0x851   : > { %v7235_v15 = vadd.f32 %v7219_v26, %v7139_v16 }
 0x853   : > { %7251 = vst.msk [vmem:[%s12036_s24 + $0x18] sm:$0xff] %vm12985_vm4, %v7235_v15  ;;  %v13002_v15 = vld [vmem:[#allocation33_spill] sm:$0xff] }
 0x856   : > { %v7181_v57 = vpop.permute.xlu0 %7180 }
 0x857   : > { %v7222_v49 = vmul.f32 %v7181_v57, %v11665_v33  ;;  %v7145_v33 = vmul.f32 %v7129_v45, %v12990_v10 }
 0x858   : > { %v7179_v38 = vpop.permute.xlu2 %7178 }
 0x859   : > { %v7238_v23 = vadd.f32 %v7222_v49, %v7142_v40  ;;  %v7221_v44 = vmul.f32 %v7179_v38, %v11628_v61  ;;  %v7144_v61 = vmul.f32 %v7128_v39, %v12991_v62  ;;  %v7149_v49 = vmul.f32 %v7133_v59, %v12926_v34 }
 0x85b   : > { %7254 = vst.msk [vmem:[%s12036_s24 + $0x30] sm:$0xff] %vm12988_vm13, %v7238_v23  ;;  %v7237_v11 = vadd.f32 %v7221_v44, %v7141_v54 }
 0x85d   : > { %7253 = vst.msk [vmem:[%s12036_s24 + $0x28] sm:$0xff] %vm12989_vm2, %v7237_v11 }
 0x85e   : > { %v7187_v50 = vpop.permute.xlu0 %7186 }
 0x85f   : > { %v7225_v47 = vmul.f32 %v7187_v50, %v11693_v21  ;;  %v7148_v21 = vmul.f32 %v7132_v29, %v12924_v4 }
 0x860   : > { %v7185_v7 = vpop.permute.xlu2 %7184 }
 0x861   : > { %v7241_v5 = vadd.f32 %v7225_v47, %v7145_v33  ;;  %v7224_v42 = vmul.f32 %v7185_v7, %v11690_v20 }
 0x863   : > { %7257 = vst.msk [vmem:[%s12036_s24 + $0x48] sm:$0xff] %vm12992_vm6, %v7241_v5  ;;  %v7240_v18 = vadd.f32 %v7224_v42, %v7144_v61 }
 0x865   : > { %7256 = vst.msk [vmem:[%s12036_s24 + $0x40] sm:$0xff] %vm12993_vm7, %v7240_v18 }
 0x866   : > { %v7193_v25 = vpop.permute.xlu0 %7192 }
 0x867   : > { %v7228_v19 = vmul.f32 %v7193_v25, %v11800_v48  ;;  %v12997_v48 = vld [vmem:[#allocation7_spill] sm:$0xff] }
 0x868   : > { %v7191_v6 = vpop.permute.xlu2 %7190  ;;  %v7140_v56 = vmul.f32 %v7124_v30, %v12997_v48 }
 0x869   : > { %v7244_v9 = vadd.f32 %v7228_v19, %v7148_v21  ;;  %v7227_v20 = vmul.f32 %v7191_v6, %v11708_v60 }
 0x86b   : > { %7260 = vst.msk [vmem:[%s12036_s24 + $0x60] sm:$0xff] %vm12995_vm12, %v7244_v9  ;;  %v7243_v17 = vadd.f32 %v7227_v20, %v7147_v8 }
 0x86d   : > { %7259 = vst.msk [vmem:[%s12036_s24 + $0x58] sm:$0xff] %vm12996_vm1, %v7243_v17 }
 0x86e   : > { %v7177_v4 = vpop.permute.xlu1 %7176 }
 0x86f   : > { %v7220_v53 = vmul.f32 %v7177_v4, %v11606_v24  ;;  %v7199_v60 = vpop.permute.xlu0 %7198 }
 0x870   : > { %v7231_v63 = vmul.f32 %v7199_v60, %v11825_v0  ;;  %v7197_v46 = vpop.permute.xlu2 %7196  ;;  %v7143_v0 = vmul.f32 %v7127_v1, %v13001_v28 }
 0x871   : > { %v7236_v55 = vadd.f32 %v7220_v53, %v7140_v56  ;;  %v7230_v13 = vmul.f32 %v7197_v46, %v11828_v27  ;;  %v7130_v27 = vsub.f32 1.0, %v11703_v43 }
 0x872   : > { %v7247_v36 = vadd.f32 %v7231_v63, %v7151_v51 }
 0x873   : > { %7252 = vst.msk [vmem:[%s12036_s24 + $0x20] sm:$0xff] %vm12998_vm3, %v7236_v55  ;;  %v7246_v32 = vadd.f32 %v7230_v13, %v7150_v58  ;;  %v7146_v12 = vmul.f32 %v7130_v27, %v13002_v15 }
 0x874   : > { %7263 = vst.msk [vmem:[%s12036_s24 + $0x78] sm:$0xff] %vm12999_vm5, %v7247_v36 }
 0x875   : > { %7262 = vst.msk [vmem:[%s12036_s24 + $0x70] sm:$0xff] %vm13000_vm9, %v7246_v32 }
 0x876   : > { %v7183_v24 = vpop.permute.xlu1 %7182 }
 0x877   : > { %v7223_v16 = vmul.f32 %v7183_v24, %v11680_v31 }
 0x879   : > { %v7239_v41 = vadd.f32 %v7223_v16, %v7143_v0 }
 0x87b   : > { %7255 = vst.msk [vmem:[%s12036_s24 + $0x38] sm:$0xff] %vm12956_vm0, %v7239_v41 }
 0x87e   : > { %v7189_v26 = vpop.permute.xlu1 %7188 }
 0x87f   : > { %v7226_v22 = vmul.f32 %v7189_v26, %v11703_v43 }
 0x881   : > { %v7242_v57 = vadd.f32 %v7226_v22, %v7146_v12 }
 0x883   : > { %7258 = vst.msk [vmem:[%s12036_s24 + $0x50] sm:$0xff] %vm13003_vm8, %v7242_v57 }
 0x886   : > { %v7195_v40 = vpop.permute.xlu1 %7194 }
 0x887   : > { %v7229_v31 = vmul.f32 %v7195_v40, %v11797_v14 }
 0x889   : > { %v7245_v38 = vadd.f32 %v7229_v31, %v7149_v49 }
 0x88b   : > { %7261 = vst.msk [vmem:[%s12036_s24 + $0x68] sm:$0xff] %vm13004_vm11, %v7245_v38 }
 0x88c PF: > { %s21_s13 = sadd.s32 1, %s8344_s13  }
 0x88d   : > { %p18_p7 = scmp.ge.s32.totalorder %s21_s13, 4  }
 0x88f   :  { %20 = sbr.rel (!%p18_p7) target bundleno = 1 (0x1), region = 122 }
 0x894   :  { %7285 = vsyncpa [#allocation3], 1 }
 0x895   :  { %7287 = vsyncpa [#allocation3 + $0x1], 1 }

</bundles_post_ra>
